<compile_context>
chip_gen: v6e
topology: v6e:2x2x1
jax: 0.10.0
libtpu: 0.0.40
codegen_flags: <defaults>
</compile_context>

<pallas_src>
import functools

import jax
import jax.numpy as jnp
from jax.experimental import pallas as pl
from jax.experimental.pallas import tpu as pltpu

MAX_M_TILE = 1024                 # keeps per-call VMEM << 2 MB even at K=576
VMEM_LIMIT = 32 * 1024 * 1024     # explicit scoped-VMEM cap: safe on v5e/v6e/v7x


def _round_up(x, m):
    return ((x + m - 1) // m) * m


def _choose_tm(M):
    """Row tile: >=2 grid steps whenever possible (pipeline overlap + v7x
    megacore), multiple of 16 (bf16 sublane packing), ~512 rows for large M,
    capped at MAX_M_TILE.  Caller pads M up to grid*TM and slices the tail."""
    tm = min(MAX_M_TILE, _round_up(pl.cdiv(M, 2), 16))
    if tm > 512:  # large M: prefer ~512-row tiles so the pipeline has >=4 steps
        tm = _round_up(pl.cdiv(M, pl.cdiv(M, 512)), 16)
    return tm


# ---------------------------------------------------------------------------
# Pallas kernels
# ---------------------------------------------------------------------------
def conv_bn_relu_kernel(a_ref, w_ref, bias_ref, o_ref):
    """out = relu(A @ W_scaled + bias); bf16 store, f32 MXU accumulate."""
    acc = jnp.dot(a_ref[...], w_ref[...], preferred_element_type=jnp.float32)
    o_ref[...] = jnp.maximum(acc + bias_ref[...], 0.0).astype(o_ref.dtype)


def conv_bn_relu_res_kernel(a_ref, w_ref, bias_ref, res_ref, o_ref):
    """out = relu(A @ W_scaled + bias + residual); residual read in bf16."""
    acc = jnp.dot(a_ref[...], w_ref[...], preferred_element_type=jnp.float32)
    acc = acc + bias_ref[...] + res_ref[...].astype(jnp.float32)
    o_ref[...] = jnp.maximum(acc, 0.0).astype(o_ref.dtype)


def pool_fc_kernel(x_ref, w_ref, b_ref, feat_ref, logit_ref, *, inv_hw):
    """Global average pool over HW then linear head (features + logits).
    The HW reduction is a tiny (B, HW, C) XLU sum — negligible at these sizes."""
    x = x_ref[...].astype(jnp.float32)               # (B, HW, C)
    feat = jnp.sum(x, axis=1) * inv_hw               # (B, C)
    feat_ref[...] = feat.astype(feat_ref.dtype)
    logit_ref[...] = (jnp.dot(feat, w_ref[...],
                              preferred_element_type=jnp.float32)
                      + b_ref[...]).astype(logit_ref.dtype)


# ---------------------------------------------------------------------------
# Conv wrapper: bf16 im2col (pure data movement, XLA) + fused Pallas matmul
# ---------------------------------------------------------------------------
def conv3x3_bn_relu(x_nhwc, conv, residual=None):
    """x_nhwc: (B,H,W,Cin) bf16.  conv: {'wmat': (Kp,Cout) bf16 BN-scale-folded,
    'bias': (1,Cout) f32, 'cout', 'k', 'stride'}.  residual: (B,Ho,Wo,Cout)
    bf16 or None.  Returns (B,Ho,Wo,Cout) bf16 at true channel width."""
    B, H, W, Cin = x_nhwc.shape
    stride = conv['stride']
    Cout = conv['cout']
    K = conv['k']
    Kp = conv['wmat'].shape[0]
    Ho = (H + 2 - 3) // stride + 1
    Wo = (W + 2 - 3) // stride + 1

    # im2col directly in bf16 (activations already flow in bf16): pad=1, 3x3.
    xp = jnp.pad(x_nhwc, ((0, 0), (1, 1), (1, 1), (0, 0)))
    patches = [xp[:, kh:kh + (Ho - 1) * stride + 1:stride,
                   kw:kw + (Wo - 1) * stride + 1:stride, :]
               for kh in range(3) for kw in range(3)]
    a = jnp.stack(patches, axis=3).reshape(B * Ho * Wo, K)
    if Kp != K:                                   # stem only (27 -> 32)
        a = jnp.pad(a, ((0, 0), (0, Kp - K)))
    # TODO(synk): replace with in-kernel im2col (9 shifted matmuls) to cut
    # A-side HBM traffic ~9x and enable per-BasicBlock fusion.

    M = B * Ho * Wo
    TM = _choose_tm(M)
    grid_m = pl.cdiv(M, TM)
    Mp = grid_m * TM
    if Mp != M:
        a = jnp.pad(a, ((0, Mp - M), (0, 0)))

    in_specs = [
        pl.BlockSpec((TM, Kp), lambda i: (i, 0)),
        pl.BlockSpec((Kp, Cout), lambda i: (0, 0)),   # VMEM-resident across steps
        pl.BlockSpec((1, Cout), lambda i: (0, 0)),
    ]
    args = [a, conv['wmat'], conv['bias']]
    if residual is None:
        kernel = conv_bn_relu_kernel
    else:
        resm = residual.reshape(M, Cout)              # bf16, true width, no pad
        if Mp != M:
            resm = jnp.pad(resm, ((0, Mp - M), (0, 0)))
        in_specs.append(pl.BlockSpec((TM, Cout), lambda i: (i, 0)))
        args.append(resm)
        kernel = conv_bn_relu_res_kernel

    out = pl.pallas_call(
        kernel,
        out_shape=jax.ShapeDtypeStruct((Mp, Cout), jnp.bfloat16),
        grid=(grid_m,),
        in_specs=in_specs,
        out_specs=pl.BlockSpec((TM, Cout), lambda i: (i, 0)),
        compiler_params=pltpu.CompilerParams(
            dimension_semantics=("parallel",),
            vmem_limit_bytes=VMEM_LIMIT),
    )(*args)
    if Mp != M:
        out = out[:M]
    return out.reshape(B, Ho, Wo, Cout)


def downsample_a(x_nhwc, stride):
    """DownsampleA: AvgPool2d(kernel=1, stride) + concat of zero channels."""
    r = x_nhwc[:, ::stride, ::stride, :]
    return jnp.concatenate([r, jnp.zeros_like(r)], axis=-1)


def basic_block(x, blk):
    out = conv3x3_bn_relu(x, blk['a'])
    residual = downsample_a(x, blk['a']['stride']) if blk['downsample'] else x
    out = conv3x3_bn_relu(out, blk['b'], residual=residual)
    return out


# ---------------------------------------------------------------------------
# Parameter init (deterministic; eval-mode BN folded into W/bias, weights
# pre-transposed to (K, Cout) and cast to bf16 once, no channel padding)
# ---------------------------------------------------------------------------
def _prep_conv(key, cin, cout, stride):
    k1, k2, k3, k4, k5 = jax.random.split(key, 5)
    w = jax.random.normal(k1, (cout, cin, 3, 3), jnp.float32) * (2.0 / (cin * 9)) ** 0.5
    gamma = 1.0 + 0.1 * jax.random.normal(k2, (cout,), jnp.float32)
    beta = 0.1 * jax.random.normal(k3, (cout,), jnp.float32)
    mean = 0.1 * jax.random.normal(k4, (cout,), jnp.float32)
    var = 1.0 + 0.1 * jax.random.uniform(k5, (cout,), jnp.float32)
    scale = gamma / jnp.sqrt(var + 1e-5)
    bias = beta - mean * scale

    K = 9 * cin
    Kp = _round_up(K, 16)            # bf16 sublane-aligned K (only stem pads)
    # (Cout,Cin,3,3) -> (kh,kw,cin,cout) -> (K,Cout); BN scale folded into W.
    wmat = jnp.transpose(w, (2, 3, 1, 0)).reshape(K, cout) * scale[None, :]
    if Kp != K:
        wmat = jnp.pad(wmat, ((0, Kp - K), (0, 0)))
    return {'wmat': wmat.astype(jnp.bfloat16),
            'bias': bias.reshape(1, cout).astype(jnp.float32),
            'cout': cout, 'k': K, 'stride': stride}


def init_params(key, nb_classes=10):
    keys = iter(jax.random.split(key, 64))

    params = {'stem': _prep_conv(next(keys), 3, 16, 1)}
    stages = []
    inplanes = 16
    for planes, stride in [(16, 1), (32, 2), (64, 2)]:   # resnet32: 3 stages x 5 blocks
        blocks = []
        for b in range(5):
            s = stride if b == 0 else 1
            blocks.append({'a': _prep_conv(next(keys), inplanes, planes, s),
                           'b': _prep_conv(next(keys), planes, planes, 1),
                           'downsample': (s != 1 or inplanes != planes)})
            inplanes = planes
        stages.append(blocks)
    params['stages'] = stages

    # fc head (BaseNet.fc abstract / generate_fc is pass; SimpleLinear semantics)
    C = 64
    wfc = jax.random.normal(next(keys), (nb_classes, C), jnp.float32) * (1.0 / C) ** 0.5
    bfc = jnp.zeros((nb_classes,), jnp.float32)
    params['fc'] = {'wmat': jnp.transpose(wfc),           # (C, nb) f32
                    'bias': bfc.reshape(1, nb_classes),   # (1, nb) f32
                    'nb': nb_classes}
    return params


# ---------------------------------------------------------------------------
# BaseNet.forward equivalent
# ---------------------------------------------------------------------------
def base_net_forward(params, x_nchw):
    # NCHW -> NHWC; activations flow in bf16 between layers.
    x = jnp.transpose(x_nchw, (0, 2, 3, 1)).astype(jnp.bfloat16)

    x = conv3x3_bn_relu(x, params['stem'])

    fmaps = []
    for blocks in params['stages']:
        for blk in blocks:
            x = basic_block(x, blk)
        fmaps.append(x)

    # fused global-avg-pool + fc head, fed the true-width 64-channel activation
    B, H, W, C = x.shape
    x3 = x.reshape(B, H * W, C)
    nb = params['fc']['nb']
    feats, logits = pl.pallas_call(
        functools.partial(pool_fc_kernel, inv_hw=1.0 / float(H * W)),
        out_shape=(jax.ShapeDtypeStruct((B, C), jnp.float32),
                   jax.ShapeDtypeStruct((B, nb), jnp.float32)),
        grid=(1,),
        in_specs=[pl.BlockSpec((B, H * W, C), lambda i: (0, 0, 0)),
                  pl.BlockSpec((C, nb), lambda i: (0, 0)),
                  pl.BlockSpec((1, nb), lambda i: (0, 0))],
        out_specs=(pl.BlockSpec((B, C), lambda i: (0, 0)),
                   pl.BlockSpec((B, nb), lambda i: (0, 0))),
        compiler_params=pltpu.CompilerParams(vmem_limit_bytes=VMEM_LIMIT),
    )(x3, params['fc']['wmat'], params['fc']['bias'])

    return {
        'logits': logits,                                   # from fc head
        'fmaps': [jnp.transpose(f.astype(jnp.float32), (0, 3, 1, 2))
                  for f in fmaps],                          # NCHW f32, PyTorch conv.
        'features': feats,                                  # (B, 64) f32
    }
    # TODO(synk): update_fc / generate_fc / copy / freeze are training-time
    # module management with no forward-pass compute; not applicable to a kernel.


if __name__ == "__main__":
    key = jax.random.PRNGKey(0)
    pkey, xkey = jax.random.split(key)
    params = init_params(pkey, nb_classes=10)
    x = jax.random.normal(xkey, (2, 3, 32, 32), jnp.float32)  # CIFAR-shaped input

    fwd = jax.jit(functools.partial(base_net_forward, params))
    out = fwd(x)
    jax.block_until_ready(out)

    assert out['logits'].shape == (2, 10)
    assert out['features'].shape == (2, 64)
    assert out['fmaps'][0].shape == (2, 16, 32, 32)
    assert out['fmaps'][1].shape == (2, 32, 16, 16)
    assert out['fmaps'][2].shape == (2, 64, 8, 8)
    assert bool(jnp.all(jnp.isfinite(out['logits'])))
    print("KERNEL_OK")
</pallas_src>

<mosaic_0001>
module attributes {stable_mosaic.version = 11 : i64} {
  func.func @conv_bn_relu_kernel(%arg0: i32, %arg1: memref<512x32xbf16, #tpu.memory_space<vmem>>, %arg2: memref<32x16xbf16, #tpu.memory_space<vmem>>, %arg3: memref<1x16xf32, #tpu.memory_space<vmem>>, %arg4: memref<512x16xbf16, #tpu.memory_space<vmem>>) attributes {dimension_semantics = [#tpu.dimension_semantics<parallel>], iteration_bounds = array<i64: 4>, scalar_prefetch = 0 : i64, scratch_operands = 0 : i64, tpu.core_type = #tpu.core_type<tc>, window_params = [{transform_indices = @transform_0, window_bounds = array<i64: 512, 32>}, {pipeline_mode = #tpu.pipeline_mode<synchronous>, transform_indices = @transform_1, window_bounds = array<i64: 32, 16>}, {pipeline_mode = #tpu.pipeline_mode<synchronous>, transform_indices = @transform_2, window_bounds = array<i64: 1, 16>}, {transform_indices = @transform_3, window_bounds = array<i64: 512, 16>}]} {
    %c0 = arith.constant 0 : index
    %c0_0 = arith.constant 0 : index
    %0 = vector.load %arg1[%c0, %c0_0] : memref<512x32xbf16, #tpu.memory_space<vmem>>, vector<512x32xbf16>
    %c0_1 = arith.constant 0 : index
    %c0_2 = arith.constant 0 : index
    %1 = vector.load %arg2[%c0_1, %c0_2] : memref<32x16xbf16, #tpu.memory_space<vmem>>, vector<32x16xbf16>
    %cst = arith.constant dense<0.000000e+00> : vector<512x16xf32>
    %2 = tpu.matmul %0, %1, %cst {dimension_numbers = #tpu.dot_dimension_numbers<[1], [0], [0], [1], [0, 0, 1, 1], [], []>} : vector<512x32xbf16>, vector<32x16xbf16>, vector<512x16xf32> -> vector<512x16xf32>
    %c0_3 = arith.constant 0 : index
    %c0_4 = arith.constant 0 : index
    %3 = vector.load %arg3[%c0_3, %c0_4] : memref<1x16xf32, #tpu.memory_space<vmem>>, vector<1x16xf32>
    %4 = vector.broadcast %3 : vector<1x16xf32> to vector<512x16xf32>
    %5 = arith.addf %2, %4 : vector<512x16xf32>
    %cst_5 = arith.constant 0.000000e+00 : f32
    %6 = vector.broadcast %cst_5 : f32 to vector<512x16xf32>
    %7 = arith.maximumf %5, %6 : vector<512x16xf32>
    %8 = arith.truncf %7 : vector<512x16xf32> to vector<512x16xbf16>
    %c0_6 = arith.constant 0 : index
    %c0_7 = arith.constant 0 : index
    %9 = vector.load %arg4[%c0_6, %c0_7] : memref<512x16xbf16, #tpu.memory_space<vmem>>, vector<512x16xbf16>
    tpu.vector_store %arg4[%c0_6, %c0_7], %8 {strides = array<i32>} : memref<512x16xbf16, #tpu.memory_space<vmem>>, vector<512x16xbf16>,
    return
  }
  func.func @transform_0(%arg0: i32) -> (i32, i32) {
    %c0_i32 = arith.constant 0 : i32
    %c0_i32_0 = arith.constant 0 : i32
    return %arg0, %c0_i32 : i32, i32
  }
  func.func @transform_1(%arg0: i32) -> (i32, i32) {
    %c0_i32 = arith.constant 0 : i32
    %c0_i32_0 = arith.constant 0 : i32
    %c0_i32_1 = arith.constant 0 : i32
    return %c0_i32, %c0_i32_0 : i32, i32
  }
  func.func @transform_2(%arg0: i32) -> (i32, i32) {
    %c0_i32 = arith.constant 0 : i32
    %c0_i32_0 = arith.constant 0 : i32
    %c0_i32_1 = arith.constant 0 : i32
    return %c0_i32, %c0_i32_0 : i32, i32
  }
  func.func @transform_3(%arg0: i32) -> (i32, i32) {
    %c0_i32 = arith.constant 0 : i32
    %c0_i32_0 = arith.constant 0 : i32
    return %arg0, %c0_i32 : i32, i32
  }
}

module attributes {stable_mosaic.version = 11 : i64} {
  func.func @conv_bn_relu_kernel(%arg0: i32, %arg1: memref<512x144xbf16, #tpu.memory_space<vmem>>, %arg2: memref<144x16xbf16, #tpu.memory_space<vmem>>, %arg3: memref<1x16xf32, #tpu.memory_space<vmem>>, %arg4: memref<512x16xbf16, #tpu.memory_space<vmem>>) attributes {dimension_semantics = [#tpu.dimension_semantics<parallel>], iteration_bounds = array<i64: 4>, scalar_prefetch = 0 : i64, scratch_operands = 0 : i64, tpu.core_type = #tpu.core_type<tc>, window_params = [{transform_indices = @transform_0, window_bounds = array<i64: 512, 144>}, {pipeline_mode = #tpu.pipeline_mode<synchronous>, transform_indices = @transform_1, window_bounds = array<i64: 144, 16>}, {pipeline_mode = #tpu.pipeline_mode<synchronous>, transform_indices = @transform_2, window_bounds = array<i64: 1, 16>}, {transform_indices = @transform_3, window_bounds = array<i64: 512, 16>}]} {
    %c0 = arith.constant 0 : index
    %c0_0 = arith.constant 0 : index
    %0 = vector.load %arg1[%c0, %c0_0] : memref<512x144xbf16, #tpu.memory_space<vmem>>, vector<512x144xbf16>
    %c0_1 = arith.constant 0 : index
    %c0_2 = arith.constant 0 : index
    %1 = vector.load %arg2[%c0_1, %c0_2] : memref<144x16xbf16, #tpu.memory_space<vmem>>, vector<144x16xbf16>
    %cst = arith.constant dense<0.000000e+00> : vector<512x16xf32>
    %2 = tpu.matmul %0, %1, %cst {dimension_numbers = #tpu.dot_dimension_numbers<[1], [0], [0], [1], [0, 0, 1, 1], [], []>} : vector<512x144xbf16>, vector<144x16xbf16>, vector<512x16xf32> -> vector<512x16xf32>
    %c0_3 = arith.constant 0 : index
    %c0_4 = arith.constant 0 : index
    %3 = vector.load %arg3[%c0_3, %c0_4] : memref<1x16xf32, #tpu.memory_space<vmem>>, vector<1x16xf32>
    %4 = vector.broadcast %3 : vector<1x16xf32> to vector<512x16xf32>
    %5 = arith.addf %2, %4 : vector<512x16xf32>
    %cst_5 = arith.constant 0.000000e+00 : f32
    %6 = vector.broadcast %cst_5 : f32 to vector<512x16xf32>
    %7 = arith.maximumf %5, %6 : vector<512x16xf32>
    %8 = arith.truncf %7 : vector<512x16xf32> to vector<512x16xbf16>
    %c0_6 = arith.constant 0 : index
    %c0_7 = arith.constant 0 : index
    %9 = vector.load %arg4[%c0_6, %c0_7] : memref<512x16xbf16, #tpu.memory_space<vmem>>, vector<512x16xbf16>
    tpu.vector_store %arg4[%c0_6, %c0_7], %8 {strides = array<i32>} : memref<512x16xbf16, #tpu.memory_space<vmem>>, vector<512x16xbf16>,
    return
  }
  func.func @transform_0(%arg0: i32) -> (i32, i32) {
    %c0_i32 = arith.constant 0 : i32
    %c0_i32_0 = arith.constant 0 : i32
    return %arg0, %c0_i32 : i32, i32
  }
  func.func @transform_1(%arg0: i32) -> (i32, i32) {
    %c0_i32 = arith.constant 0 : i32
    %c0_i32_0 = arith.constant 0 : i32
    %c0_i32_1 = arith.constant 0 : i32
    return %c0_i32, %c0_i32_0 : i32, i32
  }
  func.func @transform_2(%arg0: i32) -> (i32, i32) {
    %c0_i32 = arith.constant 0 : i32
    %c0_i32_0 = arith.constant 0 : i32
    %c0_i32_1 = arith.constant 0 : i32
    return %c0_i32, %c0_i32_0 : i32, i32
  }
  func.func @transform_3(%arg0: i32) -> (i32, i32) {
    %c0_i32 = arith.constant 0 : i32
    %c0_i32_0 = arith.constant 0 : i32
    return %arg0, %c0_i32 : i32, i32
  }
}

module attributes {stable_mosaic.version = 11 : i64} {
  func.func @conv_bn_relu_res_kernel(%arg0: i32, %arg1: memref<512x144xbf16, #tpu.memory_space<vmem>>, %arg2: memref<144x16xbf16, #tpu.memory_space<vmem>>, %arg3: memref<1x16xf32, #tpu.memory_space<vmem>>, %arg4: memref<512x16xbf16, #tpu.memory_space<vmem>>, %arg5: memref<512x16xbf16, #tpu.memory_space<vmem>>) attributes {dimension_semantics = [#tpu.dimension_semantics<parallel>], iteration_bounds = array<i64: 4>, scalar_prefetch = 0 : i64, scratch_operands = 0 : i64, tpu.core_type = #tpu.core_type<tc>, window_params = [{transform_indices = @transform_0, window_bounds = array<i64: 512, 144>}, {pipeline_mode = #tpu.pipeline_mode<synchronous>, transform_indices = @transform_1, window_bounds = array<i64: 144, 16>}, {pipeline_mode = #tpu.pipeline_mode<synchronous>, transform_indices = @transform_2, window_bounds = array<i64: 1, 16>}, {transform_indices = @transform_3, window_bounds = array<i64: 512, 16>}, {transform_indices = @transform_4, window_bounds = array<i64: 512, 16>}]} {
    %c0 = arith.constant 0 : index
    %c0_0 = arith.constant 0 : index
    %0 = vector.load %arg1[%c0, %c0_0] : memref<512x144xbf16, #tpu.memory_space<vmem>>, vector<512x144xbf16>
    %c0_1 = arith.constant 0 : index
    %c0_2 = arith.constant 0 : index
    %1 = vector.load %arg2[%c0_1, %c0_2] : memref<144x16xbf16, #tpu.memory_space<vmem>>, vector<144x16xbf16>
    %cst = arith.constant dense<0.000000e+00> : vector<512x16xf32>
    %2 = tpu.matmul %0, %1, %cst {dimension_numbers = #tpu.dot_dimension_numbers<[1], [0], [0], [1], [0, 0, 1, 1], [], []>} : vector<512x144xbf16>, vector<144x16xbf16>, vector<512x16xf32> -> vector<512x16xf32>
    %c0_3 = arith.constant 0 : index
    %c0_4 = arith.constant 0 : index
    %3 = vector.load %arg3[%c0_3, %c0_4] : memref<1x16xf32, #tpu.memory_space<vmem>>, vector<1x16xf32>
    %4 = vector.broadcast %3 : vector<1x16xf32> to vector<512x16xf32>
    %5 = arith.addf %2, %4 : vector<512x16xf32>
    %c0_5 = arith.constant 0 : index
    %c0_6 = arith.constant 0 : index
    %6 = vector.load %arg4[%c0_5, %c0_6] : memref<512x16xbf16, #tpu.memory_space<vmem>>, vector<512x16xbf16>
    %7 = arith.extf %6 : vector<512x16xbf16> to vector<512x16xf32>
    %8 = arith.addf %5, %7 : vector<512x16xf32>
    %cst_7 = arith.constant 0.000000e+00 : f32
    %9 = vector.broadcast %cst_7 : f32 to vector<512x16xf32>
    %10 = arith.maximumf %8, %9 : vector<512x16xf32>
    %11 = arith.truncf %10 : vector<512x16xf32> to vector<512x16xbf16>
    %c0_8 = arith.constant 0 : index
    %c0_9 = arith.constant 0 : index
    %12 = vector.load %arg5[%c0_8, %c0_9] : memref<512x16xbf16, #tpu.memory_space<vmem>>, vector<512x16xbf16>
    tpu.vector_store %arg5[%c0_8, %c0_9], %11 {strides = array<i32>} : memref<512x16xbf16, #tpu.memory_space<vmem>>, vector<512x16xbf16>,
    return
  }
  func.func @transform_0(%arg0: i32) -> (i32, i32) {
    %c0_i32 = arith.constant 0 : i32
    %c0_i32_0 = arith.constant 0 : i32
    return %arg0, %c0_i32 : i32, i32
  }
  func.func @transform_1(%arg0: i32) -> (i32, i32) {
    %c0_i32 = arith.constant 0 : i32
    %c0_i32_0 = arith.constant 0 : i32
    %c0_i32_1 = arith.constant 0 : i32
    return %c0_i32, %c0_i32_0 : i32, i32
  }
  func.func @transform_2(%arg0: i32) -> (i32, i32) {
    %c0_i32 = arith.constant 0 : i32
    %c0_i32_0 = arith.constant 0 : i32
    %c0_i32_1 = arith.constant 0 : i32
    return %c0_i32, %c0_i32_0 : i32, i32
  }
  func.func @transform_3(%arg0: i32) -> (i32, i32) {
    %c0_i32 = arith.constant 0 : i32
    %c0_i32_0 = arith.constant 0 : i32
    return %arg0, %c0_i32 : i32, i32
  }
  func.func @transform_4(%arg0: i32) -> (i32, i32) {
    %c0_i32 = arith.constant 0 : i32
    %c0_i32_0 = arith.constant 0 : i32
    return %arg0, %c0_i32 : i32, i32
  }
}

module attributes {stable_mosaic.version = 11 : i64} {
  func.func @conv_bn_relu_kernel(%arg0: i32, %arg1: memref<256x144xbf16, #tpu.memory_space<vmem>>, %arg2: memref<144x32xbf16, #tpu.memory_space<vmem>>, %arg3: memref<1x32xf32, #tpu.memory_space<vmem>>, %arg4: memref<256x32xbf16, #tpu.memory_space<vmem>>) attributes {dimension_semantics = [#tpu.dimension_semantics<parallel>], iteration_bounds = array<i64: 2>, scalar_prefetch = 0 : i64, scratch_operands = 0 : i64, tpu.core_type = #tpu.core_type<tc>, window_params = [{transform_indices = @transform_0, window_bounds = array<i64: 256, 144>}, {pipeline_mode = #tpu.pipeline_mode<synchronous>, transform_indices = @transform_1, window_bounds = array<i64: 144, 32>}, {pipeline_mode = #tpu.pipeline_mode<synchronous>, transform_indices = @transform_2, window_bounds = array<i64: 1, 32>}, {transform_indices = @transform_3, window_bounds = array<i64: 256, 32>}]} {
    %c0 = arith.constant 0 : index
    %c0_0 = arith.constant 0 : index
    %0 = vector.load %arg1[%c0, %c0_0] : memref<256x144xbf16, #tpu.memory_space<vmem>>, vector<256x144xbf16>
    %c0_1 = arith.constant 0 : index
    %c0_2 = arith.constant 0 : index
    %1 = vector.load %arg2[%c0_1, %c0_2] : memref<144x32xbf16, #tpu.memory_space<vmem>>, vector<144x32xbf16>
    %cst = arith.constant dense<0.000000e+00> : vector<256x32xf32>
    %2 = tpu.matmul %0, %1, %cst {dimension_numbers = #tpu.dot_dimension_numbers<[1], [0], [0], [1], [0, 0, 1, 1], [], []>} : vector<256x144xbf16>, vector<144x32xbf16>, vector<256x32xf32> -> vector<256x32xf32>
    %c0_3 = arith.constant 0 : index
    %c0_4 = arith.constant 0 : index
    %3 = vector.load %arg3[%c0_3, %c0_4] : memref<1x32xf32, #tpu.memory_space<vmem>>, vector<1x32xf32>
    %4 = vector.broadcast %3 : vector<1x32xf32> to vector<256x32xf32>
    %5 = arith.addf %2, %4 : vector<256x32xf32>
    %cst_5 = arith.constant 0.000000e+00 : f32
    %6 = vector.broadcast %cst_5 : f32 to vector<256x32xf32>
    %7 = arith.maximumf %5, %6 : vector<256x32xf32>
    %8 = arith.truncf %7 : vector<256x32xf32> to vector<256x32xbf16>
    %c0_6 = arith.constant 0 : index
    %c0_7 = arith.constant 0 : index
    %9 = vector.load %arg4[%c0_6, %c0_7] : memref<256x32xbf16, #tpu.memory_space<vmem>>, vector<256x32xbf16>
    tpu.vector_store %arg4[%c0_6, %c0_7], %8 {strides = array<i32>} : memref<256x32xbf16, #tpu.memory_space<vmem>>, vector<256x32xbf16>,
    return
  }
  func.func @transform_0(%arg0: i32) -> (i32, i32) {
    %c0_i32 = arith.constant 0 : i32
    %c0_i32_0 = arith.constant 0 : i32
    return %arg0, %c0_i32 : i32, i32
  }
  func.func @transform_1(%arg0: i32) -> (i32, i32) {
    %c0_i32 = arith.constant 0 : i32
    %c0_i32_0 = arith.constant 0 : i32
    %c0_i32_1 = arith.constant 0 : i32
    return %c0_i32, %c0_i32_0 : i32, i32
  }
  func.func @transform_2(%arg0: i32) -> (i32, i32) {
    %c0_i32 = arith.constant 0 : i32
    %c0_i32_0 = arith.constant 0 : i32
    %c0_i32_1 = arith.constant 0 : i32
    return %c0_i32, %c0_i32_0 : i32, i32
  }
  func.func @transform_3(%arg0: i32) -> (i32, i32) {
    %c0_i32 = arith.constant 0 : i32
    %c0_i32_0 = arith.constant 0 : i32
    return %arg0, %c0_i32 : i32, i32
  }
}

module attributes {stable_mosaic.version = 11 : i64} {
  func.func @conv_bn_relu_res_kernel(%arg0: i32, %arg1: memref<256x288xbf16, #tpu.memory_space<vmem>>, %arg2: memref<288x32xbf16, #tpu.memory_space<vmem>>, %arg3: memref<1x32xf32, #tpu.memory_space<vmem>>, %arg4: memref<256x32xbf16, #tpu.memory_space<vmem>>, %arg5: memref<256x32xbf16, #tpu.memory_space<vmem>>) attributes {dimension_semantics = [#tpu.dimension_semantics<parallel>], iteration_bounds = array<i64: 2>, scalar_prefetch = 0 : i64, scratch_operands = 0 : i64, tpu.core_type = #tpu.core_type<tc>, window_params = [{transform_indices = @transform_0, window_bounds = array<i64: 256, 288>}, {pipeline_mode = #tpu.pipeline_mode<synchronous>, transform_indices = @transform_1, window_bounds = array<i64: 288, 32>}, {pipeline_mode = #tpu.pipeline_mode<synchronous>, transform_indices = @transform_2, window_bounds = array<i64: 1, 32>}, {transform_indices = @transform_3, window_bounds = array<i64: 256, 32>}, {transform_indices = @transform_4, window_bounds = array<i64: 256, 32>}]} {
    %c0 = arith.constant 0 : index
    %c0_0 = arith.constant 0 : index
    %0 = vector.load %arg1[%c0, %c0_0] : memref<256x288xbf16, #tpu.memory_space<vmem>>, vector<256x288xbf16>
    %c0_1 = arith.constant 0 : index
    %c0_2 = arith.constant 0 : index
    %1 = vector.load %arg2[%c0_1, %c0_2] : memref<288x32xbf16, #tpu.memory_space<vmem>>, vector<288x32xbf16>
    %cst = arith.constant dense<0.000000e+00> : vector<256x32xf32>
    %2 = tpu.matmul %0, %1, %cst {dimension_numbers = #tpu.dot_dimension_numbers<[1], [0], [0], [1], [0, 0, 1, 1], [], []>} : vector<256x288xbf16>, vector<288x32xbf16>, vector<256x32xf32> -> vector<256x32xf32>
    %c0_3 = arith.constant 0 : index
    %c0_4 = arith.constant 0 : index
    %3 = vector.load %arg3[%c0_3, %c0_4] : memref<1x32xf32, #tpu.memory_space<vmem>>, vector<1x32xf32>
    %4 = vector.broadcast %3 : vector<1x32xf32> to vector<256x32xf32>
    %5 = arith.addf %2, %4 : vector<256x32xf32>
    %c0_5 = arith.constant 0 : index
    %c0_6 = arith.constant 0 : index
    %6 = vector.load %arg4[%c0_5, %c0_6] : memref<256x32xbf16, #tpu.memory_space<vmem>>, vector<256x32xbf16>
    %7 = arith.extf %6 : vector<256x32xbf16> to vector<256x32xf32>
    %8 = arith.addf %5, %7 : vector<256x32xf32>
    %cst_7 = arith.constant 0.000000e+00 : f32
    %9 = vector.broadcast %cst_7 : f32 to vector<256x32xf32>
    %10 = arith.maximumf %8, %9 : vector<256x32xf32>
    %11 = arith.truncf %10 : vector<256x32xf32> to vector<256x32xbf16>
    %c0_8 = arith.constant 0 : index
    %c0_9 = arith.constant 0 : index
    %12 = vector.load %arg5[%c0_8, %c0_9] : memref<256x32xbf16, #tpu.memory_space<vmem>>, vector<256x32xbf16>
    tpu.vector_store %arg5[%c0_8, %c0_9], %11 {strides = array<i32>} : memref<256x32xbf16, #tpu.memory_space<vmem>>, vector<256x32xbf16>,
    return
  }
  func.func @transform_0(%arg0: i32) -> (i32, i32) {
    %c0_i32 = arith.constant 0 : i32
    %c0_i32_0 = arith.constant 0 : i32
    return %arg0, %c0_i32 : i32, i32
  }
  func.func @transform_1(%arg0: i32) -> (i32, i32) {
    %c0_i32 = arith.constant 0 : i32
    %c0_i32_0 = arith.constant 0 : i32
    %c0_i32_1 = arith.constant 0 : i32
    return %c0_i32, %c0_i32_0 : i32, i32
  }
  func.func @transform_2(%arg0: i32) -> (i32, i32) {
    %c0_i32 = arith.constant 0 : i32
    %c0_i32_0 = arith.constant 0 : i32
    %c0_i32_1 = arith.constant 0 : i32
    return %c0_i32, %c0_i32_0 : i32, i32
  }
  func.func @transform_3(%arg0: i32) -> (i32, i32) {
    %c0_i32 = arith.constant 0 : i32
    %c0_i32_0 = arith.constant 0 : i32
    return %arg0, %c0_i32 : i32, i32
  }
  func.func @transform_4(%arg0: i32) -> (i32, i32) {
    %c0_i32 = arith.constant 0 : i32
    %c0_i32_0 = arith.constant 0 : i32
    return %arg0, %c0_i32 : i32, i32
  }
}

module attributes {stable_mosaic.version = 11 : i64} {
  func.func @conv_bn_relu_kernel(%arg0: i32, %arg1: memref<256x288xbf16, #tpu.memory_space<vmem>>, %arg2: memref<288x32xbf16, #tpu.memory_space<vmem>>, %arg3: memref<1x32xf32, #tpu.memory_space<vmem>>, %arg4: memref<256x32xbf16, #tpu.memory_space<vmem>>) attributes {dimension_semantics = [#tpu.dimension_semantics<parallel>], iteration_bounds = array<i64: 2>, scalar_prefetch = 0 : i64, scratch_operands = 0 : i64, tpu.core_type = #tpu.core_type<tc>, window_params = [{transform_indices = @transform_0, window_bounds = array<i64: 256, 288>}, {pipeline_mode = #tpu.pipeline_mode<synchronous>, transform_indices = @transform_1, window_bounds = array<i64: 288, 32>}, {pipeline_mode = #tpu.pipeline_mode<synchronous>, transform_indices = @transform_2, window_bounds = array<i64: 1, 32>}, {transform_indices = @transform_3, window_bounds = array<i64: 256, 32>}]} {
    %c0 = arith.constant 0 : index
    %c0_0 = arith.constant 0 : index
    %0 = vector.load %arg1[%c0, %c0_0] : memref<256x288xbf16, #tpu.memory_space<vmem>>, vector<256x288xbf16>
    %c0_1 = arith.constant 0 : index
    %c0_2 = arith.constant 0 : index
    %1 = vector.load %arg2[%c0_1, %c0_2] : memref<288x32xbf16, #tpu.memory_space<vmem>>, vector<288x32xbf16>
    %cst = arith.constant dense<0.000000e+00> : vector<256x32xf32>
    %2 = tpu.matmul %0, %1, %cst {dimension_numbers = #tpu.dot_dimension_numbers<[1], [0], [0], [1], [0, 0, 1, 1], [], []>} : vector<256x288xbf16>, vector<288x32xbf16>, vector<256x32xf32> -> vector<256x32xf32>
    %c0_3 = arith.constant 0 : index
    %c0_4 = arith.constant 0 : index
    %3 = vector.load %arg3[%c0_3, %c0_4] : memref<1x32xf32, #tpu.memory_space<vmem>>, vector<1x32xf32>
    %4 = vector.broadcast %3 : vector<1x32xf32> to vector<256x32xf32>
    %5 = arith.addf %2, %4 : vector<256x32xf32>
    %cst_5 = arith.constant 0.000000e+00 : f32
    %6 = vector.broadcast %cst_5 : f32 to vector<256x32xf32>
    %7 = arith.maximumf %5, %6 : vector<256x32xf32>
    %8 = arith.truncf %7 : vector<256x32xf32> to vector<256x32xbf16>
    %c0_6 = arith.constant 0 : index
    %c0_7 = arith.constant 0 : index
    %9 = vector.load %arg4[%c0_6, %c0_7] : memref<256x32xbf16, #tpu.memory_space<vmem>>, vector<256x32xbf16>
    tpu.vector_store %arg4[%c0_6, %c0_7], %8 {strides = array<i32>} : memref<256x32xbf16, #tpu.memory_space<vmem>>, vector<256x32xbf16>,
    return
  }
  func.func @transform_0(%arg0: i32) -> (i32, i32) {
    %c0_i32 = arith.constant 0 : i32
    %c0_i32_0 = arith.constant 0 : i32
    return %arg0, %c0_i32 : i32, i32
  }
  func.func @transform_1(%arg0: i32) -> (i32, i32) {
    %c0_i32 = arith.constant 0 : i32
    %c0_i32_0 = arith.constant 0 : i32
    %c0_i32_1 = arith.constant 0 : i32
    return %c0_i32, %c0_i32_0 : i32, i32
  }
  func.func @transform_2(%arg0: i32) -> (i32, i32) {
    %c0_i32 = arith.constant 0 : i32
    %c0_i32_0 = arith.constant 0 : i32
    %c0_i32_1 = arith.constant 0 : i32
    return %c0_i32, %c0_i32_0 : i32, i32
  }
  func.func @transform_3(%arg0: i32) -> (i32, i32) {
    %c0_i32 = arith.constant 0 : i32
    %c0_i32_0 = arith.constant 0 : i32
    return %arg0, %c0_i32 : i32, i32
  }
}

module attributes {stable_mosaic.version = 11 : i64} {
  func.func @conv_bn_relu_kernel(%arg0: i32, %arg1: memref<64x288xbf16, #tpu.memory_space<vmem>>, %arg2: memref<288x64xbf16, #tpu.memory_space<vmem>>, %arg3: memref<1x64xf32, #tpu.memory_space<vmem>>, %arg4: memref<64x64xbf16, #tpu.memory_space<vmem>>) attributes {dimension_semantics = [#tpu.dimension_semantics<parallel>], iteration_bounds = array<i64: 2>, scalar_prefetch = 0 : i64, scratch_operands = 0 : i64, tpu.core_type = #tpu.core_type<tc>, window_params = [{transform_indices = @transform_0, window_bounds = array<i64: 64, 288>}, {pipeline_mode = #tpu.pipeline_mode<synchronous>, transform_indices = @transform_1, window_bounds = array<i64: 288, 64>}, {pipeline_mode = #tpu.pipeline_mode<synchronous>, transform_indices = @transform_2, window_bounds = array<i64: 1, 64>}, {transform_indices = @transform_3, window_bounds = array<i64: 64, 64>}]} {
    %c0 = arith.constant 0 : index
    %c0_0 = arith.constant 0 : index
    %0 = vector.load %arg1[%c0, %c0_0] : memref<64x288xbf16, #tpu.memory_space<vmem>>, vector<64x288xbf16>
    %c0_1 = arith.constant 0 : index
    %c0_2 = arith.constant 0 : index
    %1 = vector.load %arg2[%c0_1, %c0_2] : memref<288x64xbf16, #tpu.memory_space<vmem>>, vector<288x64xbf16>
    %cst = arith.constant dense<0.000000e+00> : vector<64x64xf32>
    %2 = tpu.matmul %0, %1, %cst {dimension_numbers = #tpu.dot_dimension_numbers<[1], [0], [0], [1], [0, 0, 1, 1], [], []>} : vector<64x288xbf16>, vector<288x64xbf16>, vector<64x64xf32> -> vector<64x64xf32>
    %c0_3 = arith.constant 0 : index
    %c0_4 = arith.constant 0 : index
    %3 = vector.load %arg3[%c0_3, %c0_4] : memref<1x64xf32, #tpu.memory_space<vmem>>, vector<1x64xf32>
    %4 = vector.broadcast %3 : vector<1x64xf32> to vector<64x64xf32>
    %5 = arith.addf %2, %4 : vector<64x64xf32>
    %cst_5 = arith.constant 0.000000e+00 : f32
    %6 = vector.broadcast %cst_5 : f32 to vector<64x64xf32>
    %7 = arith.maximumf %5, %6 : vector<64x64xf32>
    %8 = arith.truncf %7 : vector<64x64xf32> to vector<64x64xbf16>
    %c0_6 = arith.constant 0 : index
    %c0_7 = arith.constant 0 : index
    %9 = vector.load %arg4[%c0_6, %c0_7] : memref<64x64xbf16, #tpu.memory_space<vmem>>, vector<64x64xbf16>
    tpu.vector_store %arg4[%c0_6, %c0_7], %8 {strides = array<i32>} : memref<64x64xbf16, #tpu.memory_space<vmem>>, vector<64x64xbf16>,
    return
  }
  func.func @transform_0(%arg0: i32) -> (i32, i32) {
    %c0_i32 = arith.constant 0 : i32
    %c0_i32_0 = arith.constant 0 : i32
    return %arg0, %c0_i32 : i32, i32
  }
  func.func @transform_1(%arg0: i32) -> (i32, i32) {
    %c0_i32 = arith.constant 0 : i32
    %c0_i32_0 = arith.constant 0 : i32
    %c0_i32_1 = arith.constant 0 : i32
    return %c0_i32, %c0_i32_0 : i32, i32
  }
  func.func @transform_2(%arg0: i32) -> (i32, i32) {
    %c0_i32 = arith.constant 0 : i32
    %c0_i32_0 = arith.constant 0 : i32
    %c0_i32_1 = arith.constant 0 : i32
    return %c0_i32, %c0_i32_0 : i32, i32
  }
  func.func @transform_3(%arg0: i32) -> (i32, i32) {
    %c0_i32 = arith.constant 0 : i32
    %c0_i32_0 = arith.constant 0 : i32
    return %arg0, %c0_i32 : i32, i32
  }
}

module attributes {stable_mosaic.version = 11 : i64} {
  func.func @conv_bn_relu_res_kernel(%arg0: i32, %arg1: memref<64x576xbf16, #tpu.memory_space<vmem>>, %arg2: memref<576x64xbf16, #tpu.memory_space<vmem>>, %arg3: memref<1x64xf32, #tpu.memory_space<vmem>>, %arg4: memref<64x64xbf16, #tpu.memory_space<vmem>>, %arg5: memref<64x64xbf16, #tpu.memory_space<vmem>>) attributes {dimension_semantics = [#tpu.dimension_semantics<parallel>], iteration_bounds = array<i64: 2>, scalar_prefetch = 0 : i64, scratch_operands = 0 : i64, tpu.core_type = #tpu.core_type<tc>, window_params = [{transform_indices = @transform_0, window_bounds = array<i64: 64, 576>}, {pipeline_mode = #tpu.pipeline_mode<synchronous>, transform_indices = @transform_1, window_bounds = array<i64: 576, 64>}, {pipeline_mode = #tpu.pipeline_mode<synchronous>, transform_indices = @transform_2, window_bounds = array<i64: 1, 64>}, {transform_indices = @transform_3, window_bounds = array<i64: 64, 64>}, {transform_indices = @transform_4, window_bounds = array<i64: 64, 64>}]} {
    %c0 = arith.constant 0 : index
    %c0_0 = arith.constant 0 : index
    %0 = vector.load %arg1[%c0, %c0_0] : memref<64x576xbf16, #tpu.memory_space<vmem>>, vector<64x576xbf16>
    %c0_1 = arith.constant 0 : index
    %c0_2 = arith.constant 0 : index
    %1 = vector.load %arg2[%c0_1, %c0_2] : memref<576x64xbf16, #tpu.memory_space<vmem>>, vector<576x64xbf16>
    %cst = arith.constant dense<0.000000e+00> : vector<64x64xf32>
    %2 = tpu.matmul %0, %1, %cst {dimension_numbers = #tpu.dot_dimension_numbers<[1], [0], [0], [1], [0, 0, 1, 1], [], []>} : vector<64x576xbf16>, vector<576x64xbf16>, vector<64x64xf32> -> vector<64x64xf32>
    %c0_3 = arith.constant 0 : index
    %c0_4 = arith.constant 0 : index
    %3 = vector.load %arg3[%c0_3, %c0_4] : memref<1x64xf32, #tpu.memory_space<vmem>>, vector<1x64xf32>
    %4 = vector.broadcast %3 : vector<1x64xf32> to vector<64x64xf32>
    %5 = arith.addf %2, %4 : vector<64x64xf32>
    %c0_5 = arith.constant 0 : index
    %c0_6 = arith.constant 0 : index
    %6 = vector.load %arg4[%c0_5, %c0_6] : memref<64x64xbf16, #tpu.memory_space<vmem>>, vector<64x64xbf16>
    %7 = arith.extf %6 : vector<64x64xbf16> to vector<64x64xf32>
    %8 = arith.addf %5, %7 : vector<64x64xf32>
    %cst_7 = arith.constant 0.000000e+00 : f32
    %9 = vector.broadcast %cst_7 : f32 to vector<64x64xf32>
    %10 = arith.maximumf %8, %9 : vector<64x64xf32>
    %11 = arith.truncf %10 : vector<64x64xf32> to vector<64x64xbf16>
    %c0_8 = arith.constant 0 : index
    %c0_9 = arith.constant 0 : index
    %12 = vector.load %arg5[%c0_8, %c0_9] : memref<64x64xbf16, #tpu.memory_space<vmem>>, vector<64x64xbf16>
    tpu.vector_store %arg5[%c0_8, %c0_9], %11 {strides = array<i32>} : memref<64x64xbf16, #tpu.memory_space<vmem>>, vector<64x64xbf16>,
    return
  }
  func.func @transform_0(%arg0: i32) -> (i32, i32) {
    %c0_i32 = arith.constant 0 : i32
    %c0_i32_0 = arith.constant 0 : i32
    return %arg0, %c0_i32 : i32, i32
  }
  func.func @transform_1(%arg0: i32) -> (i32, i32) {
    %c0_i32 = arith.constant 0 : i32
    %c0_i32_0 = arith.constant 0 : i32
    %c0_i32_1 = arith.constant 0 : i32
    return %c0_i32, %c0_i32_0 : i32, i32
  }
  func.func @transform_2(%arg0: i32) -> (i32, i32) {
    %c0_i32 = arith.constant 0 : i32
    %c0_i32_0 = arith.constant 0 : i32
    %c0_i32_1 = arith.constant 0 : i32
    return %c0_i32, %c0_i32_0 : i32, i32
  }
  func.func @transform_3(%arg0: i32) -> (i32, i32) {
    %c0_i32 = arith.constant 0 : i32
    %c0_i32_0 = arith.constant 0 : i32
    return %arg0, %c0_i32 : i32, i32
  }
  func.func @transform_4(%arg0: i32) -> (i32, i32) {
    %c0_i32 = arith.constant 0 : i32
    %c0_i32_0 = arith.constant 0 : i32
    return %arg0, %c0_i32 : i32, i32
  }
}

module attributes {stable_mosaic.version = 11 : i64} {
  func.func @conv_bn_relu_kernel(%arg0: i32, %arg1: memref<64x576xbf16, #tpu.memory_space<vmem>>, %arg2: memref<576x64xbf16, #tpu.memory_space<vmem>>, %arg3: memref<1x64xf32, #tpu.memory_space<vmem>>, %arg4: memref<64x64xbf16, #tpu.memory_space<vmem>>) attributes {dimension_semantics = [#tpu.dimension_semantics<parallel>], iteration_bounds = array<i64: 2>, scalar_prefetch = 0 : i64, scratch_operands = 0 : i64, tpu.core_type = #tpu.core_type<tc>, window_params = [{transform_indices = @transform_0, window_bounds = array<i64: 64, 576>}, {pipeline_mode = #tpu.pipeline_mode<synchronous>, transform_indices = @transform_1, window_bounds = array<i64: 576, 64>}, {pipeline_mode = #tpu.pipeline_mode<synchronous>, transform_indices = @transform_2, window_bounds = array<i64: 1, 64>}, {transform_indices = @transform_3, window_bounds = array<i64: 64, 64>}]} {
    %c0 = arith.constant 0 : index
    %c0_0 = arith.constant 0 : index
    %0 = vector.load %arg1[%c0, %c0_0] : memref<64x576xbf16, #tpu.memory_space<vmem>>, vector<64x576xbf16>
    %c0_1 = arith.constant 0 : index
    %c0_2 = arith.constant 0 : index
    %1 = vector.load %arg2[%c0_1, %c0_2] : memref<576x64xbf16, #tpu.memory_space<vmem>>, vector<576x64xbf16>
    %cst = arith.constant dense<0.000000e+00> : vector<64x64xf32>
    %2 = tpu.matmul %0, %1, %cst {dimension_numbers = #tpu.dot_dimension_numbers<[1], [0], [0], [1], [0, 0, 1, 1], [], []>} : vector<64x576xbf16>, vector<576x64xbf16>, vector<64x64xf32> -> vector<64x64xf32>
    %c0_3 = arith.constant 0 : index
    %c0_4 = arith.constant 0 : index
    %3 = vector.load %arg3[%c0_3, %c0_4] : memref<1x64xf32, #tpu.memory_space<vmem>>, vector<1x64xf32>
    %4 = vector.broadcast %3 : vector<1x64xf32> to vector<64x64xf32>
    %5 = arith.addf %2, %4 : vector<64x64xf32>
    %cst_5 = arith.constant 0.000000e+00 : f32
    %6 = vector.broadcast %cst_5 : f32 to vector<64x64xf32>
    %7 = arith.maximumf %5, %6 : vector<64x64xf32>
    %8 = arith.truncf %7 : vector<64x64xf32> to vector<64x64xbf16>
    %c0_6 = arith.constant 0 : index
    %c0_7 = arith.constant 0 : index
    %9 = vector.load %arg4[%c0_6, %c0_7] : memref<64x64xbf16, #tpu.memory_space<vmem>>, vector<64x64xbf16>
    tpu.vector_store %arg4[%c0_6, %c0_7], %8 {strides = array<i32>} : memref<64x64xbf16, #tpu.memory_space<vmem>>, vector<64x64xbf16>,
    return
  }
  func.func @transform_0(%arg0: i32) -> (i32, i32) {
    %c0_i32 = arith.constant 0 : i32
    %c0_i32_0 = arith.constant 0 : i32
    return %arg0, %c0_i32 : i32, i32
  }
  func.func @transform_1(%arg0: i32) -> (i32, i32) {
    %c0_i32 = arith.constant 0 : i32
    %c0_i32_0 = arith.constant 0 : i32
    %c0_i32_1 = arith.constant 0 : i32
    return %c0_i32, %c0_i32_0 : i32, i32
  }
  func.func @transform_2(%arg0: i32) -> (i32, i32) {
    %c0_i32 = arith.constant 0 : i32
    %c0_i32_0 = arith.constant 0 : i32
    %c0_i32_1 = arith.constant 0 : i32
    return %c0_i32, %c0_i32_0 : i32, i32
  }
  func.func @transform_3(%arg0: i32) -> (i32, i32) {
    %c0_i32 = arith.constant 0 : i32
    %c0_i32_0 = arith.constant 0 : i32
    return %arg0, %c0_i32 : i32, i32
  }
}

module attributes {stable_mosaic.version = 11 : i64} {
  func.func @pool_fc_kernel(%arg0: i32, %arg1: memref<2x64x64xbf16, #tpu.memory_space<vmem>>, %arg2: memref<64x10xf32, #tpu.memory_space<vmem>>, %arg3: memref<1x10xf32, #tpu.memory_space<vmem>>, %arg4: memref<2x64xf32, #tpu.memory_space<vmem>>, %arg5: memref<2x10xf32, #tpu.memory_space<vmem>>) attributes {dimension_semantics = [#tpu.dimension_semantics<arbitrary>], iteration_bounds = array<i64: 1>, scalar_prefetch = 0 : i64, scratch_operands = 0 : i64, tpu.core_type = #tpu.core_type<tc>, window_params = [{pipeline_mode = #tpu.pipeline_mode<synchronous>, transform_indices = @transform_0, window_bounds = array<i64: 2, 64, 64>}, {pipeline_mode = #tpu.pipeline_mode<synchronous>, transform_indices = @transform_1, window_bounds = array<i64: 64, 10>}, {pipeline_mode = #tpu.pipeline_mode<synchronous>, transform_indices = @transform_2, window_bounds = array<i64: 1, 10>}, {pipeline_mode = #tpu.pipeline_mode<synchronous>, transform_indices = @transform_3, window_bounds = array<i64: 2, 64>}, {pipeline_mode = #tpu.pipeline_mode<synchronous>, transform_indices = @transform_4, window_bounds = array<i64: 2, 10>}]} {
    %c0 = arith.constant 0 : index
    %c0_0 = arith.constant 0 : index
    %c0_1 = arith.constant 0 : index
    %0 = vector.load %arg1[%c0, %c0_0, %c0_1] : memref<2x64x64xbf16, #tpu.memory_space<vmem>>, vector<2x64x64xbf16>
    %1 = arith.extf %0 : vector<2x64x64xbf16> to vector<2x64x64xf32>
    %cst = arith.constant dense<0.000000e+00> : vector<2x64xf32>
    %2 = vector.multi_reduction <add>, %1, %cst [1] : vector<2x64x64xf32> to vector<2x64xf32>
    %cst_2 = arith.constant 1.562500e-02 : f32
    %3 = vector.broadcast %cst_2 : f32 to vector<2x64xf32>
    %4 = arith.mulf %2, %3 : vector<2x64xf32>
    %c0_3 = arith.constant 0 : index
    %c0_4 = arith.constant 0 : index
    %5 = vector.load %arg4[%c0_3, %c0_4] : memref<2x64xf32, #tpu.memory_space<vmem>>, vector<2x64xf32>
    tpu.vector_store %arg4[%c0_3, %c0_4], %4 {strides = array<i32>} : memref<2x64xf32, #tpu.memory_space<vmem>>, vector<2x64xf32>,
    %c0_5 = arith.constant 0 : index
    %c0_6 = arith.constant 0 : index
    %6 = vector.load %arg2[%c0_5, %c0_6] : memref<64x10xf32, #tpu.memory_space<vmem>>, vector<64x10xf32>
    %cst_7 = arith.constant dense<0.000000e+00> : vector<2x10xf32>
    %7 = tpu.matmul %4, %6, %cst_7 {dimension_numbers = #tpu.dot_dimension_numbers<[1], [0], [0], [1], [0, 0, 1, 1], [], []>} : vector<2x64xf32>, vector<64x10xf32>, vector<2x10xf32> -> vector<2x10xf32>
    %c0_8 = arith.constant 0 : index
    %c0_9 = arith.constant 0 : index
    %8 = vector.load %arg3[%c0_8, %c0_9] : memref<1x10xf32, #tpu.memory_space<vmem>>, vector<1x10xf32>
    %9 = vector.broadcast %8 : vector<1x10xf32> to vector<2x10xf32>
    %10 = arith.addf %7, %9 : vector<2x10xf32>
    %c0_10 = arith.constant 0 : index
    %c0_11 = arith.constant 0 : index
    %11 = vector.load %arg5[%c0_10, %c0_11] : memref<2x10xf32, #tpu.memory_space<vmem>>, vector<2x10xf32>
    tpu.vector_store %arg5[%c0_10, %c0_11], %10 {strides = array<i32>} : memref<2x10xf32, #tpu.memory_space<vmem>>, vector<2x10xf32>,
    return
  }
  func.func @transform_0(%arg0: i32) -> (i32, i32, i32) {
    %c0_i32 = arith.constant 0 : i32
    %c0_i32_0 = arith.constant 0 : i32
    %c0_i32_1 = arith.constant 0 : i32
    %c0_i32_2 = arith.constant 0 : i32
    return %c0_i32, %c0_i32_0, %c0_i32_1 : i32, i32, i32
  }
  func.func @transform_1(%arg0: i32) -> (i32, i32) {
    %c0_i32 = arith.constant 0 : i32
    %c0_i32_0 = arith.constant 0 : i32
    %c0_i32_1 = arith.constant 0 : i32
    return %c0_i32, %c0_i32_0 : i32, i32
  }
  func.func @transform_2(%arg0: i32) -> (i32, i32) {
    %c0_i32 = arith.constant 0 : i32
    %c0_i32_0 = arith.constant 0 : i32
    %c0_i32_1 = arith.constant 0 : i32
    return %c0_i32, %c0_i32_0 : i32, i32
  }
  func.func @transform_3(%arg0: i32) -> (i32, i32) {
    %c0_i32 = arith.constant 0 : i32
    %c0_i32_0 = arith.constant 0 : i32
    %c0_i32_1 = arith.constant 0 : i32
    return %c0_i32, %c0_i32_0 : i32, i32
  }
  func.func @transform_4(%arg0: i32) -> (i32, i32) {
    %c0_i32 = arith.constant 0 : i32
    %c0_i32_0 = arith.constant 0 : i32
    %c0_i32_1 = arith.constant 0 : i32
    return %c0_i32, %c0_i32_0 : i32, i32
  }
}

</mosaic_0001>

<bundles_post_ra>
// kernel: base_net_forward.32
= control target key start
LH: loop header
LB: loop body
LE: loop exit
PB: predicated region body
PF: predicated region fallthrough
CT: control target
= control target key end

     0   :  { %s1631_s12 = smov 0   ;;  %s1926_s0 = inlined_call_operand.vmem [shape: bf16[2048,32], index: 0, kind: input, shape index: {}]   ;;  %s1927_s1 = inlined_call_operand.vmem [shape: bf16[32,16], index: 1, kind: input, shape index: {}]   ;;  %s1928_s2 = inlined_call_operand.vmem [shape: f32[1,16], index: 2, kind: input, shape index: {}]   ;;  %s1929_s3 = inlined_call_operand.vmem [shape: bf16[2048,16], index: 3, kind: output, shape index: {}]  }
   0x1 LB: > { %s1249_s13 = sadd.s32 4294967295, %s1609_s12   ;;  %p1253_p0 = scmp.ge.s32.totalorder %s1609_s12, 1  ;;  %s1609_s12 = sphi %s1631_s12, %s13_s12  }
   0x2   : > { %p138_p1 = scmp.lt.s32.totalorder %s1609_s12, 5 }
   0x4   : > { %p139_p2 = pnand %p1253_p0, %p138_p1 }
   0x5   : > { %s1254_s16 = sshll.u32 (!%p139_p2), %s1249_s13, 6 }
   0x6   : > { %142 = sbr.rel (%p139_p2) target bundleno = 283 (0x11b), region = 32  ;;  %p163_p3 = scmp.lt.s32.totalorder (!%p139_p2), %s1254_s16, 255 }
   0xb   : > { %v1569_v0 = vld [vmem:[%s1927_s1 + $0x8] sm:$0xff]   ;;  %v1570_v1 = vld [vmem:[%s1927_s1] sm:$0xff]   ;;  %s1931_s16 = smov (!%p163_p3, %s1254_s16), 255  ;;  %vm422_vm0 = vcmask 261120   ;;  %vm1128_vm1 = vcmask 125952  }
   0xc   : > { %1489 = vmatprep.subr.bf16.mxu0 %v1569_v0  ;;  %1557 = vmatprep.subr.bf16.mxu1 %v1569_v0  ;;  %s1255_s19 = sshll.u32 %s1931_s16, 2  ;;  %v1722_v34 = vld [vmem:[%s1928_s2] ss:$0 sm:$0xff] }
   0xd   : > { %1490 = vmatpush3.bf16.msra.mxu0 %v1569_v0  ;;  %1559 = vmatpush3.bf16.msra.mxu1 %v1569_v0  ;;  %s1653_s22 = scalar_lea.vmem %s1926_s0, %s1255_s19  ;;  %s1732_s27 = scalar_lea.vmem %s1929_s3, %s1255_s19 }
   0xe   : > { %1491 = vmatprep.subr.bf16.mxu0 %v1570_v1  ;;  %1558 = vmatprep.subr.bf16.mxu1 %v1570_v1  ;;  %v1571_v2 = vld [vmem:[%s1653_s22] sm:$0xff]   ;;  %v1573_v4 = vld [vmem:[%s1653_s22 + $0x8] sm:$0xff]   ;;  %v1575_v6 = vld [vmem:[%s1653_s22 + $0x10] sm:$0xff]  }
   0xf   : > { %v1572_v3 = vld [vmem:[%s1653_s22 + $0x80] sm:$0xff]   ;;  %1493 = vmatprep.mubr.msk.bf16.mxu0 %vm422_vm0, %v1571_v2  ;;  %v1574_v5 = vld [vmem:[%s1653_s22 + $0x88] sm:$0xff]   ;;  %v1576_v7 = vld [vmem:[%s1653_s22 + $0x90] sm:$0xff]  }
  0x10   : > { %1525 = vmatprep.mubr.msk.bf16.mxu1 %vm422_vm0, %v1572_v3  ;;  %v1577_v8 = vld [vmem:[%s1653_s22 + $0x18] sm:$0xff]   ;;  %v1579_v10 = vld [vmem:[%s1653_s22 + $0x20] sm:$0xff]   ;;  %v1581_v12 = vld [vmem:[%s1653_s22 + $0x28] sm:$0xff]  }
  0x11   : > { %1492 = vmatpush3.bf16.msra.mxu0 %v1570_v1  ;;  %1560 = vmatpush3.bf16.msra.mxu1 %v1570_v1  ;;  %v1578_v9 = vld [vmem:[%s1653_s22 + $0x98] sm:$0xff]   ;;  %v1580_v11 = vld [vmem:[%s1653_s22 + $0xa0] sm:$0xff]   ;;  %v1582_v13 = vld [vmem:[%s1653_s22 + $0xa8] sm:$0xff]  }
  0x12   : > { %v1583_v14 = vld [vmem:[%s1653_s22 + $0x30] sm:$0xff]   ;;  %v1585_v16 = vld [vmem:[%s1653_s22 + $0x38] sm:$0xff]   ;;  %v1587_v18 = vld [vmem:[%s1653_s22 + $0x40] sm:$0xff]  }
  0x13   : > { %v1584_v15 = vld [vmem:[%s1653_s22 + $0xb0] sm:$0xff]   ;;  %v1586_v17 = vld [vmem:[%s1653_s22 + $0xb8] sm:$0xff]   ;;  %v1588_v19 = vld [vmem:[%s1653_s22 + $0xc0] sm:$0xff]  }
  0x14   : > { %1494 = vmatmul.mubr.msk.bf16.vlgmr.msra.gmra.mxu0 %vm422_vm0, %v1573_v4  ;;  %1526 = vmatmul.mubr.msk.bf16.vlgmr.msra.gmra.mxu1 %vm422_vm0, %v1574_v5  ;;  %v1589_v20 = vld [vmem:[%s1653_s22 + $0x48] sm:$0xff]   ;;  %v1591_v22 = vld [vmem:[%s1653_s22 + $0x50] sm:$0xff]   ;;  %v1593_v24 = vld [vmem:[%s1653_s22 + $0x58] sm:$0xff]  }
  0x15   : > { %1497 = vmatprep.mubr.msk.bf16.mxu0 %vm422_vm0, %v1575_v6  ;;  %1529 = vmatprep.mubr.msk.bf16.mxu1 %vm422_vm0, %v1576_v7  ;;  %v1590_v21 = vld [vmem:[%s1653_s22 + $0xc8] sm:$0xff]   ;;  %v1592_v23 = vld [vmem:[%s1653_s22 + $0xd0] sm:$0xff]   ;;  %v1594_v25 = vld [vmem:[%s1653_s22 + $0xd8] sm:$0xff]  }
  0x16   : > { %v1595_v26 = vld [vmem:[%s1653_s22 + $0x60] sm:$0xff]   ;;  %v1597_v28 = vld [vmem:[%s1653_s22 + $0x68] sm:$0xff]   ;;  %v1599_v30 = vld [vmem:[%s1653_s22 + $0x70] sm:$0xff]  }
  0x17   : > { %v1596_v27 = vld [vmem:[%s1653_s22 + $0xe0] sm:$0xff]   ;;  %v1598_v29 = vld [vmem:[%s1653_s22 + $0xe8] sm:$0xff]   ;;  %v1600_v31 = vld [vmem:[%s1653_s22 + $0xf0] sm:$0xff]  }
  0x18   : > { %v1601_v32 = vld [vmem:[%s1653_s22 + $0x78] sm:$0xff]  }
  0x19   : > { %v1602_v33 = vld [vmem:[%s1653_s22 + $0xf8] sm:$0xff]  }
  0x1c   : > { %1498 = vmatmul.mubr.msk.bf16.gmra.mxu0 %vm422_vm0, %v1577_v8  ;;  %1530 = vmatmul.mubr.msk.bf16.gmra.mxu1 %vm422_vm0, %v1578_v9 }
  0x1d   : > { %1501 = vmatprep.mubr.msk.bf16.mxu0 %vm422_vm0, %v1579_v10  ;;  %1533 = vmatprep.mubr.msk.bf16.mxu1 %vm422_vm0, %v1580_v11 }
  0x24   : > { %1502 = vmatmul.mubr.msk.bf16.gmra.mxu0 %vm422_vm0, %v1581_v12  ;;  %1534 = vmatmul.mubr.msk.bf16.gmra.mxu1 %vm422_vm0, %v1582_v13 }
  0x25   : > { %1505 = vmatprep.mubr.msk.bf16.mxu0 %vm422_vm0, %v1583_v14  ;;  %1537 = vmatprep.mubr.msk.bf16.mxu1 %vm422_vm0, %v1584_v15 }
  0x2c   : > { %1506 = vmatmul.mubr.msk.bf16.gmra.mxu0 %vm422_vm0, %v1585_v16  ;;  %1538 = vmatmul.mubr.msk.bf16.gmra.mxu1 %vm422_vm0, %v1586_v17 }
  0x2d   : > { %1509 = vmatprep.mubr.msk.bf16.mxu0 %vm422_vm0, %v1587_v18  ;;  %1541 = vmatprep.mubr.msk.bf16.mxu1 %vm422_vm0, %v1588_v19 }
  0x34   : > { %1510 = vmatmul.mubr.msk.bf16.gmra.mxu0 %vm422_vm0, %v1589_v20  ;;  %1542 = vmatmul.mubr.msk.bf16.gmra.mxu1 %vm422_vm0, %v1590_v21 }
  0x35   : > { %1513 = vmatprep.mubr.msk.bf16.mxu0 %vm422_vm0, %v1591_v22  ;;  %1545 = vmatprep.mubr.msk.bf16.mxu1 %vm422_vm0, %v1592_v23 }
  0x3c   : > { %1514 = vmatmul.mubr.msk.bf16.gmra.mxu0 %vm422_vm0, %v1593_v24  ;;  %1546 = vmatmul.mubr.msk.bf16.gmra.mxu1 %vm422_vm0, %v1594_v25 }
  0x3d   : > { %1517 = vmatprep.mubr.msk.bf16.mxu0 %vm422_vm0, %v1595_v26  ;;  %1549 = vmatprep.mubr.msk.bf16.mxu1 %vm422_vm0, %v1596_v27 }
  0x44   : > { %1518 = vmatmul.mubr.msk.bf16.gmra.mxu0 %vm422_vm0, %v1597_v28  ;;  %1550 = vmatmul.mubr.msk.bf16.gmra.mxu1 %vm422_vm0, %v1598_v29 }
  0x45   : > { %1521 = vmatprep.mubr.msk.bf16.mxu0 %vm422_vm0, %v1599_v30  ;;  %1553 = vmatprep.mubr.msk.bf16.mxu1 %vm422_vm0, %v1600_v31 }
  0x4c   : > { %1522 = vmatmul.mubr.msk.bf16.gmra.mxu0 %vm422_vm0, %v1601_v32  ;;  %1554 = vmatmul.mubr.msk.bf16.gmra.mxu1 %vm422_vm0, %v1602_v33 }
  0xd4   : > { %v1495_v35 = vpop.f32.mrf.mxu0  ;;  %v1527_v37 = vpop.f32.mrf.mxu1 }
  0xd5   : > { %v562_v36 = vadd.f32 %v1495_v35, %v1722_v34  ;;  %v690_v38 = vadd.f32 %v1527_v37, %v1722_v34 }
  0xd6   : > { %v553_v39 = vpop.f32.mrf.mxu0  ;;  %v681_v42 = vpop.f32.mrf.mxu1 }
  0xd7   : > { %v810_v40 = vmax.f32 %v562_v36, 0.0  ;;  %v554_v41 = vadd.f32 %v1722_v34, %v553_v39  ;;  %v842_v43 = vmax.f32 %v690_v38, 0.0  ;;  %v682_v44 = vadd.f32 %v1722_v34, %v681_v42 }
  0xd8   : > { %v1496_v45 = vpop.f32.mrf.mxu0  ;;  %v1528_v49 = vpop.f32.mrf.mxu1 }
  0xd9   : > { %v1393_v46 = vpack.c.bf16 %v810_v40, %v810_v40  ;;  %v808_v47 = vmax.f32 %v554_v41, 0.0  ;;  %v565_v48 = vadd.f32 %v1496_v45, %v1722_v34  ;;  %v1425_v50 = vpack.c.bf16 %v842_v43, %v842_v43 }
  0xda   : > { %v840_v51 = vmax.f32 %v682_v44, 0.0  ;;  %v693_v52 = vadd.f32 %v1528_v49, %v1722_v34  ;;  %v556_v53 = vpop.f32.mrf.mxu0  ;;  %v684_v57 = vpop.f32.mrf.mxu1 }
  0xdb   : > { %1131 = vst.msk [vmem:[%s1732_s27 + $0x8] sm:$0xf] %vm1128_vm1, %v1393_v46  ;;  %v1391_v54 = vpack.c.bf16 %v808_v47, %v808_v47  ;;  %v811_v55 = vmax.f32 %v565_v48, 0.0  ;;  %v557_v56 = vadd.f32 %v1722_v34, %v556_v53  ;;  %1163 = vst.msk [vmem:[%s1732_s27 + $0x88] sm:$0xf] %vm1128_vm1, %v1425_v50  ;;  %v685_v60 = vadd.f32 %v1722_v34, %v684_v57 }
  0xdc   : > { %v1423_v58 = vpack.c.bf16 %v840_v51, %v840_v51  ;;  %v843_v59 = vmax.f32 %v693_v52, 0.0  ;;  %v1499_v61 = vpop.f32.mrf.mxu0  ;;  %v1531_v1 = vpop.f32.mrf.mxu1 }
  0xdd   : > { %1129 = vst.msk [vmem:[%s1732_s27] sm:$0xf] %vm1128_vm1, %v1391_v54  ;;  %v1394_v62 = vpack.c.bf16 %v811_v55, %v811_v55  ;;  %v809_v63 = vmax.f32 %v557_v56, 0.0  ;;  %v578_v0 = vadd.f32 %v1499_v61, %v1722_v34  ;;  %v841_v3 = vmax.f32 %v685_v60, 0.0 }
  0xde   : > { %1161 = vst.msk [vmem:[%s1732_s27 + $0x80] sm:$0xf] %vm1128_vm1, %v1423_v58  ;;  %v1426_v2 = vpack.c.bf16 %v843_v59, %v843_v59  ;;  %v706_v4 = vadd.f32 %v1531_v1, %v1722_v34  ;;  %v569_v5 = vpop.f32.mrf.mxu0  ;;  %v697_v9 = vpop.f32.mrf.mxu1 }
  0xdf   : > { %1132 = vst.msk [vmem:[%s1732_s27 + $0xc] sm:$0xf] %vm1128_vm1, %v1394_v62  ;;  %v1392_v6 = vpack.c.bf16 %v809_v63, %v809_v63  ;;  %v814_v7 = vmax.f32 %v578_v0, 0.0  ;;  %v570_v8 = vadd.f32 %v1722_v34, %v569_v5  ;;  %v1424_v10 = vpack.c.bf16 %v841_v3, %v841_v3 }
  0xe0   : > { %1164 = vst.msk [vmem:[%s1732_s27 + $0x8c] sm:$0xf] %vm1128_vm1, %v1426_v2  ;;  %v846_v11 = vmax.f32 %v706_v4, 0.0  ;;  %v698_v12 = vadd.f32 %v1722_v34, %v697_v9  ;;  %v1500_v13 = vpop.f32.mrf.mxu0  ;;  %v1532_v17 = vpop.f32.mrf.mxu1 }
  0xe1   : > { %1130 = vst.msk [vmem:[%s1732_s27 + $0x4] sm:$0xf] %vm1128_vm1, %v1392_v6  ;;  %v1397_v14 = vpack.c.bf16 %v814_v7, %v814_v7  ;;  %v812_v15 = vmax.f32 %v570_v8, 0.0  ;;  %v581_v16 = vadd.f32 %v1500_v13, %v1722_v34  ;;  %1162 = vst.msk [vmem:[%s1732_s27 + $0x84] sm:$0xf] %vm1128_vm1, %v1424_v10  ;;  %v709_v20 = vadd.f32 %v1532_v17, %v1722_v34 }
  0xe2   : > { %v1429_v18 = vpack.c.bf16 %v846_v11, %v846_v11  ;;  %v844_v19 = vmax.f32 %v698_v12, 0.0  ;;  %v572_v21 = vpop.f32.mrf.mxu0  ;;  %v700_v25 = vpop.f32.mrf.mxu1 }
  0xe3   : > { %1135 = vst.msk [vmem:[%s1732_s27 + $0x18] sm:$0xf] %vm1128_vm1, %v1397_v14  ;;  %v1395_v22 = vpack.c.bf16 %v812_v15, %v812_v15  ;;  %v815_v23 = vmax.f32 %v581_v16, 0.0  ;;  %v573_v24 = vadd.f32 %v1722_v34, %v572_v21  ;;  %v847_v27 = vmax.f32 %v709_v20, 0.0 }
  0xe4   : > { %1167 = vst.msk [vmem:[%s1732_s27 + $0x98] sm:$0xf] %vm1128_vm1, %v1429_v18  ;;  %v1427_v26 = vpack.c.bf16 %v844_v19, %v844_v19  ;;  %v701_v28 = vadd.f32 %v1722_v34, %v700_v25  ;;  %v1503_v29 = vpop.f32.mrf.mxu0  ;;  %v1535_v33 = vpop.f32.mrf.mxu1 }
  0xe5   : > { %1133 = vst.msk [vmem:[%s1732_s27 + $0x10] sm:$0xf] %vm1128_vm1, %v1395_v22  ;;  %v1398_v30 = vpack.c.bf16 %v815_v23, %v815_v23  ;;  %v813_v31 = vmax.f32 %v573_v24, 0.0  ;;  %v594_v32 = vadd.f32 %v1503_v29, %v1722_v34  ;;  %v1430_v35 = vpack.c.bf16 %v847_v27, %v847_v27 }
  0xe6   : > { %1165 = vst.msk [vmem:[%s1732_s27 + $0x90] sm:$0xf] %vm1128_vm1, %v1427_v26  ;;  %v845_v36 = vmax.f32 %v701_v28, 0.0  ;;  %v722_v37 = vadd.f32 %v1535_v33, %v1722_v34  ;;  %v585_v38 = vpop.f32.mrf.mxu0  ;;  %v713_v42 = vpop.f32.mrf.mxu1 }
  0xe7   : > { %1136 = vst.msk [vmem:[%s1732_s27 + $0x1c] sm:$0xf] %vm1128_vm1, %v1398_v30  ;;  %v1396_v39 = vpack.c.bf16 %v813_v31, %v813_v31  ;;  %v818_v40 = vmax.f32 %v594_v32, 0.0  ;;  %v586_v41 = vadd.f32 %v1722_v34, %v585_v38  ;;  %1168 = vst.msk [vmem:[%s1732_s27 + $0x9c] sm:$0xf] %vm1128_vm1, %v1430_v35  ;;  %v714_v45 = vadd.f32 %v1722_v34, %v713_v42 }
  0xe8   : > { %v1428_v43 = vpack.c.bf16 %v845_v36, %v845_v36  ;;  %v850_v44 = vmax.f32 %v722_v37, 0.0  ;;  %v1504_v46 = vpop.f32.mrf.mxu0  ;;  %v1536_v50 = vpop.f32.mrf.mxu1 }
  0xe9   : > { %1134 = vst.msk [vmem:[%s1732_s27 + $0x14] sm:$0xf] %vm1128_vm1, %v1396_v39  ;;  %v1401_v47 = vpack.c.bf16 %v818_v40, %v818_v40  ;;  %v816_v48 = vmax.f32 %v586_v41, 0.0  ;;  %v597_v49 = vadd.f32 %v1504_v46, %v1722_v34  ;;  %v848_v52 = vmax.f32 %v714_v45, 0.0 }
  0xea   : > { %1166 = vst.msk [vmem:[%s1732_s27 + $0x94] sm:$0xf] %vm1128_vm1, %v1428_v43  ;;  %v1433_v51 = vpack.c.bf16 %v850_v44, %v850_v44  ;;  %v725_v53 = vadd.f32 %v1536_v50, %v1722_v34  ;;  %v588_v54 = vpop.f32.mrf.mxu0  ;;  %v716_v58 = vpop.f32.mrf.mxu1 }
  0xeb   : > { %1139 = vst.msk [vmem:[%s1732_s27 + $0x28] sm:$0xf] %vm1128_vm1, %v1401_v47  ;;  %v1399_v55 = vpack.c.bf16 %v816_v48, %v816_v48  ;;  %v819_v56 = vmax.f32 %v597_v49, 0.0  ;;  %v589_v57 = vadd.f32 %v1722_v34, %v588_v54  ;;  %v1431_v59 = vpack.c.bf16 %v848_v52, %v848_v52 }
  0xec   : > { %1171 = vst.msk [vmem:[%s1732_s27 + $0xa8] sm:$0xf] %vm1128_vm1, %v1433_v51  ;;  %v851_v60 = vmax.f32 %v725_v53, 0.0  ;;  %v717_v61 = vadd.f32 %v1722_v34, %v716_v58  ;;  %v1507_v62 = vpop.f32.mrf.mxu0  ;;  %v1539_v2 = vpop.f32.mrf.mxu1 }
  0xed   : > { %1137 = vst.msk [vmem:[%s1732_s27 + $0x20] sm:$0xf] %vm1128_vm1, %v1399_v55  ;;  %v1402_v63 = vpack.c.bf16 %v819_v56, %v819_v56  ;;  %v817_v0 = vmax.f32 %v589_v57, 0.0  ;;  %v610_v1 = vadd.f32 %v1507_v62, %v1722_v34  ;;  %1169 = vst.msk [vmem:[%s1732_s27 + $0xa0] sm:$0xf] %vm1128_vm1, %v1431_v59  ;;  %v738_v5 = vadd.f32 %v1539_v2, %v1722_v34 }
  0xee   : > { %v1434_v3 = vpack.c.bf16 %v851_v60, %v851_v60  ;;  %v849_v4 = vmax.f32 %v717_v61, 0.0  ;;  %v601_v6 = vpop.f32.mrf.mxu0  ;;  %v729_v10 = vpop.f32.mrf.mxu1 }
  0xef   : > { %1140 = vst.msk [vmem:[%s1732_s27 + $0x2c] sm:$0xf] %vm1128_vm1, %v1402_v63  ;;  %v1400_v7 = vpack.c.bf16 %v817_v0, %v817_v0  ;;  %v822_v8 = vmax.f32 %v610_v1, 0.0  ;;  %v602_v9 = vadd.f32 %v1722_v34, %v601_v6  ;;  %v854_v12 = vmax.f32 %v738_v5, 0.0 }
  0xf0   : > { %1172 = vst.msk [vmem:[%s1732_s27 + $0xac] sm:$0xf] %vm1128_vm1, %v1434_v3  ;;  %v1432_v11 = vpack.c.bf16 %v849_v4, %v849_v4  ;;  %v730_v13 = vadd.f32 %v1722_v34, %v729_v10  ;;  %v1508_v14 = vpop.f32.mrf.mxu0  ;;  %v1540_v18 = vpop.f32.mrf.mxu1 }
  0xf1   : > { %1138 = vst.msk [vmem:[%s1732_s27 + $0x24] sm:$0xf] %vm1128_vm1, %v1400_v7  ;;  %v1405_v15 = vpack.c.bf16 %v822_v8, %v822_v8  ;;  %v820_v16 = vmax.f32 %v602_v9, 0.0  ;;  %v613_v17 = vadd.f32 %v1508_v14, %v1722_v34  ;;  %v1437_v19 = vpack.c.bf16 %v854_v12, %v854_v12 }
  0xf2   : > { %1170 = vst.msk [vmem:[%s1732_s27 + $0xa4] sm:$0xf] %vm1128_vm1, %v1432_v11  ;;  %v852_v20 = vmax.f32 %v730_v13, 0.0  ;;  %v741_v21 = vadd.f32 %v1540_v18, %v1722_v34  ;;  %v604_v22 = vpop.f32.mrf.mxu0  ;;  %v732_v26 = vpop.f32.mrf.mxu1 }
  0xf3   : > { %1143 = vst.msk [vmem:[%s1732_s27 + $0x38] sm:$0xf] %vm1128_vm1, %v1405_v15  ;;  %v1403_v23 = vpack.c.bf16 %v820_v16, %v820_v16  ;;  %v823_v24 = vmax.f32 %v613_v17, 0.0  ;;  %v605_v25 = vadd.f32 %v1722_v34, %v604_v22  ;;  %1175 = vst.msk [vmem:[%s1732_s27 + $0xb8] sm:$0xf] %vm1128_vm1, %v1437_v19  ;;  %v733_v29 = vadd.f32 %v1722_v34, %v732_v26 }
  0xf4   : > { %v1435_v27 = vpack.c.bf16 %v852_v20, %v852_v20  ;;  %v855_v28 = vmax.f32 %v741_v21, 0.0  ;;  %v1511_v30 = vpop.f32.mrf.mxu0  ;;  %v1543_v35 = vpop.f32.mrf.mxu1 }
  0xf5   : > { %1141 = vst.msk [vmem:[%s1732_s27 + $0x30] sm:$0xf] %vm1128_vm1, %v1403_v23  ;;  %v1406_v31 = vpack.c.bf16 %v823_v24, %v823_v24  ;;  %v821_v32 = vmax.f32 %v605_v25, 0.0  ;;  %v626_v33 = vadd.f32 %v1511_v30, %v1722_v34  ;;  %v853_v37 = vmax.f32 %v733_v29, 0.0 }
  0xf6   : > { %1173 = vst.msk [vmem:[%s1732_s27 + $0xb0] sm:$0xf] %vm1128_vm1, %v1435_v27  ;;  %v1438_v36 = vpack.c.bf16 %v855_v28, %v855_v28  ;;  %v754_v38 = vadd.f32 %v1543_v35, %v1722_v34  ;;  %v617_v39 = vpop.f32.mrf.mxu0  ;;  %v745_v43 = vpop.f32.mrf.mxu1 }
  0xf7   : > { %1144 = vst.msk [vmem:[%s1732_s27 + $0x3c] sm:$0xf] %vm1128_vm1, %v1406_v31  ;;  %v1404_v40 = vpack.c.bf16 %v821_v32, %v821_v32  ;;  %v826_v41 = vmax.f32 %v626_v33, 0.0  ;;  %v618_v42 = vadd.f32 %v1722_v34, %v617_v39  ;;  %v1436_v44 = vpack.c.bf16 %v853_v37, %v853_v37 }
  0xf8   : > { %1176 = vst.msk [vmem:[%s1732_s27 + $0xbc] sm:$0xf] %vm1128_vm1, %v1438_v36  ;;  %v858_v45 = vmax.f32 %v754_v38, 0.0  ;;  %v746_v46 = vadd.f32 %v1722_v34, %v745_v43  ;;  %v1512_v47 = vpop.f32.mrf.mxu0  ;;  %v1544_v51 = vpop.f32.mrf.mxu1 }
  0xf9   : > { %1142 = vst.msk [vmem:[%s1732_s27 + $0x34] sm:$0xf] %vm1128_vm1, %v1404_v40  ;;  %v1409_v48 = vpack.c.bf16 %v826_v41, %v826_v41  ;;  %v824_v49 = vmax.f32 %v618_v42, 0.0  ;;  %v629_v50 = vadd.f32 %v1512_v47, %v1722_v34  ;;  %1174 = vst.msk [vmem:[%s1732_s27 + $0xb4] sm:$0xf] %vm1128_vm1, %v1436_v44  ;;  %v757_v54 = vadd.f32 %v1544_v51, %v1722_v34 }
  0xfa   : > { %v1441_v52 = vpack.c.bf16 %v858_v45, %v858_v45  ;;  %v856_v53 = vmax.f32 %v746_v46, 0.0  ;;  %v620_v55 = vpop.f32.mrf.mxu0  ;;  %v748_v59 = vpop.f32.mrf.mxu1 }
  0xfb   : > { %1147 = vst.msk [vmem:[%s1732_s27 + $0x48] sm:$0xf] %vm1128_vm1, %v1409_v48  ;;  %v1407_v56 = vpack.c.bf16 %v824_v49, %v824_v49  ;;  %v827_v57 = vmax.f32 %v629_v50, 0.0  ;;  %v621_v58 = vadd.f32 %v1722_v34, %v620_v55  ;;  %v859_v61 = vmax.f32 %v757_v54, 0.0 }
  0xfc   : > { %1179 = vst.msk [vmem:[%s1732_s27 + $0xc8] sm:$0xf] %vm1128_vm1, %v1441_v52  ;;  %v1439_v60 = vpack.c.bf16 %v856_v53, %v856_v53  ;;  %v749_v62 = vadd.f32 %v1722_v34, %v748_v59  ;;  %v1515_v63 = vpop.f32.mrf.mxu0  ;;  %v1547_v3 = vpop.f32.mrf.mxu1 }
  0xfd   : > { %1145 = vst.msk [vmem:[%s1732_s27 + $0x40] sm:$0xf] %vm1128_vm1, %v1407_v56  ;;  %v1410_v0 = vpack.c.bf16 %v827_v57, %v827_v57  ;;  %v825_v1 = vmax.f32 %v621_v58, 0.0  ;;  %v642_v2 = vadd.f32 %v1515_v63, %v1722_v34  ;;  %v1442_v4 = vpack.c.bf16 %v859_v61, %v859_v61 }
  0xfe   : > { %1177 = vst.msk [vmem:[%s1732_s27 + $0xc0] sm:$0xf] %vm1128_vm1, %v1439_v60  ;;  %v857_v5 = vmax.f32 %v749_v62, 0.0  ;;  %v770_v6 = vadd.f32 %v1547_v3, %v1722_v34  ;;  %v633_v7 = vpop.f32.mrf.mxu0  ;;  %v761_v11 = vpop.f32.mrf.mxu1 }
  0xff   : > { %1148 = vst.msk [vmem:[%s1732_s27 + $0x4c] sm:$0xf] %vm1128_vm1, %v1410_v0  ;;  %v1408_v8 = vpack.c.bf16 %v825_v1, %v825_v1  ;;  %v830_v9 = vmax.f32 %v642_v2, 0.0  ;;  %v634_v10 = vadd.f32 %v1722_v34, %v633_v7  ;;  %1180 = vst.msk [vmem:[%s1732_s27 + $0xcc] sm:$0xf] %vm1128_vm1, %v1442_v4  ;;  %v762_v14 = vadd.f32 %v1722_v34, %v761_v11 }
 0x100   : > { %v1440_v12 = vpack.c.bf16 %v857_v5, %v857_v5  ;;  %v862_v13 = vmax.f32 %v770_v6, 0.0  ;;  %v1516_v15 = vpop.f32.mrf.mxu0  ;;  %v1548_v19 = vpop.f32.mrf.mxu1 }
 0x101   : > { %1146 = vst.msk [vmem:[%s1732_s27 + $0x44] sm:$0xf] %vm1128_vm1, %v1408_v8  ;;  %v1413_v16 = vpack.c.bf16 %v830_v9, %v830_v9  ;;  %v828_v17 = vmax.f32 %v634_v10, 0.0  ;;  %v645_v18 = vadd.f32 %v1516_v15, %v1722_v34  ;;  %v860_v21 = vmax.f32 %v762_v14, 0.0 }
 0x102   : > { %1178 = vst.msk [vmem:[%s1732_s27 + $0xc4] sm:$0xf] %vm1128_vm1, %v1440_v12  ;;  %v1445_v20 = vpack.c.bf16 %v862_v13, %v862_v13  ;;  %v773_v22 = vadd.f32 %v1548_v19, %v1722_v34  ;;  %v636_v23 = vpop.f32.mrf.mxu0  ;;  %v764_v27 = vpop.f32.mrf.mxu1 }
 0x103   : > { %1151 = vst.msk [vmem:[%s1732_s27 + $0x58] sm:$0xf] %vm1128_vm1, %v1413_v16  ;;  %v1411_v24 = vpack.c.bf16 %v828_v17, %v828_v17  ;;  %v831_v25 = vmax.f32 %v645_v18, 0.0  ;;  %v637_v26 = vadd.f32 %v1722_v34, %v636_v23  ;;  %v1443_v28 = vpack.c.bf16 %v860_v21, %v860_v21 }
 0x104   : > { %1183 = vst.msk [vmem:[%s1732_s27 + $0xd8] sm:$0xf] %vm1128_vm1, %v1445_v20  ;;  %v863_v29 = vmax.f32 %v773_v22, 0.0  ;;  %v765_v30 = vadd.f32 %v1722_v34, %v764_v27  ;;  %v1519_v31 = vpop.f32.mrf.mxu0  ;;  %v1551_v36 = vpop.f32.mrf.mxu1 }
 0x105   : > { %1149 = vst.msk [vmem:[%s1732_s27 + $0x50] sm:$0xf] %vm1128_vm1, %v1411_v24  ;;  %v1414_v32 = vpack.c.bf16 %v831_v25, %v831_v25  ;;  %v829_v33 = vmax.f32 %v637_v26, 0.0  ;;  %v658_v35 = vadd.f32 %v1519_v31, %v1722_v34  ;;  %1181 = vst.msk [vmem:[%s1732_s27 + $0xd0] sm:$0xf] %vm1128_vm1, %v1443_v28  ;;  %v786_v39 = vadd.f32 %v1551_v36, %v1722_v34 }
 0x106   : > { %v1446_v37 = vpack.c.bf16 %v863_v29, %v863_v29  ;;  %v861_v38 = vmax.f32 %v765_v30, 0.0  ;;  %v649_v40 = vpop.f32.mrf.mxu0  ;;  %v777_v44 = vpop.f32.mrf.mxu1 }
 0x107   : > { %1152 = vst.msk [vmem:[%s1732_s27 + $0x5c] sm:$0xf] %vm1128_vm1, %v1414_v32  ;;  %v1412_v41 = vpack.c.bf16 %v829_v33, %v829_v33  ;;  %v834_v42 = vmax.f32 %v658_v35, 0.0  ;;  %v650_v43 = vadd.f32 %v1722_v34, %v649_v40  ;;  %v866_v46 = vmax.f32 %v786_v39, 0.0 }
 0x108   : > { %1184 = vst.msk [vmem:[%s1732_s27 + $0xdc] sm:$0xf] %vm1128_vm1, %v1446_v37  ;;  %v1444_v45 = vpack.c.bf16 %v861_v38, %v861_v38  ;;  %v778_v47 = vadd.f32 %v1722_v34, %v777_v44  ;;  %v1520_v48 = vpop.f32.mrf.mxu0  ;;  %v1552_v52 = vpop.f32.mrf.mxu1 }
 0x109   : > { %1150 = vst.msk [vmem:[%s1732_s27 + $0x54] sm:$0xf] %vm1128_vm1, %v1412_v41  ;;  %v1417_v49 = vpack.c.bf16 %v834_v42, %v834_v42  ;;  %v832_v50 = vmax.f32 %v650_v43, 0.0  ;;  %v661_v51 = vadd.f32 %v1520_v48, %v1722_v34  ;;  %v1449_v53 = vpack.c.bf16 %v866_v46, %v866_v46 }
 0x10a   : > { %1182 = vst.msk [vmem:[%s1732_s27 + $0xd4] sm:$0xf] %vm1128_vm1, %v1444_v45  ;;  %v864_v54 = vmax.f32 %v778_v47, 0.0  ;;  %v789_v55 = vadd.f32 %v1552_v52, %v1722_v34  ;;  %v652_v56 = vpop.f32.mrf.mxu0  ;;  %v780_v60 = vpop.f32.mrf.mxu1 }
 0x10b   : > { %1155 = vst.msk [vmem:[%s1732_s27 + $0x68] sm:$0xf] %vm1128_vm1, %v1417_v49  ;;  %v1415_v57 = vpack.c.bf16 %v832_v50, %v832_v50  ;;  %v835_v58 = vmax.f32 %v661_v51, 0.0  ;;  %v653_v59 = vadd.f32 %v1722_v34, %v652_v56  ;;  %1187 = vst.msk [vmem:[%s1732_s27 + $0xe8] sm:$0xf] %vm1128_vm1, %v1449_v53  ;;  %v781_v63 = vadd.f32 %v1722_v34, %v780_v60 }
 0x10c   : > { %v1447_v61 = vpack.c.bf16 %v864_v54, %v864_v54  ;;  %v867_v62 = vmax.f32 %v789_v55, 0.0  ;;  %v1523_v0 = vpop.f32.mrf.mxu0  ;;  %v1555_v4 = vpop.f32.mrf.mxu1 }
 0x10d   : > { %1153 = vst.msk [vmem:[%s1732_s27 + $0x60] sm:$0xf] %vm1128_vm1, %v1415_v57  ;;  %v1418_v1 = vpack.c.bf16 %v835_v58, %v835_v58  ;;  %v833_v2 = vmax.f32 %v653_v59, 0.0  ;;  %v674_v3 = vadd.f32 %v1523_v0, %v1722_v34  ;;  %v865_v6 = vmax.f32 %v781_v63, 0.0 }
 0x10e   : > { %1185 = vst.msk [vmem:[%s1732_s27 + $0xe0] sm:$0xf] %vm1128_vm1, %v1447_v61  ;;  %v1450_v5 = vpack.c.bf16 %v867_v62, %v867_v62  ;;  %v802_v7 = vadd.f32 %v1555_v4, %v1722_v34  ;;  %v665_v8 = vpop.f32.mrf.mxu0  ;;  %v793_v12 = vpop.f32.mrf.mxu1 }
 0x10f   : > { %1156 = vst.msk [vmem:[%s1732_s27 + $0x6c] sm:$0xf] %vm1128_vm1, %v1418_v1  ;;  %v1416_v9 = vpack.c.bf16 %v833_v2, %v833_v2  ;;  %v838_v10 = vmax.f32 %v674_v3, 0.0  ;;  %v666_v11 = vadd.f32 %v1722_v34, %v665_v8  ;;  %v1448_v13 = vpack.c.bf16 %v865_v6, %v865_v6 }
 0x110   : > { %1188 = vst.msk [vmem:[%s1732_s27 + $0xec] sm:$0xf] %vm1128_vm1, %v1450_v5  ;;  %v870_v14 = vmax.f32 %v802_v7, 0.0  ;;  %v794_v15 = vadd.f32 %v1722_v34, %v793_v12  ;;  %v1524_v16 = vpop.f32.mrf.mxu0  ;;  %v1556_v20 = vpop.f32.mrf.mxu1 }
 0x111   : > { %1154 = vst.msk [vmem:[%s1732_s27 + $0x64] sm:$0xf] %vm1128_vm1, %v1416_v9  ;;  %v1421_v17 = vpack.c.bf16 %v838_v10, %v838_v10  ;;  %v836_v18 = vmax.f32 %v666_v11, 0.0  ;;  %v677_v19 = vadd.f32 %v1524_v16, %v1722_v34  ;;  %1186 = vst.msk [vmem:[%s1732_s27 + $0xe4] sm:$0xf] %vm1128_vm1, %v1448_v13  ;;  %v805_v23 = vadd.f32 %v1556_v20, %v1722_v34 }
 0x112   : > { %v1453_v21 = vpack.c.bf16 %v870_v14, %v870_v14  ;;  %v868_v22 = vmax.f32 %v794_v15, 0.0  ;;  %v668_v24 = vpop.f32.mrf.mxu0  ;;  %v796_v28 = vpop.f32.mrf.mxu1 }
 0x113   : > { %1159 = vst.msk [vmem:[%s1732_s27 + $0x78] sm:$0xf] %vm1128_vm1, %v1421_v17  ;;  %v1419_v25 = vpack.c.bf16 %v836_v18, %v836_v18  ;;  %v839_v26 = vmax.f32 %v677_v19, 0.0  ;;  %v669_v27 = vadd.f32 %v1722_v34, %v668_v24  ;;  %v871_v30 = vmax.f32 %v805_v23, 0.0 }
 0x114   : > { %1191 = vst.msk [vmem:[%s1732_s27 + $0xf8] sm:$0xf] %vm1128_vm1, %v1453_v21  ;;  %v1451_v29 = vpack.c.bf16 %v868_v22, %v868_v22  ;;  %v797_v31 = vadd.f32 %v1722_v34, %v796_v28 }
 0x115   : > { %1157 = vst.msk [vmem:[%s1732_s27 + $0x70] sm:$0xf] %vm1128_vm1, %v1419_v25  ;;  %v1422_v32 = vpack.c.bf16 %v839_v26, %v839_v26  ;;  %v837_v33 = vmax.f32 %v669_v27, 0.0  ;;  %v1454_v35 = vpack.c.bf16 %v871_v30, %v871_v30 }
 0x116   : > { %1189 = vst.msk [vmem:[%s1732_s27 + $0xf0] sm:$0xf] %vm1128_vm1, %v1451_v29  ;;  %v869_v36 = vmax.f32 %v797_v31, 0.0 }
 0x117   : > { %1160 = vst.msk [vmem:[%s1732_s27 + $0x7c] sm:$0xf] %vm1128_vm1, %v1422_v32  ;;  %v1420_v37 = vpack.c.bf16 %v837_v33, %v837_v33  ;;  %1192 = vst.msk [vmem:[%s1732_s27 + $0xfc] sm:$0xf] %vm1128_vm1, %v1454_v35 }
 0x118   : > { %v1452_v38 = vpack.c.bf16 %v869_v36, %v869_v36 }
 0x119   : > { %1158 = vst.msk [vmem:[%s1732_s27 + $0x74] sm:$0xf] %vm1128_vm1, %v1420_v37 }
 0x11a   : > { %1190 = vst.msk [vmem:[%s1732_s27 + $0xf4] sm:$0xf] %vm1128_vm1, %v1452_v38 }
 0x11b PF: > { %s13_s12 = sadd.s32 1, %s1609_s12  }
 0x11c   : > { %p10_p4 = scmp.ge.s32.totalorder %s13_s12, 6  }
 0x11e   :  { %12 = sbr.rel (!%p10_p4) target bundleno = 1 (0x1), region = 62 }

// kernel: base_net_forward.33
= control target key start
LH: loop header
LB: loop body
LE: loop exit
PB: predicated region body
PF: predicated region fallthrough
CT: control target
= control target key end

     0   :  { %s1844_s12 = smov 0   ;;  %s2189_s0 = inlined_call_operand.vmem [shape: bf16[2048,144], index: 0, kind: input, shape index: {}]   ;;  %s2190_s1 = inlined_call_operand.vmem [shape: bf16[144,16], index: 1, kind: input, shape index: {}]   ;;  %s2191_s2 = inlined_call_operand.vmem [shape: f32[1,16], index: 2, kind: input, shape index: {}]   ;;  %s2192_s3 = inlined_call_operand.vmem [shape: bf16[2048,16], index: 3, kind: output, shape index: {}]  }
   0x1 LB: > { %s1436_s13 = sadd.s32 4294967295, %s1821_s12   ;;  %p1440_p0 = scmp.ge.s32.totalorder %s1821_s12, 1  ;;  %s1821_s12 = sphi %s1844_s12, %s13_s12  }
   0x2   : > { %p139_p1 = scmp.lt.s32.totalorder %s1821_s12, 5 }
   0x4   : > { %p140_p2 = pnand %p1440_p0, %p139_p1 }
   0x5   : > { %s1441_s16 = sshll.u32 (!%p140_p2), %s1436_s13, 6 }
   0x6   : > { %143 = sbr.rel (%p140_p2) target bundleno = 372 (0x174), region = 32  ;;  %p165_p3 = scmp.lt.s32.totalorder (!%p140_p2), %s1441_s16, 255 }
   0xb   : > { %v1710_v0 = vld [vmem:[%s2190_s1 + $0x38] sm:$0xff]   ;;  %v1823_v1 = vmov 0   ;;  %v1711_v2 = vld [vmem:[%s2190_s1 + $0x30] sm:$0xff]   ;;  %s2194_s16 = smov (!%p165_p3, %s1441_s16), 255  ;;  %v1712_v3 = vld [vmem:[%s2190_s1 + $0x28] sm:$0xff]   ;;  %vm609_vm0 = vcmask 130048  }
   0xc   : > { %706 = vmatprep.subr.bf16.mxu0 %v1823_v1  ;;  %1683 = vmatprep.subr.bf16.mxu1 %v1823_v1  ;;  %s1618_s21 = sshll.u32 %s2194_s16, 3  ;;  %v1713_v4 = vld [vmem:[%s2190_s1 + $0x20] sm:$0xff]   ;;  %v1714_v7 = vld [vmem:[%s2190_s1 + $0x18] sm:$0xff]   ;;  %v1715_v8 = vld [vmem:[%s2190_s1 + $0x10] sm:$0xff]   ;;  %s1445_s13 = sshll.u32 %s2194_s16, 2  ;;  %vm1315_vm1 = vcmask 125952  }
   0xd   : > { %707 = vmatpush1.bf16.msra.mxu0 %v1710_v0  ;;  %1692 = vmatpush1.bf16.msra.mxu1 %v1710_v0  ;;  %s1867_s24 = scalar_lea.vmem %s2189_s0, %s1618_s21  ;;  %v1716_v9 = vld [vmem:[%s2190_s1 + $0x8] sm:$0xff]   ;;  %v1717_v10 = vld [vmem:[%s2190_s1] sm:$0xff]   ;;  %s1994_s17 = scalar_lea.vmem %s2192_s3, %s1445_s13 }
   0xe   : > { %708 = vmatprep.subr.bf16.mxu0 %v1823_v1  ;;  %1684 = vmatprep.subr.bf16.mxu1 %v1823_v1  ;;  %v1721_v5 = vld [vmem:[%s1867_s24 + $0x4] ss:$8 sps:$4 sm:$0xff]   ;;  %v1719_v12 = vld [vmem:[%s1867_s24] ss:$8 sps:$4 sm:$0xff]   ;;  %v1725_v14 = vld [vmem:[%s1867_s24 + $0x14] ss:$8 sps:$4 sm:$0xff]  }
   0xf   : > { %v1724_v6 = vld [vmem:[%s1867_s24 + $0x104] ss:$8 sps:$4 sm:$0xff]   ;;  %1520 = vmatprep.mubr.msk.bf16.mxu0 %vm609_vm0, %v1721_v5  ;;  %v1722_v13 = vld [vmem:[%s1867_s24 + $0x100] ss:$8 sps:$4 sm:$0xff]   ;;  %v1727_v15 = vld [vmem:[%s1867_s24 + $0x114] ss:$8 sps:$4 sm:$0xff]  }
  0x10   : > { %1536 = vmatprep.mubr.msk.bf16.mxu1 %vm609_vm0, %v1724_v6  ;;  %v1718_v11 = vld [vmem:[%s2190_s1 + $0x40] sm:$0xff]   ;;  %v1729_v16 = vld [vmem:[%s1867_s24 + $0x10] ss:$8 sps:$4 sm:$0xff]   ;;  %v1737_v22 = vld [vmem:[%s1867_s24 + $0x34] ss:$8 sps:$4 sm:$0xff]  }
  0x11   : > { %709 = vmatpush1.bf16.msra.mxu0 %v1711_v2  ;;  %1693 = vmatpush1.bf16.msra.mxu1 %v1711_v2  ;;  %v1730_v17 = vld [vmem:[%s1867_s24 + $0x110] ss:$8 sps:$4 sm:$0xff]   ;;  %v1731_v18 = vld [vmem:[%s1867_s24 + $0x24] ss:$8 sps:$4 sm:$0xff]   ;;  %v1735_v20 = vld [vmem:[%s1867_s24 + $0x20] ss:$8 sps:$4 sm:$0xff]  }
  0x12   : > { %710 = vmatprep.subr.bf16.mxu0 %v1823_v1  ;;  %1685 = vmatprep.subr.bf16.mxu1 %v1823_v1  ;;  %v1733_v19 = vld [vmem:[%s1867_s24 + $0x124] ss:$8 sps:$4 sm:$0xff]   ;;  %v1736_v21 = vld [vmem:[%s1867_s24 + $0x120] ss:$8 sps:$4 sm:$0xff]   ;;  %v1739_v23 = vld [vmem:[%s1867_s24 + $0x134] ss:$8 sps:$4 sm:$0xff]  }
  0x13   : > { %v1741_v24 = vld [vmem:[%s1867_s24 + $0x30] ss:$8 sps:$4 sm:$0xff]   ;;  %v1743_v26 = vld [vmem:[%s1867_s24 + $0x44] ss:$8 sps:$4 sm:$0xff]   ;;  %v1747_v28 = vld [vmem:[%s1867_s24 + $0x40] ss:$8 sps:$4 sm:$0xff]  }
  0x14   : > { %v1742_v25 = vld [vmem:[%s1867_s24 + $0x130] ss:$8 sps:$4 sm:$0xff]   ;;  %v1745_v27 = vld [vmem:[%s1867_s24 + $0x144] ss:$8 sps:$4 sm:$0xff]   ;;  %v1748_v29 = vld [vmem:[%s1867_s24 + $0x140] ss:$8 sps:$4 sm:$0xff]  }
  0x15   : > { %711 = vmatpush1.bf16.msra.mxu0 %v1712_v3  ;;  %1694 = vmatpush1.bf16.msra.mxu1 %v1712_v3  ;;  %v1749_v30 = vld [vmem:[%s1867_s24 + $0x54] ss:$8 sps:$4 sm:$0xff]   ;;  %v1753_v32 = vld [vmem:[%s1867_s24 + $0x50] ss:$8 sps:$4 sm:$0xff]   ;;  %v1755_v34 = vld [vmem:[%s1867_s24 + $0x64] ss:$8 sps:$4 sm:$0xff]  }
  0x16   : > { %712 = vmatprep.subr.bf16.mxu0 %v1823_v1  ;;  %1686 = vmatprep.subr.bf16.mxu1 %v1823_v1  ;;  %v1751_v31 = vld [vmem:[%s1867_s24 + $0x154] ss:$8 sps:$4 sm:$0xff]   ;;  %v1754_v33 = vld [vmem:[%s1867_s24 + $0x150] ss:$8 sps:$4 sm:$0xff]   ;;  %v1757_v35 = vld [vmem:[%s1867_s24 + $0x164] ss:$8 sps:$4 sm:$0xff]  }
  0x17   : > { %v1759_v36 = vld [vmem:[%s1867_s24 + $0x60] ss:$8 sps:$4 sm:$0xff]   ;;  %v1761_v38 = vld [vmem:[%s1867_s24 + $0x74] ss:$8 sps:$4 sm:$0xff]   ;;  %v1765_v40 = vld [vmem:[%s1867_s24 + $0x70] ss:$8 sps:$4 sm:$0xff]  }
  0x18   : > { %v1760_v37 = vld [vmem:[%s1867_s24 + $0x160] ss:$8 sps:$4 sm:$0xff]   ;;  %v1763_v39 = vld [vmem:[%s1867_s24 + $0x174] ss:$8 sps:$4 sm:$0xff]   ;;  %v1766_v41 = vld [vmem:[%s1867_s24 + $0x170] ss:$8 sps:$4 sm:$0xff]  }
  0x19   : > { %713 = vmatpush1.bf16.msra.mxu0 %v1713_v4  ;;  %1695 = vmatpush1.bf16.msra.mxu1 %v1713_v4  ;;  %v1767_v42 = vld [vmem:[%s1867_s24 + $0x84] ss:$8 sps:$4 sm:$0xff]   ;;  %v1771_v44 = vld [vmem:[%s1867_s24 + $0x80] ss:$8 sps:$4 sm:$0xff]   ;;  %v1773_v46 = vld [vmem:[%s1867_s24 + $0x94] ss:$8 sps:$4 sm:$0xff]  }
  0x1a   : > { %714 = vmatprep.subr.bf16.mxu0 %v1823_v1  ;;  %1687 = vmatprep.subr.bf16.mxu1 %v1823_v1  ;;  %v1769_v43 = vld [vmem:[%s1867_s24 + $0x184] ss:$8 sps:$4 sm:$0xff]   ;;  %v1772_v45 = vld [vmem:[%s1867_s24 + $0x180] ss:$8 sps:$4 sm:$0xff]   ;;  %v1775_v47 = vld [vmem:[%s1867_s24 + $0x194] ss:$8 sps:$4 sm:$0xff]  }
  0x1b   : > { %v1777_v48 = vld [vmem:[%s1867_s24 + $0x90] ss:$8 sps:$4 sm:$0xff]   ;;  %v1779_v50 = vld [vmem:[%s1867_s24 + $0xa4] ss:$8 sps:$4 sm:$0xff]   ;;  %v1783_v52 = vld [vmem:[%s1867_s24 + $0xa0] ss:$8 sps:$4 sm:$0xff]  }
  0x1c   : > { %v1778_v49 = vld [vmem:[%s1867_s24 + $0x190] ss:$8 sps:$4 sm:$0xff]   ;;  %v1781_v51 = vld [vmem:[%s1867_s24 + $0x1a4] ss:$8 sps:$4 sm:$0xff]   ;;  %v1784_v53 = vld [vmem:[%s1867_s24 + $0x1a0] ss:$8 sps:$4 sm:$0xff]  }
  0x1d   : > { %715 = vmatpush1.bf16.msra.mxu0 %v1714_v7  ;;  %1696 = vmatpush1.bf16.msra.mxu1 %v1714_v7  ;;  %v1785_v54 = vld [vmem:[%s1867_s24 + $0xb4] ss:$8 sps:$4 sm:$0xff]   ;;  %v1789_v56 = vld [vmem:[%s1867_s24 + $0xb0] ss:$8 sps:$4 sm:$0xff]   ;;  %v1791_v58 = vld [vmem:[%s1867_s24 + $0xc4] ss:$8 sps:$4 sm:$0xff]  }
  0x1e   : > { %716 = vmatprep.subr.bf16.mxu0 %v1823_v1  ;;  %1688 = vmatprep.subr.bf16.mxu1 %v1823_v1  ;;  %v1787_v55 = vld [vmem:[%s1867_s24 + $0x1b4] ss:$8 sps:$4 sm:$0xff]   ;;  %v1790_v57 = vld [vmem:[%s1867_s24 + $0x1b0] ss:$8 sps:$4 sm:$0xff]   ;;  %v1793_v59 = vld [vmem:[%s1867_s24 + $0x1c4] ss:$8 sps:$4 sm:$0xff]  }
  0x1f   : > { %v1795_v60 = vld [vmem:[%s1867_s24 + $0xc0] ss:$8 sps:$4 sm:$0xff]   ;;  %v1797_v62 = vld [vmem:[%s1867_s24 + $0xd4] ss:$8 sps:$4 sm:$0xff]   ;;  %v1801_v0 = vld [vmem:[%s1867_s24 + $0xd0] ss:$8 sps:$4 sm:$0xff]  }
  0x20   : > { %v1796_v61 = vld [vmem:[%s1867_s24 + $0x1c0] ss:$8 sps:$4 sm:$0xff]   ;;  %v1799_v63 = vld [vmem:[%s1867_s24 + $0x1d4] ss:$8 sps:$4 sm:$0xff]   ;;  %v1803_v2 = vld [vmem:[%s1867_s24 + $0xe4] ss:$8 sps:$4 sm:$0xff]  }
  0x21   : > { %717 = vmatpush1.bf16.msra.mxu0 %v1715_v8  ;;  %1697 = vmatpush1.bf16.msra.mxu1 %v1715_v8  ;;  %v1805_v3 = vld [vmem:[%s1867_s24 + $0x1e4] ss:$8 sps:$4 sm:$0xff]   ;;  %v1807_v4 = vld [vmem:[%s1867_s24 + $0xe0] ss:$8 sps:$4 sm:$0xff]   ;;  %v1809_v6 = vld [vmem:[%s1867_s24 + $0xf4] ss:$8 sps:$4 sm:$0xff]  }
  0x22   : > { %718 = vmatprep.subr.bf16.mxu0 %v1823_v1  ;;  %1689 = vmatprep.subr.bf16.mxu1 %v1823_v1  ;;  %v1808_v5 = vld [vmem:[%s1867_s24 + $0x1e0] ss:$8 sps:$4 sm:$0xff]   ;;  %v1811_v7 = vld [vmem:[%s1867_s24 + $0x1f4] ss:$8 sps:$4 sm:$0xff]   ;;  %v1813_v8 = vld [vmem:[%s1867_s24 + $0xf0] ss:$8 sps:$4 sm:$0xff]  }
  0x25   : > { %719 = vmatpush1.bf16.msra.mxu0 %v1716_v9  ;;  %1698 = vmatpush1.bf16.msra.mxu1 %v1716_v9  ;;  %v1814_v9 = vld [vmem:[%s1867_s24 + $0x1f0] ss:$8 sps:$4 sm:$0xff]  }
  0x26   : > { %720 = vmatprep.subr.bf16.mxu0 %v1823_v1  ;;  %1690 = vmatprep.subr.bf16.mxu1 %v1823_v1 }
  0x29   : > { %721 = vmatpush1.bf16.msra.mxu0 %v1717_v10  ;;  %1699 = vmatpush1.bf16.msra.mxu1 %v1717_v10  ;;  %v1986_v10 = vld [vmem:[%s2191_s2] ss:$0 sm:$0xff] }
  0x2a   : > { %736 = vmatprep.subr.bf16.mxu0 %v1823_v1  ;;  %1691 = vmatprep.subr.bf16.mxu1 %v1823_v1  ;;  %v1802_v1 = vld [vmem:[%s1867_s24 + $0x1d0] ss:$8 sps:$4 sm:$0xff]  }
  0x2d   : > { %737 = vmatpush2.bf16.msra.mxu0 %v1718_v11  ;;  %1700 = vmatpush2.bf16.msra.mxu1 %v1718_v11 }
  0x30   : > { %739 = vmatmul.mubr.bf16.vlgmr.msra.gmra.mxu0 %v1719_v12  ;;  %867 = vmatmul.mubr.bf16.vlgmr.msra.gmra.mxu1 %v1722_v13 }
  0x31   : > { %1521 = vmatprep.mubr.msk.bf16.mxu0 %vm609_vm0, %v1725_v14  ;;  %1537 = vmatprep.mubr.msk.bf16.mxu1 %vm609_vm0, %v1727_v15 }
  0x38   : > { %747 = vmatmul.mubr.bf16.gmra.mxu0 %v1729_v16  ;;  %875 = vmatmul.mubr.bf16.gmra.mxu1 %v1730_v17 }
  0x39   : > { %1522 = vmatprep.mubr.msk.bf16.mxu0 %vm609_vm0, %v1731_v18  ;;  %1538 = vmatprep.mubr.msk.bf16.mxu1 %vm609_vm0, %v1733_v19 }
  0x40   : > { %755 = vmatmul.mubr.bf16.gmra.mxu0 %v1735_v20  ;;  %883 = vmatmul.mubr.bf16.gmra.mxu1 %v1736_v21 }
  0x41   : > { %1523 = vmatprep.mubr.msk.bf16.mxu0 %vm609_vm0, %v1737_v22  ;;  %1539 = vmatprep.mubr.msk.bf16.mxu1 %vm609_vm0, %v1739_v23 }
  0x48   : > { %763 = vmatmul.mubr.bf16.gmra.mxu0 %v1741_v24  ;;  %891 = vmatmul.mubr.bf16.gmra.mxu1 %v1742_v25 }
  0x49   : > { %1524 = vmatprep.mubr.msk.bf16.mxu0 %vm609_vm0, %v1743_v26  ;;  %1540 = vmatprep.mubr.msk.bf16.mxu1 %vm609_vm0, %v1745_v27 }
  0x50   : > { %771 = vmatmul.mubr.bf16.gmra.mxu0 %v1747_v28  ;;  %899 = vmatmul.mubr.bf16.gmra.mxu1 %v1748_v29 }
  0x51   : > { %1525 = vmatprep.mubr.msk.bf16.mxu0 %vm609_vm0, %v1749_v30  ;;  %1541 = vmatprep.mubr.msk.bf16.mxu1 %vm609_vm0, %v1751_v31 }
  0x58   : > { %779 = vmatmul.mubr.bf16.gmra.mxu0 %v1753_v32  ;;  %907 = vmatmul.mubr.bf16.gmra.mxu1 %v1754_v33 }
  0x59   : > { %1526 = vmatprep.mubr.msk.bf16.mxu0 %vm609_vm0, %v1755_v34  ;;  %1542 = vmatprep.mubr.msk.bf16.mxu1 %vm609_vm0, %v1757_v35 }
  0x60   : > { %787 = vmatmul.mubr.bf16.gmra.mxu0 %v1759_v36  ;;  %915 = vmatmul.mubr.bf16.gmra.mxu1 %v1760_v37 }
  0x61   : > { %1527 = vmatprep.mubr.msk.bf16.mxu0 %vm609_vm0, %v1761_v38  ;;  %1543 = vmatprep.mubr.msk.bf16.mxu1 %vm609_vm0, %v1763_v39 }
  0x68   : > { %795 = vmatmul.mubr.bf16.gmra.mxu0 %v1765_v40  ;;  %923 = vmatmul.mubr.bf16.gmra.mxu1 %v1766_v41 }
  0x69   : > { %1528 = vmatprep.mubr.msk.bf16.mxu0 %vm609_vm0, %v1767_v42  ;;  %1544 = vmatprep.mubr.msk.bf16.mxu1 %vm609_vm0, %v1769_v43 }
  0x70   : > { %803 = vmatmul.mubr.bf16.gmra.mxu0 %v1771_v44  ;;  %931 = vmatmul.mubr.bf16.gmra.mxu1 %v1772_v45 }
  0x71   : > { %1529 = vmatprep.mubr.msk.bf16.mxu0 %vm609_vm0, %v1773_v46  ;;  %1545 = vmatprep.mubr.msk.bf16.mxu1 %vm609_vm0, %v1775_v47 }
  0x78   : > { %811 = vmatmul.mubr.bf16.gmra.mxu0 %v1777_v48  ;;  %939 = vmatmul.mubr.bf16.gmra.mxu1 %v1778_v49 }
  0x79   : > { %1530 = vmatprep.mubr.msk.bf16.mxu0 %vm609_vm0, %v1779_v50  ;;  %1546 = vmatprep.mubr.msk.bf16.mxu1 %vm609_vm0, %v1781_v51 }
  0x80   : > { %819 = vmatmul.mubr.bf16.gmra.mxu0 %v1783_v52  ;;  %947 = vmatmul.mubr.bf16.gmra.mxu1 %v1784_v53 }
  0x81   : > { %1531 = vmatprep.mubr.msk.bf16.mxu0 %vm609_vm0, %v1785_v54  ;;  %1547 = vmatprep.mubr.msk.bf16.mxu1 %vm609_vm0, %v1787_v55 }
  0x88   : > { %827 = vmatmul.mubr.bf16.gmra.mxu0 %v1789_v56  ;;  %955 = vmatmul.mubr.bf16.gmra.mxu1 %v1790_v57 }
  0x89   : > { %1532 = vmatprep.mubr.msk.bf16.mxu0 %vm609_vm0, %v1791_v58  ;;  %1548 = vmatprep.mubr.msk.bf16.mxu1 %vm609_vm0, %v1793_v59 }
  0x90   : > { %835 = vmatmul.mubr.bf16.gmra.mxu0 %v1795_v60  ;;  %963 = vmatmul.mubr.bf16.gmra.mxu1 %v1796_v61 }
  0x91   : > { %1533 = vmatprep.mubr.msk.bf16.mxu0 %vm609_vm0, %v1797_v62  ;;  %1549 = vmatprep.mubr.msk.bf16.mxu1 %vm609_vm0, %v1799_v63 }
  0x98   : > { %843 = vmatmul.mubr.bf16.gmra.mxu0 %v1801_v0  ;;  %971 = vmatmul.mubr.bf16.gmra.mxu1 %v1802_v1 }
  0x99   : > { %1534 = vmatprep.mubr.msk.bf16.mxu0 %vm609_vm0, %v1803_v2  ;;  %1550 = vmatprep.mubr.msk.bf16.mxu1 %vm609_vm0, %v1805_v3 }
  0xa0   : > { %851 = vmatmul.mubr.bf16.gmra.mxu0 %v1807_v4  ;;  %979 = vmatmul.mubr.bf16.gmra.mxu1 %v1808_v5 }
  0xa1   : > { %1535 = vmatprep.mubr.msk.bf16.mxu0 %vm609_vm0, %v1809_v6  ;;  %1551 = vmatprep.mubr.msk.bf16.mxu1 %vm609_vm0, %v1811_v7 }
  0xa8   : > { %859 = vmatmul.mubr.bf16.gmra.mxu0 %v1813_v8  ;;  %987 = vmatmul.mubr.bf16.gmra.mxu1 %v1814_v9 }
  0xf0   : > { %v740_v11 = vpop.f32.mrf.mxu0  ;;  %v868_v12 = vpop.f32.mrf.mxu1 }
  0xf1   : > { %v741_v13 = vadd.f32 %v1986_v10, %v740_v11  ;;  %v869_v14 = vadd.f32 %v1986_v10, %v868_v12 }
  0xf2   : > { %v742_v15 = vpop.f32.mrf.mxu0  ;;  %v870_v16 = vpop.f32.mrf.mxu1 }
  0xf3   : > { %v995_v17 = vmax.f32 %v741_v13, 0.0  ;;  %v1027_v18 = vmax.f32 %v869_v14, 0.0 }
  0xf4   : > { %v743_v19 = vpop.f32.mrf.mxu0  ;;  %v871_v20 = vpop.f32.mrf.mxu1 }
  0xf5   : > { %v1619_v21 = vpack.c.bf16 %v995_v17, %v995_v17  ;;  %v1651_v22 = vpack.c.bf16 %v1027_v18, %v1027_v18  ;;  %v744_v23 = vadd.f32 %v1986_v10, %v743_v19  ;;  %v872_v24 = vadd.f32 %v1986_v10, %v871_v20 }
  0xf6   : > { %v745_v25 = vpop.f32.mrf.mxu0  ;;  %v873_v26 = vpop.f32.mrf.mxu1 }
  0xf7   : > { %1316 = vst.msk [vmem:[%s1994_s17] sm:$0xf] %vm1315_vm1, %v1619_v21  ;;  %1348 = vst.msk [vmem:[%s1994_s17 + $0x80] sm:$0xf] %vm1315_vm1, %v1651_v22  ;;  %v996_v27 = vmax.f32 %v744_v23, 0.0  ;;  %v1028_v28 = vmax.f32 %v872_v24, 0.0 }
  0xf8   : > { %v748_v29 = vpop.f32.mrf.mxu0  ;;  %v876_v30 = vpop.f32.mrf.mxu1 }
  0xf9   : > { %v1620_v31 = vpack.c.bf16 %v996_v27, %v996_v27  ;;  %v1652_v32 = vpack.c.bf16 %v1028_v28, %v1028_v28  ;;  %v749_v33 = vadd.f32 %v1986_v10, %v748_v29  ;;  %v877_v34 = vadd.f32 %v1986_v10, %v876_v30 }
  0xfa   : > { %v750_v35 = vpop.f32.mrf.mxu0  ;;  %v878_v36 = vpop.f32.mrf.mxu1 }
  0xfb   : > { %1317 = vst.msk [vmem:[%s1994_s17 + $0x4] sm:$0xf] %vm1315_vm1, %v1620_v31  ;;  %1349 = vst.msk [vmem:[%s1994_s17 + $0x84] sm:$0xf] %vm1315_vm1, %v1652_v32  ;;  %v997_v37 = vmax.f32 %v749_v33, 0.0  ;;  %v1029_v38 = vmax.f32 %v877_v34, 0.0 }
  0xfc   : > { %v751_v39 = vpop.f32.mrf.mxu0  ;;  %v879_v40 = vpop.f32.mrf.mxu1 }
  0xfd   : > { %v1621_v41 = vpack.c.bf16 %v997_v37, %v997_v37  ;;  %v1653_v42 = vpack.c.bf16 %v1029_v38, %v1029_v38  ;;  %v752_v43 = vadd.f32 %v1986_v10, %v751_v39  ;;  %v880_v44 = vadd.f32 %v1986_v10, %v879_v40 }
  0xfe   : > { %v753_v45 = vpop.f32.mrf.mxu0  ;;  %v881_v46 = vpop.f32.mrf.mxu1 }
  0xff   : > { %1318 = vst.msk [vmem:[%s1994_s17 + $0x8] sm:$0xf] %vm1315_vm1, %v1621_v41  ;;  %1350 = vst.msk [vmem:[%s1994_s17 + $0x88] sm:$0xf] %vm1315_vm1, %v1653_v42  ;;  %v998_v47 = vmax.f32 %v752_v43, 0.0  ;;  %v1030_v48 = vmax.f32 %v880_v44, 0.0 }
 0x100   : > { %v756_v49 = vpop.f32.mrf.mxu0  ;;  %v884_v50 = vpop.f32.mrf.mxu1 }
 0x101   : > { %v1622_v51 = vpack.c.bf16 %v998_v47, %v998_v47  ;;  %v1654_v52 = vpack.c.bf16 %v1030_v48, %v1030_v48  ;;  %v757_v53 = vadd.f32 %v1986_v10, %v756_v49  ;;  %v885_v54 = vadd.f32 %v1986_v10, %v884_v50 }
 0x102   : > { %v758_v55 = vpop.f32.mrf.mxu0  ;;  %v886_v56 = vpop.f32.mrf.mxu1 }
 0x103   : > { %1319 = vst.msk [vmem:[%s1994_s17 + $0xc] sm:$0xf] %vm1315_vm1, %v1622_v51  ;;  %1351 = vst.msk [vmem:[%s1994_s17 + $0x8c] sm:$0xf] %vm1315_vm1, %v1654_v52  ;;  %v999_v57 = vmax.f32 %v757_v53, 0.0  ;;  %v1031_v58 = vmax.f32 %v885_v54, 0.0 }
 0x104   : > { %v759_v59 = vpop.f32.mrf.mxu0  ;;  %v887_v60 = vpop.f32.mrf.mxu1 }
 0x105   : > { %v1623_v61 = vpack.c.bf16 %v999_v57, %v999_v57  ;;  %v1655_v62 = vpack.c.bf16 %v1031_v58, %v1031_v58  ;;  %v760_v63 = vadd.f32 %v1986_v10, %v759_v59  ;;  %v888_v0 = vadd.f32 %v1986_v10, %v887_v60 }
 0x106   : > { %v761_v1 = vpop.f32.mrf.mxu0  ;;  %v889_v2 = vpop.f32.mrf.mxu1 }
 0x107   : > { %1320 = vst.msk [vmem:[%s1994_s17 + $0x10] sm:$0xf] %vm1315_vm1, %v1623_v61  ;;  %1352 = vst.msk [vmem:[%s1994_s17 + $0x90] sm:$0xf] %vm1315_vm1, %v1655_v62  ;;  %v1000_v3 = vmax.f32 %v760_v63, 0.0  ;;  %v1032_v4 = vmax.f32 %v888_v0, 0.0 }
 0x108   : > { %v764_v5 = vpop.f32.mrf.mxu0  ;;  %v892_v6 = vpop.f32.mrf.mxu1 }
 0x109   : > { %v1624_v7 = vpack.c.bf16 %v1000_v3, %v1000_v3  ;;  %v1656_v8 = vpack.c.bf16 %v1032_v4, %v1032_v4  ;;  %v765_v9 = vadd.f32 %v1986_v10, %v764_v5  ;;  %v893_v11 = vadd.f32 %v1986_v10, %v892_v6 }
 0x10a   : > { %v766_v12 = vpop.f32.mrf.mxu0  ;;  %v894_v13 = vpop.f32.mrf.mxu1 }
 0x10b   : > { %1321 = vst.msk [vmem:[%s1994_s17 + $0x14] sm:$0xf] %vm1315_vm1, %v1624_v7  ;;  %1353 = vst.msk [vmem:[%s1994_s17 + $0x94] sm:$0xf] %vm1315_vm1, %v1656_v8  ;;  %v1001_v14 = vmax.f32 %v765_v9, 0.0  ;;  %v1033_v15 = vmax.f32 %v893_v11, 0.0 }
 0x10c   : > { %v767_v16 = vpop.f32.mrf.mxu0  ;;  %v895_v17 = vpop.f32.mrf.mxu1 }
 0x10d   : > { %v1625_v18 = vpack.c.bf16 %v1001_v14, %v1001_v14  ;;  %v1657_v19 = vpack.c.bf16 %v1033_v15, %v1033_v15  ;;  %v768_v20 = vadd.f32 %v1986_v10, %v767_v16  ;;  %v896_v21 = vadd.f32 %v1986_v10, %v895_v17 }
 0x10e   : > { %v769_v22 = vpop.f32.mrf.mxu0  ;;  %v897_v23 = vpop.f32.mrf.mxu1 }
 0x10f   : > { %1322 = vst.msk [vmem:[%s1994_s17 + $0x18] sm:$0xf] %vm1315_vm1, %v1625_v18  ;;  %1354 = vst.msk [vmem:[%s1994_s17 + $0x98] sm:$0xf] %vm1315_vm1, %v1657_v19  ;;  %v1002_v24 = vmax.f32 %v768_v20, 0.0  ;;  %v1034_v25 = vmax.f32 %v896_v21, 0.0 }
 0x110   : > { %v772_v26 = vpop.f32.mrf.mxu0  ;;  %v900_v27 = vpop.f32.mrf.mxu1 }
 0x111   : > { %v1626_v28 = vpack.c.bf16 %v1002_v24, %v1002_v24  ;;  %v1658_v29 = vpack.c.bf16 %v1034_v25, %v1034_v25  ;;  %v773_v30 = vadd.f32 %v1986_v10, %v772_v26  ;;  %v901_v31 = vadd.f32 %v1986_v10, %v900_v27 }
 0x112   : > { %v774_v32 = vpop.f32.mrf.mxu0  ;;  %v902_v33 = vpop.f32.mrf.mxu1 }
 0x113   : > { %1323 = vst.msk [vmem:[%s1994_s17 + $0x1c] sm:$0xf] %vm1315_vm1, %v1626_v28  ;;  %1355 = vst.msk [vmem:[%s1994_s17 + $0x9c] sm:$0xf] %vm1315_vm1, %v1658_v29  ;;  %v1003_v34 = vmax.f32 %v773_v30, 0.0  ;;  %v1035_v35 = vmax.f32 %v901_v31, 0.0 }
 0x114   : > { %v775_v36 = vpop.f32.mrf.mxu0  ;;  %v903_v37 = vpop.f32.mrf.mxu1 }
 0x115   : > { %v1627_v38 = vpack.c.bf16 %v1003_v34, %v1003_v34  ;;  %v1659_v39 = vpack.c.bf16 %v1035_v35, %v1035_v35  ;;  %v776_v40 = vadd.f32 %v1986_v10, %v775_v36  ;;  %v904_v41 = vadd.f32 %v1986_v10, %v903_v37 }
 0x116   : > { %v777_v42 = vpop.f32.mrf.mxu0  ;;  %v905_v43 = vpop.f32.mrf.mxu1 }
 0x117   : > { %1324 = vst.msk [vmem:[%s1994_s17 + $0x20] sm:$0xf] %vm1315_vm1, %v1627_v38  ;;  %1356 = vst.msk [vmem:[%s1994_s17 + $0xa0] sm:$0xf] %vm1315_vm1, %v1659_v39  ;;  %v1004_v44 = vmax.f32 %v776_v40, 0.0  ;;  %v1036_v45 = vmax.f32 %v904_v41, 0.0 }
 0x118   : > { %v780_v46 = vpop.f32.mrf.mxu0  ;;  %v908_v47 = vpop.f32.mrf.mxu1 }
 0x119   : > { %v1628_v48 = vpack.c.bf16 %v1004_v44, %v1004_v44  ;;  %v1660_v49 = vpack.c.bf16 %v1036_v45, %v1036_v45  ;;  %v781_v50 = vadd.f32 %v1986_v10, %v780_v46  ;;  %v909_v51 = vadd.f32 %v1986_v10, %v908_v47 }
 0x11a   : > { %v782_v52 = vpop.f32.mrf.mxu0  ;;  %v910_v53 = vpop.f32.mrf.mxu1 }
 0x11b   : > { %1325 = vst.msk [vmem:[%s1994_s17 + $0x24] sm:$0xf] %vm1315_vm1, %v1628_v48  ;;  %1357 = vst.msk [vmem:[%s1994_s17 + $0xa4] sm:$0xf] %vm1315_vm1, %v1660_v49  ;;  %v1005_v54 = vmax.f32 %v781_v50, 0.0  ;;  %v1037_v55 = vmax.f32 %v909_v51, 0.0 }
 0x11c   : > { %v783_v56 = vpop.f32.mrf.mxu0  ;;  %v911_v57 = vpop.f32.mrf.mxu1 }
 0x11d   : > { %v1629_v58 = vpack.c.bf16 %v1005_v54, %v1005_v54  ;;  %v1661_v59 = vpack.c.bf16 %v1037_v55, %v1037_v55  ;;  %v784_v60 = vadd.f32 %v1986_v10, %v783_v56  ;;  %v912_v61 = vadd.f32 %v1986_v10, %v911_v57 }
 0x11e   : > { %v785_v62 = vpop.f32.mrf.mxu0  ;;  %v913_v63 = vpop.f32.mrf.mxu1 }
 0x11f   : > { %1326 = vst.msk [vmem:[%s1994_s17 + $0x28] sm:$0xf] %vm1315_vm1, %v1629_v58  ;;  %1358 = vst.msk [vmem:[%s1994_s17 + $0xa8] sm:$0xf] %vm1315_vm1, %v1661_v59  ;;  %v1006_v0 = vmax.f32 %v784_v60, 0.0  ;;  %v1038_v1 = vmax.f32 %v912_v61, 0.0 }
 0x120   : > { %v788_v2 = vpop.f32.mrf.mxu0  ;;  %v916_v3 = vpop.f32.mrf.mxu1 }
 0x121   : > { %v1630_v4 = vpack.c.bf16 %v1006_v0, %v1006_v0  ;;  %v1662_v5 = vpack.c.bf16 %v1038_v1, %v1038_v1  ;;  %v789_v6 = vadd.f32 %v1986_v10, %v788_v2  ;;  %v917_v7 = vadd.f32 %v1986_v10, %v916_v3 }
 0x122   : > { %v790_v8 = vpop.f32.mrf.mxu0  ;;  %v918_v9 = vpop.f32.mrf.mxu1 }
 0x123   : > { %1327 = vst.msk [vmem:[%s1994_s17 + $0x2c] sm:$0xf] %vm1315_vm1, %v1630_v4  ;;  %1359 = vst.msk [vmem:[%s1994_s17 + $0xac] sm:$0xf] %vm1315_vm1, %v1662_v5  ;;  %v1007_v11 = vmax.f32 %v789_v6, 0.0  ;;  %v1039_v12 = vmax.f32 %v917_v7, 0.0 }
 0x124   : > { %v791_v13 = vpop.f32.mrf.mxu0  ;;  %v919_v14 = vpop.f32.mrf.mxu1 }
 0x125   : > { %v1631_v15 = vpack.c.bf16 %v1007_v11, %v1007_v11  ;;  %v1663_v16 = vpack.c.bf16 %v1039_v12, %v1039_v12  ;;  %v792_v17 = vadd.f32 %v1986_v10, %v791_v13  ;;  %v920_v18 = vadd.f32 %v1986_v10, %v919_v14 }
 0x126   : > { %v793_v19 = vpop.f32.mrf.mxu0  ;;  %v921_v20 = vpop.f32.mrf.mxu1 }
 0x127   : > { %1328 = vst.msk [vmem:[%s1994_s17 + $0x30] sm:$0xf] %vm1315_vm1, %v1631_v15  ;;  %1360 = vst.msk [vmem:[%s1994_s17 + $0xb0] sm:$0xf] %vm1315_vm1, %v1663_v16  ;;  %v1008_v21 = vmax.f32 %v792_v17, 0.0  ;;  %v1040_v22 = vmax.f32 %v920_v18, 0.0 }
 0x128   : > { %v796_v23 = vpop.f32.mrf.mxu0  ;;  %v924_v24 = vpop.f32.mrf.mxu1 }
 0x129   : > { %v1632_v25 = vpack.c.bf16 %v1008_v21, %v1008_v21  ;;  %v1664_v26 = vpack.c.bf16 %v1040_v22, %v1040_v22  ;;  %v797_v27 = vadd.f32 %v1986_v10, %v796_v23  ;;  %v925_v28 = vadd.f32 %v1986_v10, %v924_v24 }
 0x12a   : > { %v798_v29 = vpop.f32.mrf.mxu0  ;;  %v926_v30 = vpop.f32.mrf.mxu1 }
 0x12b   : > { %1329 = vst.msk [vmem:[%s1994_s17 + $0x34] sm:$0xf] %vm1315_vm1, %v1632_v25  ;;  %1361 = vst.msk [vmem:[%s1994_s17 + $0xb4] sm:$0xf] %vm1315_vm1, %v1664_v26  ;;  %v1009_v31 = vmax.f32 %v797_v27, 0.0  ;;  %v1041_v32 = vmax.f32 %v925_v28, 0.0 }
 0x12c   : > { %v799_v33 = vpop.f32.mrf.mxu0  ;;  %v927_v34 = vpop.f32.mrf.mxu1 }
 0x12d   : > { %v1633_v35 = vpack.c.bf16 %v1009_v31, %v1009_v31  ;;  %v1665_v36 = vpack.c.bf16 %v1041_v32, %v1041_v32  ;;  %v800_v37 = vadd.f32 %v1986_v10, %v799_v33  ;;  %v928_v38 = vadd.f32 %v1986_v10, %v927_v34 }
 0x12e   : > { %v801_v39 = vpop.f32.mrf.mxu0  ;;  %v929_v40 = vpop.f32.mrf.mxu1 }
 0x12f   : > { %1330 = vst.msk [vmem:[%s1994_s17 + $0x38] sm:$0xf] %vm1315_vm1, %v1633_v35  ;;  %1362 = vst.msk [vmem:[%s1994_s17 + $0xb8] sm:$0xf] %vm1315_vm1, %v1665_v36  ;;  %v1010_v41 = vmax.f32 %v800_v37, 0.0  ;;  %v1042_v42 = vmax.f32 %v928_v38, 0.0 }
 0x130   : > { %v804_v43 = vpop.f32.mrf.mxu0  ;;  %v932_v44 = vpop.f32.mrf.mxu1 }
 0x131   : > { %v1634_v45 = vpack.c.bf16 %v1010_v41, %v1010_v41  ;;  %v1666_v46 = vpack.c.bf16 %v1042_v42, %v1042_v42  ;;  %v805_v47 = vadd.f32 %v1986_v10, %v804_v43  ;;  %v933_v48 = vadd.f32 %v1986_v10, %v932_v44 }
 0x132   : > { %v806_v49 = vpop.f32.mrf.mxu0  ;;  %v934_v50 = vpop.f32.mrf.mxu1 }
 0x133   : > { %1331 = vst.msk [vmem:[%s1994_s17 + $0x3c] sm:$0xf] %vm1315_vm1, %v1634_v45  ;;  %1363 = vst.msk [vmem:[%s1994_s17 + $0xbc] sm:$0xf] %vm1315_vm1, %v1666_v46  ;;  %v1011_v51 = vmax.f32 %v805_v47, 0.0  ;;  %v1043_v52 = vmax.f32 %v933_v48, 0.0 }
 0x134   : > { %v807_v53 = vpop.f32.mrf.mxu0  ;;  %v935_v54 = vpop.f32.mrf.mxu1 }
 0x135   : > { %v1635_v55 = vpack.c.bf16 %v1011_v51, %v1011_v51  ;;  %v1667_v56 = vpack.c.bf16 %v1043_v52, %v1043_v52  ;;  %v808_v57 = vadd.f32 %v1986_v10, %v807_v53  ;;  %v936_v58 = vadd.f32 %v1986_v10, %v935_v54 }
 0x136   : > { %v809_v59 = vpop.f32.mrf.mxu0  ;;  %v937_v60 = vpop.f32.mrf.mxu1 }
 0x137   : > { %1332 = vst.msk [vmem:[%s1994_s17 + $0x40] sm:$0xf] %vm1315_vm1, %v1635_v55  ;;  %1364 = vst.msk [vmem:[%s1994_s17 + $0xc0] sm:$0xf] %vm1315_vm1, %v1667_v56  ;;  %v1012_v61 = vmax.f32 %v808_v57, 0.0  ;;  %v1044_v62 = vmax.f32 %v936_v58, 0.0 }
 0x138   : > { %v812_v63 = vpop.f32.mrf.mxu0  ;;  %v940_v0 = vpop.f32.mrf.mxu1 }
 0x139   : > { %v1636_v1 = vpack.c.bf16 %v1012_v61, %v1012_v61  ;;  %v1668_v2 = vpack.c.bf16 %v1044_v62, %v1044_v62  ;;  %v813_v3 = vadd.f32 %v1986_v10, %v812_v63  ;;  %v941_v4 = vadd.f32 %v1986_v10, %v940_v0 }
 0x13a   : > { %v814_v5 = vpop.f32.mrf.mxu0  ;;  %v942_v6 = vpop.f32.mrf.mxu1 }
 0x13b   : > { %1333 = vst.msk [vmem:[%s1994_s17 + $0x44] sm:$0xf] %vm1315_vm1, %v1636_v1  ;;  %1365 = vst.msk [vmem:[%s1994_s17 + $0xc4] sm:$0xf] %vm1315_vm1, %v1668_v2  ;;  %v1013_v7 = vmax.f32 %v813_v3, 0.0  ;;  %v1045_v8 = vmax.f32 %v941_v4, 0.0 }
 0x13c   : > { %v815_v9 = vpop.f32.mrf.mxu0  ;;  %v943_v11 = vpop.f32.mrf.mxu1 }
 0x13d   : > { %v1637_v12 = vpack.c.bf16 %v1013_v7, %v1013_v7  ;;  %v1669_v13 = vpack.c.bf16 %v1045_v8, %v1045_v8  ;;  %v816_v14 = vadd.f32 %v1986_v10, %v815_v9  ;;  %v944_v15 = vadd.f32 %v1986_v10, %v943_v11 }
 0x13e   : > { %v817_v16 = vpop.f32.mrf.mxu0  ;;  %v945_v17 = vpop.f32.mrf.mxu1 }
 0x13f   : > { %1334 = vst.msk [vmem:[%s1994_s17 + $0x48] sm:$0xf] %vm1315_vm1, %v1637_v12  ;;  %1366 = vst.msk [vmem:[%s1994_s17 + $0xc8] sm:$0xf] %vm1315_vm1, %v1669_v13  ;;  %v1014_v18 = vmax.f32 %v816_v14, 0.0  ;;  %v1046_v19 = vmax.f32 %v944_v15, 0.0 }
 0x140   : > { %v820_v20 = vpop.f32.mrf.mxu0  ;;  %v948_v21 = vpop.f32.mrf.mxu1 }
 0x141   : > { %v1638_v22 = vpack.c.bf16 %v1014_v18, %v1014_v18  ;;  %v1670_v23 = vpack.c.bf16 %v1046_v19, %v1046_v19  ;;  %v821_v24 = vadd.f32 %v1986_v10, %v820_v20  ;;  %v949_v25 = vadd.f32 %v1986_v10, %v948_v21 }
 0x142   : > { %v822_v26 = vpop.f32.mrf.mxu0  ;;  %v950_v27 = vpop.f32.mrf.mxu1 }
 0x143   : > { %1335 = vst.msk [vmem:[%s1994_s17 + $0x4c] sm:$0xf] %vm1315_vm1, %v1638_v22  ;;  %1367 = vst.msk [vmem:[%s1994_s17 + $0xcc] sm:$0xf] %vm1315_vm1, %v1670_v23  ;;  %v1015_v28 = vmax.f32 %v821_v24, 0.0  ;;  %v1047_v29 = vmax.f32 %v949_v25, 0.0 }
 0x144   : > { %v823_v30 = vpop.f32.mrf.mxu0  ;;  %v951_v31 = vpop.f32.mrf.mxu1 }
 0x145   : > { %v1639_v32 = vpack.c.bf16 %v1015_v28, %v1015_v28  ;;  %v1671_v33 = vpack.c.bf16 %v1047_v29, %v1047_v29  ;;  %v824_v34 = vadd.f32 %v1986_v10, %v823_v30  ;;  %v952_v35 = vadd.f32 %v1986_v10, %v951_v31 }
 0x146   : > { %v825_v36 = vpop.f32.mrf.mxu0  ;;  %v953_v37 = vpop.f32.mrf.mxu1 }
 0x147   : > { %1336 = vst.msk [vmem:[%s1994_s17 + $0x50] sm:$0xf] %vm1315_vm1, %v1639_v32  ;;  %1368 = vst.msk [vmem:[%s1994_s17 + $0xd0] sm:$0xf] %vm1315_vm1, %v1671_v33  ;;  %v1016_v38 = vmax.f32 %v824_v34, 0.0  ;;  %v1048_v39 = vmax.f32 %v952_v35, 0.0 }
 0x148   : > { %v828_v40 = vpop.f32.mrf.mxu0  ;;  %v956_v41 = vpop.f32.mrf.mxu1 }
 0x149   : > { %v1640_v42 = vpack.c.bf16 %v1016_v38, %v1016_v38  ;;  %v1672_v43 = vpack.c.bf16 %v1048_v39, %v1048_v39  ;;  %v829_v44 = vadd.f32 %v1986_v10, %v828_v40  ;;  %v957_v45 = vadd.f32 %v1986_v10, %v956_v41 }
 0x14a   : > { %v830_v46 = vpop.f32.mrf.mxu0  ;;  %v958_v47 = vpop.f32.mrf.mxu1 }
 0x14b   : > { %1337 = vst.msk [vmem:[%s1994_s17 + $0x54] sm:$0xf] %vm1315_vm1, %v1640_v42  ;;  %1369 = vst.msk [vmem:[%s1994_s17 + $0xd4] sm:$0xf] %vm1315_vm1, %v1672_v43  ;;  %v1017_v48 = vmax.f32 %v829_v44, 0.0  ;;  %v1049_v49 = vmax.f32 %v957_v45, 0.0 }
 0x14c   : > { %v831_v50 = vpop.f32.mrf.mxu0  ;;  %v959_v51 = vpop.f32.mrf.mxu1 }
 0x14d   : > { %v1641_v52 = vpack.c.bf16 %v1017_v48, %v1017_v48  ;;  %v1673_v53 = vpack.c.bf16 %v1049_v49, %v1049_v49  ;;  %v832_v54 = vadd.f32 %v1986_v10, %v831_v50  ;;  %v960_v55 = vadd.f32 %v1986_v10, %v959_v51 }
 0x14e   : > { %v833_v56 = vpop.f32.mrf.mxu0  ;;  %v961_v57 = vpop.f32.mrf.mxu1 }
 0x14f   : > { %1338 = vst.msk [vmem:[%s1994_s17 + $0x58] sm:$0xf] %vm1315_vm1, %v1641_v52  ;;  %1370 = vst.msk [vmem:[%s1994_s17 + $0xd8] sm:$0xf] %vm1315_vm1, %v1673_v53  ;;  %v1018_v58 = vmax.f32 %v832_v54, 0.0  ;;  %v1050_v59 = vmax.f32 %v960_v55, 0.0 }
 0x150   : > { %v836_v60 = vpop.f32.mrf.mxu0  ;;  %v964_v61 = vpop.f32.mrf.mxu1 }
 0x151   : > { %v1642_v62 = vpack.c.bf16 %v1018_v58, %v1018_v58  ;;  %v1674_v63 = vpack.c.bf16 %v1050_v59, %v1050_v59  ;;  %v837_v0 = vadd.f32 %v1986_v10, %v836_v60  ;;  %v965_v1 = vadd.f32 %v1986_v10, %v964_v61 }
 0x152   : > { %v838_v2 = vpop.f32.mrf.mxu0  ;;  %v966_v3 = vpop.f32.mrf.mxu1 }
 0x153   : > { %1339 = vst.msk [vmem:[%s1994_s17 + $0x5c] sm:$0xf] %vm1315_vm1, %v1642_v62  ;;  %1371 = vst.msk [vmem:[%s1994_s17 + $0xdc] sm:$0xf] %vm1315_vm1, %v1674_v63  ;;  %v1019_v4 = vmax.f32 %v837_v0, 0.0  ;;  %v1051_v5 = vmax.f32 %v965_v1, 0.0 }
 0x154   : > { %v839_v6 = vpop.f32.mrf.mxu0  ;;  %v967_v7 = vpop.f32.mrf.mxu1 }
 0x155   : > { %v1643_v8 = vpack.c.bf16 %v1019_v4, %v1019_v4  ;;  %v1675_v9 = vpack.c.bf16 %v1051_v5, %v1051_v5  ;;  %v840_v11 = vadd.f32 %v1986_v10, %v839_v6  ;;  %v968_v12 = vadd.f32 %v1986_v10, %v967_v7 }
 0x156   : > { %v841_v13 = vpop.f32.mrf.mxu0  ;;  %v969_v14 = vpop.f32.mrf.mxu1 }
 0x157   : > { %1340 = vst.msk [vmem:[%s1994_s17 + $0x60] sm:$0xf] %vm1315_vm1, %v1643_v8  ;;  %1372 = vst.msk [vmem:[%s1994_s17 + $0xe0] sm:$0xf] %vm1315_vm1, %v1675_v9  ;;  %v1020_v15 = vmax.f32 %v840_v11, 0.0  ;;  %v1052_v16 = vmax.f32 %v968_v12, 0.0 }
 0x158   : > { %v844_v17 = vpop.f32.mrf.mxu0  ;;  %v972_v18 = vpop.f32.mrf.mxu1 }
 0x159   : > { %v1644_v19 = vpack.c.bf16 %v1020_v15, %v1020_v15  ;;  %v1676_v20 = vpack.c.bf16 %v1052_v16, %v1052_v16  ;;  %v845_v21 = vadd.f32 %v1986_v10, %v844_v17  ;;  %v973_v22 = vadd.f32 %v1986_v10, %v972_v18 }
 0x15a   : > { %v846_v23 = vpop.f32.mrf.mxu0  ;;  %v974_v24 = vpop.f32.mrf.mxu1 }
 0x15b   : > { %1341 = vst.msk [vmem:[%s1994_s17 + $0x64] sm:$0xf] %vm1315_vm1, %v1644_v19  ;;  %1373 = vst.msk [vmem:[%s1994_s17 + $0xe4] sm:$0xf] %vm1315_vm1, %v1676_v20  ;;  %v1021_v25 = vmax.f32 %v845_v21, 0.0  ;;  %v1053_v26 = vmax.f32 %v973_v22, 0.0 }
 0x15c   : > { %v847_v27 = vpop.f32.mrf.mxu0  ;;  %v975_v28 = vpop.f32.mrf.mxu1 }
 0x15d   : > { %v1645_v29 = vpack.c.bf16 %v1021_v25, %v1021_v25  ;;  %v1677_v30 = vpack.c.bf16 %v1053_v26, %v1053_v26  ;;  %v848_v31 = vadd.f32 %v1986_v10, %v847_v27  ;;  %v976_v32 = vadd.f32 %v1986_v10, %v975_v28 }
 0x15e   : > { %v849_v33 = vpop.f32.mrf.mxu0  ;;  %v977_v34 = vpop.f32.mrf.mxu1 }
 0x15f   : > { %1342 = vst.msk [vmem:[%s1994_s17 + $0x68] sm:$0xf] %vm1315_vm1, %v1645_v29  ;;  %1374 = vst.msk [vmem:[%s1994_s17 + $0xe8] sm:$0xf] %vm1315_vm1, %v1677_v30  ;;  %v1022_v35 = vmax.f32 %v848_v31, 0.0  ;;  %v1054_v36 = vmax.f32 %v976_v32, 0.0 }
 0x160   : > { %v852_v37 = vpop.f32.mrf.mxu0  ;;  %v980_v38 = vpop.f32.mrf.mxu1 }
 0x161   : > { %v1646_v39 = vpack.c.bf16 %v1022_v35, %v1022_v35  ;;  %v1678_v40 = vpack.c.bf16 %v1054_v36, %v1054_v36  ;;  %v853_v41 = vadd.f32 %v1986_v10, %v852_v37  ;;  %v981_v42 = vadd.f32 %v1986_v10, %v980_v38 }
 0x162   : > { %v854_v43 = vpop.f32.mrf.mxu0  ;;  %v982_v44 = vpop.f32.mrf.mxu1 }
 0x163   : > { %1343 = vst.msk [vmem:[%s1994_s17 + $0x6c] sm:$0xf] %vm1315_vm1, %v1646_v39  ;;  %1375 = vst.msk [vmem:[%s1994_s17 + $0xec] sm:$0xf] %vm1315_vm1, %v1678_v40  ;;  %v1023_v45 = vmax.f32 %v853_v41, 0.0  ;;  %v1055_v46 = vmax.f32 %v981_v42, 0.0 }
 0x164   : > { %v855_v47 = vpop.f32.mrf.mxu0  ;;  %v983_v48 = vpop.f32.mrf.mxu1 }
 0x165   : > { %v1647_v49 = vpack.c.bf16 %v1023_v45, %v1023_v45  ;;  %v1679_v50 = vpack.c.bf16 %v1055_v46, %v1055_v46  ;;  %v856_v51 = vadd.f32 %v1986_v10, %v855_v47  ;;  %v984_v52 = vadd.f32 %v1986_v10, %v983_v48 }
 0x166   : > { %v857_v53 = vpop.f32.mrf.mxu0  ;;  %v985_v54 = vpop.f32.mrf.mxu1 }
 0x167   : > { %1344 = vst.msk [vmem:[%s1994_s17 + $0x70] sm:$0xf] %vm1315_vm1, %v1647_v49  ;;  %1376 = vst.msk [vmem:[%s1994_s17 + $0xf0] sm:$0xf] %vm1315_vm1, %v1679_v50  ;;  %v1024_v55 = vmax.f32 %v856_v51, 0.0  ;;  %v1056_v56 = vmax.f32 %v984_v52, 0.0 }
 0x168   : > { %v860_v57 = vpop.f32.mrf.mxu0  ;;  %v988_v58 = vpop.f32.mrf.mxu1 }
 0x169   : > { %v1648_v59 = vpack.c.bf16 %v1024_v55, %v1024_v55  ;;  %v1680_v60 = vpack.c.bf16 %v1056_v56, %v1056_v56  ;;  %v861_v61 = vadd.f32 %v1986_v10, %v860_v57  ;;  %v989_v62 = vadd.f32 %v1986_v10, %v988_v58 }
 0x16a   : > { %v862_v63 = vpop.f32.mrf.mxu0  ;;  %v990_v0 = vpop.f32.mrf.mxu1 }
 0x16b   : > { %1345 = vst.msk [vmem:[%s1994_s17 + $0x74] sm:$0xf] %vm1315_vm1, %v1648_v59  ;;  %1377 = vst.msk [vmem:[%s1994_s17 + $0xf4] sm:$0xf] %vm1315_vm1, %v1680_v60  ;;  %v1025_v1 = vmax.f32 %v861_v61, 0.0  ;;  %v1057_v2 = vmax.f32 %v989_v62, 0.0 }
 0x16c   : > { %v863_v3 = vpop.f32.mrf.mxu0  ;;  %v991_v4 = vpop.f32.mrf.mxu1 }
 0x16d   : > { %v1649_v5 = vpack.c.bf16 %v1025_v1, %v1025_v1  ;;  %v1681_v6 = vpack.c.bf16 %v1057_v2, %v1057_v2  ;;  %v864_v7 = vadd.f32 %v1986_v10, %v863_v3  ;;  %v992_v8 = vadd.f32 %v1986_v10, %v991_v4 }
 0x16e   : > { %v865_v9 = vpop.f32.mrf.mxu0  ;;  %v993_v11 = vpop.f32.mrf.mxu1 }
 0x16f   : > { %1346 = vst.msk [vmem:[%s1994_s17 + $0x78] sm:$0xf] %vm1315_vm1, %v1649_v5  ;;  %1378 = vst.msk [vmem:[%s1994_s17 + $0xf8] sm:$0xf] %vm1315_vm1, %v1681_v6  ;;  %v1026_v12 = vmax.f32 %v864_v7, 0.0  ;;  %v1058_v13 = vmax.f32 %v992_v8, 0.0 }
 0x171   : > { %v1650_v14 = vpack.c.bf16 %v1026_v12, %v1026_v12  ;;  %v1682_v15 = vpack.c.bf16 %v1058_v13, %v1058_v13 }
 0x173   : > { %1347 = vst.msk [vmem:[%s1994_s17 + $0x7c] sm:$0xf] %vm1315_vm1, %v1650_v14  ;;  %1379 = vst.msk [vmem:[%s1994_s17 + $0xfc] sm:$0xf] %vm1315_vm1, %v1682_v15 }
 0x174 PF: > { %s13_s12 = sadd.s32 1, %s1821_s12  }
 0x175   : > { %p10_p4 = scmp.ge.s32.totalorder %s13_s12, 6  }
 0x177   :  { %12 = sbr.rel (!%p10_p4) target bundleno = 1 (0x1), region = 62 }

// kernel: base_net_forward.34
= control target key start
LH: loop header
LB: loop body
LE: loop exit
PB: predicated region body
PF: predicated region fallthrough
CT: control target
= control target key end

     0   :  { %s2264_s15 = smov 0   ;;  %s2645_s0 = inlined_call_operand.vmem [shape: bf16[2048,144], index: 0, kind: input, shape index: {}]   ;;  %s2646_s1 = inlined_call_operand.vmem [shape: bf16[144,16], index: 1, kind: input, shape index: {}]   ;;  %s2647_s2 = inlined_call_operand.vmem [shape: f32[1,16], index: 2, kind: input, shape index: {}]   ;;  %s2648_s3 = inlined_call_operand.vmem [shape: bf16[2048,16], index: 3, kind: input, shape index: {}]   ;;  %s2649_s4 = inlined_call_operand.vmem [shape: bf16[2048,16], index: 4, kind: output, shape index: {}]  }
   0x1 LB: > { %s1689_s16 = sadd.s32 4294967295, %s2236_s15   ;;  %p1693_p0 = scmp.ge.s32.totalorder %s2236_s15, 1  ;;  %s2236_s15 = sphi %s2264_s15, %s14_s15  }
   0x2   : > { %p175_p1 = scmp.lt.s32.totalorder %s2236_s15, 5 }
   0x4   : > { %p176_p2 = pnand %p1693_p0, %p175_p1 }
   0x5   : > { %s1694_s19 = sshll.u32 (!%p176_p2), %s1689_s16, 6 }
   0x6   : > { %179 = sbr.rel (%p176_p2) target bundleno = 374 (0x176), region = 36  ;;  %p208_p3 = scmp.lt.s32.totalorder (!%p176_p2), %s1694_s19, 255 }
   0xb   : > { %v2124_v0 = vld [vmem:[%s2646_s1 + $0x38] sm:$0xff]   ;;  %v2238_v1 = vmov 0   ;;  %v2125_v2 = vld [vmem:[%s2646_s1 + $0x30] sm:$0xff]   ;;  %s2651_s19 = smov (!%p208_p3, %s1694_s19), 255  ;;  %v2126_v3 = vld [vmem:[%s2646_s1 + $0x28] sm:$0xff]   ;;  %vm658_vm0 = vcmask 130048  }
   0xc   : > { %755 = vmatprep.subr.bf16.mxu0 %v2238_v1  ;;  %2097 = vmatprep.subr.bf16.mxu1 %v2238_v1  ;;  %s1873_s24 = sshll.u32 %s2651_s19, 3  ;;  %v2127_v4 = vld [vmem:[%s2646_s1 + $0x20] sm:$0xff]   ;;  %v2128_v7 = vld [vmem:[%s2646_s1 + $0x18] sm:$0xff]   ;;  %v2129_v8 = vld [vmem:[%s2646_s1 + $0x10] sm:$0xff]   ;;  %s1698_s14 = sshll.u32 %s2651_s19, 2  ;;  %vm1556_vm1 = vcmask 125952  }
   0xd   : > { %756 = vmatpush1.bf16.msra.mxu0 %v2124_v0  ;;  %2106 = vmatpush1.bf16.msra.mxu1 %v2124_v0  ;;  %s2287_s27 = scalar_lea.vmem %s2645_s0, %s1873_s24  ;;  %v2130_v9 = vld [vmem:[%s2646_s1 + $0x8] sm:$0xff]   ;;  %v2131_v10 = vld [vmem:[%s2646_s1] sm:$0xff]   ;;  %s2407_s18 = scalar_lea.vmem %s2648_s3, %s1698_s14 }
   0xe   : > { %757 = vmatprep.subr.bf16.mxu0 %v2238_v1  ;;  %2098 = vmatprep.subr.bf16.mxu1 %v2238_v1  ;;  %v2135_v5 = vld [vmem:[%s2287_s27 + $0x4] ss:$8 sps:$4 sm:$0xff]   ;;  %v2133_v12 = vld [vmem:[%s2287_s27] ss:$8 sps:$4 sm:$0xff]   ;;  %v2139_v14 = vld [vmem:[%s2287_s27 + $0x14] ss:$8 sps:$4 sm:$0xff]   ;;  %s2425_s23 = scalar_lea.vmem %s2649_s4, %s1698_s14 }
   0xf   : > { %v2138_v6 = vld [vmem:[%s2287_s27 + $0x104] ss:$8 sps:$4 sm:$0xff]   ;;  %1775 = vmatprep.mubr.msk.bf16.mxu0 %vm658_vm0, %v2135_v5  ;;  %v2136_v13 = vld [vmem:[%s2287_s27 + $0x100] ss:$8 sps:$4 sm:$0xff]   ;;  %v2141_v15 = vld [vmem:[%s2287_s27 + $0x114] ss:$8 sps:$4 sm:$0xff]  }
  0x10   : > { %1791 = vmatprep.mubr.msk.bf16.mxu1 %vm658_vm0, %v2138_v6  ;;  %v2132_v11 = vld [vmem:[%s2646_s1 + $0x40] sm:$0xff]   ;;  %v2143_v16 = vld [vmem:[%s2287_s27 + $0x10] ss:$8 sps:$4 sm:$0xff]   ;;  %v2151_v22 = vld [vmem:[%s2287_s27 + $0x34] ss:$8 sps:$4 sm:$0xff]  }
  0x11   : > { %758 = vmatpush1.bf16.msra.mxu0 %v2125_v2  ;;  %2107 = vmatpush1.bf16.msra.mxu1 %v2125_v2  ;;  %v2144_v17 = vld [vmem:[%s2287_s27 + $0x110] ss:$8 sps:$4 sm:$0xff]   ;;  %v2145_v18 = vld [vmem:[%s2287_s27 + $0x24] ss:$8 sps:$4 sm:$0xff]   ;;  %v2149_v20 = vld [vmem:[%s2287_s27 + $0x20] ss:$8 sps:$4 sm:$0xff]  }
  0x12   : > { %759 = vmatprep.subr.bf16.mxu0 %v2238_v1  ;;  %2099 = vmatprep.subr.bf16.mxu1 %v2238_v1  ;;  %v2147_v19 = vld [vmem:[%s2287_s27 + $0x124] ss:$8 sps:$4 sm:$0xff]   ;;  %v2150_v21 = vld [vmem:[%s2287_s27 + $0x120] ss:$8 sps:$4 sm:$0xff]   ;;  %v2153_v23 = vld [vmem:[%s2287_s27 + $0x134] ss:$8 sps:$4 sm:$0xff]  }
  0x13   : > { %v2155_v24 = vld [vmem:[%s2287_s27 + $0x30] ss:$8 sps:$4 sm:$0xff]   ;;  %v2157_v26 = vld [vmem:[%s2287_s27 + $0x44] ss:$8 sps:$4 sm:$0xff]   ;;  %v2161_v28 = vld [vmem:[%s2287_s27 + $0x40] ss:$8 sps:$4 sm:$0xff]  }
  0x14   : > { %v2156_v25 = vld [vmem:[%s2287_s27 + $0x130] ss:$8 sps:$4 sm:$0xff]   ;;  %v2159_v27 = vld [vmem:[%s2287_s27 + $0x144] ss:$8 sps:$4 sm:$0xff]   ;;  %v2162_v29 = vld [vmem:[%s2287_s27 + $0x140] ss:$8 sps:$4 sm:$0xff]  }
  0x15   : > { %760 = vmatpush1.bf16.msra.mxu0 %v2126_v3  ;;  %2108 = vmatpush1.bf16.msra.mxu1 %v2126_v3  ;;  %v2163_v30 = vld [vmem:[%s2287_s27 + $0x54] ss:$8 sps:$4 sm:$0xff]   ;;  %v2167_v32 = vld [vmem:[%s2287_s27 + $0x50] ss:$8 sps:$4 sm:$0xff]   ;;  %v2169_v34 = vld [vmem:[%s2287_s27 + $0x64] ss:$8 sps:$4 sm:$0xff]  }
  0x16   : > { %761 = vmatprep.subr.bf16.mxu0 %v2238_v1  ;;  %2100 = vmatprep.subr.bf16.mxu1 %v2238_v1  ;;  %v2165_v31 = vld [vmem:[%s2287_s27 + $0x154] ss:$8 sps:$4 sm:$0xff]   ;;  %v2168_v33 = vld [vmem:[%s2287_s27 + $0x150] ss:$8 sps:$4 sm:$0xff]   ;;  %v2171_v35 = vld [vmem:[%s2287_s27 + $0x164] ss:$8 sps:$4 sm:$0xff]  }
  0x17   : > { %v2173_v36 = vld [vmem:[%s2287_s27 + $0x60] ss:$8 sps:$4 sm:$0xff]   ;;  %v2175_v38 = vld [vmem:[%s2287_s27 + $0x74] ss:$8 sps:$4 sm:$0xff]   ;;  %v2179_v40 = vld [vmem:[%s2287_s27 + $0x70] ss:$8 sps:$4 sm:$0xff]  }
  0x18   : > { %v2174_v37 = vld [vmem:[%s2287_s27 + $0x160] ss:$8 sps:$4 sm:$0xff]   ;;  %v2177_v39 = vld [vmem:[%s2287_s27 + $0x174] ss:$8 sps:$4 sm:$0xff]   ;;  %v2180_v41 = vld [vmem:[%s2287_s27 + $0x170] ss:$8 sps:$4 sm:$0xff]  }
  0x19   : > { %762 = vmatpush1.bf16.msra.mxu0 %v2127_v4  ;;  %2109 = vmatpush1.bf16.msra.mxu1 %v2127_v4  ;;  %v2181_v42 = vld [vmem:[%s2287_s27 + $0x84] ss:$8 sps:$4 sm:$0xff]   ;;  %v2185_v44 = vld [vmem:[%s2287_s27 + $0x80] ss:$8 sps:$4 sm:$0xff]   ;;  %v2187_v46 = vld [vmem:[%s2287_s27 + $0x94] ss:$8 sps:$4 sm:$0xff]  }
  0x1a   : > { %763 = vmatprep.subr.bf16.mxu0 %v2238_v1  ;;  %2101 = vmatprep.subr.bf16.mxu1 %v2238_v1  ;;  %v2183_v43 = vld [vmem:[%s2287_s27 + $0x184] ss:$8 sps:$4 sm:$0xff]   ;;  %v2186_v45 = vld [vmem:[%s2287_s27 + $0x180] ss:$8 sps:$4 sm:$0xff]   ;;  %v2189_v47 = vld [vmem:[%s2287_s27 + $0x194] ss:$8 sps:$4 sm:$0xff]  }
  0x1b   : > { %v2191_v48 = vld [vmem:[%s2287_s27 + $0x90] ss:$8 sps:$4 sm:$0xff]   ;;  %v2193_v50 = vld [vmem:[%s2287_s27 + $0xa4] ss:$8 sps:$4 sm:$0xff]   ;;  %v2197_v52 = vld [vmem:[%s2287_s27 + $0xa0] ss:$8 sps:$4 sm:$0xff]  }
  0x1c   : > { %v2192_v49 = vld [vmem:[%s2287_s27 + $0x190] ss:$8 sps:$4 sm:$0xff]   ;;  %v2195_v51 = vld [vmem:[%s2287_s27 + $0x1a4] ss:$8 sps:$4 sm:$0xff]   ;;  %v2198_v53 = vld [vmem:[%s2287_s27 + $0x1a0] ss:$8 sps:$4 sm:$0xff]  }
  0x1d   : > { %764 = vmatpush1.bf16.msra.mxu0 %v2128_v7  ;;  %2110 = vmatpush1.bf16.msra.mxu1 %v2128_v7  ;;  %v2199_v54 = vld [vmem:[%s2287_s27 + $0xb4] ss:$8 sps:$4 sm:$0xff]   ;;  %v2203_v56 = vld [vmem:[%s2287_s27 + $0xb0] ss:$8 sps:$4 sm:$0xff]   ;;  %v2205_v58 = vld [vmem:[%s2287_s27 + $0xc4] ss:$8 sps:$4 sm:$0xff]  }
  0x1e   : > { %765 = vmatprep.subr.bf16.mxu0 %v2238_v1  ;;  %2102 = vmatprep.subr.bf16.mxu1 %v2238_v1  ;;  %v2201_v55 = vld [vmem:[%s2287_s27 + $0x1b4] ss:$8 sps:$4 sm:$0xff]   ;;  %v2204_v57 = vld [vmem:[%s2287_s27 + $0x1b0] ss:$8 sps:$4 sm:$0xff]   ;;  %v2207_v59 = vld [vmem:[%s2287_s27 + $0x1c4] ss:$8 sps:$4 sm:$0xff]  }
  0x1f   : > { %v2209_v60 = vld [vmem:[%s2287_s27 + $0xc0] ss:$8 sps:$4 sm:$0xff]   ;;  %v2211_v62 = vld [vmem:[%s2287_s27 + $0xd4] ss:$8 sps:$4 sm:$0xff]   ;;  %v2215_v0 = vld [vmem:[%s2287_s27 + $0xd0] ss:$8 sps:$4 sm:$0xff]  }
  0x20   : > { %v2210_v61 = vld [vmem:[%s2287_s27 + $0x1c0] ss:$8 sps:$4 sm:$0xff]   ;;  %v2213_v63 = vld [vmem:[%s2287_s27 + $0x1d4] ss:$8 sps:$4 sm:$0xff]   ;;  %v2217_v2 = vld [vmem:[%s2287_s27 + $0xe4] ss:$8 sps:$4 sm:$0xff]  }
  0x21   : > { %766 = vmatpush1.bf16.msra.mxu0 %v2129_v8  ;;  %2111 = vmatpush1.bf16.msra.mxu1 %v2129_v8  ;;  %v2219_v3 = vld [vmem:[%s2287_s27 + $0x1e4] ss:$8 sps:$4 sm:$0xff]   ;;  %v2221_v4 = vld [vmem:[%s2287_s27 + $0xe0] ss:$8 sps:$4 sm:$0xff]   ;;  %v2223_v6 = vld [vmem:[%s2287_s27 + $0xf4] ss:$8 sps:$4 sm:$0xff]  }
  0x22   : > { %767 = vmatprep.subr.bf16.mxu0 %v2238_v1  ;;  %2103 = vmatprep.subr.bf16.mxu1 %v2238_v1  ;;  %v2222_v5 = vld [vmem:[%s2287_s27 + $0x1e0] ss:$8 sps:$4 sm:$0xff]   ;;  %v2225_v7 = vld [vmem:[%s2287_s27 + $0x1f4] ss:$8 sps:$4 sm:$0xff]   ;;  %v2227_v8 = vld [vmem:[%s2287_s27 + $0xf0] ss:$8 sps:$4 sm:$0xff]  }
  0x25   : > { %768 = vmatpush1.bf16.msra.mxu0 %v2130_v9  ;;  %2112 = vmatpush1.bf16.msra.mxu1 %v2130_v9  ;;  %v2228_v9 = vld [vmem:[%s2287_s27 + $0x1f0] ss:$8 sps:$4 sm:$0xff]  }
  0x26   : > { %769 = vmatprep.subr.bf16.mxu0 %v2238_v1  ;;  %2104 = vmatprep.subr.bf16.mxu1 %v2238_v1 }
  0x29   : > { %770 = vmatpush1.bf16.msra.mxu0 %v2131_v10  ;;  %2113 = vmatpush1.bf16.msra.mxu1 %v2131_v10  ;;  %v1939_v10 = vld [vmem:[%s2407_s18] sm:$0xff]  }
  0x2a   : > { %785 = vmatprep.subr.bf16.mxu0 %v2238_v1  ;;  %2105 = vmatprep.subr.bf16.mxu1 %v2238_v1  ;;  %v2216_v1 = vld [vmem:[%s2287_s27 + $0x1d0] ss:$8 sps:$4 sm:$0xff]  }
  0x2d   : > { %786 = vmatpush2.bf16.msra.mxu0 %v2132_v11  ;;  %2114 = vmatpush2.bf16.msra.mxu1 %v2132_v11  ;;  %v2081_v11 = vld [vmem:[%s2407_s18 + $0x80] sm:$0xff]  }
  0x30   : > { %788 = vmatmul.mubr.bf16.vlgmr.msra.gmra.mxu0 %v2133_v12  ;;  %916 = vmatmul.mubr.bf16.vlgmr.msra.gmra.mxu1 %v2136_v13  ;;  %v2414_v12 = vld [vmem:[%s2647_s2] ss:$0 sm:$0xff]  ;;  %v1940_v13 = vunpack.c.l.bf16 %v1939_v10 }
  0x31   : > { %1776 = vmatprep.mubr.msk.bf16.mxu0 %vm658_vm0, %v2139_v14  ;;  %1792 = vmatprep.mubr.msk.bf16.mxu1 %vm658_vm0, %v2141_v15  ;;  %v2004_v14 = vunpack.c.l.bf16 %v2081_v11 }
  0x38   : > { %796 = vmatmul.mubr.bf16.gmra.mxu0 %v2143_v16  ;;  %924 = vmatmul.mubr.bf16.gmra.mxu1 %v2144_v17 }
  0x39   : > { %1777 = vmatprep.mubr.msk.bf16.mxu0 %vm658_vm0, %v2145_v18  ;;  %1793 = vmatprep.mubr.msk.bf16.mxu1 %vm658_vm0, %v2147_v19 }
  0x40   : > { %804 = vmatmul.mubr.bf16.gmra.mxu0 %v2149_v20  ;;  %932 = vmatmul.mubr.bf16.gmra.mxu1 %v2150_v21 }
  0x41   : > { %1778 = vmatprep.mubr.msk.bf16.mxu0 %vm658_vm0, %v2151_v22  ;;  %1794 = vmatprep.mubr.msk.bf16.mxu1 %vm658_vm0, %v2153_v23  ;;  %v1941_v23 = vunpack.c.h.bf16 %v1939_v10 }
  0x48   : > { %812 = vmatmul.mubr.bf16.gmra.mxu0 %v2155_v24  ;;  %940 = vmatmul.mubr.bf16.gmra.mxu1 %v2156_v25  ;;  %v2005_v24 = vunpack.c.h.bf16 %v2081_v11  ;;  %v2066_v25 = vld [vmem:[%s2407_s18 + $0x8] sm:$0xff]  }
  0x49   : > { %1779 = vmatprep.mubr.msk.bf16.mxu0 %vm658_vm0, %v2157_v26  ;;  %1795 = vmatprep.mubr.msk.bf16.mxu1 %vm658_vm0, %v2159_v27  ;;  %v2082_v26 = vld [vmem:[%s2407_s18 + $0x88] sm:$0xff]  }
  0x50   : > { %820 = vmatmul.mubr.bf16.gmra.mxu0 %v2161_v28  ;;  %948 = vmatmul.mubr.bf16.gmra.mxu1 %v2162_v29 }
  0x51   : > { %1780 = vmatprep.mubr.msk.bf16.mxu0 %vm658_vm0, %v2163_v30  ;;  %1796 = vmatprep.mubr.msk.bf16.mxu1 %vm658_vm0, %v2165_v31 }
  0x58   : > { %828 = vmatmul.mubr.bf16.gmra.mxu0 %v2167_v32  ;;  %956 = vmatmul.mubr.bf16.gmra.mxu1 %v2168_v33 }
  0x59   : > { %1781 = vmatprep.mubr.msk.bf16.mxu0 %vm658_vm0, %v2169_v34  ;;  %1797 = vmatprep.mubr.msk.bf16.mxu1 %vm658_vm0, %v2171_v35  ;;  %v1944_v35 = vunpack.c.l.bf16 %v2066_v25 }
  0x60   : > { %836 = vmatmul.mubr.bf16.gmra.mxu0 %v2173_v36  ;;  %964 = vmatmul.mubr.bf16.gmra.mxu1 %v2174_v37  ;;  %v2008_v36 = vunpack.c.l.bf16 %v2082_v26 }
  0x61   : > { %1782 = vmatprep.mubr.msk.bf16.mxu0 %vm658_vm0, %v2175_v38  ;;  %1798 = vmatprep.mubr.msk.bf16.mxu1 %vm658_vm0, %v2177_v39 }
  0x68   : > { %844 = vmatmul.mubr.bf16.gmra.mxu0 %v2179_v40  ;;  %972 = vmatmul.mubr.bf16.gmra.mxu1 %v2180_v41 }
  0x69   : > { %1783 = vmatprep.mubr.msk.bf16.mxu0 %vm658_vm0, %v2181_v42  ;;  %1799 = vmatprep.mubr.msk.bf16.mxu1 %vm658_vm0, %v2183_v43 }
  0x70   : > { %852 = vmatmul.mubr.bf16.gmra.mxu0 %v2185_v44  ;;  %980 = vmatmul.mubr.bf16.gmra.mxu1 %v2186_v45 }
  0x71   : > { %1784 = vmatprep.mubr.msk.bf16.mxu0 %vm658_vm0, %v2187_v46  ;;  %1800 = vmatprep.mubr.msk.bf16.mxu1 %vm658_vm0, %v2189_v47 }
  0x78   : > { %860 = vmatmul.mubr.bf16.gmra.mxu0 %v2191_v48  ;;  %988 = vmatmul.mubr.bf16.gmra.mxu1 %v2192_v49  ;;  %v1945_v49 = vunpack.c.h.bf16 %v2066_v25 }
  0x79   : > { %1785 = vmatprep.mubr.msk.bf16.mxu0 %vm658_vm0, %v2193_v50  ;;  %1801 = vmatprep.mubr.msk.bf16.mxu1 %vm658_vm0, %v2195_v51  ;;  %v2009_v50 = vunpack.c.h.bf16 %v2082_v26 }
  0x80   : > { %868 = vmatmul.mubr.bf16.gmra.mxu0 %v2197_v52  ;;  %996 = vmatmul.mubr.bf16.gmra.mxu1 %v2198_v53 }
  0x81   : > { %1786 = vmatprep.mubr.msk.bf16.mxu0 %vm658_vm0, %v2199_v54  ;;  %1802 = vmatprep.mubr.msk.bf16.mxu1 %vm658_vm0, %v2201_v55  ;;  %v2067_v55 = vld [vmem:[%s2407_s18 + $0x10] sm:$0xff]  }
  0x88   : > { %876 = vmatmul.mubr.bf16.gmra.mxu0 %v2203_v56  ;;  %1004 = vmatmul.mubr.bf16.gmra.mxu1 %v2204_v57  ;;  %v2083_v56 = vld [vmem:[%s2407_s18 + $0x90] sm:$0xff]  }
  0x89   : > { %1787 = vmatprep.mubr.msk.bf16.mxu0 %vm658_vm0, %v2205_v58  ;;  %1803 = vmatprep.mubr.msk.bf16.mxu1 %vm658_vm0, %v2207_v59 }
  0x90   : > { %884 = vmatmul.mubr.bf16.gmra.mxu0 %v2209_v60  ;;  %1012 = vmatmul.mubr.bf16.gmra.mxu1 %v2210_v61 }
  0x91   : > { %1788 = vmatprep.mubr.msk.bf16.mxu0 %vm658_vm0, %v2211_v62  ;;  %1804 = vmatprep.mubr.msk.bf16.mxu1 %vm658_vm0, %v2213_v63 }
  0x98   : > { %892 = vmatmul.mubr.bf16.gmra.mxu0 %v2215_v0  ;;  %1020 = vmatmul.mubr.bf16.gmra.mxu1 %v2216_v1  ;;  %v1948_v1 = vunpack.c.l.bf16 %v2067_v55 }
  0x99   : > { %1789 = vmatprep.mubr.msk.bf16.mxu0 %vm658_vm0, %v2217_v2  ;;  %1805 = vmatprep.mubr.msk.bf16.mxu1 %vm658_vm0, %v2219_v3  ;;  %v2012_v2 = vunpack.c.l.bf16 %v2083_v56 }
  0xa0   : > { %900 = vmatmul.mubr.bf16.gmra.mxu0 %v2221_v4  ;;  %1028 = vmatmul.mubr.bf16.gmra.mxu1 %v2222_v5 }
  0xa1   : > { %1790 = vmatprep.mubr.msk.bf16.mxu0 %vm658_vm0, %v2223_v6  ;;  %1806 = vmatprep.mubr.msk.bf16.mxu1 %vm658_vm0, %v2225_v7 }
  0xa8   : > { %908 = vmatmul.mubr.bf16.gmra.mxu0 %v2227_v8  ;;  %1036 = vmatmul.mubr.bf16.gmra.mxu1 %v2228_v9 }
  0xf0   : > { %v789_v15 = vpop.f32.mrf.mxu0  ;;  %v917_v16 = vpop.f32.mrf.mxu1 }
  0xf1   : > { %v790_v17 = vadd.f32 %v2414_v12, %v789_v15  ;;  %v918_v18 = vadd.f32 %v2414_v12, %v917_v16  ;;  %v1949_v16 = vunpack.c.h.bf16 %v2067_v55 }
  0xf2   : > { %v791_v19 = vpop.f32.mrf.mxu0  ;;  %v919_v20 = vpop.f32.mrf.mxu1 }
  0xf3   : > { %v1172_v21 = vadd.f32 %v1940_v13, %v790_v17  ;;  %v1204_v22 = vadd.f32 %v2004_v14, %v918_v18  ;;  %v2013_v17 = vunpack.c.h.bf16 %v2083_v56 }
  0xf4   : > { %v792_v27 = vpop.f32.mrf.mxu0  ;;  %v920_v28 = vpop.f32.mrf.mxu1 }
  0xf5   : > { %v1236_v29 = vmax.f32 %v1172_v21, 0.0  ;;  %v1268_v30 = vmax.f32 %v1204_v22, 0.0  ;;  %v793_v31 = vadd.f32 %v2414_v12, %v792_v27  ;;  %v921_v32 = vadd.f32 %v2414_v12, %v920_v28  ;;  %v2068_v22 = vld [vmem:[%s2407_s18 + $0x18] sm:$0xff]  }
  0xf6   : > { %v794_v33 = vpop.f32.mrf.mxu0  ;;  %v922_v34 = vpop.f32.mrf.mxu1 }
  0xf7   : > { %v1874_v37 = vpack.c.bf16 %v1236_v29, %v1236_v29  ;;  %v1906_v38 = vpack.c.bf16 %v1268_v30, %v1268_v30  ;;  %v1173_v39 = vadd.f32 %v1941_v23, %v793_v31  ;;  %v1205_v40 = vadd.f32 %v2005_v24, %v921_v32  ;;  %v2084_v23 = vld [vmem:[%s2407_s18 + $0x98] sm:$0xff]  }
  0xf8   : > { %v797_v41 = vpop.f32.mrf.mxu0  ;;  %v925_v42 = vpop.f32.mrf.mxu1  ;;  %v1952_v32 = vunpack.c.l.bf16 %v2068_v22  ;;  %v2016_v33 = vunpack.c.l.bf16 %v2084_v23 }
  0xf9   : > { %1557 = vst.msk [vmem:[%s2425_s23] sm:$0xf] %vm1556_vm1, %v1874_v37  ;;  %1589 = vst.msk [vmem:[%s2425_s23 + $0x80] sm:$0xf] %vm1556_vm1, %v1906_v38  ;;  %v1237_v43 = vmax.f32 %v1173_v39, 0.0  ;;  %v1269_v44 = vmax.f32 %v1205_v40, 0.0  ;;  %v798_v45 = vadd.f32 %v2414_v12, %v797_v41  ;;  %v926_v46 = vadd.f32 %v2414_v12, %v925_v42 }
  0xfa   : > { %v799_v47 = vpop.f32.mrf.mxu0  ;;  %v927_v48 = vpop.f32.mrf.mxu1 }
  0xfb   : > { %v1875_v51 = vpack.c.bf16 %v1237_v43, %v1237_v43  ;;  %v1907_v52 = vpack.c.bf16 %v1269_v44, %v1269_v44  ;;  %v1174_v53 = vadd.f32 %v1944_v35, %v798_v45  ;;  %v1206_v54 = vadd.f32 %v2008_v36, %v926_v46 }
  0xfc   : > { %v800_v57 = vpop.f32.mrf.mxu0  ;;  %v928_v58 = vpop.f32.mrf.mxu1  ;;  %v1953_v46 = vunpack.c.h.bf16 %v2068_v22  ;;  %v2017_v47 = vunpack.c.h.bf16 %v2084_v23 }
  0xfd   : > { %1558 = vst.msk [vmem:[%s2425_s23 + $0x4] sm:$0xf] %vm1556_vm1, %v1875_v51  ;;  %1590 = vst.msk [vmem:[%s2425_s23 + $0x84] sm:$0xf] %vm1556_vm1, %v1907_v52  ;;  %v1238_v59 = vmax.f32 %v1174_v53, 0.0  ;;  %v1270_v60 = vmax.f32 %v1206_v54, 0.0  ;;  %v801_v61 = vadd.f32 %v2414_v12, %v800_v57  ;;  %v929_v62 = vadd.f32 %v2414_v12, %v928_v58 }
  0xfe   : > { %v802_v63 = vpop.f32.mrf.mxu0  ;;  %v930_v0 = vpop.f32.mrf.mxu1  ;;  %v2069_v52 = vld [vmem:[%s2407_s18 + $0x20] sm:$0xff]  }
  0xff   : > { %v1876_v3 = vpack.c.bf16 %v1238_v59, %v1238_v59  ;;  %v1908_v4 = vpack.c.bf16 %v1270_v60, %v1270_v60  ;;  %v1175_v5 = vadd.f32 %v1945_v49, %v801_v61  ;;  %v1207_v6 = vadd.f32 %v2009_v50, %v929_v62  ;;  %v2085_v53 = vld [vmem:[%s2407_s18 + $0xa0] sm:$0xff]  }
 0x100   : > { %v805_v7 = vpop.f32.mrf.mxu0  ;;  %v933_v8 = vpop.f32.mrf.mxu1  ;;  %v1956_v62 = vunpack.c.l.bf16 %v2069_v52  ;;  %v2020_v63 = vunpack.c.l.bf16 %v2085_v53 }
 0x101   : > { %1559 = vst.msk [vmem:[%s2425_s23 + $0x8] sm:$0xf] %vm1556_vm1, %v1876_v3  ;;  %1591 = vst.msk [vmem:[%s2425_s23 + $0x88] sm:$0xf] %vm1556_vm1, %v1908_v4  ;;  %v1239_v9 = vmax.f32 %v1175_v5, 0.0  ;;  %v1271_v10 = vmax.f32 %v1207_v6, 0.0  ;;  %v806_v11 = vadd.f32 %v2414_v12, %v805_v7  ;;  %v934_v13 = vadd.f32 %v2414_v12, %v933_v8 }
 0x102   : > { %v807_v14 = vpop.f32.mrf.mxu0  ;;  %v935_v15 = vpop.f32.mrf.mxu1 }
 0x103   : > { %v1877_v18 = vpack.c.bf16 %v1239_v9, %v1239_v9  ;;  %v1909_v19 = vpack.c.bf16 %v1271_v10, %v1271_v10  ;;  %v1176_v20 = vadd.f32 %v1948_v1, %v806_v11  ;;  %v1208_v21 = vadd.f32 %v2012_v2, %v934_v13 }
 0x104   : > { %v808_v24 = vpop.f32.mrf.mxu0  ;;  %v936_v25 = vpop.f32.mrf.mxu1  ;;  %v1957_v13 = vunpack.c.h.bf16 %v2069_v52  ;;  %v2021_v14 = vunpack.c.h.bf16 %v2085_v53 }
 0x105   : > { %1560 = vst.msk [vmem:[%s2425_s23 + $0xc] sm:$0xf] %vm1556_vm1, %v1877_v18  ;;  %1592 = vst.msk [vmem:[%s2425_s23 + $0x8c] sm:$0xf] %vm1556_vm1, %v1909_v19  ;;  %v1240_v26 = vmax.f32 %v1176_v20, 0.0  ;;  %v1272_v27 = vmax.f32 %v1208_v21, 0.0  ;;  %v809_v28 = vadd.f32 %v2414_v12, %v808_v24  ;;  %v937_v29 = vadd.f32 %v2414_v12, %v936_v25 }
 0x106   : > { %v810_v30 = vpop.f32.mrf.mxu0  ;;  %v938_v31 = vpop.f32.mrf.mxu1  ;;  %v2070_v19 = vld [vmem:[%s2407_s18 + $0x28] sm:$0xff]  }
 0x107   : > { %v1878_v34 = vpack.c.bf16 %v1240_v26, %v1240_v26  ;;  %v1910_v35 = vpack.c.bf16 %v1272_v27, %v1272_v27  ;;  %v1177_v36 = vadd.f32 %v1949_v16, %v809_v28  ;;  %v1209_v37 = vadd.f32 %v2013_v17, %v937_v29  ;;  %v2086_v20 = vld [vmem:[%s2407_s18 + $0xa8] sm:$0xff]  }
 0x108   : > { %v813_v38 = vpop.f32.mrf.mxu0  ;;  %v941_v39 = vpop.f32.mrf.mxu1  ;;  %v1960_v29 = vunpack.c.l.bf16 %v2070_v19  ;;  %v2024_v30 = vunpack.c.l.bf16 %v2086_v20 }
 0x109   : > { %1561 = vst.msk [vmem:[%s2425_s23 + $0x10] sm:$0xf] %vm1556_vm1, %v1878_v34  ;;  %1593 = vst.msk [vmem:[%s2425_s23 + $0x90] sm:$0xf] %vm1556_vm1, %v1910_v35  ;;  %v1241_v40 = vmax.f32 %v1177_v36, 0.0  ;;  %v1273_v41 = vmax.f32 %v1209_v37, 0.0  ;;  %v814_v42 = vadd.f32 %v2414_v12, %v813_v38  ;;  %v942_v43 = vadd.f32 %v2414_v12, %v941_v39 }
 0x10a   : > { %v815_v44 = vpop.f32.mrf.mxu0  ;;  %v943_v45 = vpop.f32.mrf.mxu1 }
 0x10b   : > { %v1879_v48 = vpack.c.bf16 %v1241_v40, %v1241_v40  ;;  %v1911_v49 = vpack.c.bf16 %v1273_v41, %v1273_v41  ;;  %v1178_v50 = vadd.f32 %v1952_v32, %v814_v42  ;;  %v1210_v51 = vadd.f32 %v2016_v33, %v942_v43 }
 0x10c   : > { %v816_v54 = vpop.f32.mrf.mxu0  ;;  %v944_v55 = vpop.f32.mrf.mxu1  ;;  %v1961_v43 = vunpack.c.h.bf16 %v2070_v19  ;;  %v2025_v44 = vunpack.c.h.bf16 %v2086_v20 }
 0x10d   : > { %1562 = vst.msk [vmem:[%s2425_s23 + $0x14] sm:$0xf] %vm1556_vm1, %v1879_v48  ;;  %1594 = vst.msk [vmem:[%s2425_s23 + $0x94] sm:$0xf] %vm1556_vm1, %v1911_v49  ;;  %v1242_v56 = vmax.f32 %v1178_v50, 0.0  ;;  %v1274_v57 = vmax.f32 %v1210_v51, 0.0  ;;  %v817_v58 = vadd.f32 %v2414_v12, %v816_v54  ;;  %v945_v59 = vadd.f32 %v2414_v12, %v944_v55 }
 0x10e   : > { %v818_v60 = vpop.f32.mrf.mxu0  ;;  %v946_v61 = vpop.f32.mrf.mxu1  ;;  %v2071_v49 = vld [vmem:[%s2407_s18 + $0x30] sm:$0xff]  }
 0x10f   : > { %v1880_v0 = vpack.c.bf16 %v1242_v56, %v1242_v56  ;;  %v1912_v1 = vpack.c.bf16 %v1274_v57, %v1274_v57  ;;  %v1179_v2 = vadd.f32 %v1953_v46, %v817_v58  ;;  %v1211_v3 = vadd.f32 %v2017_v47, %v945_v59  ;;  %v2087_v50 = vld [vmem:[%s2407_s18 + $0xb0] sm:$0xff]  }
 0x110   : > { %v821_v4 = vpop.f32.mrf.mxu0  ;;  %v949_v5 = vpop.f32.mrf.mxu1  ;;  %v1964_v59 = vunpack.c.l.bf16 %v2071_v49  ;;  %v2028_v60 = vunpack.c.l.bf16 %v2087_v50 }
 0x111   : > { %1563 = vst.msk [vmem:[%s2425_s23 + $0x18] sm:$0xf] %vm1556_vm1, %v1880_v0  ;;  %1595 = vst.msk [vmem:[%s2425_s23 + $0x98] sm:$0xf] %vm1556_vm1, %v1912_v1  ;;  %v1243_v6 = vmax.f32 %v1179_v2, 0.0  ;;  %v1275_v7 = vmax.f32 %v1211_v3, 0.0  ;;  %v822_v8 = vadd.f32 %v2414_v12, %v821_v4  ;;  %v950_v9 = vadd.f32 %v2414_v12, %v949_v5 }
 0x112   : > { %v823_v10 = vpop.f32.mrf.mxu0  ;;  %v951_v11 = vpop.f32.mrf.mxu1 }
 0x113   : > { %v1881_v15 = vpack.c.bf16 %v1243_v6, %v1243_v6  ;;  %v1913_v16 = vpack.c.bf16 %v1275_v7, %v1275_v7  ;;  %v1180_v17 = vadd.f32 %v1956_v62, %v822_v8  ;;  %v1212_v18 = vadd.f32 %v2020_v63, %v950_v9 }
 0x114   : > { %v824_v21 = vpop.f32.mrf.mxu0  ;;  %v952_v22 = vpop.f32.mrf.mxu1  ;;  %v1965_v9 = vunpack.c.h.bf16 %v2071_v49  ;;  %v2029_v10 = vunpack.c.h.bf16 %v2087_v50 }
 0x115   : > { %1564 = vst.msk [vmem:[%s2425_s23 + $0x1c] sm:$0xf] %vm1556_vm1, %v1881_v15  ;;  %1596 = vst.msk [vmem:[%s2425_s23 + $0x9c] sm:$0xf] %vm1556_vm1, %v1913_v16  ;;  %v1244_v23 = vmax.f32 %v1180_v17, 0.0  ;;  %v1276_v24 = vmax.f32 %v1212_v18, 0.0  ;;  %v825_v25 = vadd.f32 %v2414_v12, %v824_v21  ;;  %v953_v26 = vadd.f32 %v2414_v12, %v952_v22 }
 0x116   : > { %v826_v27 = vpop.f32.mrf.mxu0  ;;  %v954_v28 = vpop.f32.mrf.mxu1  ;;  %v2072_v16 = vld [vmem:[%s2407_s18 + $0x38] sm:$0xff]  }
 0x117   : > { %v1882_v31 = vpack.c.bf16 %v1244_v23, %v1244_v23  ;;  %v1914_v32 = vpack.c.bf16 %v1276_v24, %v1276_v24  ;;  %v1181_v33 = vadd.f32 %v1957_v13, %v825_v25  ;;  %v1213_v34 = vadd.f32 %v2021_v14, %v953_v26  ;;  %v2088_v17 = vld [vmem:[%s2407_s18 + $0xb8] sm:$0xff]  }
 0x118   : > { %v829_v35 = vpop.f32.mrf.mxu0  ;;  %v957_v36 = vpop.f32.mrf.mxu1  ;;  %v1968_v26 = vunpack.c.l.bf16 %v2072_v16  ;;  %v2032_v27 = vunpack.c.l.bf16 %v2088_v17 }
 0x119   : > { %1565 = vst.msk [vmem:[%s2425_s23 + $0x20] sm:$0xf] %vm1556_vm1, %v1882_v31  ;;  %1597 = vst.msk [vmem:[%s2425_s23 + $0xa0] sm:$0xf] %vm1556_vm1, %v1914_v32  ;;  %v1245_v37 = vmax.f32 %v1181_v33, 0.0  ;;  %v1277_v38 = vmax.f32 %v1213_v34, 0.0  ;;  %v830_v39 = vadd.f32 %v2414_v12, %v829_v35  ;;  %v958_v40 = vadd.f32 %v2414_v12, %v957_v36 }
 0x11a   : > { %v831_v41 = vpop.f32.mrf.mxu0  ;;  %v959_v42 = vpop.f32.mrf.mxu1 }
 0x11b   : > { %v1883_v45 = vpack.c.bf16 %v1245_v37, %v1245_v37  ;;  %v1915_v46 = vpack.c.bf16 %v1277_v38, %v1277_v38  ;;  %v1182_v47 = vadd.f32 %v1960_v29, %v830_v39  ;;  %v1214_v48 = vadd.f32 %v2024_v30, %v958_v40 }
 0x11c   : > { %v832_v51 = vpop.f32.mrf.mxu0  ;;  %v960_v52 = vpop.f32.mrf.mxu1  ;;  %v1969_v40 = vunpack.c.h.bf16 %v2072_v16  ;;  %v2033_v41 = vunpack.c.h.bf16 %v2088_v17 }
 0x11d   : > { %1566 = vst.msk [vmem:[%s2425_s23 + $0x24] sm:$0xf] %vm1556_vm1, %v1883_v45  ;;  %1598 = vst.msk [vmem:[%s2425_s23 + $0xa4] sm:$0xf] %vm1556_vm1, %v1915_v46  ;;  %v1246_v53 = vmax.f32 %v1182_v47, 0.0  ;;  %v1278_v54 = vmax.f32 %v1214_v48, 0.0  ;;  %v833_v55 = vadd.f32 %v2414_v12, %v832_v51  ;;  %v961_v56 = vadd.f32 %v2414_v12, %v960_v52 }
 0x11e   : > { %v834_v57 = vpop.f32.mrf.mxu0  ;;  %v962_v58 = vpop.f32.mrf.mxu1  ;;  %v2073_v46 = vld [vmem:[%s2407_s18 + $0x40] sm:$0xff]  }
 0x11f   : > { %v1884_v61 = vpack.c.bf16 %v1246_v53, %v1246_v53  ;;  %v1916_v62 = vpack.c.bf16 %v1278_v54, %v1278_v54  ;;  %v1183_v63 = vadd.f32 %v1961_v43, %v833_v55  ;;  %v1215_v0 = vadd.f32 %v2025_v44, %v961_v56  ;;  %v2089_v47 = vld [vmem:[%s2407_s18 + $0xc0] sm:$0xff]  }
 0x120   : > { %v837_v1 = vpop.f32.mrf.mxu0  ;;  %v965_v2 = vpop.f32.mrf.mxu1  ;;  %v1972_v56 = vunpack.c.l.bf16 %v2073_v46  ;;  %v2036_v57 = vunpack.c.l.bf16 %v2089_v47 }
 0x121   : > { %1567 = vst.msk [vmem:[%s2425_s23 + $0x28] sm:$0xf] %vm1556_vm1, %v1884_v61  ;;  %1599 = vst.msk [vmem:[%s2425_s23 + $0xa8] sm:$0xf] %vm1556_vm1, %v1916_v62  ;;  %v1247_v3 = vmax.f32 %v1183_v63, 0.0  ;;  %v1279_v4 = vmax.f32 %v1215_v0, 0.0  ;;  %v838_v5 = vadd.f32 %v2414_v12, %v837_v1  ;;  %v966_v6 = vadd.f32 %v2414_v12, %v965_v2 }
 0x122   : > { %v839_v7 = vpop.f32.mrf.mxu0  ;;  %v967_v8 = vpop.f32.mrf.mxu1 }
 0x123   : > { %v1885_v11 = vpack.c.bf16 %v1247_v3, %v1247_v3  ;;  %v1917_v13 = vpack.c.bf16 %v1279_v4, %v1279_v4  ;;  %v1184_v14 = vadd.f32 %v1964_v59, %v838_v5  ;;  %v1216_v15 = vadd.f32 %v2028_v60, %v966_v6 }
 0x124   : > { %v840_v18 = vpop.f32.mrf.mxu0  ;;  %v968_v19 = vpop.f32.mrf.mxu1  ;;  %v1973_v6 = vunpack.c.h.bf16 %v2073_v46  ;;  %v2037_v7 = vunpack.c.h.bf16 %v2089_v47 }
 0x125   : > { %1568 = vst.msk [vmem:[%s2425_s23 + $0x2c] sm:$0xf] %vm1556_vm1, %v1885_v11  ;;  %1600 = vst.msk [vmem:[%s2425_s23 + $0xac] sm:$0xf] %vm1556_vm1, %v1917_v13  ;;  %v1248_v20 = vmax.f32 %v1184_v14, 0.0  ;;  %v1280_v21 = vmax.f32 %v1216_v15, 0.0  ;;  %v841_v22 = vadd.f32 %v2414_v12, %v840_v18  ;;  %v969_v23 = vadd.f32 %v2414_v12, %v968_v19 }
 0x126   : > { %v842_v24 = vpop.f32.mrf.mxu0  ;;  %v970_v25 = vpop.f32.mrf.mxu1  ;;  %v2074_v13 = vld [vmem:[%s2407_s18 + $0x48] sm:$0xff]  }
 0x127   : > { %v1886_v28 = vpack.c.bf16 %v1248_v20, %v1248_v20  ;;  %v1918_v29 = vpack.c.bf16 %v1280_v21, %v1280_v21  ;;  %v1185_v30 = vadd.f32 %v1965_v9, %v841_v22  ;;  %v1217_v31 = vadd.f32 %v2029_v10, %v969_v23  ;;  %v2090_v14 = vld [vmem:[%s2407_s18 + $0xc8] sm:$0xff]  }
 0x128   : > { %v845_v32 = vpop.f32.mrf.mxu0  ;;  %v973_v33 = vpop.f32.mrf.mxu1  ;;  %v1976_v23 = vunpack.c.l.bf16 %v2074_v13  ;;  %v2040_v24 = vunpack.c.l.bf16 %v2090_v14 }
 0x129   : > { %1569 = vst.msk [vmem:[%s2425_s23 + $0x30] sm:$0xf] %vm1556_vm1, %v1886_v28  ;;  %1601 = vst.msk [vmem:[%s2425_s23 + $0xb0] sm:$0xf] %vm1556_vm1, %v1918_v29  ;;  %v1249_v34 = vmax.f32 %v1185_v30, 0.0  ;;  %v1281_v35 = vmax.f32 %v1217_v31, 0.0  ;;  %v846_v36 = vadd.f32 %v2414_v12, %v845_v32  ;;  %v974_v37 = vadd.f32 %v2414_v12, %v973_v33 }
 0x12a   : > { %v847_v38 = vpop.f32.mrf.mxu0  ;;  %v975_v39 = vpop.f32.mrf.mxu1 }
 0x12b   : > { %v1887_v42 = vpack.c.bf16 %v1249_v34, %v1249_v34  ;;  %v1919_v43 = vpack.c.bf16 %v1281_v35, %v1281_v35  ;;  %v1186_v44 = vadd.f32 %v1968_v26, %v846_v36  ;;  %v1218_v45 = vadd.f32 %v2032_v27, %v974_v37 }
 0x12c   : > { %v848_v48 = vpop.f32.mrf.mxu0  ;;  %v976_v49 = vpop.f32.mrf.mxu1  ;;  %v1977_v37 = vunpack.c.h.bf16 %v2074_v13  ;;  %v2041_v38 = vunpack.c.h.bf16 %v2090_v14 }
 0x12d   : > { %1570 = vst.msk [vmem:[%s2425_s23 + $0x34] sm:$0xf] %vm1556_vm1, %v1887_v42  ;;  %1602 = vst.msk [vmem:[%s2425_s23 + $0xb4] sm:$0xf] %vm1556_vm1, %v1919_v43  ;;  %v1250_v50 = vmax.f32 %v1186_v44, 0.0  ;;  %v1282_v51 = vmax.f32 %v1218_v45, 0.0  ;;  %v849_v52 = vadd.f32 %v2414_v12, %v848_v48  ;;  %v977_v53 = vadd.f32 %v2414_v12, %v976_v49 }
 0x12e   : > { %v850_v54 = vpop.f32.mrf.mxu0  ;;  %v978_v55 = vpop.f32.mrf.mxu1  ;;  %v2075_v43 = vld [vmem:[%s2407_s18 + $0x50] sm:$0xff]  }
 0x12f   : > { %v1888_v58 = vpack.c.bf16 %v1250_v50, %v1250_v50  ;;  %v1920_v59 = vpack.c.bf16 %v1282_v51, %v1282_v51  ;;  %v1187_v60 = vadd.f32 %v1969_v40, %v849_v52  ;;  %v1219_v61 = vadd.f32 %v2033_v41, %v977_v53  ;;  %v2091_v44 = vld [vmem:[%s2407_s18 + $0xd0] sm:$0xff]  }
 0x130   : > { %v853_v62 = vpop.f32.mrf.mxu0  ;;  %v981_v63 = vpop.f32.mrf.mxu1  ;;  %v1980_v53 = vunpack.c.l.bf16 %v2075_v43  ;;  %v2044_v54 = vunpack.c.l.bf16 %v2091_v44 }
 0x131   : > { %1571 = vst.msk [vmem:[%s2425_s23 + $0x38] sm:$0xf] %vm1556_vm1, %v1888_v58  ;;  %1603 = vst.msk [vmem:[%s2425_s23 + $0xb8] sm:$0xf] %vm1556_vm1, %v1920_v59  ;;  %v1251_v0 = vmax.f32 %v1187_v60, 0.0  ;;  %v1283_v1 = vmax.f32 %v1219_v61, 0.0  ;;  %v854_v2 = vadd.f32 %v2414_v12, %v853_v62  ;;  %v982_v3 = vadd.f32 %v2414_v12, %v981_v63 }
 0x132   : > { %v855_v4 = vpop.f32.mrf.mxu0  ;;  %v983_v5 = vpop.f32.mrf.mxu1 }
 0x133   : > { %v1889_v8 = vpack.c.bf16 %v1251_v0, %v1251_v0  ;;  %v1921_v9 = vpack.c.bf16 %v1283_v1, %v1283_v1  ;;  %v1188_v10 = vadd.f32 %v1972_v56, %v854_v2  ;;  %v1220_v11 = vadd.f32 %v2036_v57, %v982_v3 }
 0x134   : > { %v856_v15 = vpop.f32.mrf.mxu0  ;;  %v984_v16 = vpop.f32.mrf.mxu1  ;;  %v1981_v3 = vunpack.c.h.bf16 %v2075_v43  ;;  %v2045_v4 = vunpack.c.h.bf16 %v2091_v44 }
 0x135   : > { %1572 = vst.msk [vmem:[%s2425_s23 + $0x3c] sm:$0xf] %vm1556_vm1, %v1889_v8  ;;  %1604 = vst.msk [vmem:[%s2425_s23 + $0xbc] sm:$0xf] %vm1556_vm1, %v1921_v9  ;;  %v1252_v17 = vmax.f32 %v1188_v10, 0.0  ;;  %v1284_v18 = vmax.f32 %v1220_v11, 0.0  ;;  %v857_v19 = vadd.f32 %v2414_v12, %v856_v15  ;;  %v985_v20 = vadd.f32 %v2414_v12, %v984_v16 }
 0x136   : > { %v858_v21 = vpop.f32.mrf.mxu0  ;;  %v986_v22 = vpop.f32.mrf.mxu1  ;;  %v2076_v9 = vld [vmem:[%s2407_s18 + $0x58] sm:$0xff]  }
 0x137   : > { %v1890_v25 = vpack.c.bf16 %v1252_v17, %v1252_v17  ;;  %v1922_v26 = vpack.c.bf16 %v1284_v18, %v1284_v18  ;;  %v1189_v27 = vadd.f32 %v1973_v6, %v857_v19  ;;  %v1221_v28 = vadd.f32 %v2037_v7, %v985_v20  ;;  %v2092_v10 = vld [vmem:[%s2407_s18 + $0xd8] sm:$0xff]  }
 0x138   : > { %v861_v29 = vpop.f32.mrf.mxu0  ;;  %v989_v30 = vpop.f32.mrf.mxu1  ;;  %v1984_v20 = vunpack.c.l.bf16 %v2076_v9  ;;  %v2048_v21 = vunpack.c.l.bf16 %v2092_v10 }
 0x139   : > { %1573 = vst.msk [vmem:[%s2425_s23 + $0x40] sm:$0xf] %vm1556_vm1, %v1890_v25  ;;  %1605 = vst.msk [vmem:[%s2425_s23 + $0xc0] sm:$0xf] %vm1556_vm1, %v1922_v26  ;;  %v1253_v31 = vmax.f32 %v1189_v27, 0.0  ;;  %v1285_v32 = vmax.f32 %v1221_v28, 0.0  ;;  %v862_v33 = vadd.f32 %v2414_v12, %v861_v29  ;;  %v990_v34 = vadd.f32 %v2414_v12, %v989_v30 }
 0x13a   : > { %v863_v35 = vpop.f32.mrf.mxu0  ;;  %v991_v36 = vpop.f32.mrf.mxu1 }
 0x13b   : > { %v1891_v39 = vpack.c.bf16 %v1253_v31, %v1253_v31  ;;  %v1923_v40 = vpack.c.bf16 %v1285_v32, %v1285_v32  ;;  %v1190_v41 = vadd.f32 %v1976_v23, %v862_v33  ;;  %v1222_v42 = vadd.f32 %v2040_v24, %v990_v34 }
 0x13c   : > { %v864_v45 = vpop.f32.mrf.mxu0  ;;  %v992_v46 = vpop.f32.mrf.mxu1  ;;  %v1985_v34 = vunpack.c.h.bf16 %v2076_v9  ;;  %v2049_v35 = vunpack.c.h.bf16 %v2092_v10 }
 0x13d   : > { %1574 = vst.msk [vmem:[%s2425_s23 + $0x44] sm:$0xf] %vm1556_vm1, %v1891_v39  ;;  %1606 = vst.msk [vmem:[%s2425_s23 + $0xc4] sm:$0xf] %vm1556_vm1, %v1923_v40  ;;  %v1254_v47 = vmax.f32 %v1190_v41, 0.0  ;;  %v1286_v48 = vmax.f32 %v1222_v42, 0.0  ;;  %v865_v49 = vadd.f32 %v2414_v12, %v864_v45  ;;  %v993_v50 = vadd.f32 %v2414_v12, %v992_v46 }
 0x13e   : > { %v866_v51 = vpop.f32.mrf.mxu0  ;;  %v994_v52 = vpop.f32.mrf.mxu1  ;;  %v2077_v40 = vld [vmem:[%s2407_s18 + $0x60] sm:$0xff]  }
 0x13f   : > { %v1892_v55 = vpack.c.bf16 %v1254_v47, %v1254_v47  ;;  %v1924_v56 = vpack.c.bf16 %v1286_v48, %v1286_v48  ;;  %v1191_v57 = vadd.f32 %v1977_v37, %v865_v49  ;;  %v1223_v58 = vadd.f32 %v2041_v38, %v993_v50  ;;  %v2093_v41 = vld [vmem:[%s2407_s18 + $0xe0] sm:$0xff]  }
 0x140   : > { %v869_v59 = vpop.f32.mrf.mxu0  ;;  %v997_v60 = vpop.f32.mrf.mxu1  ;;  %v1988_v50 = vunpack.c.l.bf16 %v2077_v40  ;;  %v2052_v51 = vunpack.c.l.bf16 %v2093_v41 }
 0x141   : > { %1575 = vst.msk [vmem:[%s2425_s23 + $0x48] sm:$0xf] %vm1556_vm1, %v1892_v55  ;;  %1607 = vst.msk [vmem:[%s2425_s23 + $0xc8] sm:$0xf] %vm1556_vm1, %v1924_v56  ;;  %v1255_v61 = vmax.f32 %v1191_v57, 0.0  ;;  %v1287_v62 = vmax.f32 %v1223_v58, 0.0  ;;  %v870_v63 = vadd.f32 %v2414_v12, %v869_v59  ;;  %v998_v0 = vadd.f32 %v2414_v12, %v997_v60 }
 0x142   : > { %v871_v1 = vpop.f32.mrf.mxu0  ;;  %v999_v2 = vpop.f32.mrf.mxu1 }
 0x143   : > { %v1893_v5 = vpack.c.bf16 %v1255_v61, %v1255_v61  ;;  %v1925_v6 = vpack.c.bf16 %v1287_v62, %v1287_v62  ;;  %v1192_v7 = vadd.f32 %v1980_v53, %v870_v63  ;;  %v1224_v8 = vadd.f32 %v2044_v54, %v998_v0 }
 0x144   : > { %v872_v11 = vpop.f32.mrf.mxu0  ;;  %v1000_v13 = vpop.f32.mrf.mxu1  ;;  %v1989_v0 = vunpack.c.h.bf16 %v2077_v40  ;;  %v2053_v1 = vunpack.c.h.bf16 %v2093_v41 }
 0x145   : > { %1576 = vst.msk [vmem:[%s2425_s23 + $0x4c] sm:$0xf] %vm1556_vm1, %v1893_v5  ;;  %1608 = vst.msk [vmem:[%s2425_s23 + $0xcc] sm:$0xf] %vm1556_vm1, %v1925_v6  ;;  %v1256_v14 = vmax.f32 %v1192_v7, 0.0  ;;  %v1288_v15 = vmax.f32 %v1224_v8, 0.0  ;;  %v873_v16 = vadd.f32 %v2414_v12, %v872_v11  ;;  %v1001_v17 = vadd.f32 %v2414_v12, %v1000_v13 }
 0x146   : > { %v874_v18 = vpop.f32.mrf.mxu0  ;;  %v1002_v19 = vpop.f32.mrf.mxu1  ;;  %v2078_v6 = vld [vmem:[%s2407_s18 + $0x68] sm:$0xff]  }
 0x147   : > { %v1894_v22 = vpack.c.bf16 %v1256_v14, %v1256_v14  ;;  %v1926_v23 = vpack.c.bf16 %v1288_v15, %v1288_v15  ;;  %v1193_v24 = vadd.f32 %v1981_v3, %v873_v16  ;;  %v1225_v25 = vadd.f32 %v2045_v4, %v1001_v17  ;;  %v2094_v7 = vld [vmem:[%s2407_s18 + $0xe8] sm:$0xff]  }
 0x148   : > { %v877_v26 = vpop.f32.mrf.mxu0  ;;  %v1005_v27 = vpop.f32.mrf.mxu1  ;;  %v1992_v17 = vunpack.c.l.bf16 %v2078_v6  ;;  %v2056_v18 = vunpack.c.l.bf16 %v2094_v7 }
 0x149   : > { %1577 = vst.msk [vmem:[%s2425_s23 + $0x50] sm:$0xf] %vm1556_vm1, %v1894_v22  ;;  %1609 = vst.msk [vmem:[%s2425_s23 + $0xd0] sm:$0xf] %vm1556_vm1, %v1926_v23  ;;  %v1257_v28 = vmax.f32 %v1193_v24, 0.0  ;;  %v1289_v29 = vmax.f32 %v1225_v25, 0.0  ;;  %v878_v30 = vadd.f32 %v2414_v12, %v877_v26  ;;  %v1006_v31 = vadd.f32 %v2414_v12, %v1005_v27 }
 0x14a   : > { %v879_v32 = vpop.f32.mrf.mxu0  ;;  %v1007_v33 = vpop.f32.mrf.mxu1 }
 0x14b   : > { %v1895_v36 = vpack.c.bf16 %v1257_v28, %v1257_v28  ;;  %v1927_v37 = vpack.c.bf16 %v1289_v29, %v1289_v29  ;;  %v1194_v38 = vadd.f32 %v1984_v20, %v878_v30  ;;  %v1226_v39 = vadd.f32 %v2048_v21, %v1006_v31 }
 0x14c   : > { %v880_v42 = vpop.f32.mrf.mxu0  ;;  %v1008_v43 = vpop.f32.mrf.mxu1  ;;  %v1993_v31 = vunpack.c.h.bf16 %v2078_v6  ;;  %v2057_v32 = vunpack.c.h.bf16 %v2094_v7 }
 0x14d   : > { %1578 = vst.msk [vmem:[%s2425_s23 + $0x54] sm:$0xf] %vm1556_vm1, %v1895_v36  ;;  %1610 = vst.msk [vmem:[%s2425_s23 + $0xd4] sm:$0xf] %vm1556_vm1, %v1927_v37  ;;  %v1258_v44 = vmax.f32 %v1194_v38, 0.0  ;;  %v1290_v45 = vmax.f32 %v1226_v39, 0.0  ;;  %v881_v46 = vadd.f32 %v2414_v12, %v880_v42  ;;  %v1009_v47 = vadd.f32 %v2414_v12, %v1008_v43 }
 0x14e   : > { %v882_v48 = vpop.f32.mrf.mxu0  ;;  %v1010_v49 = vpop.f32.mrf.mxu1  ;;  %v2079_v37 = vld [vmem:[%s2407_s18 + $0x70] sm:$0xff]  }
 0x14f   : > { %v1896_v52 = vpack.c.bf16 %v1258_v44, %v1258_v44  ;;  %v1928_v53 = vpack.c.bf16 %v1290_v45, %v1290_v45  ;;  %v1195_v54 = vadd.f32 %v1985_v34, %v881_v46  ;;  %v1227_v55 = vadd.f32 %v2049_v35, %v1009_v47  ;;  %v2095_v38 = vld [vmem:[%s2407_s18 + $0xf0] sm:$0xff]  }
 0x150   : > { %v885_v56 = vpop.f32.mrf.mxu0  ;;  %v1013_v57 = vpop.f32.mrf.mxu1  ;;  %v1996_v47 = vunpack.c.l.bf16 %v2079_v37  ;;  %v2060_v48 = vunpack.c.l.bf16 %v2095_v38 }
 0x151   : > { %1579 = vst.msk [vmem:[%s2425_s23 + $0x58] sm:$0xf] %vm1556_vm1, %v1896_v52  ;;  %1611 = vst.msk [vmem:[%s2425_s23 + $0xd8] sm:$0xf] %vm1556_vm1, %v1928_v53  ;;  %v1259_v58 = vmax.f32 %v1195_v54, 0.0  ;;  %v1291_v59 = vmax.f32 %v1227_v55, 0.0  ;;  %v886_v60 = vadd.f32 %v2414_v12, %v885_v56  ;;  %v1014_v61 = vadd.f32 %v2414_v12, %v1013_v57 }
 0x152   : > { %v887_v62 = vpop.f32.mrf.mxu0  ;;  %v1015_v63 = vpop.f32.mrf.mxu1 }
 0x153   : > { %v1897_v2 = vpack.c.bf16 %v1259_v58, %v1259_v58  ;;  %v1929_v3 = vpack.c.bf16 %v1291_v59, %v1291_v59  ;;  %v1196_v4 = vadd.f32 %v1988_v50, %v886_v60  ;;  %v1228_v5 = vadd.f32 %v2052_v51, %v1014_v61 }
 0x154   : > { %v888_v8 = vpop.f32.mrf.mxu0  ;;  %v1016_v9 = vpop.f32.mrf.mxu1  ;;  %v1997_v61 = vunpack.c.h.bf16 %v2079_v37  ;;  %v2061_v62 = vunpack.c.h.bf16 %v2095_v38 }
 0x155   : > { %1580 = vst.msk [vmem:[%s2425_s23 + $0x5c] sm:$0xf] %vm1556_vm1, %v1897_v2  ;;  %1612 = vst.msk [vmem:[%s2425_s23 + $0xdc] sm:$0xf] %vm1556_vm1, %v1929_v3  ;;  %v1260_v10 = vmax.f32 %v1196_v4, 0.0  ;;  %v1292_v11 = vmax.f32 %v1228_v5, 0.0  ;;  %v889_v13 = vadd.f32 %v2414_v12, %v888_v8  ;;  %v1017_v14 = vadd.f32 %v2414_v12, %v1016_v9 }
 0x156   : > { %v890_v15 = vpop.f32.mrf.mxu0  ;;  %v1018_v16 = vpop.f32.mrf.mxu1  ;;  %v2080_v3 = vld [vmem:[%s2407_s18 + $0x78] sm:$0xff]  }
 0x157   : > { %v1898_v19 = vpack.c.bf16 %v1260_v10, %v1260_v10  ;;  %v1930_v20 = vpack.c.bf16 %v1292_v11, %v1292_v11  ;;  %v1197_v21 = vadd.f32 %v1989_v0, %v889_v13  ;;  %v1229_v22 = vadd.f32 %v2053_v1, %v1017_v14  ;;  %v2096_v4 = vld [vmem:[%s2407_s18 + $0xf8] sm:$0xff]  }
 0x158   : > { %v893_v23 = vpop.f32.mrf.mxu0  ;;  %v1021_v24 = vpop.f32.mrf.mxu1  ;;  %v2000_v14 = vunpack.c.l.bf16 %v2080_v3  ;;  %v2064_v15 = vunpack.c.l.bf16 %v2096_v4 }
 0x159   : > { %1581 = vst.msk [vmem:[%s2425_s23 + $0x60] sm:$0xf] %vm1556_vm1, %v1898_v19  ;;  %1613 = vst.msk [vmem:[%s2425_s23 + $0xe0] sm:$0xf] %vm1556_vm1, %v1930_v20  ;;  %v1261_v25 = vmax.f32 %v1197_v21, 0.0  ;;  %v1293_v26 = vmax.f32 %v1229_v22, 0.0  ;;  %v894_v27 = vadd.f32 %v2414_v12, %v893_v23  ;;  %v1022_v28 = vadd.f32 %v2414_v12, %v1021_v24 }
 0x15a   : > { %v895_v29 = vpop.f32.mrf.mxu0  ;;  %v1023_v30 = vpop.f32.mrf.mxu1 }
 0x15b   : > { %v1899_v33 = vpack.c.bf16 %v1261_v25, %v1261_v25  ;;  %v1931_v34 = vpack.c.bf16 %v1293_v26, %v1293_v26  ;;  %v1198_v35 = vadd.f32 %v1992_v17, %v894_v27  ;;  %v1230_v36 = vadd.f32 %v2056_v18, %v1022_v28 }
 0x15c   : > { %v896_v39 = vpop.f32.mrf.mxu0  ;;  %v1024_v40 = vpop.f32.mrf.mxu1  ;;  %v2001_v28 = vunpack.c.h.bf16 %v2080_v3  ;;  %v2065_v29 = vunpack.c.h.bf16 %v2096_v4 }
 0x15d   : > { %1582 = vst.msk [vmem:[%s2425_s23 + $0x64] sm:$0xf] %vm1556_vm1, %v1899_v33  ;;  %1614 = vst.msk [vmem:[%s2425_s23 + $0xe4] sm:$0xf] %vm1556_vm1, %v1931_v34  ;;  %v1262_v41 = vmax.f32 %v1198_v35, 0.0  ;;  %v1294_v42 = vmax.f32 %v1230_v36, 0.0  ;;  %v897_v43 = vadd.f32 %v2414_v12, %v896_v39  ;;  %v1025_v44 = vadd.f32 %v2414_v12, %v1024_v40 }
 0x15e   : > { %v898_v45 = vpop.f32.mrf.mxu0  ;;  %v1026_v46 = vpop.f32.mrf.mxu1 }
 0x15f   : > { %v1900_v49 = vpack.c.bf16 %v1262_v41, %v1262_v41  ;;  %v1932_v50 = vpack.c.bf16 %v1294_v42, %v1294_v42  ;;  %v1199_v51 = vadd.f32 %v1993_v31, %v897_v43  ;;  %v1231_v52 = vadd.f32 %v2057_v32, %v1025_v44 }
 0x160   : > { %v901_v53 = vpop.f32.mrf.mxu0  ;;  %v1029_v54 = vpop.f32.mrf.mxu1 }
 0x161   : > { %1583 = vst.msk [vmem:[%s2425_s23 + $0x68] sm:$0xf] %vm1556_vm1, %v1900_v49  ;;  %1615 = vst.msk [vmem:[%s2425_s23 + $0xe8] sm:$0xf] %vm1556_vm1, %v1932_v50  ;;  %v1263_v55 = vmax.f32 %v1199_v51, 0.0  ;;  %v1295_v56 = vmax.f32 %v1231_v52, 0.0  ;;  %v902_v57 = vadd.f32 %v2414_v12, %v901_v53  ;;  %v1030_v58 = vadd.f32 %v2414_v12, %v1029_v54 }
 0x162   : > { %v903_v59 = vpop.f32.mrf.mxu0  ;;  %v1031_v60 = vpop.f32.mrf.mxu1 }
 0x163   : > { %v1901_v63 = vpack.c.bf16 %v1263_v55, %v1263_v55  ;;  %v1933_v0 = vpack.c.bf16 %v1295_v56, %v1295_v56  ;;  %v1200_v1 = vadd.f32 %v1996_v47, %v902_v57  ;;  %v1232_v2 = vadd.f32 %v2060_v48, %v1030_v58 }
 0x164   : > { %v904_v5 = vpop.f32.mrf.mxu0  ;;  %v1032_v6 = vpop.f32.mrf.mxu1 }
 0x165   : > { %1584 = vst.msk [vmem:[%s2425_s23 + $0x6c] sm:$0xf] %vm1556_vm1, %v1901_v63  ;;  %1616 = vst.msk [vmem:[%s2425_s23 + $0xec] sm:$0xf] %vm1556_vm1, %v1933_v0  ;;  %v1264_v7 = vmax.f32 %v1200_v1, 0.0  ;;  %v1296_v8 = vmax.f32 %v1232_v2, 0.0  ;;  %v905_v9 = vadd.f32 %v2414_v12, %v904_v5  ;;  %v1033_v10 = vadd.f32 %v2414_v12, %v1032_v6 }
 0x166   : > { %v906_v11 = vpop.f32.mrf.mxu0  ;;  %v1034_v13 = vpop.f32.mrf.mxu1  ;;  %v2229_v12 = vld [vmem:[%s2647_s2] ss:$0 sm:$0xff] }
 0x167   : > { %v1902_v16 = vpack.c.bf16 %v1264_v7, %v1264_v7  ;;  %v1934_v17 = vpack.c.bf16 %v1296_v8, %v1296_v8  ;;  %v1201_v18 = vadd.f32 %v1997_v61, %v905_v9  ;;  %v1233_v19 = vadd.f32 %v2061_v62, %v1033_v10 }
 0x168   : > { %v909_v20 = vpop.f32.mrf.mxu0  ;;  %v1037_v21 = vpop.f32.mrf.mxu1 }
 0x169   : > { %1585 = vst.msk [vmem:[%s2425_s23 + $0x70] sm:$0xf] %vm1556_vm1, %v1902_v16  ;;  %1617 = vst.msk [vmem:[%s2425_s23 + $0xf0] sm:$0xf] %vm1556_vm1, %v1934_v17  ;;  %v1265_v22 = vmax.f32 %v1201_v18, 0.0  ;;  %v1297_v23 = vmax.f32 %v1233_v19, 0.0  ;;  %v910_v24 = vadd.f32 %v2229_v12, %v909_v20  ;;  %v1038_v25 = vadd.f32 %v2229_v12, %v1037_v21 }
 0x16a   : > { %v911_v26 = vpop.f32.mrf.mxu0  ;;  %v1039_v27 = vpop.f32.mrf.mxu1 }
 0x16b   : > { %v1903_v30 = vpack.c.bf16 %v1265_v22, %v1265_v22  ;;  %v1935_v31 = vpack.c.bf16 %v1297_v23, %v1297_v23  ;;  %v1202_v32 = vadd.f32 %v2000_v14, %v910_v24  ;;  %v1234_v33 = vadd.f32 %v2064_v15, %v1038_v25 }
 0x16c   : > { %v912_v34 = vpop.f32.mrf.mxu0  ;;  %v1040_v35 = vpop.f32.mrf.mxu1 }
 0x16d   : > { %1586 = vst.msk [vmem:[%s2425_s23 + $0x74] sm:$0xf] %vm1556_vm1, %v1903_v30  ;;  %1618 = vst.msk [vmem:[%s2425_s23 + $0xf4] sm:$0xf] %vm1556_vm1, %v1935_v31  ;;  %v1266_v36 = vmax.f32 %v1202_v32, 0.0  ;;  %v1298_v37 = vmax.f32 %v1234_v33, 0.0  ;;  %v913_v38 = vadd.f32 %v2229_v12, %v912_v34  ;;  %v1041_v39 = vadd.f32 %v2229_v12, %v1040_v35 }
 0x16e   : > { %v914_v40 = vpop.f32.mrf.mxu0  ;;  %v1042_v41 = vpop.f32.mrf.mxu1 }
 0x16f   : > { %v1904_v42 = vpack.c.bf16 %v1266_v36, %v1266_v36  ;;  %v1936_v43 = vpack.c.bf16 %v1298_v37, %v1298_v37  ;;  %v1203_v44 = vadd.f32 %v2001_v28, %v913_v38  ;;  %v1235_v45 = vadd.f32 %v2065_v29, %v1041_v39 }
 0x171   : > { %1587 = vst.msk [vmem:[%s2425_s23 + $0x78] sm:$0xf] %vm1556_vm1, %v1904_v42  ;;  %1619 = vst.msk [vmem:[%s2425_s23 + $0xf8] sm:$0xf] %vm1556_vm1, %v1936_v43  ;;  %v1267_v46 = vmax.f32 %v1203_v44, 0.0  ;;  %v1299_v47 = vmax.f32 %v1235_v45, 0.0 }
 0x173   : > { %v1905_v48 = vpack.c.bf16 %v1267_v46, %v1267_v46  ;;  %v1937_v49 = vpack.c.bf16 %v1299_v47, %v1299_v47 }
 0x175   : > { %1588 = vst.msk [vmem:[%s2425_s23 + $0x7c] sm:$0xf] %vm1556_vm1, %v1905_v48  ;;  %1620 = vst.msk [vmem:[%s2425_s23 + $0xfc] sm:$0xf] %vm1556_vm1, %v1937_v49 }
 0x176 PF: > { %s14_s15 = sadd.s32 1, %s2236_s15  }
 0x177   : > { %p11_p4 = scmp.ge.s32.totalorder %s14_s15, 6  }
 0x179   :  { %13 = sbr.rel (!%p11_p4) target bundleno = 1 (0x1), region = 69 }

// kernel: base_net_forward.43
= control target key start
LH: loop header
LB: loop body
LE: loop exit
PB: predicated region body
PF: predicated region fallthrough
CT: control target
= control target key end

     0   :  { %s1140_s12 = smov 0   ;;  %s1341_s0 = inlined_call_operand.vmem [shape: bf16[512,144], index: 0, kind: input, shape index: {}]   ;;  %s1342_s1 = inlined_call_operand.vmem [shape: bf16[144,32], index: 1, kind: input, shape index: {}]   ;;  %s1343_s2 = inlined_call_operand.vmem [shape: f32[1,32], index: 2, kind: input, shape index: {}]   ;;  %s1344_s3 = inlined_call_operand.vmem [shape: bf16[512,32], index: 3, kind: output, shape index: {}]  }
   0x1 LB: > { %s892_s13 = sadd.s32 4294967295, %s1117_s12   ;;  %p896_p0 = scmp.ge.s32.totalorder %s1117_s12, 1  ;;  %s1117_s12 = sphi %s1140_s12, %s13_s12  }
   0x2   : > { %p139_p1 = scmp.lt.s32.totalorder %s1117_s12, 3 }
   0x4   : > { %p140_p2 = pnand %p896_p0, %p139_p1 }
   0x5   : > { %s897_s16 = sshll.u32 (!%p140_p2), %s892_s13, 5 }
   0x6   : > { %143 = sbr.rel (%p140_p2) target bundleno = 308 (0x134), region = 32  ;;  %p165_p3 = scmp.lt.s32.totalorder (!%p140_p2), %s897_s16, 63 }
   0xb   : > { %v1054_v0 = vld [vmem:[%s1342_s1 + $0x38] sm:$0xff]   ;;  %v1119_v1 = vmov 0   ;;  %v1055_v2 = vld [vmem:[%s1342_s1 + $0x30] sm:$0xff]   ;;  %s1346_s16 = smov (!%p165_p3, %s897_s16), 63  ;;  %v1056_v3 = vld [vmem:[%s1342_s1 + $0x28] sm:$0xff]   ;;  %vm433_vm0 = vcmask 130048  }
   0xc   : > { %482 = vmatprep.subr.bf16.mxu0 %v1119_v1  ;;  %1027 = vmatprep.subr.bf16.mxu1 %v1119_v1  ;;  %s994_s21 = sshll.u32 %s1346_s16, 3  ;;  %v1057_v4 = vld [vmem:[%s1342_s1 + $0x20] sm:$0xff]   ;;  %v1058_v7 = vld [vmem:[%s1342_s1 + $0x18] sm:$0xff]   ;;  %v1059_v8 = vld [vmem:[%s1342_s1 + $0x10] sm:$0xff]   ;;  %s901_s13 = sshll.u32 %s1346_s16, 2  ;;  %vm803_vm1 = vcmask 257024  }
   0xd   : > { %483 = vmatpush1.bf16.msra.mxu0 %v1054_v0  ;;  %1036 = vmatpush1.bf16.msra.mxu1 %v1054_v0  ;;  %s1163_s24 = scalar_lea.vmem %s1341_s0, %s994_s21  ;;  %v1060_v9 = vld [vmem:[%s1342_s1 + $0x8] sm:$0xff]   ;;  %v1061_v10 = vld [vmem:[%s1342_s1] sm:$0xff]   ;;  %s1242_s17 = scalar_lea.vmem %s1344_s3, %s901_s13 }
   0xe   : > { %484 = vmatprep.subr.bf16.mxu0 %v1119_v1  ;;  %1028 = vmatprep.subr.bf16.mxu1 %v1119_v1  ;;  %v1065_v5 = vld [vmem:[%s1163_s24 + $0x4] ss:$8 sps:$4 sm:$0xff]   ;;  %v1063_v12 = vld [vmem:[%s1163_s24] ss:$8 sps:$4 sm:$0xff]   ;;  %v1069_v14 = vld [vmem:[%s1163_s24 + $0x14] ss:$8 sps:$4 sm:$0xff]  }
   0xf   : > { %v1068_v6 = vld [vmem:[%s1163_s24 + $0x84] ss:$8 sps:$4 sm:$0xff]   ;;  %944 = vmatprep.mubr.msk.bf16.mxu0 %vm433_vm0, %v1065_v5  ;;  %v1066_v13 = vld [vmem:[%s1163_s24 + $0x80] ss:$8 sps:$4 sm:$0xff]   ;;  %v1071_v15 = vld [vmem:[%s1163_s24 + $0x94] ss:$8 sps:$4 sm:$0xff]  }
  0x10   : > { %952 = vmatprep.mubr.msk.bf16.mxu1 %vm433_vm0, %v1068_v6  ;;  %v1062_v11 = vld [vmem:[%s1342_s1 + $0x40] sm:$0xff]   ;;  %v1073_v16 = vld [vmem:[%s1163_s24 + $0x10] ss:$8 sps:$4 sm:$0xff]   ;;  %v1081_v22 = vld [vmem:[%s1163_s24 + $0x34] ss:$8 sps:$4 sm:$0xff]  }
  0x11   : > { %485 = vmatpush1.bf16.msra.mxu0 %v1055_v2  ;;  %1037 = vmatpush1.bf16.msra.mxu1 %v1055_v2  ;;  %v1074_v17 = vld [vmem:[%s1163_s24 + $0x90] ss:$8 sps:$4 sm:$0xff]   ;;  %v1075_v18 = vld [vmem:[%s1163_s24 + $0x24] ss:$8 sps:$4 sm:$0xff]   ;;  %v1079_v20 = vld [vmem:[%s1163_s24 + $0x20] ss:$8 sps:$4 sm:$0xff]  }
  0x12   : > { %486 = vmatprep.subr.bf16.mxu0 %v1119_v1  ;;  %1029 = vmatprep.subr.bf16.mxu1 %v1119_v1  ;;  %v1077_v19 = vld [vmem:[%s1163_s24 + $0xa4] ss:$8 sps:$4 sm:$0xff]   ;;  %v1080_v21 = vld [vmem:[%s1163_s24 + $0xa0] ss:$8 sps:$4 sm:$0xff]   ;;  %v1083_v23 = vld [vmem:[%s1163_s24 + $0xb4] ss:$8 sps:$4 sm:$0xff]  }
  0x13   : > { %v1085_v24 = vld [vmem:[%s1163_s24 + $0x30] ss:$8 sps:$4 sm:$0xff]   ;;  %v1087_v26 = vld [vmem:[%s1163_s24 + $0x44] ss:$8 sps:$4 sm:$0xff]   ;;  %v1091_v28 = vld [vmem:[%s1163_s24 + $0x40] ss:$8 sps:$4 sm:$0xff]  }
  0x14   : > { %v1086_v25 = vld [vmem:[%s1163_s24 + $0xb0] ss:$8 sps:$4 sm:$0xff]   ;;  %v1089_v27 = vld [vmem:[%s1163_s24 + $0xc4] ss:$8 sps:$4 sm:$0xff]   ;;  %v1092_v29 = vld [vmem:[%s1163_s24 + $0xc0] ss:$8 sps:$4 sm:$0xff]  }
  0x15   : > { %487 = vmatpush1.bf16.msra.mxu0 %v1056_v3  ;;  %1038 = vmatpush1.bf16.msra.mxu1 %v1056_v3  ;;  %v1093_v30 = vld [vmem:[%s1163_s24 + $0x54] ss:$8 sps:$4 sm:$0xff]   ;;  %v1097_v32 = vld [vmem:[%s1163_s24 + $0x50] ss:$8 sps:$4 sm:$0xff]   ;;  %v1099_v34 = vld [vmem:[%s1163_s24 + $0x64] ss:$8 sps:$4 sm:$0xff]  }
  0x16   : > { %488 = vmatprep.subr.bf16.mxu0 %v1119_v1  ;;  %1030 = vmatprep.subr.bf16.mxu1 %v1119_v1  ;;  %v1095_v31 = vld [vmem:[%s1163_s24 + $0xd4] ss:$8 sps:$4 sm:$0xff]   ;;  %v1098_v33 = vld [vmem:[%s1163_s24 + $0xd0] ss:$8 sps:$4 sm:$0xff]   ;;  %v1101_v35 = vld [vmem:[%s1163_s24 + $0xe4] ss:$8 sps:$4 sm:$0xff]  }
  0x17   : > { %v1103_v36 = vld [vmem:[%s1163_s24 + $0x60] ss:$8 sps:$4 sm:$0xff]   ;;  %v1105_v38 = vld [vmem:[%s1163_s24 + $0x74] ss:$8 sps:$4 sm:$0xff]   ;;  %v1109_v40 = vld [vmem:[%s1163_s24 + $0x70] ss:$8 sps:$4 sm:$0xff]  }
  0x18   : > { %v1104_v37 = vld [vmem:[%s1163_s24 + $0xe0] ss:$8 sps:$4 sm:$0xff]   ;;  %v1107_v39 = vld [vmem:[%s1163_s24 + $0xf4] ss:$8 sps:$4 sm:$0xff]   ;;  %v1110_v41 = vld [vmem:[%s1163_s24 + $0xf0] ss:$8 sps:$4 sm:$0xff]  }
  0x19   : > { %489 = vmatpush1.bf16.msra.mxu0 %v1057_v4  ;;  %1039 = vmatpush1.bf16.msra.mxu1 %v1057_v4  ;;  %v1234_v42 = vld [vmem:[%s1343_s2] ss:$0 sm:$0xff] }
  0x1a   : > { %490 = vmatprep.subr.bf16.mxu0 %v1119_v1  ;;  %1031 = vmatprep.subr.bf16.mxu1 %v1119_v1 }
  0x1d   : > { %491 = vmatpush1.bf16.msra.mxu0 %v1058_v7  ;;  %1040 = vmatpush1.bf16.msra.mxu1 %v1058_v7 }
  0x1e   : > { %492 = vmatprep.subr.bf16.mxu0 %v1119_v1  ;;  %1032 = vmatprep.subr.bf16.mxu1 %v1119_v1 }
  0x21   : > { %493 = vmatpush1.bf16.msra.mxu0 %v1059_v8  ;;  %1041 = vmatpush1.bf16.msra.mxu1 %v1059_v8 }
  0x22   : > { %494 = vmatprep.subr.bf16.mxu0 %v1119_v1  ;;  %1033 = vmatprep.subr.bf16.mxu1 %v1119_v1 }
  0x25   : > { %495 = vmatpush1.bf16.msra.mxu0 %v1060_v9  ;;  %1042 = vmatpush1.bf16.msra.mxu1 %v1060_v9 }
  0x26   : > { %496 = vmatprep.subr.bf16.mxu0 %v1119_v1  ;;  %1034 = vmatprep.subr.bf16.mxu1 %v1119_v1 }
  0x29   : > { %497 = vmatpush1.bf16.msra.mxu0 %v1061_v10  ;;  %1043 = vmatpush1.bf16.msra.mxu1 %v1061_v10 }
  0x2a   : > { %512 = vmatprep.subr.bf16.mxu0 %v1119_v1  ;;  %1035 = vmatprep.subr.bf16.mxu1 %v1119_v1 }
  0x2d   : > { %513 = vmatpush2.bf16.msra.mxu0 %v1062_v11  ;;  %1044 = vmatpush2.bf16.msra.mxu1 %v1062_v11 }
  0x30   : > { %515 = vmatmul.mubr.bf16.vlgmr.msra.gmra.mxu0 %v1063_v12  ;;  %579 = vmatmul.mubr.bf16.vlgmr.msra.gmra.mxu1 %v1066_v13 }
  0x31   : > { %945 = vmatprep.mubr.msk.bf16.mxu0 %vm433_vm0, %v1069_v14  ;;  %953 = vmatprep.mubr.msk.bf16.mxu1 %vm433_vm0, %v1071_v15 }
  0x38   : > { %523 = vmatmul.mubr.bf16.gmra.mxu0 %v1073_v16  ;;  %587 = vmatmul.mubr.bf16.gmra.mxu1 %v1074_v17 }
  0x39   : > { %946 = vmatprep.mubr.msk.bf16.mxu0 %vm433_vm0, %v1075_v18  ;;  %954 = vmatprep.mubr.msk.bf16.mxu1 %vm433_vm0, %v1077_v19 }
  0x40   : > { %531 = vmatmul.mubr.bf16.gmra.mxu0 %v1079_v20  ;;  %595 = vmatmul.mubr.bf16.gmra.mxu1 %v1080_v21 }
  0x41   : > { %947 = vmatprep.mubr.msk.bf16.mxu0 %vm433_vm0, %v1081_v22  ;;  %955 = vmatprep.mubr.msk.bf16.mxu1 %vm433_vm0, %v1083_v23 }
  0x48   : > { %539 = vmatmul.mubr.bf16.gmra.mxu0 %v1085_v24  ;;  %603 = vmatmul.mubr.bf16.gmra.mxu1 %v1086_v25 }
  0x49   : > { %948 = vmatprep.mubr.msk.bf16.mxu0 %vm433_vm0, %v1087_v26  ;;  %956 = vmatprep.mubr.msk.bf16.mxu1 %vm433_vm0, %v1089_v27 }
  0x50   : > { %547 = vmatmul.mubr.bf16.gmra.mxu0 %v1091_v28  ;;  %611 = vmatmul.mubr.bf16.gmra.mxu1 %v1092_v29 }
  0x51   : > { %949 = vmatprep.mubr.msk.bf16.mxu0 %vm433_vm0, %v1093_v30  ;;  %957 = vmatprep.mubr.msk.bf16.mxu1 %vm433_vm0, %v1095_v31 }
  0x58   : > { %555 = vmatmul.mubr.bf16.gmra.mxu0 %v1097_v32  ;;  %619 = vmatmul.mubr.bf16.gmra.mxu1 %v1098_v33 }
  0x59   : > { %950 = vmatprep.mubr.msk.bf16.mxu0 %vm433_vm0, %v1099_v34  ;;  %958 = vmatprep.mubr.msk.bf16.mxu1 %vm433_vm0, %v1101_v35 }
  0x60   : > { %563 = vmatmul.mubr.bf16.gmra.mxu0 %v1103_v36  ;;  %627 = vmatmul.mubr.bf16.gmra.mxu1 %v1104_v37 }
  0x61   : > { %951 = vmatprep.mubr.msk.bf16.mxu0 %vm433_vm0, %v1105_v38  ;;  %959 = vmatprep.mubr.msk.bf16.mxu1 %vm433_vm0, %v1107_v39 }
  0x68   : > { %571 = vmatmul.mubr.bf16.gmra.mxu0 %v1109_v40  ;;  %635 = vmatmul.mubr.bf16.gmra.mxu1 %v1110_v41 }
  0xf0   : > { %v516_v43 = vpop.f32.mrf.mxu0  ;;  %v580_v44 = vpop.f32.mrf.mxu1 }
  0xf1   : > { %v517_v45 = vadd.f32 %v1234_v42, %v516_v43  ;;  %v581_v46 = vadd.f32 %v1234_v42, %v580_v44 }
  0xf2   : > { %v518_v47 = vpop.f32.mrf.mxu0  ;;  %v582_v48 = vpop.f32.mrf.mxu1 }
  0xf3   : > { %v643_v49 = vmax.f32 %v517_v45, 0.0  ;;  %v659_v50 = vmax.f32 %v581_v46, 0.0 }
  0xf4   : > { %v519_v51 = vpop.f32.mrf.mxu0  ;;  %v583_v52 = vpop.f32.mrf.mxu1 }
  0xf5   : > { %v995_v53 = vpack.c.bf16 %v643_v49, %v643_v49  ;;  %v1011_v54 = vpack.c.bf16 %v659_v50, %v659_v50  ;;  %v520_v55 = vadd.f32 %v1234_v42, %v519_v51  ;;  %v584_v56 = vadd.f32 %v1234_v42, %v583_v52 }
  0xf6   : > { %v521_v57 = vpop.f32.mrf.mxu0  ;;  %v585_v58 = vpop.f32.mrf.mxu1 }
  0xf7   : > { %804 = vst.msk [vmem:[%s1242_s17] sm:$0xf] %vm803_vm1, %v995_v53  ;;  %820 = vst.msk [vmem:[%s1242_s17 + $0x40] sm:$0xf] %vm803_vm1, %v1011_v54  ;;  %v644_v59 = vmax.f32 %v520_v55, 0.0  ;;  %v660_v60 = vmax.f32 %v584_v56, 0.0 }
  0xf8   : > { %v524_v61 = vpop.f32.mrf.mxu0  ;;  %v588_v62 = vpop.f32.mrf.mxu1 }
  0xf9   : > { %v996_v63 = vpack.c.bf16 %v644_v59, %v644_v59  ;;  %v1012_v0 = vpack.c.bf16 %v660_v60, %v660_v60  ;;  %v525_v1 = vadd.f32 %v1234_v42, %v524_v61  ;;  %v589_v2 = vadd.f32 %v1234_v42, %v588_v62 }
  0xfa   : > { %v526_v3 = vpop.f32.mrf.mxu0  ;;  %v590_v4 = vpop.f32.mrf.mxu1 }
  0xfb   : > { %805 = vst.msk [vmem:[%s1242_s17 + $0x4] sm:$0xf] %vm803_vm1, %v996_v63  ;;  %821 = vst.msk [vmem:[%s1242_s17 + $0x44] sm:$0xf] %vm803_vm1, %v1012_v0  ;;  %v645_v5 = vmax.f32 %v525_v1, 0.0  ;;  %v661_v6 = vmax.f32 %v589_v2, 0.0 }
  0xfc   : > { %v527_v7 = vpop.f32.mrf.mxu0  ;;  %v591_v8 = vpop.f32.mrf.mxu1 }
  0xfd   : > { %v997_v9 = vpack.c.bf16 %v645_v5, %v645_v5  ;;  %v1013_v10 = vpack.c.bf16 %v661_v6, %v661_v6  ;;  %v528_v11 = vadd.f32 %v1234_v42, %v527_v7  ;;  %v592_v12 = vadd.f32 %v1234_v42, %v591_v8 }
  0xfe   : > { %v529_v13 = vpop.f32.mrf.mxu0  ;;  %v593_v14 = vpop.f32.mrf.mxu1 }
  0xff   : > { %806 = vst.msk [vmem:[%s1242_s17 + $0x8] sm:$0xf] %vm803_vm1, %v997_v9  ;;  %822 = vst.msk [vmem:[%s1242_s17 + $0x48] sm:$0xf] %vm803_vm1, %v1013_v10  ;;  %v646_v15 = vmax.f32 %v528_v11, 0.0  ;;  %v662_v16 = vmax.f32 %v592_v12, 0.0 }
 0x100   : > { %v532_v17 = vpop.f32.mrf.mxu0  ;;  %v596_v18 = vpop.f32.mrf.mxu1 }
 0x101   : > { %v998_v19 = vpack.c.bf16 %v646_v15, %v646_v15  ;;  %v1014_v20 = vpack.c.bf16 %v662_v16, %v662_v16  ;;  %v533_v21 = vadd.f32 %v1234_v42, %v532_v17  ;;  %v597_v22 = vadd.f32 %v1234_v42, %v596_v18 }
 0x102   : > { %v534_v23 = vpop.f32.mrf.mxu0  ;;  %v598_v24 = vpop.f32.mrf.mxu1 }
 0x103   : > { %807 = vst.msk [vmem:[%s1242_s17 + $0xc] sm:$0xf] %vm803_vm1, %v998_v19  ;;  %823 = vst.msk [vmem:[%s1242_s17 + $0x4c] sm:$0xf] %vm803_vm1, %v1014_v20  ;;  %v647_v25 = vmax.f32 %v533_v21, 0.0  ;;  %v663_v26 = vmax.f32 %v597_v22, 0.0 }
 0x104   : > { %v535_v27 = vpop.f32.mrf.mxu0  ;;  %v599_v28 = vpop.f32.mrf.mxu1 }
 0x105   : > { %v999_v29 = vpack.c.bf16 %v647_v25, %v647_v25  ;;  %v1015_v30 = vpack.c.bf16 %v663_v26, %v663_v26  ;;  %v536_v31 = vadd.f32 %v1234_v42, %v535_v27  ;;  %v600_v32 = vadd.f32 %v1234_v42, %v599_v28 }
 0x106   : > { %v537_v33 = vpop.f32.mrf.mxu0  ;;  %v601_v34 = vpop.f32.mrf.mxu1 }
 0x107   : > { %808 = vst.msk [vmem:[%s1242_s17 + $0x10] sm:$0xf] %vm803_vm1, %v999_v29  ;;  %824 = vst.msk [vmem:[%s1242_s17 + $0x50] sm:$0xf] %vm803_vm1, %v1015_v30  ;;  %v648_v35 = vmax.f32 %v536_v31, 0.0  ;;  %v664_v36 = vmax.f32 %v600_v32, 0.0 }
 0x108   : > { %v540_v37 = vpop.f32.mrf.mxu0  ;;  %v604_v38 = vpop.f32.mrf.mxu1 }
 0x109   : > { %v1000_v39 = vpack.c.bf16 %v648_v35, %v648_v35  ;;  %v1016_v40 = vpack.c.bf16 %v664_v36, %v664_v36  ;;  %v541_v41 = vadd.f32 %v1234_v42, %v540_v37  ;;  %v605_v43 = vadd.f32 %v1234_v42, %v604_v38 }
 0x10a   : > { %v542_v44 = vpop.f32.mrf.mxu0  ;;  %v606_v45 = vpop.f32.mrf.mxu1 }
 0x10b   : > { %809 = vst.msk [vmem:[%s1242_s17 + $0x14] sm:$0xf] %vm803_vm1, %v1000_v39  ;;  %825 = vst.msk [vmem:[%s1242_s17 + $0x54] sm:$0xf] %vm803_vm1, %v1016_v40  ;;  %v649_v46 = vmax.f32 %v541_v41, 0.0  ;;  %v665_v47 = vmax.f32 %v605_v43, 0.0 }
 0x10c   : > { %v543_v48 = vpop.f32.mrf.mxu0  ;;  %v607_v49 = vpop.f32.mrf.mxu1 }
 0x10d   : > { %v1001_v50 = vpack.c.bf16 %v649_v46, %v649_v46  ;;  %v1017_v51 = vpack.c.bf16 %v665_v47, %v665_v47  ;;  %v544_v52 = vadd.f32 %v1234_v42, %v543_v48  ;;  %v608_v53 = vadd.f32 %v1234_v42, %v607_v49 }
 0x10e   : > { %v545_v54 = vpop.f32.mrf.mxu0  ;;  %v609_v55 = vpop.f32.mrf.mxu1 }
 0x10f   : > { %810 = vst.msk [vmem:[%s1242_s17 + $0x18] sm:$0xf] %vm803_vm1, %v1001_v50  ;;  %826 = vst.msk [vmem:[%s1242_s17 + $0x58] sm:$0xf] %vm803_vm1, %v1017_v51  ;;  %v650_v56 = vmax.f32 %v544_v52, 0.0  ;;  %v666_v57 = vmax.f32 %v608_v53, 0.0 }
 0x110   : > { %v548_v58 = vpop.f32.mrf.mxu0  ;;  %v612_v59 = vpop.f32.mrf.mxu1 }
 0x111   : > { %v1002_v60 = vpack.c.bf16 %v650_v56, %v650_v56  ;;  %v1018_v61 = vpack.c.bf16 %v666_v57, %v666_v57  ;;  %v549_v62 = vadd.f32 %v1234_v42, %v548_v58  ;;  %v613_v63 = vadd.f32 %v1234_v42, %v612_v59 }
 0x112   : > { %v550_v0 = vpop.f32.mrf.mxu0  ;;  %v614_v1 = vpop.f32.mrf.mxu1 }
 0x113   : > { %811 = vst.msk [vmem:[%s1242_s17 + $0x1c] sm:$0xf] %vm803_vm1, %v1002_v60  ;;  %827 = vst.msk [vmem:[%s1242_s17 + $0x5c] sm:$0xf] %vm803_vm1, %v1018_v61  ;;  %v651_v2 = vmax.f32 %v549_v62, 0.0  ;;  %v667_v3 = vmax.f32 %v613_v63, 0.0 }
 0x114   : > { %v551_v4 = vpop.f32.mrf.mxu0  ;;  %v615_v5 = vpop.f32.mrf.mxu1 }
 0x115   : > { %v1003_v6 = vpack.c.bf16 %v651_v2, %v651_v2  ;;  %v1019_v7 = vpack.c.bf16 %v667_v3, %v667_v3  ;;  %v552_v8 = vadd.f32 %v1234_v42, %v551_v4  ;;  %v616_v9 = vadd.f32 %v1234_v42, %v615_v5 }
 0x116   : > { %v553_v10 = vpop.f32.mrf.mxu0  ;;  %v617_v11 = vpop.f32.mrf.mxu1 }
 0x117   : > { %812 = vst.msk [vmem:[%s1242_s17 + $0x20] sm:$0xf] %vm803_vm1, %v1003_v6  ;;  %828 = vst.msk [vmem:[%s1242_s17 + $0x60] sm:$0xf] %vm803_vm1, %v1019_v7  ;;  %v652_v12 = vmax.f32 %v552_v8, 0.0  ;;  %v668_v13 = vmax.f32 %v616_v9, 0.0 }
 0x118   : > { %v556_v14 = vpop.f32.mrf.mxu0  ;;  %v620_v15 = vpop.f32.mrf.mxu1 }
 0x119   : > { %v1004_v16 = vpack.c.bf16 %v652_v12, %v652_v12  ;;  %v1020_v17 = vpack.c.bf16 %v668_v13, %v668_v13  ;;  %v557_v18 = vadd.f32 %v1234_v42, %v556_v14  ;;  %v621_v19 = vadd.f32 %v1234_v42, %v620_v15 }
 0x11a   : > { %v558_v20 = vpop.f32.mrf.mxu0  ;;  %v622_v21 = vpop.f32.mrf.mxu1 }
 0x11b   : > { %813 = vst.msk [vmem:[%s1242_s17 + $0x24] sm:$0xf] %vm803_vm1, %v1004_v16  ;;  %829 = vst.msk [vmem:[%s1242_s17 + $0x64] sm:$0xf] %vm803_vm1, %v1020_v17  ;;  %v653_v22 = vmax.f32 %v557_v18, 0.0  ;;  %v669_v23 = vmax.f32 %v621_v19, 0.0 }
 0x11c   : > { %v559_v24 = vpop.f32.mrf.mxu0  ;;  %v623_v25 = vpop.f32.mrf.mxu1 }
 0x11d   : > { %v1005_v26 = vpack.c.bf16 %v653_v22, %v653_v22  ;;  %v1021_v27 = vpack.c.bf16 %v669_v23, %v669_v23  ;;  %v560_v28 = vadd.f32 %v1234_v42, %v559_v24  ;;  %v624_v29 = vadd.f32 %v1234_v42, %v623_v25 }
 0x11e   : > { %v561_v30 = vpop.f32.mrf.mxu0  ;;  %v625_v31 = vpop.f32.mrf.mxu1 }
 0x11f   : > { %814 = vst.msk [vmem:[%s1242_s17 + $0x28] sm:$0xf] %vm803_vm1, %v1005_v26  ;;  %830 = vst.msk [vmem:[%s1242_s17 + $0x68] sm:$0xf] %vm803_vm1, %v1021_v27  ;;  %v654_v32 = vmax.f32 %v560_v28, 0.0  ;;  %v670_v33 = vmax.f32 %v624_v29, 0.0 }
 0x120   : > { %v564_v34 = vpop.f32.mrf.mxu0  ;;  %v628_v35 = vpop.f32.mrf.mxu1 }
 0x121   : > { %v1006_v36 = vpack.c.bf16 %v654_v32, %v654_v32  ;;  %v1022_v37 = vpack.c.bf16 %v670_v33, %v670_v33  ;;  %v565_v38 = vadd.f32 %v1234_v42, %v564_v34  ;;  %v629_v39 = vadd.f32 %v1234_v42, %v628_v35 }
 0x122   : > { %v566_v40 = vpop.f32.mrf.mxu0  ;;  %v630_v41 = vpop.f32.mrf.mxu1 }
 0x123   : > { %815 = vst.msk [vmem:[%s1242_s17 + $0x2c] sm:$0xf] %vm803_vm1, %v1006_v36  ;;  %831 = vst.msk [vmem:[%s1242_s17 + $0x6c] sm:$0xf] %vm803_vm1, %v1022_v37  ;;  %v655_v43 = vmax.f32 %v565_v38, 0.0  ;;  %v671_v44 = vmax.f32 %v629_v39, 0.0 }
 0x124   : > { %v567_v45 = vpop.f32.mrf.mxu0  ;;  %v631_v46 = vpop.f32.mrf.mxu1 }
 0x125   : > { %v1007_v47 = vpack.c.bf16 %v655_v43, %v655_v43  ;;  %v1023_v48 = vpack.c.bf16 %v671_v44, %v671_v44  ;;  %v568_v49 = vadd.f32 %v1234_v42, %v567_v45  ;;  %v632_v50 = vadd.f32 %v1234_v42, %v631_v46 }
 0x126   : > { %v569_v51 = vpop.f32.mrf.mxu0  ;;  %v633_v52 = vpop.f32.mrf.mxu1 }
 0x127   : > { %816 = vst.msk [vmem:[%s1242_s17 + $0x30] sm:$0xf] %vm803_vm1, %v1007_v47  ;;  %832 = vst.msk [vmem:[%s1242_s17 + $0x70] sm:$0xf] %vm803_vm1, %v1023_v48  ;;  %v656_v53 = vmax.f32 %v568_v49, 0.0  ;;  %v672_v54 = vmax.f32 %v632_v50, 0.0 }
 0x128   : > { %v572_v55 = vpop.f32.mrf.mxu0  ;;  %v636_v56 = vpop.f32.mrf.mxu1 }
 0x129   : > { %v1008_v57 = vpack.c.bf16 %v656_v53, %v656_v53  ;;  %v1024_v58 = vpack.c.bf16 %v672_v54, %v672_v54  ;;  %v573_v59 = vadd.f32 %v1234_v42, %v572_v55  ;;  %v637_v60 = vadd.f32 %v1234_v42, %v636_v56 }
 0x12a   : > { %v574_v61 = vpop.f32.mrf.mxu0  ;;  %v638_v62 = vpop.f32.mrf.mxu1 }
 0x12b   : > { %817 = vst.msk [vmem:[%s1242_s17 + $0x34] sm:$0xf] %vm803_vm1, %v1008_v57  ;;  %833 = vst.msk [vmem:[%s1242_s17 + $0x74] sm:$0xf] %vm803_vm1, %v1024_v58  ;;  %v657_v63 = vmax.f32 %v573_v59, 0.0  ;;  %v673_v0 = vmax.f32 %v637_v60, 0.0 }
 0x12c   : > { %v575_v1 = vpop.f32.mrf.mxu0  ;;  %v639_v2 = vpop.f32.mrf.mxu1 }
 0x12d   : > { %v1009_v3 = vpack.c.bf16 %v657_v63, %v657_v63  ;;  %v1025_v4 = vpack.c.bf16 %v673_v0, %v673_v0  ;;  %v576_v5 = vadd.f32 %v1234_v42, %v575_v1  ;;  %v640_v6 = vadd.f32 %v1234_v42, %v639_v2 }
 0x12e   : > { %v577_v7 = vpop.f32.mrf.mxu0  ;;  %v641_v8 = vpop.f32.mrf.mxu1 }
 0x12f   : > { %818 = vst.msk [vmem:[%s1242_s17 + $0x38] sm:$0xf] %vm803_vm1, %v1009_v3  ;;  %834 = vst.msk [vmem:[%s1242_s17 + $0x78] sm:$0xf] %vm803_vm1, %v1025_v4  ;;  %v658_v9 = vmax.f32 %v576_v5, 0.0  ;;  %v674_v10 = vmax.f32 %v640_v6, 0.0 }
 0x131   : > { %v1010_v11 = vpack.c.bf16 %v658_v9, %v658_v9  ;;  %v1026_v12 = vpack.c.bf16 %v674_v10, %v674_v10 }
 0x133   : > { %819 = vst.msk [vmem:[%s1242_s17 + $0x3c] sm:$0xf] %vm803_vm1, %v1010_v11  ;;  %835 = vst.msk [vmem:[%s1242_s17 + $0x7c] sm:$0xf] %vm803_vm1, %v1026_v12 }
 0x134 PF: > { %s13_s12 = sadd.s32 1, %s1117_s12  }
 0x135   : > { %p10_p4 = scmp.ge.s32.totalorder %s13_s12, 4  }
 0x137   :  { %12 = sbr.rel (!%p10_p4) target bundleno = 1 (0x1), region = 62 }

// kernel: base_net_forward.44
= control target key start
LH: loop header
LB: loop body
LE: loop exit
PB: predicated region body
PF: predicated region fallthrough
CT: control target
= control target key end

     0   :  { %s1955_s15 = smov 0   ;;  %s2316_s0 = inlined_call_operand.vmem [shape: bf16[512,288], index: 0, kind: input, shape index: {}]   ;;  %s2317_s1 = inlined_call_operand.vmem [shape: bf16[288,32], index: 1, kind: input, shape index: {}]   ;;  %s2318_s2 = inlined_call_operand.vmem [shape: f32[1,32], index: 2, kind: input, shape index: {}]   ;;  %s2319_s3 = inlined_call_operand.vmem [shape: bf16[512,32], index: 3, kind: input, shape index: {}]   ;;  %s2320_s4 = inlined_call_operand.vmem [shape: bf16[512,32], index: 4, kind: output, shape index: {}]  }
   0x1 LB: > { %s1410_s16 = sadd.s32 4294967295, %s1928_s15   ;;  %p1414_p0 = scmp.ge.s32.totalorder %s1928_s15, 1  ;;  %s1928_s15 = sphi %s1955_s15, %s14_s15  }
   0x2   : > { %p175_p1 = scmp.lt.s32.totalorder %s1928_s15, 3 }
   0x4   : > { %p176_p2 = pnand %p1414_p0, %p175_p1 }
   0x5   : > { %s1415_s19 = sshll.u32 (!%p176_p2), %s1410_s16, 5 }
   0x6   : > { %179 = sbr.rel (%p176_p2) target bundleno = 344 (0x158), region = 36  ;;  %p208_p3 = scmp.lt.s32.totalorder (!%p176_p2), %s1415_s19, 63 }
   0xb   : > { %v1840_v0 = vld [vmem:[%s2317_s1 + $0x78] sm:$0xff]   ;;  %v1842_v2 = vld [vmem:[%s2317_s1 + $0x70] sm:$0xff]   ;;  %v1844_v4 = vld [vmem:[%s2317_s1 + $0x68] sm:$0xff]   ;;  %s2322_s19 = smov (!%p208_p3, %s1415_s19), 63  ;;  %vm682_vm0 = vcmask 261120   ;;  %vm1309_vm1 = vcmask 257024  }
   0xc   : > { %v1841_v1 = vld [vmem:[%s2317_s1 + $0x38] sm:$0xff]   ;;  %1649 = vmatprep.subr.bf16.mxu0 %v1840_v0  ;;  %1815 = vmatprep.subr.bf16.mxu1 %v1840_v0  ;;  %v1843_v3 = vld [vmem:[%s2317_s1 + $0x30] sm:$0xff]   ;;  %v1845_v5 = vld [vmem:[%s2317_s1 + $0x28] sm:$0xff]   ;;  %s1831_s6 = smul.u32 12, %s2322_s19  ;;  %s1418_s8 = sshll.u32 %s2322_s19, 2 }
   0xd   : > { %1650 = vmatpush3.bf16.msra.mxu0 %v1841_v1  ;;  %1823 = vmatpush3.bf16.msra.mxu1 %v1841_v1  ;;  %v1846_v6 = vld [vmem:[%s2317_s1 + $0x60] sm:$0xff]   ;;  %v1848_v8 = vld [vmem:[%s2317_s1 + $0x58] sm:$0xff]   ;;  %v1850_v10 = vld [vmem:[%s2317_s1 + $0x50] sm:$0xff]   ;;  %s2113_s11 = scalar_lea.vmem %s2319_s3, %s1418_s8  ;;  %s2142_s17 = scalar_lea.vmem %s2320_s4, %s1418_s8 }
   0xe   : > { %1651 = vmatprep.subr.bf16.mxu0 %v1842_v2  ;;  %1816 = vmatprep.subr.bf16.mxu1 %v1842_v2  ;;  %v1847_v7 = vld [vmem:[%s2317_s1 + $0x20] sm:$0xff]   ;;  %s1996_s13 = scalar_lea.vmem %s2316_s0, %s1831_s6  ;;  %v1849_v9 = vld [vmem:[%s2317_s1 + $0x18] sm:$0xff]   ;;  %v1851_v13 = vld [vmem:[%s2317_s1 + $0x10] sm:$0xff]  }
   0xf   : > { %v1858_v11 = vld [vmem:[%s1996_s13 + $0x4] ss:$12 sps:$4 sm:$0xff]   ;;  %v1852_v14 = vld [vmem:[%s2317_s1 + $0x48] sm:$0xff]   ;;  %v1869_v26 = vld [vmem:[%s1996_s13 + $0x34] ss:$12 sps:$4 sm:$0xff]  }
  0x10   : > { %v1861_v12 = vld [vmem:[%s1996_s13 + $0x124] ss:$12 sps:$4 sm:$0xff]   ;;  %763 = vmatprep.mubr.bf16.mxu0 %v1858_v11  ;;  %v1853_v15 = vld [vmem:[%s2317_s1 + $0x8] sm:$0xff]   ;;  %v1871_v27 = vld [vmem:[%s1996_s13 + $0x154] ss:$12 sps:$4 sm:$0xff]  }
  0x11   : > { %1652 = vmatpush3.bf16.msra.mxu0 %v1843_v3  ;;  %1824 = vmatpush3.bf16.msra.mxu1 %v1843_v3  ;;  %v1854_v16 = vld [vmem:[%s2317_s1 + $0x40] sm:$0xff]   ;;  %v1862_v18 = vld [vmem:[%s2317_s1 + $0x88] sm:$0xff]   ;;  %v1873_v28 = vld [vmem:[%s1996_s13 + $0x30] ss:$12 sps:$4 sm:$0xff]  }
  0x12   : > { %1653 = vmatprep.subr.bf16.mxu0 %v1844_v4  ;;  %1817 = vmatprep.subr.bf16.mxu1 %v1844_v4  ;;  %v1855_v17 = vld [vmem:[%s2317_s1] sm:$0xff]   ;;  %v1863_v21 = vld [vmem:[%s1996_s13 + $0x1c] ss:$12 sps:$4 sm:$0xff]   ;;  %v1876_v30 = vld [vmem:[%s1996_s13 + $0x4c] ss:$12 sps:$4 sm:$0xff]  }
  0x13   : > { %859 = vmatprep.mubr.bf16.mxu1 %v1861_v12  ;;  %v1856_v19 = vld [vmem:[%s1996_s13] ss:$12 sps:$4 sm:$0xff]   ;;  %v1865_v22 = vld [vmem:[%s1996_s13 + $0x13c] ss:$12 sps:$4 sm:$0xff]   ;;  %v1867_v24 = vld [vmem:[%s1996_s13 + $0x18] ss:$12 sps:$4 sm:$0xff]  }
  0x14   : > { %v1859_v20 = vld [vmem:[%s1996_s13 + $0x120] ss:$12 sps:$4 sm:$0xff]   ;;  %v1868_v25 = vld [vmem:[%s1996_s13 + $0x138] ss:$12 sps:$4 sm:$0xff]   ;;  %v1874_v29 = vld [vmem:[%s1996_s13 + $0x150] ss:$12 sps:$4 sm:$0xff]  }
  0x15   : > { %1654 = vmatpush3.bf16.msra.mxu0 %v1845_v5  ;;  %1825 = vmatpush3.bf16.msra.mxu1 %v1845_v5  ;;  %v1875_v23 = vld [vmem:[%s2317_s1 + $0x80] sm:$0xff]   ;;  %v1878_v31 = vld [vmem:[%s1996_s13 + $0x16c] ss:$12 sps:$4 sm:$0xff]   ;;  %v1880_v32 = vld [vmem:[%s1996_s13 + $0x48] ss:$12 sps:$4 sm:$0xff]  }
  0x16   : > { %1655 = vmatprep.subr.bf16.mxu0 %v1846_v6  ;;  %1818 = vmatprep.subr.bf16.mxu1 %v1846_v6  ;;  %v1881_v33 = vld [vmem:[%s1996_s13 + $0x168] ss:$12 sps:$4 sm:$0xff]   ;;  %v1882_v34 = vld [vmem:[%s1996_s13 + $0x64] ss:$12 sps:$4 sm:$0xff]   ;;  %v1885_v36 = vld [vmem:[%s1996_s13 + $0x60] ss:$12 sps:$4 sm:$0xff]  }
  0x17   : > { %v1884_v35 = vld [vmem:[%s1996_s13 + $0x8] ss:$12 sps:$4 sm:$0xff]   ;;  %v1886_v37 = vld [vmem:[%s1996_s13 + $0x20] ss:$12 sps:$4 sm:$0xff]   ;;  %v1889_v39 = vld [vmem:[%s1996_s13 + $0x38] ss:$12 sps:$4 sm:$0xff]  }
  0x18   : > { %v1887_v38 = vld [vmem:[%s1996_s13 + $0x7c] ss:$12 sps:$4 sm:$0xff]   ;;  %v1890_v40 = vld [vmem:[%s1996_s13 + $0x78] ss:$12 sps:$4 sm:$0xff]   ;;  %v1892_v42 = vld [vmem:[%s1996_s13 + $0x94] ss:$12 sps:$4 sm:$0xff]  }
  0x19   : > { %1656 = vmatpush3.bf16.msra.mxu0 %v1847_v7  ;;  %1826 = vmatpush3.bf16.msra.mxu1 %v1847_v7  ;;  %v1891_v41 = vld [vmem:[%s1996_s13 + $0x50] ss:$12 sps:$4 sm:$0xff]   ;;  %v1894_v43 = vld [vmem:[%s1996_s13 + $0x68] ss:$12 sps:$4 sm:$0xff]   ;;  %v1896_v45 = vld [vmem:[%s1996_s13 + $0x80] ss:$12 sps:$4 sm:$0xff]  }
  0x1a   : > { %1657 = vmatprep.subr.bf16.mxu0 %v1848_v8  ;;  %1819 = vmatprep.subr.bf16.mxu1 %v1848_v8  ;;  %v1895_v44 = vld [vmem:[%s1996_s13 + $0x90] ss:$12 sps:$4 sm:$0xff]   ;;  %v1897_v46 = vld [vmem:[%s1996_s13 + $0xac] ss:$12 sps:$4 sm:$0xff]   ;;  %v1900_v48 = vld [vmem:[%s1996_s13 + $0xa8] ss:$12 sps:$4 sm:$0xff]  }
  0x1b   : > { %v1899_v47 = vld [vmem:[%s1996_s13 + $0x98] ss:$12 sps:$4 sm:$0xff]   ;;  %v1901_v49 = vld [vmem:[%s1996_s13 + $0xb0] ss:$12 sps:$4 sm:$0xff]   ;;  %v1904_v51 = vld [vmem:[%s1996_s13 + $0xc8] ss:$12 sps:$4 sm:$0xff]  }
  0x1c   : > { %v1902_v50 = vld [vmem:[%s1996_s13 + $0xc4] ss:$12 sps:$4 sm:$0xff]   ;;  %v1905_v52 = vld [vmem:[%s1996_s13 + $0xc0] ss:$12 sps:$4 sm:$0xff]   ;;  %v1907_v54 = vld [vmem:[%s1996_s13 + $0xdc] ss:$12 sps:$4 sm:$0xff]  }
  0x1d   : > { %1658 = vmatpush3.bf16.msra.mxu0 %v1849_v9  ;;  %1827 = vmatpush3.bf16.msra.mxu1 %v1849_v9  ;;  %v1906_v53 = vld [vmem:[%s1996_s13 + $0xe0] ss:$12 sps:$4 sm:$0xff]   ;;  %v1909_v55 = vld [vmem:[%s1996_s13 + $0xf8] ss:$12 sps:$4 sm:$0xff]   ;;  %v1911_v57 = vld [vmem:[%s1996_s13 + $0x110] ss:$12 sps:$4 sm:$0xff]  }
  0x1e   : > { %1659 = vmatprep.subr.bf16.mxu0 %v1850_v10  ;;  %1820 = vmatprep.subr.bf16.mxu1 %v1850_v10  ;;  %v1910_v56 = vld [vmem:[%s1996_s13 + $0xd8] ss:$12 sps:$4 sm:$0xff]   ;;  %v1912_v58 = vld [vmem:[%s1996_s13 + $0xf4] ss:$12 sps:$4 sm:$0xff]   ;;  %v1915_v60 = vld [vmem:[%s1996_s13 + $0xf0] ss:$12 sps:$4 sm:$0xff]  }
  0x1f   : > { %v1914_v59 = vld [vmem:[%s1996_s13 + $0x128] ss:$12 sps:$4 sm:$0xff]   ;;  %v1916_v61 = vld [vmem:[%s1996_s13 + $0x140] ss:$12 sps:$4 sm:$0xff]   ;;  %v1919_v63 = vld [vmem:[%s1996_s13 + $0x158] ss:$12 sps:$4 sm:$0xff]  }
  0x20   : > { %v1917_v62 = vld [vmem:[%s1996_s13 + $0x10c] ss:$12 sps:$4 sm:$0xff]   ;;  %v1920_v0 = vld [vmem:[%s1996_s13 + $0x108] ss:$12 sps:$4 sm:$0xff]   ;;  %v1921_v1 = vld [vmem:[%s1996_s13 + $0x170] ss:$12 sps:$4 sm:$0xff]  }
  0x21   : > { %1660 = vmatpush3.bf16.msra.mxu0 %v1851_v13  ;;  %1828 = vmatpush3.bf16.msra.mxu1 %v1851_v13 }
  0x22   : > { %1661 = vmatprep.subr.bf16.mxu0 %v1852_v14  ;;  %1821 = vmatprep.subr.bf16.mxu1 %v1852_v14 }
  0x25   : > { %1662 = vmatpush3.bf16.msra.mxu0 %v1853_v15  ;;  %1829 = vmatpush3.bf16.msra.mxu1 %v1853_v15 }
  0x26   : > { %1663 = vmatprep.subr.bf16.mxu0 %v1854_v16  ;;  %1822 = vmatprep.subr.bf16.mxu1 %v1854_v16 }
  0x29   : > { %1664 = vmatpush3.bf16.msra.mxu0 %v1855_v17  ;;  %1830 = vmatpush3.bf16.msra.mxu1 %v1855_v17 }
  0x2a   : > { %1779 = vmatprep.subr.bf16.mxu1 %v1862_v18 }
  0x2c   : > { %764 = vmatmul.mubr.bf16.vlgmr.msra.gmra.mxu0 %v1856_v19  ;;  %860 = vmatmul.mubr.bf16.vlgmr.msra.gmra.mxu1 %v1859_v20 }
  0x2d   : > { %1780 = vmatpush3.bf16.msra.mxu1 %v1862_v18  ;;  %771 = vmatprep.mubr.bf16.mxu0 %v1863_v21 }
  0x2e   : > { %867 = vmatprep.mubr.bf16.mxu1 %v1865_v22  ;;  %1781 = vmatprep.subr.bf16.mxu1 %v1875_v23 }
  0x31   : > { %1782 = vmatpush3.bf16.msra.mxu1 %v1875_v23 }
  0x34   : > { %772 = vmatmul.mubr.bf16.gmra.mxu0 %v1867_v24  ;;  %868 = vmatmul.mubr.bf16.gmra.mxu1 %v1868_v25 }
  0x35   : > { %779 = vmatprep.mubr.bf16.mxu0 %v1869_v26  ;;  %875 = vmatprep.mubr.bf16.mxu1 %v1871_v27 }
  0x3c   : > { %780 = vmatmul.mubr.bf16.gmra.mxu0 %v1873_v28  ;;  %876 = vmatmul.mubr.bf16.gmra.mxu1 %v1874_v29 }
  0x3d   : > { %787 = vmatprep.mubr.bf16.mxu0 %v1876_v30  ;;  %883 = vmatprep.mubr.bf16.mxu1 %v1878_v31 }
  0x44   : > { %788 = vmatmul.mubr.bf16.gmra.mxu0 %v1880_v32  ;;  %884 = vmatmul.mubr.bf16.gmra.mxu1 %v1881_v33 }
  0x45   : > { %795 = vmatprep.mubr.bf16.mxu0 %v1882_v34  ;;  %1783 = vmatprep.mubr.msk.bf16.mxu1 %vm682_vm0, %v1884_v35 }
  0x4c   : > { %796 = vmatmul.mubr.bf16.gmra.mxu0 %v1885_v36  ;;  %1784 = vmatmul.mubr.msk.bf16.vlgmr.msra.gmra.mxu1 %vm682_vm0, %v1886_v37 }
  0x4d   : > { %803 = vmatprep.mubr.bf16.mxu0 %v1887_v38  ;;  %1787 = vmatprep.mubr.msk.bf16.mxu1 %vm682_vm0, %v1889_v39  ;;  %v1634_v39 = vld [vmem:[%s2113_s11 + $0x8] sm:$0xff]  }
  0x54   : > { %804 = vmatmul.mubr.bf16.gmra.mxu0 %v1890_v40  ;;  %1788 = vmatmul.mubr.msk.bf16.gmra.mxu1 %vm682_vm0, %v1891_v41 }
  0x55   : > { %811 = vmatprep.mubr.bf16.mxu0 %v1892_v42  ;;  %1791 = vmatprep.mubr.msk.bf16.mxu1 %vm682_vm0, %v1894_v43  ;;  %v2125_v43 = vld [vmem:[%s2318_s2] ss:$0 sm:$0xff] }
  0x5c   : > { %812 = vmatmul.mubr.bf16.gmra.mxu0 %v1895_v44  ;;  %1792 = vmatmul.mubr.msk.bf16.gmra.mxu1 %vm682_vm0, %v1896_v45  ;;  %v1571_v44 = vld [vmem:[%s2113_s11] sm:$0xff]  }
  0x5d   : > { %819 = vmatprep.mubr.bf16.mxu0 %v1897_v46  ;;  %1795 = vmatprep.mubr.msk.bf16.mxu1 %vm682_vm0, %v1899_v47  ;;  %v1576_v47 = vunpack.c.l.bf16 %v1634_v39 }
  0x64   : > { %820 = vmatmul.mubr.bf16.gmra.mxu0 %v1900_v48  ;;  %1796 = vmatmul.mubr.msk.bf16.gmra.mxu1 %vm682_vm0, %v1901_v49 }
  0x65   : > { %827 = vmatprep.mubr.bf16.mxu0 %v1902_v50  ;;  %1799 = vmatprep.mubr.msk.bf16.mxu1 %vm682_vm0, %v1904_v51 }
  0x6c   : > { %828 = vmatmul.mubr.bf16.gmra.mxu0 %v1905_v52  ;;  %1800 = vmatmul.mubr.msk.bf16.gmra.mxu1 %vm682_vm0, %v1906_v53  ;;  %v1572_v52 = vunpack.c.l.bf16 %v1571_v44 }
  0x6d   : > { %835 = vmatprep.mubr.bf16.mxu0 %v1907_v54  ;;  %1803 = vmatprep.mubr.msk.bf16.mxu1 %vm682_vm0, %v1909_v55 }
  0x74   : > { %836 = vmatmul.mubr.bf16.gmra.mxu0 %v1910_v56  ;;  %1804 = vmatmul.mubr.msk.bf16.gmra.mxu1 %vm682_vm0, %v1911_v57  ;;  %v1577_v56 = vunpack.c.h.bf16 %v1634_v39 }
  0x75   : > { %843 = vmatprep.mubr.bf16.mxu0 %v1912_v58  ;;  %1807 = vmatprep.mubr.msk.bf16.mxu1 %vm682_vm0, %v1914_v59 }
  0x7c   : > { %844 = vmatmul.mubr.bf16.gmra.mxu0 %v1915_v60  ;;  %1808 = vmatmul.mubr.msk.bf16.gmra.mxu1 %vm682_vm0, %v1916_v61  ;;  %v1636_v61 = vld [vmem:[%s2113_s11 + $0x18] sm:$0xff]  }
  0x7d   : > { %851 = vmatprep.mubr.bf16.mxu0 %v1917_v62  ;;  %1811 = vmatprep.mubr.msk.bf16.mxu1 %vm682_vm0, %v1919_v63  ;;  %v1585_v39 = vunpack.c.h.bf16 %v1636_v61 }
  0x84   : > { %852 = vmatmul.mubr.bf16.gmra.mxu0 %v1920_v0  ;;  %1812 = vmatmul.mubr.msk.bf16.gmra.mxu1 %vm682_vm0, %v1921_v1 }
  0xec   : > { %v1665_v2 = vpop.f32.mrf.mxu0  ;;  %v1737_v3 = vpop.f32.mrf.mxu1 }
  0xee   : > { %v1666_v4 = vpop.f32.mrf.mxu0  ;;  %v1738_v5 = vpop.f32.mrf.mxu1 }
  0xef   : > { %v2089_v6 = vadd.f32 %v1738_v5, %v1737_v3  ;;  %v1667_v40 = vadd.f32 %v1666_v4, %v1665_v2  ;;  %v2135_v4 = vld [vmem:[%s2113_s11 + $0x10] sm:$0xff]  }
  0xf0   : > { %v1668_v7 = vpop.f32.mrf.mxu0  ;;  %v1740_v8 = vpop.f32.mrf.mxu1 }
  0xf1   : > { %v766_v51 = vadd.f32 %v1667_v40, %v2125_v43 }
  0xf2   : > { %v1669_v9 = vpop.f32.mrf.mxu0  ;;  %v1741_v10 = vpop.f32.mrf.mxu1 }
  0xf3   : > { %v2091_v11 = vadd.f32 %v1741_v10, %v1740_v8  ;;  %v1670_v53 = vadd.f32 %v1669_v9, %v1668_v7  ;;  %v1573_v10 = vunpack.c.h.bf16 %v1571_v44 }
  0xf4   : > { %v1671_v12 = vpop.f32.mrf.mxu0  ;;  %v1743_v13 = vpop.f32.mrf.mxu1 }
  0xf5   : > { %v769_v8 = vadd.f32 %v1670_v53, %v2125_v43 }
  0xf6   : > { %v1672_v14 = vpop.f32.mrf.mxu0  ;;  %v1744_v15 = vpop.f32.mrf.mxu1 }
  0xf7   : > { %v2093_v16 = vadd.f32 %v1744_v15, %v1743_v13  ;;  %v1673_v36 = vadd.f32 %v1672_v14, %v1671_v12  ;;  %v1584_v12 = vunpack.c.l.bf16 %v1636_v61 }
  0xf8   : > { %v1674_v17 = vpop.f32.mrf.mxu0  ;;  %v1746_v18 = vpop.f32.mrf.mxu1 }
  0xf9   : > { %v774_v46 = vadd.f32 %v1673_v36, %v2125_v43 }
  0xfa   : > { %v1675_v19 = vpop.f32.mrf.mxu0  ;;  %v1747_v20 = vpop.f32.mrf.mxu1 }
  0xfb   : > { %v2095_v21 = vadd.f32 %v1747_v20, %v1746_v18  ;;  %v1676_v45 = vadd.f32 %v1675_v19, %v1674_v17 }
  0xfc   : > { %v1677_v22 = vpop.f32.mrf.mxu0  ;;  %v1749_v23 = vpop.f32.mrf.mxu1 }
  0xfd   : > { %v777_v60 = vadd.f32 %v1676_v45, %v2125_v43 }
  0xfe   : > { %v1678_v24 = vpop.f32.mrf.mxu0  ;;  %v1750_v25 = vpop.f32.mrf.mxu1 }
  0xff   : > { %v2097_v26 = vadd.f32 %v1750_v25, %v1749_v23  ;;  %v1679_v0 = vadd.f32 %v1678_v24, %v1677_v22  ;;  %v1580_v22 = vunpack.c.l.bf16 %v2135_v4 }
 0x100   : > { %v2099_v27 = vpop.f32.mrf.mxu0  ;;  %v1752_v28 = vpop.f32.mrf.mxu1 }
 0x102   : > { %v2101_v29 = vpop.f32.mrf.mxu0  ;;  %v1753_v30 = vpop.f32.mrf.mxu1 }
 0x103   : > { %v2104_v31 = vadd.f32 %v1753_v30, %v1752_v28  ;;  %v782_v28 = vadd.f32 %v1679_v0, %v2125_v43  ;;  %v1682_v30 = vadd.f32 %v2101_v29, %v2099_v27  ;;  %v1581_v27 = vunpack.c.h.bf16 %v2135_v4 }
 0x104   : > { %v1683_v32 = vpop.f32.mrf.mxu0  ;;  %v2106_v33 = vpop.f32.mrf.mxu1 }
 0x106   : > { %v1684_v34 = vpop.f32.mrf.mxu0  ;;  %v2115_v35 = vpop.f32.mrf.mxu1 }
 0x107   : > { %v1685_v57 = vadd.f32 %v1684_v34, %v1683_v32 }
 0x108   : > { %v1686_v37 = vpop.f32.mrf.mxu0  ;;  %v2117_v38 = vpop.f32.mrf.mxu1 }
 0x109   : > { %v790_v17 = vadd.f32 %v1685_v57, %v2125_v43 }
 0x10a   : > { %v1687_v41 = vpop.f32.mrf.mxu0  ;;  %v2120_v42 = vpop.f32.mrf.mxu1 }
 0x10b   : > { %v1688_v5 = vadd.f32 %v1687_v41, %v1686_v37 }
 0x10c   : > { %v1689_v48 = vpop.f32.mrf.mxu0  ;;  %v1785_v49 = vpop.f32.mrf.mxu1 }
 0x10d   : > { %v935_v50 = vadd.f32 %v1785_v49, %v774_v46  ;;  %v793_v37 = vadd.f32 %v1688_v5, %v2125_v43  ;;  %v1638_v46 = vld [vmem:[%s2113_s11 + $0x28] sm:$0xff]  }
 0x10e   : > { %v1690_v54 = vpop.f32.mrf.mxu0  ;;  %v926_v55 = vpop.f32.mrf.mxu1  ;;  %v1592_v61 = vunpack.c.l.bf16 %v1638_v46 }
 0x10f   : > { %v1119_v58 = vadd.f32 %v1576_v47, %v935_v50  ;;  %v927_v59 = vadd.f32 %v926_v55, %v766_v51  ;;  %v1691_v29 = vadd.f32 %v1690_v54, %v1689_v48  ;;  %v1637_v55 = vld [vmem:[%s2113_s11 + $0x20] sm:$0xff]  }
 0x110   : > { %v2132_v62 = vpop.f32.mrf.mxu0  ;;  %v1786_v63 = vpop.f32.mrf.mxu1  ;;  %v1588_v4 = vunpack.c.l.bf16 %v1637_v55 }
 0x111   : > { %v1151_v1 = vmax.f32 %v1119_v58, 0.0  ;;  %v1117_v2 = vadd.f32 %v1572_v52, %v927_v59  ;;  %v938_v3 = vadd.f32 %v1786_v63, %v777_v60  ;;  %v785_v58 = vadd.f32 %v1682_v30, %v2125_v43 }
 0x112   : > { %v1693_v7 = vpop.f32.mrf.mxu0  ;;  %v929_v9 = vpop.f32.mrf.mxu1 }
 0x113   : > { %v1540_v13 = vpack.c.bf16 %v1151_v1, %v1151_v1  ;;  %v1149_v14 = vmax.f32 %v1117_v2, 0.0  ;;  %v1120_v15 = vadd.f32 %v1577_v56, %v938_v3  ;;  %v930_v18 = vadd.f32 %v929_v9, %v769_v8 }
 0x114   : > { %v1695_v19 = vpop.f32.mrf.mxu0  ;;  %v1789_v20 = vpop.f32.mrf.mxu1 }
 0x115   : > { %1312 = vst.msk [vmem:[%s2142_s17 + $0x8] sm:$0xf] %vm1309_vm1, %v1540_v13  ;;  %v1538_v23 = vpack.c.bf16 %v1149_v14, %v1149_v14  ;;  %v1152_v24 = vmax.f32 %v1120_v15, 0.0  ;;  %v951_v25 = vadd.f32 %v1789_v20, %v790_v17  ;;  %v1118_v32 = vadd.f32 %v1573_v10, %v930_v18 }
 0x116   : > { %v1696_v34 = vpop.f32.mrf.mxu0  ;;  %v942_v36 = vpop.f32.mrf.mxu1  ;;  %v798_v10 = vadd.f32 %v1691_v29, %v2125_v43  ;;  %v1593_v17 = vunpack.c.h.bf16 %v1638_v46 }
 0x117   : > { %1310 = vst.msk [vmem:[%s2142_s17] sm:$0xf] %vm1309_vm1, %v1538_v23  ;;  %v1541_v40 = vpack.c.bf16 %v1152_v24, %v1152_v24  ;;  %v1123_v41 = vadd.f32 %v1584_v12, %v951_v25  ;;  %v1697_v44 = vadd.f32 %v1696_v34, %v1695_v19  ;;  %v943_v45 = vadd.f32 %v942_v36, %v782_v28 }
 0x118   : > { %v1150_v47 = vmax.f32 %v1118_v32, 0.0  ;;  %v1698_v49 = vpop.f32.mrf.mxu0  ;;  %v1790_v50 = vpop.f32.mrf.mxu1  ;;  %v1694_v12 = vadd.f32 %v1693_v7, %v2132_v62  ;;  %v1639_v32 = vld [vmem:[%s2113_s11 + $0x30] sm:$0xff]  }
 0x119   : > { %1313 = vst.msk [vmem:[%s2142_s17 + $0xc] sm:$0xf] %vm1309_vm1, %v1541_v40  ;;  %v1155_v51 = vmax.f32 %v1123_v41, 0.0  ;;  %v1121_v52 = vadd.f32 %v1580_v22, %v943_v45  ;;  %v954_v53 = vadd.f32 %v1790_v50, %v793_v37  ;;  %v806_v60 = vadd.f32 %v1697_v44, %v2125_v43 }
 0x11a   : > { %v1539_v56 = vpack.c.bf16 %v1150_v47, %v1150_v47  ;;  %v1699_v57 = vpop.f32.mrf.mxu0  ;;  %v945_v59 = vpop.f32.mrf.mxu1  ;;  %v801_v37 = vadd.f32 %v1694_v12, %v2125_v43  ;;  %v1589_v40 = vunpack.c.h.bf16 %v1637_v55  ;;  %v1596_v50 = vunpack.c.l.bf16 %v1639_v32 }
 0x11b   : > { %v1544_v63 = vpack.c.bf16 %v1155_v51, %v1155_v51  ;;  %v1153_v0 = vmax.f32 %v1121_v52, 0.0  ;;  %v1124_v1 = vadd.f32 %v1585_v39, %v954_v53  ;;  %v1700_v48 = vadd.f32 %v1699_v57, %v1698_v49  ;;  %v1640_v52 = vld [vmem:[%s2113_s11 + $0x38] sm:$0xff]  }
 0x11c   : > { %1311 = vst.msk [vmem:[%s2142_s17 + $0x4] sm:$0xf] %vm1309_vm1, %v1539_v56  ;;  %v946_v54 = vadd.f32 %v945_v59, %v785_v58  ;;  %v1701_v2 = vpop.f32.mrf.mxu0  ;;  %v1793_v3 = vpop.f32.mrf.mxu1 }
 0x11d   : > { %1316 = vst.msk [vmem:[%s2142_s17 + $0x18] sm:$0xf] %vm1309_vm1, %v1544_v63  ;;  %v1542_v5 = vpack.c.bf16 %v1153_v0, %v1153_v0  ;;  %v1156_v8 = vmax.f32 %v1124_v1, 0.0  ;;  %v967_v9 = vadd.f32 %v1793_v3, %v806_v60  ;;  %v809_v22 = vadd.f32 %v1700_v48, %v2125_v43 }
 0x11e   : > { %v1122_v13 = vadd.f32 %v1581_v27, %v946_v54  ;;  %v1702_v14 = vpop.f32.mrf.mxu0  ;;  %v958_v15 = vpop.f32.mrf.mxu1  ;;  %v1600_v63 = vunpack.c.l.bf16 %v1640_v52  ;;  %v1597_v3 = vunpack.c.h.bf16 %v1639_v32 }
 0x11f   : > { %1314 = vst.msk [vmem:[%s2142_s17 + $0x10] sm:$0xf] %vm1309_vm1, %v1542_v5  ;;  %v1545_v18 = vpack.c.bf16 %v1156_v8, %v1156_v8  ;;  %v1127_v19 = vadd.f32 %v1592_v61, %v967_v9  ;;  %v959_v20 = vadd.f32 %v958_v15, %v798_v10  ;;  %v1703_v62 = vadd.f32 %v1702_v14, %v1701_v2 }
 0x120   : > { %v1154_v23 = vmax.f32 %v1122_v13, 0.0  ;;  %v1704_v24 = vpop.f32.mrf.mxu0  ;;  %v1794_v25 = vpop.f32.mrf.mxu1  ;;  %v1601_v14 = vunpack.c.h.bf16 %v1640_v52 }
 0x121   : > { %1317 = vst.msk [vmem:[%s2142_s17 + $0x1c] sm:$0xf] %vm1309_vm1, %v1545_v18  ;;  %v1159_v28 = vmax.f32 %v1127_v19, 0.0  ;;  %v1125_v7 = vadd.f32 %v1588_v4, %v959_v20  ;;  %v970_v30 = vadd.f32 %v1794_v25, %v809_v22  ;;  %v814_v53 = vadd.f32 %v1703_v62, %v2125_v43 }
 0x122   : > { %v1543_v34 = vpack.c.bf16 %v1154_v23, %v1154_v23  ;;  %v1705_v36 = vpop.f32.mrf.mxu0  ;;  %v961_v39 = vpop.f32.mrf.mxu1  ;;  %v1641_v23 = vld [vmem:[%s2113_s11 + $0x40] sm:$0xff]  }
 0x123   : > { %v1548_v41 = vpack.c.bf16 %v1159_v28, %v1159_v28  ;;  %v1157_v44 = vmax.f32 %v1125_v7, 0.0  ;;  %v1128_v45 = vadd.f32 %v1593_v17, %v970_v30  ;;  %v962_v46 = vadd.f32 %v961_v39, %v801_v37 }
 0x124   : > { %1315 = vst.msk [vmem:[%s2142_s17 + $0x14] sm:$0xf] %vm1309_vm1, %v1543_v34  ;;  %v1707_v47 = vpop.f32.mrf.mxu0  ;;  %v1797_v49 = vpop.f32.mrf.mxu1  ;;  %v1706_v51 = vadd.f32 %v1705_v36, %v1704_v24  ;;  %v1604_v32 = vunpack.c.l.bf16 %v1641_v23 }
 0x125   : > { %1320 = vst.msk [vmem:[%s2142_s17 + $0x28] sm:$0xf] %vm1309_vm1, %v1548_v41  ;;  %v1546_v27 = vpack.c.bf16 %v1157_v44, %v1157_v44  ;;  %v1160_v29 = vmax.f32 %v1128_v45, 0.0  ;;  %v1126_v55 = vadd.f32 %v1589_v40, %v962_v46 }
 0x126   : > { %v1708_v56 = vpop.f32.mrf.mxu0  ;;  %v974_v57 = vpop.f32.mrf.mxu1  ;;  %v817_v2 = vadd.f32 %v1706_v51, %v2125_v43 }
 0x127   : > { %1318 = vst.msk [vmem:[%s2142_s17 + $0x20] sm:$0xf] %vm1309_vm1, %v1546_v27  ;;  %v1549_v58 = vpack.c.bf16 %v1160_v29, %v1160_v29  ;;  %v1709_v59 = vadd.f32 %v1708_v56, %v1707_v47  ;;  %v975_v60 = vadd.f32 %v974_v57, %v814_v53  ;;  %v1158_v61 = vmax.f32 %v1126_v55, 0.0  ;;  %v1642_v56 = vld [vmem:[%s2113_s11 + $0x48] sm:$0xff]  }
 0x128   : > { %v1710_v0 = vpop.f32.mrf.mxu0  ;;  %v1798_v1 = vpop.f32.mrf.mxu1  ;;  %v1605_v53 = vunpack.c.h.bf16 %v1641_v23 }
 0x129   : > { %1321 = vst.msk [vmem:[%s2142_s17 + $0x2c] sm:$0xf] %vm1309_vm1, %v1549_v58  ;;  %v822_v48 = vadd.f32 %v1709_v59, %v2125_v43  ;;  %v1129_v54 = vadd.f32 %v1596_v50, %v975_v60  ;;  %v1547_v4 = vpack.c.bf16 %v1158_v61, %v1158_v61  ;;  %v2209_v61 = vld [vmem:[%s2113_s11 + $0x68] sm:$0xff]  }
 0x12a   : > { %v1711_v5 = vpop.f32.mrf.mxu0  ;;  %v977_v8 = vpop.f32.mrf.mxu1 }
 0x12b   : > { %v983_v9 = vadd.f32 %v1797_v49, %v822_v48  ;;  %v1161_v10 = vmax.f32 %v1129_v54, 0.0  ;;  %v1712_v12 = vadd.f32 %v1711_v5, %v1710_v0  ;;  %v978_v13 = vadd.f32 %v977_v8, %v817_v2  ;;  %1319 = vst.msk [vmem:[%s2142_s17 + $0x24] sm:$0xf] %vm1309_vm1, %v1547_v4  ;;  %v2218_v4 = vld [vmem:[%s2113_s11 + $0x50] sm:$0xff]   ;;  %v2221_v5 = vld [vmem:[%s2113_s11 + $0x78] sm:$0xff]  }
 0x12c   : > { %v1713_v15 = vpop.f32.mrf.mxu0  ;;  %v1801_v17 = vpop.f32.mrf.mxu1 }
 0x12d   : > { %v1131_v18 = vadd.f32 %v1600_v63, %v983_v9  ;;  %v1550_v19 = vpack.c.bf16 %v1161_v10, %v1161_v10  ;;  %v825_v20 = vadd.f32 %v1712_v12, %v2125_v43  ;;  %v1130_v22 = vadd.f32 %v1597_v3, %v978_v13  ;;  %v2212_v63 = vld [vmem:[%s2113_s11 + $0x60] sm:$0xff]  }
 0x12e   : > { %v1714_v24 = vpop.f32.mrf.mxu0  ;;  %v990_v25 = vpop.f32.mrf.mxu1  ;;  %v1608_v3 = vunpack.c.l.bf16 %v1642_v56  ;;  %v1609_v9 = vunpack.c.h.bf16 %v1642_v56  ;;  %v1624_v12 = vunpack.c.l.bf16 %v2209_v61  ;;  %v1620_v13 = vunpack.c.l.bf16 %v2212_v63 }
 0x12f   : > { %v1163_v28 = vmax.f32 %v1131_v18, 0.0  ;;  %1322 = vst.msk [vmem:[%s2142_s17 + $0x30] sm:$0xf] %vm1309_vm1, %v1550_v19  ;;  %v986_v62 = vadd.f32 %v1798_v1, %v825_v20  ;;  %v1162_v7 = vmax.f32 %v1130_v22, 0.0  ;;  %v1715_v30 = vadd.f32 %v1714_v24, %v1713_v15  ;;  %v2233_v22 = vld [vmem:[%s2113_s11 + $0x70] sm:$0xff]  }
 0x130   : > { %v1716_v34 = vpop.f32.mrf.mxu0  ;;  %v2193_v36 = vpop.f32.mrf.mxu1  ;;  %v870_v20 = vadd.f32 %v2093_v16, %v2125_v43  ;;  %v1757_v16 = vadd.f32 %v2115_v35, %v2106_v33  ;;  %v873_v33 = vadd.f32 %v2095_v21, %v2125_v43 }
 0x131   : > { %v1552_v37 = vpack.c.bf16 %v1163_v28, %v1163_v28  ;;  %v1132_v39 = vadd.f32 %v1601_v14, %v986_v62  ;;  %v1551_v40 = vpack.c.bf16 %v1162_v7, %v1162_v7  ;;  %v830_v41 = vadd.f32 %v1715_v30, %v2125_v43 }
 0x132   : > { %v1717_v44 = vpop.f32.mrf.mxu0  ;;  %v993_v45 = vpop.f32.mrf.mxu1  ;;  %v1625_v14 = vunpack.c.h.bf16 %v2209_v61  ;;  %v1613_v28 = vunpack.c.h.bf16 %v2218_v4  ;;  %v1621_v62 = vunpack.c.h.bf16 %v2212_v63  ;;  %v1632_v7 = vunpack.c.l.bf16 %v2221_v5 }
 0x133   : > { %1324 = vst.msk [vmem:[%s2142_s17 + $0x38] sm:$0xf] %vm1309_vm1, %v1552_v37  ;;  %v1164_v46 = vmax.f32 %v1132_v39, 0.0  ;;  %1323 = vst.msk [vmem:[%s2142_s17 + $0x34] sm:$0xf] %vm1309_vm1, %v1551_v40  ;;  %v991_v47 = vadd.f32 %v990_v25, %v830_v41  ;;  %v1718_v49 = vadd.f32 %v1717_v44, %v1716_v34  ;;  %v1612_v25 = vunpack.c.l.bf16 %v2218_v4  ;;  %v2241_v37 = vld [vmem:[%s2113_s11 + $0x58] sm:$0xff]  }
 0x134   : > { %v1719_v50 = vpop.f32.mrf.mxu0  ;;  %v2200_v27 = vpop.f32.mrf.mxu1  ;;  %v862_v40 = vadd.f32 %v2089_v6, %v2125_v43  ;;  %v1628_v44 = vunpack.c.l.bf16 %v2233_v22  ;;  %v1616_v6 = vunpack.c.l.bf16 %v2241_v37  ;;  %v865_v61 = vadd.f32 %v2091_v11, %v2125_v43 }
 0x135   : > { %v1553_v29 = vpack.c.bf16 %v1164_v46, %v1164_v46  ;;  %v1133_v51 = vadd.f32 %v1604_v32, %v991_v47  ;;  %v833_v52 = vadd.f32 %v1718_v49, %v2125_v43  ;;  %v886_v21 = vadd.f32 %v1757_v16, %v2125_v43 }
 0x136   : > { %v1720_v55 = vpop.f32.mrf.mxu0  ;;  %v2204_v57 = vpop.f32.mrf.mxu1 }
 0x137   : > { %1325 = vst.msk [vmem:[%s2142_s17 + $0x3c] sm:$0xf] %vm1309_vm1, %v1553_v29  ;;  %v1165_v58 = vmax.f32 %v1133_v51, 0.0  ;;  %v994_v59 = vadd.f32 %v993_v45, %v833_v52  ;;  %v1721_v60 = vadd.f32 %v1720_v55, %v1719_v50  ;;  %v1633_v45 = vunpack.c.h.bf16 %v2221_v5 }
 0x138   : > { %v1722_v0 = vpop.f32.mrf.mxu0  ;;  %v2214_v1 = vpop.f32.mrf.mxu1  ;;  %v1629_v52 = vunpack.c.h.bf16 %v2233_v22 }
 0x139   : > { %v1554_v48 = vpack.c.bf16 %v1165_v58, %v1165_v58  ;;  %v1134_v54 = vadd.f32 %v1605_v53, %v994_v59  ;;  %v838_v2 = vadd.f32 %v1721_v60, %v2125_v43 }
 0x13a   : > { %v1723_v8 = vpop.f32.mrf.mxu0  ;;  %v2223_v10 = vpop.f32.mrf.mxu1 }
 0x13b   : > { %1326 = vst.msk [vmem:[%s2142_s17 + $0x40] sm:$0xf] %vm1309_vm1, %v1554_v48  ;;  %v1166_v15 = vmax.f32 %v1134_v54, 0.0  ;;  %v999_v18 = vadd.f32 %v1801_v17, %v838_v2  ;;  %v1724_v19 = vadd.f32 %v1723_v8, %v1722_v0 }
 0x13c   : > { %v1725_v23 = vpop.f32.mrf.mxu0  ;;  %v1809_v24 = vpop.f32.mrf.mxu1 }
 0x13d   : > { %v1555_v30 = vpack.c.bf16 %v1166_v15, %v1166_v15  ;;  %v1135_v32 = vadd.f32 %v1608_v3, %v999_v18  ;;  %v841_v17 = vadd.f32 %v1724_v19, %v2125_v43  ;;  %v1031_v34 = vadd.f32 %v1809_v24, %v870_v20 }
 0x13e   : > { %v1726_v39 = vpop.f32.mrf.mxu0  ;;  %v1022_v41 = vpop.f32.mrf.mxu1  ;;  %v1760_v3 = vadd.f32 %v2120_v42, %v2117_v38  ;;  %v878_v38 = vadd.f32 %v2097_v26, %v2125_v43 }
 0x13f   : > { %1327 = vst.msk [vmem:[%s2142_s17 + $0x44] sm:$0xf] %vm1309_vm1, %v1555_v30  ;;  %v1167_v46 = vmax.f32 %v1135_v32, 0.0  ;;  %v1002_v47 = vadd.f32 %v2193_v36, %v841_v17  ;;  %v1143_v49 = vadd.f32 %v1624_v12, %v1031_v34  ;;  %v1727_v50 = vadd.f32 %v1726_v39, %v1725_v23 }
 0x140   : > { %v1023_v29 = vadd.f32 %v1022_v41, %v862_v40  ;;  %v1728_v51 = vpop.f32.mrf.mxu0  ;;  %v1810_v35 = vpop.f32.mrf.mxu1  ;;  %v889_v40 = vadd.f32 %v1760_v3, %v2125_v43 }
 0x141   : > { %v1556_v53 = vpack.c.bf16 %v1167_v46, %v1167_v46  ;;  %v1136_v55 = vadd.f32 %v1609_v9, %v1002_v47  ;;  %v1175_v56 = vmax.f32 %v1143_v49, 0.0  ;;  %v846_v58 = vadd.f32 %v1727_v50, %v2125_v43 }
 0x142   : > { %v1141_v59 = vadd.f32 %v1620_v13, %v1023_v29  ;;  %v1034_v36 = vadd.f32 %v1810_v35, %v873_v33  ;;  %v1729_v60 = vpop.f32.mrf.mxu0  ;;  %v1025_v63 = vpop.f32.mrf.mxu1 }
 0x143   : > { %1328 = vst.msk [vmem:[%s2142_s17 + $0x48] sm:$0xf] %vm1309_vm1, %v1556_v53  ;;  %v1168_v0 = vmax.f32 %v1136_v55, 0.0  ;;  %v1564_v48 = vpack.c.bf16 %v1175_v56, %v1175_v56  ;;  %v1007_v54 = vadd.f32 %v2204_v57, %v846_v58  ;;  %v1730_v2 = vadd.f32 %v1729_v60, %v1728_v51 }
 0x144   : > { %v1173_v8 = vmax.f32 %v1141_v59, 0.0  ;;  %v1144_v9 = vadd.f32 %v1625_v14, %v1034_v36  ;;  %v1026_v12 = vadd.f32 %v1025_v63, %v865_v61  ;;  %v1731_v13 = vpop.f32.mrf.mxu0  ;;  %v1813_v15 = vpop.f32.mrf.mxu1  ;;  %v881_v51 = vadd.f32 %v2104_v31, %v2125_v43 }
 0x145   : > { %v1557_v11 = vpack.c.bf16 %v1168_v0, %v1168_v0  ;;  %1336 = vst.msk [vmem:[%s2142_s17 + $0x68] sm:$0xf] %vm1309_vm1, %v1564_v48  ;;  %v1137_v18 = vadd.f32 %v1612_v25, %v1007_v54  ;;  %v849_v19 = vadd.f32 %v1730_v2, %v2125_v43  ;;  %v1047_v20 = vadd.f32 %v1813_v15, %v886_v21 }
 0x146   : > { %v1562_v23 = vpack.c.bf16 %v1173_v8, %v1173_v8  ;;  %v1176_v57 = vmax.f32 %v1144_v9, 0.0  ;;  %v1142_v24 = vadd.f32 %v1621_v62, %v1026_v12  ;;  %v1732_v30 = vpop.f32.mrf.mxu0  ;;  %v1038_v42 = vpop.f32.mrf.mxu1 }
 0x147   : > { %1329 = vst.msk [vmem:[%s2142_s17 + $0x4c] sm:$0xf] %vm1309_vm1, %v1557_v11  ;;  %v1169_v14 = vmax.f32 %v1137_v18, 0.0  ;;  %v1010_v32 = vadd.f32 %v2223_v10, %v849_v19  ;;  %v1147_v17 = vadd.f32 %v1632_v7, %v1047_v20  ;;  %v1733_v34 = vadd.f32 %v1732_v30, %v1731_v13 }
 0x148   : > { %1334 = vst.msk [vmem:[%s2142_s17 + $0x60] sm:$0xf] %vm1309_vm1, %v1562_v23  ;;  %v1565_v25 = vpack.c.bf16 %v1176_v57, %v1176_v57  ;;  %v1174_v16 = vmax.f32 %v1142_v24, 0.0  ;;  %v1039_v39 = vadd.f32 %v1038_v42, %v878_v38  ;;  %v1734_v62 = vpop.f32.mrf.mxu0  ;;  %v1814_v41 = vpop.f32.mrf.mxu1 }
 0x149   : > { %v1558_v26 = vpack.c.bf16 %v1169_v14, %v1169_v14  ;;  %v1138_v46 = vadd.f32 %v1613_v28, %v1010_v32  ;;  %v1179_v47 = vmax.f32 %v1147_v17, 0.0  ;;  %v854_v10 = vadd.f32 %v1733_v34, %v2125_v43 }
 0x14a   : > { %1337 = vst.msk [vmem:[%s2142_s17 + $0x6c] sm:$0xf] %vm1309_vm1, %v1565_v25  ;;  %v1563_v7 = vpack.c.bf16 %v1174_v16, %v1174_v16  ;;  %v1145_v49 = vadd.f32 %v1628_v44, %v1039_v39  ;;  %v1050_v50 = vadd.f32 %v1814_v41, %v889_v40  ;;  %v1735_v29 = vpop.f32.mrf.mxu0  ;;  %v1041_v33 = vpop.f32.mrf.mxu1 }
 0x14b   : > { %1330 = vst.msk [vmem:[%s2142_s17 + $0x50] sm:$0xf] %vm1309_vm1, %v1558_v26  ;;  %v1170_v4 = vmax.f32 %v1138_v46, 0.0  ;;  %v1568_v28 = vpack.c.bf16 %v1179_v47, %v1179_v47  ;;  %v1015_v35 = vadd.f32 %v2200_v27, %v854_v10  ;;  %v1736_v53 = vadd.f32 %v1735_v29, %v1734_v62 }
 0x14c   : > { %1335 = vst.msk [vmem:[%s2142_s17 + $0x64] sm:$0xf] %vm1309_vm1, %v1563_v7  ;;  %v1177_v55 = vmax.f32 %v1145_v49, 0.0  ;;  %v1148_v44 = vadd.f32 %v1633_v45, %v1050_v50  ;;  %v1042_v56 = vadd.f32 %v1041_v33, %v881_v51  ;;  %v1617_v27 = vunpack.c.h.bf16 %v2241_v37 }
 0x14d   : > { %v1559_v58 = vpack.c.bf16 %v1170_v4, %v1170_v4  ;;  %1340 = vst.msk [vmem:[%s2142_s17 + $0x78] sm:$0xf] %vm1309_vm1, %v1568_v28  ;;  %v1139_v31 = vadd.f32 %v1616_v6, %v1015_v35  ;;  %v857_v59 = vadd.f32 %v1736_v53, %v2125_v43 }
 0x14e   : > { %v1566_v36 = vpack.c.bf16 %v1177_v55, %v1177_v55  ;;  %v1180_v60 = vmax.f32 %v1148_v44, 0.0  ;;  %v1146_v5 = vadd.f32 %v1629_v52, %v1042_v56 }
 0x14f   : > { %1331 = vst.msk [vmem:[%s2142_s17 + $0x54] sm:$0xf] %vm1309_vm1, %v1559_v58  ;;  %v1171_v45 = vmax.f32 %v1139_v31, 0.0  ;;  %v1018_v61 = vadd.f32 %v2214_v1, %v857_v59 }
 0x150   : > { %1338 = vst.msk [vmem:[%s2142_s17 + $0x70] sm:$0xf] %vm1309_vm1, %v1566_v36  ;;  %v1569_v6 = vpack.c.bf16 %v1180_v60, %v1180_v60  ;;  %v1178_v63 = vmax.f32 %v1146_v5, 0.0 }
 0x151   : > { %v1560_v21 = vpack.c.bf16 %v1171_v45, %v1171_v45  ;;  %v1140_v43 = vadd.f32 %v1617_v27, %v1018_v61 }
 0x152   : > { %1341 = vst.msk [vmem:[%s2142_s17 + $0x7c] sm:$0xf] %vm1309_vm1, %v1569_v6  ;;  %v1567_v37 = vpack.c.bf16 %v1178_v63, %v1178_v63 }
 0x153   : > { %1332 = vst.msk [vmem:[%s2142_s17 + $0x58] sm:$0xf] %vm1309_vm1, %v1560_v21  ;;  %v1172_v0 = vmax.f32 %v1140_v43, 0.0 }
 0x154   : > { %1339 = vst.msk [vmem:[%s2142_s17 + $0x74] sm:$0xf] %vm1309_vm1, %v1567_v37 }
 0x155   : > { %v1561_v22 = vpack.c.bf16 %v1172_v0, %v1172_v0 }
 0x157   : > { %1333 = vst.msk [vmem:[%s2142_s17 + $0x5c] sm:$0xf] %vm1309_vm1, %v1561_v22 }
 0x158 PF: > { %s14_s15 = sadd.s32 1, %s1928_s15  }
 0x159   : > { %p11_p4 = scmp.ge.s32.totalorder %s14_s15, 4  }
 0x15b   :  { %13 = sbr.rel (!%p11_p4) target bundleno = 1 (0x1), region = 69 }

// kernel: base_net_forward.45
= control target key start
LH: loop header
LB: loop body
LE: loop exit
PB: predicated region body
PF: predicated region fallthrough
CT: control target
= control target key end

     0   :  { %s1712_s12 = smov 0   ;;  %s1992_s0 = inlined_call_operand.vmem [shape: bf16[512,288], index: 0, kind: input, shape index: {}]   ;;  %s1993_s1 = inlined_call_operand.vmem [shape: bf16[288,32], index: 1, kind: input, shape index: {}]   ;;  %s1994_s2 = inlined_call_operand.vmem [shape: f32[1,32], index: 2, kind: input, shape index: {}]   ;;  %s1995_s3 = inlined_call_operand.vmem [shape: bf16[512,32], index: 3, kind: output, shape index: {}]  }
   0x1 LB: > { %s1253_s13 = sadd.s32 4294967295, %s1690_s12   ;;  %p1257_p0 = scmp.ge.s32.totalorder %s1690_s12, 1  ;;  %s1690_s12 = sphi %s1712_s12, %s13_s12  }
   0x2   : > { %p139_p1 = scmp.lt.s32.totalorder %s1690_s12, 3 }
   0x4   : > { %p140_p2 = pnand %p1257_p0, %p139_p1 }
   0x5   : > { %s1258_s16 = sshll.u32 (!%p140_p2), %s1253_s13, 5 }
   0x6   : > { %143 = sbr.rel (%p140_p2) target bundleno = 342 (0x156), region = 32  ;;  %p165_p3 = scmp.lt.s32.totalorder (!%p140_p2), %s1258_s16, 63 }
   0xb   : > { %v1602_v0 = vld [vmem:[%s1993_s1 + $0x78] sm:$0xff]   ;;  %v1604_v2 = vld [vmem:[%s1993_s1 + $0x70] sm:$0xff]   ;;  %v1606_v4 = vld [vmem:[%s1993_s1 + $0x68] sm:$0xff]   ;;  %s1997_s16 = smov (!%p165_p3, %s1258_s16), 63  ;;  %vm633_vm0 = vcmask 261120   ;;  %vm1164_vm1 = vcmask 257024  }
   0xc   : > { %v1603_v1 = vld [vmem:[%s1993_s1 + $0x38] sm:$0xff]   ;;  %1411 = vmatprep.subr.bf16.mxu0 %v1602_v0  ;;  %1577 = vmatprep.subr.bf16.mxu1 %v1602_v0  ;;  %v1605_v3 = vld [vmem:[%s1993_s1 + $0x30] sm:$0xff]   ;;  %v1607_v5 = vld [vmem:[%s1993_s1 + $0x28] sm:$0xff]   ;;  %s1593_s29 = smul.u32 12, %s1997_s16  ;;  %s1261_s5 = sshll.u32 %s1997_s16, 2 }
   0xd   : > { %1412 = vmatpush3.bf16.msra.mxu0 %v1603_v1  ;;  %1585 = vmatpush3.bf16.msra.mxu1 %v1603_v1  ;;  %v1608_v6 = vld [vmem:[%s1993_s1 + $0x60] sm:$0xff]   ;;  %v1610_v8 = vld [vmem:[%s1993_s1 + $0x58] sm:$0xff]   ;;  %v1612_v10 = vld [vmem:[%s1993_s1 + $0x50] sm:$0xff]   ;;  %s1878_s8 = scalar_lea.vmem %s1995_s3, %s1261_s5 }
   0xe   : > { %1413 = vmatprep.subr.bf16.mxu0 %v1604_v2  ;;  %1578 = vmatprep.subr.bf16.mxu1 %v1604_v2  ;;  %v1609_v7 = vld [vmem:[%s1993_s1 + $0x20] sm:$0xff]   ;;  %s1753_s9 = scalar_lea.vmem %s1992_s0, %s1593_s29  ;;  %v1611_v9 = vld [vmem:[%s1993_s1 + $0x18] sm:$0xff]   ;;  %v1613_v13 = vld [vmem:[%s1993_s1 + $0x10] sm:$0xff]  }
   0xf   : > { %v1620_v11 = vld [vmem:[%s1753_s9 + $0x4] ss:$12 sps:$4 sm:$0xff]   ;;  %v1614_v14 = vld [vmem:[%s1993_s1 + $0x48] sm:$0xff]   ;;  %v1631_v26 = vld [vmem:[%s1753_s9 + $0x34] ss:$12 sps:$4 sm:$0xff]  }
  0x10   : > { %v1623_v12 = vld [vmem:[%s1753_s9 + $0x124] ss:$12 sps:$4 sm:$0xff]   ;;  %714 = vmatprep.mubr.bf16.mxu0 %v1620_v11  ;;  %v1615_v15 = vld [vmem:[%s1993_s1 + $0x8] sm:$0xff]   ;;  %v1633_v27 = vld [vmem:[%s1753_s9 + $0x154] ss:$12 sps:$4 sm:$0xff]  }
  0x11   : > { %1414 = vmatpush3.bf16.msra.mxu0 %v1605_v3  ;;  %1586 = vmatpush3.bf16.msra.mxu1 %v1605_v3  ;;  %v1616_v16 = vld [vmem:[%s1993_s1 + $0x40] sm:$0xff]   ;;  %v1624_v18 = vld [vmem:[%s1993_s1 + $0x88] sm:$0xff]   ;;  %v1635_v28 = vld [vmem:[%s1753_s9 + $0x30] ss:$12 sps:$4 sm:$0xff]  }
  0x12   : > { %1415 = vmatprep.subr.bf16.mxu0 %v1606_v4  ;;  %1579 = vmatprep.subr.bf16.mxu1 %v1606_v4  ;;  %v1617_v17 = vld [vmem:[%s1993_s1] sm:$0xff]   ;;  %v1625_v21 = vld [vmem:[%s1753_s9 + $0x1c] ss:$12 sps:$4 sm:$0xff]   ;;  %v1638_v30 = vld [vmem:[%s1753_s9 + $0x4c] ss:$12 sps:$4 sm:$0xff]  }
  0x13   : > { %810 = vmatprep.mubr.bf16.mxu1 %v1623_v12  ;;  %v1618_v19 = vld [vmem:[%s1753_s9] ss:$12 sps:$4 sm:$0xff]   ;;  %v1627_v22 = vld [vmem:[%s1753_s9 + $0x13c] ss:$12 sps:$4 sm:$0xff]   ;;  %v1629_v24 = vld [vmem:[%s1753_s9 + $0x18] ss:$12 sps:$4 sm:$0xff]  }
  0x14   : > { %v1621_v20 = vld [vmem:[%s1753_s9 + $0x120] ss:$12 sps:$4 sm:$0xff]   ;;  %v1630_v25 = vld [vmem:[%s1753_s9 + $0x138] ss:$12 sps:$4 sm:$0xff]   ;;  %v1636_v29 = vld [vmem:[%s1753_s9 + $0x150] ss:$12 sps:$4 sm:$0xff]  }
  0x15   : > { %1416 = vmatpush3.bf16.msra.mxu0 %v1607_v5  ;;  %1587 = vmatpush3.bf16.msra.mxu1 %v1607_v5  ;;  %v1637_v23 = vld [vmem:[%s1993_s1 + $0x80] sm:$0xff]   ;;  %v1640_v31 = vld [vmem:[%s1753_s9 + $0x16c] ss:$12 sps:$4 sm:$0xff]   ;;  %v1642_v32 = vld [vmem:[%s1753_s9 + $0x48] ss:$12 sps:$4 sm:$0xff]  }
  0x16   : > { %1417 = vmatprep.subr.bf16.mxu0 %v1608_v6  ;;  %1580 = vmatprep.subr.bf16.mxu1 %v1608_v6  ;;  %v1643_v33 = vld [vmem:[%s1753_s9 + $0x168] ss:$12 sps:$4 sm:$0xff]   ;;  %v1644_v34 = vld [vmem:[%s1753_s9 + $0x64] ss:$12 sps:$4 sm:$0xff]   ;;  %v1647_v36 = vld [vmem:[%s1753_s9 + $0x60] ss:$12 sps:$4 sm:$0xff]  }
  0x17   : > { %v1646_v35 = vld [vmem:[%s1753_s9 + $0x8] ss:$12 sps:$4 sm:$0xff]   ;;  %v1648_v37 = vld [vmem:[%s1753_s9 + $0x20] ss:$12 sps:$4 sm:$0xff]   ;;  %v1651_v39 = vld [vmem:[%s1753_s9 + $0x38] ss:$12 sps:$4 sm:$0xff]  }
  0x18   : > { %v1649_v38 = vld [vmem:[%s1753_s9 + $0x7c] ss:$12 sps:$4 sm:$0xff]   ;;  %v1652_v40 = vld [vmem:[%s1753_s9 + $0x78] ss:$12 sps:$4 sm:$0xff]   ;;  %v1654_v42 = vld [vmem:[%s1753_s9 + $0x94] ss:$12 sps:$4 sm:$0xff]  }
  0x19   : > { %1418 = vmatpush3.bf16.msra.mxu0 %v1609_v7  ;;  %1588 = vmatpush3.bf16.msra.mxu1 %v1609_v7  ;;  %v1653_v41 = vld [vmem:[%s1753_s9 + $0x50] ss:$12 sps:$4 sm:$0xff]   ;;  %v1656_v43 = vld [vmem:[%s1753_s9 + $0x68] ss:$12 sps:$4 sm:$0xff]   ;;  %v1658_v45 = vld [vmem:[%s1753_s9 + $0x80] ss:$12 sps:$4 sm:$0xff]  }
  0x1a   : > { %1419 = vmatprep.subr.bf16.mxu0 %v1610_v8  ;;  %1581 = vmatprep.subr.bf16.mxu1 %v1610_v8  ;;  %v1657_v44 = vld [vmem:[%s1753_s9 + $0x90] ss:$12 sps:$4 sm:$0xff]   ;;  %v1659_v46 = vld [vmem:[%s1753_s9 + $0xac] ss:$12 sps:$4 sm:$0xff]   ;;  %v1662_v48 = vld [vmem:[%s1753_s9 + $0xa8] ss:$12 sps:$4 sm:$0xff]  }
  0x1b   : > { %v1661_v47 = vld [vmem:[%s1753_s9 + $0x98] ss:$12 sps:$4 sm:$0xff]   ;;  %v1663_v49 = vld [vmem:[%s1753_s9 + $0xb0] ss:$12 sps:$4 sm:$0xff]   ;;  %v1666_v51 = vld [vmem:[%s1753_s9 + $0xc8] ss:$12 sps:$4 sm:$0xff]  }
  0x1c   : > { %v1664_v50 = vld [vmem:[%s1753_s9 + $0xc4] ss:$12 sps:$4 sm:$0xff]   ;;  %v1667_v52 = vld [vmem:[%s1753_s9 + $0xc0] ss:$12 sps:$4 sm:$0xff]   ;;  %v1669_v54 = vld [vmem:[%s1753_s9 + $0xdc] ss:$12 sps:$4 sm:$0xff]  }
  0x1d   : > { %1420 = vmatpush3.bf16.msra.mxu0 %v1611_v9  ;;  %1589 = vmatpush3.bf16.msra.mxu1 %v1611_v9  ;;  %v1668_v53 = vld [vmem:[%s1753_s9 + $0xe0] ss:$12 sps:$4 sm:$0xff]   ;;  %v1671_v55 = vld [vmem:[%s1753_s9 + $0xf8] ss:$12 sps:$4 sm:$0xff]   ;;  %v1673_v57 = vld [vmem:[%s1753_s9 + $0x110] ss:$12 sps:$4 sm:$0xff]  }
  0x1e   : > { %1421 = vmatprep.subr.bf16.mxu0 %v1612_v10  ;;  %1582 = vmatprep.subr.bf16.mxu1 %v1612_v10  ;;  %v1672_v56 = vld [vmem:[%s1753_s9 + $0xd8] ss:$12 sps:$4 sm:$0xff]   ;;  %v1674_v58 = vld [vmem:[%s1753_s9 + $0xf4] ss:$12 sps:$4 sm:$0xff]   ;;  %v1677_v60 = vld [vmem:[%s1753_s9 + $0xf0] ss:$12 sps:$4 sm:$0xff]  }
  0x1f   : > { %v1676_v59 = vld [vmem:[%s1753_s9 + $0x128] ss:$12 sps:$4 sm:$0xff]   ;;  %v1678_v61 = vld [vmem:[%s1753_s9 + $0x140] ss:$12 sps:$4 sm:$0xff]   ;;  %v1681_v63 = vld [vmem:[%s1753_s9 + $0x158] ss:$12 sps:$4 sm:$0xff]  }
  0x20   : > { %v1679_v62 = vld [vmem:[%s1753_s9 + $0x10c] ss:$12 sps:$4 sm:$0xff]   ;;  %v1682_v0 = vld [vmem:[%s1753_s9 + $0x108] ss:$12 sps:$4 sm:$0xff]   ;;  %v1683_v1 = vld [vmem:[%s1753_s9 + $0x170] ss:$12 sps:$4 sm:$0xff]  }
  0x21   : > { %1422 = vmatpush3.bf16.msra.mxu0 %v1613_v13  ;;  %1590 = vmatpush3.bf16.msra.mxu1 %v1613_v13 }
  0x22   : > { %1423 = vmatprep.subr.bf16.mxu0 %v1614_v14  ;;  %1583 = vmatprep.subr.bf16.mxu1 %v1614_v14 }
  0x25   : > { %1424 = vmatpush3.bf16.msra.mxu0 %v1615_v15  ;;  %1591 = vmatpush3.bf16.msra.mxu1 %v1615_v15 }
  0x26   : > { %1425 = vmatprep.subr.bf16.mxu0 %v1616_v16  ;;  %1584 = vmatprep.subr.bf16.mxu1 %v1616_v16 }
  0x29   : > { %1426 = vmatpush3.bf16.msra.mxu0 %v1617_v17  ;;  %1592 = vmatpush3.bf16.msra.mxu1 %v1617_v17 }
  0x2a   : > { %1541 = vmatprep.subr.bf16.mxu1 %v1624_v18 }
  0x2c   : > { %715 = vmatmul.mubr.bf16.vlgmr.msra.gmra.mxu0 %v1618_v19  ;;  %811 = vmatmul.mubr.bf16.vlgmr.msra.gmra.mxu1 %v1621_v20 }
  0x2d   : > { %1542 = vmatpush3.bf16.msra.mxu1 %v1624_v18  ;;  %722 = vmatprep.mubr.bf16.mxu0 %v1625_v21 }
  0x2e   : > { %818 = vmatprep.mubr.bf16.mxu1 %v1627_v22  ;;  %1543 = vmatprep.subr.bf16.mxu1 %v1637_v23 }
  0x31   : > { %1544 = vmatpush3.bf16.msra.mxu1 %v1637_v23 }
  0x34   : > { %723 = vmatmul.mubr.bf16.gmra.mxu0 %v1629_v24  ;;  %819 = vmatmul.mubr.bf16.gmra.mxu1 %v1630_v25 }
  0x35   : > { %730 = vmatprep.mubr.bf16.mxu0 %v1631_v26  ;;  %826 = vmatprep.mubr.bf16.mxu1 %v1633_v27 }
  0x3c   : > { %731 = vmatmul.mubr.bf16.gmra.mxu0 %v1635_v28  ;;  %827 = vmatmul.mubr.bf16.gmra.mxu1 %v1636_v29 }
  0x3d   : > { %738 = vmatprep.mubr.bf16.mxu0 %v1638_v30  ;;  %834 = vmatprep.mubr.bf16.mxu1 %v1640_v31 }
  0x44   : > { %739 = vmatmul.mubr.bf16.gmra.mxu0 %v1642_v32  ;;  %835 = vmatmul.mubr.bf16.gmra.mxu1 %v1643_v33 }
  0x45   : > { %746 = vmatprep.mubr.bf16.mxu0 %v1644_v34  ;;  %1545 = vmatprep.mubr.msk.bf16.mxu1 %vm633_vm0, %v1646_v35 }
  0x4c   : > { %747 = vmatmul.mubr.bf16.gmra.mxu0 %v1647_v36  ;;  %1546 = vmatmul.mubr.msk.bf16.vlgmr.msra.gmra.mxu1 %vm633_vm0, %v1648_v37 }
  0x4d   : > { %754 = vmatprep.mubr.bf16.mxu0 %v1649_v38  ;;  %1549 = vmatprep.mubr.msk.bf16.mxu1 %vm633_vm0, %v1651_v39 }
  0x54   : > { %755 = vmatmul.mubr.bf16.gmra.mxu0 %v1652_v40  ;;  %1550 = vmatmul.mubr.msk.bf16.gmra.mxu1 %vm633_vm0, %v1653_v41 }
  0x55   : > { %762 = vmatprep.mubr.bf16.mxu0 %v1654_v42  ;;  %1553 = vmatprep.mubr.msk.bf16.mxu1 %vm633_vm0, %v1656_v43  ;;  %v1869_v42 = vld [vmem:[%s1994_s2] ss:$0 sm:$0xff] }
  0x5c   : > { %763 = vmatmul.mubr.bf16.gmra.mxu0 %v1657_v44  ;;  %1554 = vmatmul.mubr.msk.bf16.gmra.mxu1 %vm633_vm0, %v1658_v45 }
  0x5d   : > { %770 = vmatprep.mubr.bf16.mxu0 %v1659_v46  ;;  %1557 = vmatprep.mubr.msk.bf16.mxu1 %vm633_vm0, %v1661_v47 }
  0x64   : > { %771 = vmatmul.mubr.bf16.gmra.mxu0 %v1662_v48  ;;  %1558 = vmatmul.mubr.msk.bf16.gmra.mxu1 %vm633_vm0, %v1663_v49 }
  0x65   : > { %778 = vmatprep.mubr.bf16.mxu0 %v1664_v50  ;;  %1561 = vmatprep.mubr.msk.bf16.mxu1 %vm633_vm0, %v1666_v51 }
  0x6c   : > { %779 = vmatmul.mubr.bf16.gmra.mxu0 %v1667_v52  ;;  %1562 = vmatmul.mubr.msk.bf16.gmra.mxu1 %vm633_vm0, %v1668_v53 }
  0x6d   : > { %786 = vmatprep.mubr.bf16.mxu0 %v1669_v54  ;;  %1565 = vmatprep.mubr.msk.bf16.mxu1 %vm633_vm0, %v1671_v55 }
  0x74   : > { %787 = vmatmul.mubr.bf16.gmra.mxu0 %v1672_v56  ;;  %1566 = vmatmul.mubr.msk.bf16.gmra.mxu1 %vm633_vm0, %v1673_v57 }
  0x75   : > { %794 = vmatprep.mubr.bf16.mxu0 %v1674_v58  ;;  %1569 = vmatprep.mubr.msk.bf16.mxu1 %vm633_vm0, %v1676_v59 }
  0x7c   : > { %795 = vmatmul.mubr.bf16.gmra.mxu0 %v1677_v60  ;;  %1570 = vmatmul.mubr.msk.bf16.gmra.mxu1 %vm633_vm0, %v1678_v61 }
  0x7d   : > { %802 = vmatprep.mubr.bf16.mxu0 %v1679_v62  ;;  %1573 = vmatprep.mubr.msk.bf16.mxu1 %vm633_vm0, %v1681_v63 }
  0x84   : > { %803 = vmatmul.mubr.bf16.gmra.mxu0 %v1682_v0  ;;  %1574 = vmatmul.mubr.msk.bf16.gmra.mxu1 %vm633_vm0, %v1683_v1 }
  0xec   : > { %v1427_v2 = vpop.f32.mrf.mxu0  ;;  %v1499_v3 = vpop.f32.mrf.mxu1 }
  0xee   : > { %v1428_v4 = vpop.f32.mrf.mxu0  ;;  %v1500_v5 = vpop.f32.mrf.mxu1 }
  0xef   : > { %v1846_v6 = vadd.f32 %v1500_v5, %v1499_v3  ;;  %v1429_v39 = vadd.f32 %v1428_v4, %v1427_v2 }
  0xf0   : > { %v1430_v7 = vpop.f32.mrf.mxu0  ;;  %v1502_v8 = vpop.f32.mrf.mxu1 }
  0xf1   : > { %v717_v49 = vadd.f32 %v1429_v39, %v1869_v42 }
  0xf2   : > { %v1431_v9 = vpop.f32.mrf.mxu0  ;;  %v1503_v10 = vpop.f32.mrf.mxu1 }
  0xf3   : > { %v1848_v11 = vadd.f32 %v1503_v10, %v1502_v8  ;;  %v1432_v45 = vadd.f32 %v1431_v9, %v1430_v7 }
  0xf4   : > { %v1433_v12 = vpop.f32.mrf.mxu0  ;;  %v1505_v13 = vpop.f32.mrf.mxu1 }
  0xf5   : > { %v720_v58 = vadd.f32 %v1432_v45, %v1869_v42 }
  0xf6   : > { %v1434_v14 = vpop.f32.mrf.mxu0  ;;  %v1506_v15 = vpop.f32.mrf.mxu1 }
  0xf7   : > { %v1850_v16 = vadd.f32 %v1506_v15, %v1505_v13  ;;  %v1435_v36 = vadd.f32 %v1434_v14, %v1433_v12 }
  0xf8   : > { %v1436_v17 = vpop.f32.mrf.mxu0  ;;  %v1508_v18 = vpop.f32.mrf.mxu1 }
  0xf9   : > { %v725_v44 = vadd.f32 %v1435_v36, %v1869_v42 }
  0xfa   : > { %v1437_v19 = vpop.f32.mrf.mxu0  ;;  %v1509_v20 = vpop.f32.mrf.mxu1 }
  0xfb   : > { %v1852_v21 = vadd.f32 %v1509_v20, %v1508_v18  ;;  %v1438_v43 = vadd.f32 %v1437_v19, %v1436_v17 }
  0xfc   : > { %v1439_v22 = vpop.f32.mrf.mxu0  ;;  %v1511_v23 = vpop.f32.mrf.mxu1 }
  0xfd   : > { %v728_v55 = vadd.f32 %v1438_v43, %v1869_v42 }
  0xfe   : > { %v1440_v24 = vpop.f32.mrf.mxu0  ;;  %v1512_v25 = vpop.f32.mrf.mxu1 }
  0xff   : > { %v1854_v26 = vadd.f32 %v1512_v25, %v1511_v23  ;;  %v1441_v59 = vadd.f32 %v1440_v24, %v1439_v22 }
 0x100   : > { %v1442_v27 = vpop.f32.mrf.mxu0  ;;  %v1514_v28 = vpop.f32.mrf.mxu1 }
 0x101   : > { %v733_v14 = vadd.f32 %v1441_v59, %v1869_v42 }
 0x102   : > { %v1443_v29 = vpop.f32.mrf.mxu0  ;;  %v1515_v30 = vpop.f32.mrf.mxu1 }
 0x103   : > { %v1856_v31 = vadd.f32 %v1515_v30, %v1514_v28  ;;  %v1444_v7 = vadd.f32 %v1443_v29, %v1442_v27 }
 0x104   : > { %v1445_v32 = vpop.f32.mrf.mxu0  ;;  %v1858_v33 = vpop.f32.mrf.mxu1 }
 0x105   : > { %v736_v27 = vadd.f32 %v1444_v7, %v1869_v42 }
 0x106   : > { %v1446_v34 = vpop.f32.mrf.mxu0  ;;  %v1860_v35 = vpop.f32.mrf.mxu1 }
 0x107   : > { %v1447_v52 = vadd.f32 %v1446_v34, %v1445_v32 }
 0x108   : > { %v1448_v37 = vpop.f32.mrf.mxu0  ;;  %v1862_v38 = vpop.f32.mrf.mxu1 }
 0x109   : > { %v741_v5 = vadd.f32 %v1447_v52, %v1869_v42 }
 0x10a   : > { %v1449_v40 = vpop.f32.mrf.mxu0  ;;  %v1864_v41 = vpop.f32.mrf.mxu1 }
 0x10b   : > { %v1450_v63 = vadd.f32 %v1449_v40, %v1448_v37 }
 0x10c   : > { %v1451_v46 = vpop.f32.mrf.mxu0  ;;  %v1547_v47 = vpop.f32.mrf.mxu1 }
 0x10d   : > { %v886_v48 = vadd.f32 %v1547_v47, %v725_v44  ;;  %v744_v18 = vadd.f32 %v1450_v63, %v1869_v42 }
 0x10e   : > { %v1452_v50 = vpop.f32.mrf.mxu0  ;;  %v877_v51 = vpop.f32.mrf.mxu1 }
 0x10f   : > { %v1006_v53 = vmax.f32 %v886_v48, 0.0  ;;  %v878_v54 = vadd.f32 %v877_v51, %v717_v49  ;;  %v1453_v28 = vadd.f32 %v1452_v50, %v1451_v46 }
 0x110   : > { %v1454_v56 = vpop.f32.mrf.mxu0  ;;  %v1548_v57 = vpop.f32.mrf.mxu1 }
 0x111   : > { %v1381_v60 = vpack.c.bf16 %v1006_v53, %v1006_v53  ;;  %v1004_v61 = vmax.f32 %v878_v54, 0.0  ;;  %v889_v62 = vadd.f32 %v1548_v57, %v728_v55  ;;  %v749_v51 = vadd.f32 %v1453_v28, %v1869_v42 }
 0x112   : > { %v1455_v0 = vpop.f32.mrf.mxu0  ;;  %v880_v1 = vpop.f32.mrf.mxu1 }
 0x113   : > { %1167 = vst.msk [vmem:[%s1878_s8 + $0x8] sm:$0xf] %vm1164_vm1, %v1381_v60  ;;  %v1379_v2 = vpack.c.bf16 %v1004_v61, %v1004_v61  ;;  %v1007_v3 = vmax.f32 %v889_v62, 0.0  ;;  %v881_v4 = vadd.f32 %v880_v1, %v720_v58  ;;  %v1456_v45 = vadd.f32 %v1455_v0, %v1454_v56 }
 0x114   : > { %v1457_v8 = vpop.f32.mrf.mxu0  ;;  %v1551_v9 = vpop.f32.mrf.mxu1 }
 0x115   : > { %1165 = vst.msk [vmem:[%s1878_s8] sm:$0xf] %vm1164_vm1, %v1379_v2  ;;  %v1382_v10 = vpack.c.bf16 %v1007_v3, %v1007_v3  ;;  %v1005_v12 = vmax.f32 %v881_v4, 0.0  ;;  %v902_v13 = vadd.f32 %v1551_v9, %v741_v5  ;;  %v752_v60 = vadd.f32 %v1456_v45, %v1869_v42 }
 0x116   : > { %v1458_v15 = vpop.f32.mrf.mxu0  ;;  %v893_v17 = vpop.f32.mrf.mxu1 }
 0x117   : > { %1168 = vst.msk [vmem:[%s1878_s8 + $0xc] sm:$0xf] %vm1164_vm1, %v1382_v10  ;;  %v1380_v19 = vpack.c.bf16 %v1005_v12, %v1005_v12  ;;  %v1010_v20 = vmax.f32 %v902_v13, 0.0  ;;  %v1459_v22 = vadd.f32 %v1458_v15, %v1457_v8  ;;  %v894_v23 = vadd.f32 %v893_v17, %v733_v14 }
 0x118   : > { %v1460_v24 = vpop.f32.mrf.mxu0  ;;  %v1552_v25 = vpop.f32.mrf.mxu1 }
 0x119   : > { %1166 = vst.msk [vmem:[%s1878_s8 + $0x4] sm:$0xf] %vm1164_vm1, %v1380_v19  ;;  %v1385_v29 = vpack.c.bf16 %v1010_v20, %v1010_v20  ;;  %v1008_v30 = vmax.f32 %v894_v23, 0.0  ;;  %v905_v32 = vadd.f32 %v1552_v25, %v744_v18  ;;  %v757_v37 = vadd.f32 %v1459_v22, %v1869_v42 }
 0x11a   : > { %v1461_v34 = vpop.f32.mrf.mxu0  ;;  %v896_v36 = vpop.f32.mrf.mxu1 }
 0x11b   : > { %1171 = vst.msk [vmem:[%s1878_s8 + $0x18] sm:$0xf] %vm1164_vm1, %v1385_v29  ;;  %v1383_v39 = vpack.c.bf16 %v1008_v30, %v1008_v30  ;;  %v1011_v40 = vmax.f32 %v905_v32, 0.0  ;;  %v1462_v43 = vadd.f32 %v1461_v34, %v1460_v24  ;;  %v897_v44 = vadd.f32 %v896_v36, %v736_v27 }
 0x11c   : > { %v1463_v47 = vpop.f32.mrf.mxu0  ;;  %v1555_v46 = vpop.f32.mrf.mxu1 }
 0x11d   : > { %1169 = vst.msk [vmem:[%s1878_s8 + $0x10] sm:$0xf] %vm1164_vm1, %v1383_v39  ;;  %v1386_v48 = vpack.c.bf16 %v1011_v40, %v1011_v40  ;;  %v1009_v49 = vmax.f32 %v897_v44, 0.0  ;;  %v918_v50 = vadd.f32 %v1555_v46, %v757_v37  ;;  %v760_v56 = vadd.f32 %v1462_v43, %v1869_v42 }
 0x11e   : > { %v1464_v52 = vpop.f32.mrf.mxu0  ;;  %v909_v53 = vpop.f32.mrf.mxu1 }
 0x11f   : > { %1172 = vst.msk [vmem:[%s1878_s8 + $0x1c] sm:$0xf] %vm1164_vm1, %v1386_v48  ;;  %v1384_v54 = vpack.c.bf16 %v1009_v49, %v1009_v49  ;;  %v1014_v55 = vmax.f32 %v918_v50, 0.0  ;;  %v910_v57 = vadd.f32 %v909_v53, %v749_v51  ;;  %v1465_v62 = vadd.f32 %v1464_v52, %v1463_v47 }
 0x120   : > { %v1466_v58 = vpop.f32.mrf.mxu0  ;;  %v1556_v59 = vpop.f32.mrf.mxu1 }
 0x121   : > { %1170 = vst.msk [vmem:[%s1878_s8 + $0x14] sm:$0xf] %vm1164_vm1, %v1384_v54  ;;  %v1389_v61 = vpack.c.bf16 %v1014_v55, %v1014_v55  ;;  %v1012_v63 = vmax.f32 %v910_v57, 0.0  ;;  %v921_v0 = vadd.f32 %v1556_v59, %v760_v56  ;;  %v765_v13 = vadd.f32 %v1465_v62, %v1869_v42 }
 0x122   : > { %v1467_v1 = vpop.f32.mrf.mxu0  ;;  %v912_v2 = vpop.f32.mrf.mxu1 }
 0x123   : > { %1175 = vst.msk [vmem:[%s1878_s8 + $0x28] sm:$0xf] %vm1164_vm1, %v1389_v61  ;;  %v1387_v3 = vpack.c.bf16 %v1012_v63, %v1012_v63  ;;  %v1015_v4 = vmax.f32 %v921_v0, 0.0  ;;  %v913_v5 = vadd.f32 %v912_v2, %v752_v60  ;;  %v1468_v10 = vadd.f32 %v1467_v1, %v1466_v58 }
 0x124   : > { %v1469_v7 = vpop.f32.mrf.mxu0  ;;  %v1559_v8 = vpop.f32.mrf.mxu1 }
 0x125   : > { %1173 = vst.msk [vmem:[%s1878_s8 + $0x20] sm:$0xf] %vm1164_vm1, %v1387_v3  ;;  %v1390_v9 = vpack.c.bf16 %v1015_v4, %v1015_v4  ;;  %v1013_v12 = vmax.f32 %v913_v5, 0.0  ;;  %v768_v25 = vadd.f32 %v1468_v10, %v1869_v42 }
 0x126   : > { %v1470_v14 = vpop.f32.mrf.mxu0  ;;  %v925_v15 = vpop.f32.mrf.mxu1 }
 0x127   : > { %1176 = vst.msk [vmem:[%s1878_s8 + $0x2c] sm:$0xf] %vm1164_vm1, %v1390_v9  ;;  %v1388_v17 = vpack.c.bf16 %v1013_v12, %v1013_v12  ;;  %v1471_v18 = vadd.f32 %v1470_v14, %v1469_v7  ;;  %v926_v19 = vadd.f32 %v925_v15, %v765_v13  ;;  %v821_v15 = vadd.f32 %v1850_v16, %v1869_v42 }
 0x128   : > { %v1472_v20 = vpop.f32.mrf.mxu0  ;;  %v1560_v22 = vpop.f32.mrf.mxu1  ;;  %v824_v16 = vadd.f32 %v1852_v21, %v1869_v42 }
 0x129   : > { %1174 = vst.msk [vmem:[%s1878_s8 + $0x24] sm:$0xf] %vm1164_vm1, %v1388_v17  ;;  %v773_v23 = vadd.f32 %v1471_v18, %v1869_v42  ;;  %v1016_v24 = vmax.f32 %v926_v19, 0.0 }
 0x12a   : > { %v1473_v27 = vpop.f32.mrf.mxu0  ;;  %v928_v28 = vpop.f32.mrf.mxu1 }
 0x12b   : > { %v934_v29 = vadd.f32 %v1559_v8, %v773_v23  ;;  %v1391_v30 = vpack.c.bf16 %v1016_v24, %v1016_v24  ;;  %v1474_v32 = vadd.f32 %v1473_v27, %v1472_v20  ;;  %v929_v34 = vadd.f32 %v928_v28, %v768_v25 }
 0x12c   : > { %v1475_v36 = vpop.f32.mrf.mxu0  ;;  %v1563_v37 = vpop.f32.mrf.mxu1  ;;  %v1519_v23 = vadd.f32 %v1860_v35, %v1858_v33  ;;  %v813_v25 = vadd.f32 %v1846_v6, %v1869_v42  ;;  %v1522_v6 = vadd.f32 %v1864_v41, %v1862_v38 }
 0x12d   : > { %v1018_v39 = vmax.f32 %v934_v29, 0.0  ;;  %1177 = vst.msk [vmem:[%s1878_s8 + $0x30] sm:$0xf] %vm1164_vm1, %v1391_v30  ;;  %v776_v40 = vadd.f32 %v1474_v32, %v1869_v42  ;;  %v1017_v43 = vmax.f32 %v929_v34, 0.0 }
 0x12e   : > { %v1476_v44 = vpop.f32.mrf.mxu0  ;;  %v941_v45 = vpop.f32.mrf.mxu1 }
 0x12f   : > { %v1393_v47 = vpack.c.bf16 %v1018_v39, %v1018_v39  ;;  %v937_v46 = vadd.f32 %v1560_v22, %v776_v40  ;;  %v1392_v48 = vpack.c.bf16 %v1017_v43, %v1017_v43  ;;  %v1477_v49 = vadd.f32 %v1476_v44, %v1475_v36 }
 0x130   : > { %v1478_v50 = vpop.f32.mrf.mxu0  ;;  %v1564_v51 = vpop.f32.mrf.mxu1  ;;  %v816_v44 = vadd.f32 %v1848_v11, %v1869_v42 }
 0x131   : > { %1179 = vst.msk [vmem:[%s1878_s8 + $0x38] sm:$0xf] %vm1164_vm1, %v1393_v47  ;;  %v1019_v52 = vmax.f32 %v937_v46, 0.0  ;;  %1178 = vst.msk [vmem:[%s1878_s8 + $0x34] sm:$0xf] %vm1164_vm1, %v1392_v48  ;;  %v781_v53 = vadd.f32 %v1477_v49, %v1869_v42  ;;  %v837_v47 = vadd.f32 %v1519_v23, %v1869_v42 }
 0x132   : > { %v1479_v54 = vpop.f32.mrf.mxu0  ;;  %v944_v55 = vpop.f32.mrf.mxu1 }
 0x133   : > { %v1394_v57 = vpack.c.bf16 %v1019_v52, %v1019_v52  ;;  %v942_v56 = vadd.f32 %v941_v45, %v781_v53  ;;  %v1480_v58 = vadd.f32 %v1479_v54, %v1478_v50 }
 0x134   : > { %v1481_v59 = vpop.f32.mrf.mxu0  ;;  %v1924_v60 = vpop.f32.mrf.mxu1 }
 0x135   : > { %1180 = vst.msk [vmem:[%s1878_s8 + $0x3c] sm:$0xf] %vm1164_vm1, %v1394_v57  ;;  %v1020_v61 = vmax.f32 %v942_v56, 0.0  ;;  %v784_v62 = vadd.f32 %v1480_v58, %v1869_v42  ;;  %v829_v58 = vadd.f32 %v1854_v26, %v1869_v42 }
 0x136   : > { %v1482_v63 = vpop.f32.mrf.mxu0  ;;  %v957_v0 = vpop.f32.mrf.mxu1 }
 0x137   : > { %v1395_v1 = vpack.c.bf16 %v1020_v61, %v1020_v61  ;;  %v945_v2 = vadd.f32 %v944_v55, %v784_v62  ;;  %v1483_v3 = vadd.f32 %v1482_v63, %v1481_v59  ;;  %v840_v61 = vadd.f32 %v1522_v6, %v1869_v42 }
 0x138   : > { %v1484_v4 = vpop.f32.mrf.mxu0  ;;  %v1929_v5 = vpop.f32.mrf.mxu1 }
 0x139   : > { %1181 = vst.msk [vmem:[%s1878_s8 + $0x40] sm:$0xf] %vm1164_vm1, %v1395_v1  ;;  %v1021_v7 = vmax.f32 %v945_v2, 0.0  ;;  %v789_v8 = vadd.f32 %v1483_v3, %v1869_v42 }
 0x13a   : > { %v1485_v9 = vpop.f32.mrf.mxu0  ;;  %v960_v10 = vpop.f32.mrf.mxu1 }
 0x13b   : > { %v1396_v12 = vpack.c.bf16 %v1021_v7, %v1021_v7  ;;  %v950_v13 = vadd.f32 %v1563_v37, %v789_v8  ;;  %v1486_v14 = vadd.f32 %v1485_v9, %v1484_v4 }
 0x13c   : > { %v1487_v17 = vpop.f32.mrf.mxu0  ;;  %v1571_v18 = vpop.f32.mrf.mxu1 }
 0x13d   : > { %1182 = vst.msk [vmem:[%s1878_s8 + $0x44] sm:$0xf] %vm1164_vm1, %v1396_v12  ;;  %v1022_v19 = vmax.f32 %v950_v13, 0.0  ;;  %v792_v20 = vadd.f32 %v1486_v14, %v1869_v42  ;;  %v982_v22 = vadd.f32 %v1571_v18, %v821_v15  ;;  %v832_v14 = vadd.f32 %v1856_v31, %v1869_v42 }
 0x13e   : > { %v1488_v24 = vpop.f32.mrf.mxu0  ;;  %v973_v27 = vpop.f32.mrf.mxu1 }
 0x13f   : > { %v1397_v28 = vpack.c.bf16 %v1022_v19, %v1022_v19  ;;  %v953_v29 = vadd.f32 %v1564_v51, %v792_v20  ;;  %v1030_v30 = vmax.f32 %v982_v22, 0.0  ;;  %v1489_v32 = vadd.f32 %v1488_v24, %v1487_v17 }
 0x140   : > { %v974_v34 = vadd.f32 %v973_v27, %v813_v25  ;;  %v1490_v36 = vpop.f32.mrf.mxu0  ;;  %v1572_v37 = vpop.f32.mrf.mxu1 }
 0x141   : > { %1183 = vst.msk [vmem:[%s1878_s8 + $0x48] sm:$0xf] %vm1164_vm1, %v1397_v28  ;;  %v1023_v39 = vmax.f32 %v953_v29, 0.0  ;;  %v1405_v33 = vpack.c.bf16 %v1030_v30, %v1030_v30  ;;  %v797_v35 = vadd.f32 %v1489_v32, %v1869_v42  ;;  %v985_v40 = vadd.f32 %v1572_v37, %v824_v16 }
 0x142   : > { %v1028_v21 = vmax.f32 %v974_v34, 0.0  ;;  %v1491_v43 = vpop.f32.mrf.mxu0  ;;  %v976_v45 = vpop.f32.mrf.mxu1 }
 0x143   : > { %v1398_v46 = vpack.c.bf16 %v1023_v39, %v1023_v39  ;;  %1191 = vst.msk [vmem:[%s1878_s8 + $0x68] sm:$0xf] %vm1164_vm1, %v1405_v33  ;;  %v958_v48 = vadd.f32 %v957_v0, %v797_v35  ;;  %v1031_v49 = vmax.f32 %v985_v40, 0.0  ;;  %v1492_v50 = vadd.f32 %v1491_v43, %v1490_v36 }
 0x144   : > { %v1403_v51 = vpack.c.bf16 %v1028_v21, %v1028_v21  ;;  %v977_v52 = vadd.f32 %v976_v45, %v816_v44  ;;  %v1493_v53 = vpop.f32.mrf.mxu0  ;;  %v1575_v38 = vpop.f32.mrf.mxu1 }
 0x145   : > { %1184 = vst.msk [vmem:[%s1878_s8 + $0x4c] sm:$0xf] %vm1164_vm1, %v1398_v46  ;;  %v1024_v41 = vmax.f32 %v958_v48, 0.0  ;;  %v1406_v54 = vpack.c.bf16 %v1031_v49, %v1031_v49  ;;  %v800_v11 = vadd.f32 %v1492_v50, %v1869_v42  ;;  %v998_v55 = vadd.f32 %v1575_v38, %v837_v47 }
 0x146   : > { %1189 = vst.msk [vmem:[%s1878_s8 + $0x60] sm:$0xf] %vm1164_vm1, %v1403_v51  ;;  %v1029_v57 = vmax.f32 %v977_v52, 0.0  ;;  %v1494_v56 = vpop.f32.mrf.mxu0  ;;  %v989_v59 = vpop.f32.mrf.mxu1 }
 0x147   : > { %v1399_v62 = vpack.c.bf16 %v1024_v41, %v1024_v41  ;;  %1192 = vst.msk [vmem:[%s1878_s8 + $0x6c] sm:$0xf] %vm1164_vm1, %v1406_v54  ;;  %v961_v63 = vadd.f32 %v960_v10, %v800_v11  ;;  %v1034_v0 = vmax.f32 %v998_v55, 0.0  ;;  %v1495_v1 = vadd.f32 %v1494_v56, %v1493_v53 }
 0x148   : > { %v1404_v2 = vpack.c.bf16 %v1029_v57, %v1029_v57  ;;  %v990_v3 = vadd.f32 %v989_v59, %v829_v58  ;;  %v1496_v4 = vpop.f32.mrf.mxu0  ;;  %v1576_v7 = vpop.f32.mrf.mxu1 }
 0x149   : > { %1185 = vst.msk [vmem:[%s1878_s8 + $0x50] sm:$0xf] %vm1164_vm1, %v1399_v62  ;;  %v1025_v8 = vmax.f32 %v961_v63, 0.0  ;;  %v1409_v26 = vpack.c.bf16 %v1034_v0, %v1034_v0  ;;  %v805_v9 = vadd.f32 %v1495_v1, %v1869_v42  ;;  %v1001_v12 = vadd.f32 %v1576_v7, %v840_v61 }
 0x14a   : > { %1190 = vst.msk [vmem:[%s1878_s8 + $0x64] sm:$0xf] %vm1164_vm1, %v1404_v2  ;;  %v1032_v13 = vmax.f32 %v990_v3, 0.0  ;;  %v1497_v10 = vpop.f32.mrf.mxu0  ;;  %v992_v15 = vpop.f32.mrf.mxu1 }
 0x14b   : > { %v1400_v17 = vpack.c.bf16 %v1025_v8, %v1025_v8  ;;  %1195 = vst.msk [vmem:[%s1878_s8 + $0x78] sm:$0xf] %vm1164_vm1, %v1409_v26  ;;  %v966_v18 = vadd.f32 %v1924_v60, %v805_v9  ;;  %v1035_v19 = vmax.f32 %v1001_v12, 0.0  ;;  %v1498_v20 = vadd.f32 %v1497_v10, %v1496_v4 }
 0x14c   : > { %v1407_v22 = vpack.c.bf16 %v1032_v13, %v1032_v13  ;;  %v993_v23 = vadd.f32 %v992_v15, %v832_v14 }
 0x14d   : > { %1186 = vst.msk [vmem:[%s1878_s8 + $0x54] sm:$0xf] %vm1164_vm1, %v1400_v17  ;;  %v1026_v24 = vmax.f32 %v966_v18, 0.0  ;;  %v1410_v25 = vpack.c.bf16 %v1035_v19, %v1035_v19  ;;  %v808_v31 = vadd.f32 %v1498_v20, %v1869_v42 }
 0x14e   : > { %1193 = vst.msk [vmem:[%s1878_s8 + $0x70] sm:$0xf] %vm1164_vm1, %v1407_v22  ;;  %v1033_v27 = vmax.f32 %v993_v23, 0.0 }
 0x14f   : > { %v1401_v16 = vpack.c.bf16 %v1026_v24, %v1026_v24  ;;  %1196 = vst.msk [vmem:[%s1878_s8 + $0x7c] sm:$0xf] %vm1164_vm1, %v1410_v25  ;;  %v969_v60 = vadd.f32 %v1929_v5, %v808_v31 }
 0x150   : > { %v1408_v28 = vpack.c.bf16 %v1033_v27, %v1033_v27 }
 0x151   : > { %1187 = vst.msk [vmem:[%s1878_s8 + $0x58] sm:$0xf] %vm1164_vm1, %v1401_v16  ;;  %v1027_v29 = vmax.f32 %v969_v60, 0.0 }
 0x152   : > { %1194 = vst.msk [vmem:[%s1878_s8 + $0x74] sm:$0xf] %vm1164_vm1, %v1408_v28 }
 0x153   : > { %v1402_v30 = vpack.c.bf16 %v1027_v29, %v1027_v29 }
 0x155   : > { %1188 = vst.msk [vmem:[%s1878_s8 + $0x5c] sm:$0xf] %vm1164_vm1, %v1402_v30 }
 0x156 PF: > { %s13_s12 = sadd.s32 1, %s1690_s12  }
 0x157   : > { %p10_p4 = scmp.ge.s32.totalorder %s13_s12, 4  }
 0x159   :  { %12 = sbr.rel (!%p10_p4) target bundleno = 1 (0x1), region = 62 }

// kernel: base_net_forward.53
= control target key start
LH: loop header
LB: loop body
LE: loop exit
PB: predicated region body
PF: predicated region fallthrough
CT: control target
= control target key end

     0   :  { %s860_s12 = smov 0   ;;  %s974_s0 = inlined_call_operand.vmem [shape: bf16[128,288], index: 0, kind: input, shape index: {}]   ;;  %s975_s1 = inlined_call_operand.vmem [shape: bf16[288,64], index: 1, kind: input, shape index: {}]   ;;  %s976_s2 = inlined_call_operand.vmem [shape: f32[1,64], index: 2, kind: input, shape index: {}]   ;;  %s977_s3 = inlined_call_operand.vmem [shape: bf16[128,64], index: 3, kind: output, shape index: {}]  }
   0x1 LB: > { %s653_s13 = sadd.s32 4294967295, %s838_s12   ;;  %p657_p0 = scmp.ge.s32.totalorder %s838_s12, 1  ;;  %s838_s12 = sphi %s860_s12, %s13_s12  }
   0x2   : > { %p139_p1 = scmp.lt.s32.totalorder %s838_s12, 3 }
   0x4   : > { %p140_p2 = pnand %p657_p0, %p139_p1 }
   0x5   : > { %s658_s16 = sshll.u32 (!%p140_p2), %s653_s13, 3 }
   0x6   : > { %143 = sbr.rel (%p140_p2) target bundleno = 270 (0x10e), region = 32  ;;  %p165_p3 = scmp.lt.s32.totalorder (!%p140_p2), %s658_s16, 15 }
   0xb   : > { %v798_v0 = vld [vmem:[%s975_s1 + $0x78] sm:$0xff]   ;;  %v800_v2 = vld [vmem:[%s975_s1 + $0x70] sm:$0xff]   ;;  %v802_v4 = vld [vmem:[%s975_s1 + $0x68] sm:$0xff]   ;;  %s979_s16 = smov (!%p165_p3, %s658_s16), 15  ;;  %vm405_vm0 = vcmask 261120   ;;  %vm588_vm1 = vcmask 519168  }
   0xc   : > { %v799_v1 = vld [vmem:[%s975_s1 + $0x38] sm:$0xff]   ;;  %715 = vmatprep.subr.bf16.mxu0 %v798_v0  ;;  %773 = vmatprep.subr.bf16.mxu1 %v798_v0  ;;  %v801_v3 = vld [vmem:[%s975_s1 + $0x30] sm:$0xff]   ;;  %v803_v5 = vld [vmem:[%s975_s1 + $0x28] sm:$0xff]   ;;  %s789_s29 = smul.u32 12, %s979_s16  ;;  %s661_s5 = sshll.u32 %s979_s16, 2 }
   0xd   : > { %716 = vmatpush3.bf16.msra.mxu0 %v799_v1  ;;  %781 = vmatpush3.bf16.msra.mxu1 %v799_v1  ;;  %v804_v6 = vld [vmem:[%s975_s1 + $0x60] sm:$0xff]   ;;  %v806_v8 = vld [vmem:[%s975_s1 + $0x58] sm:$0xff]   ;;  %v808_v10 = vld [vmem:[%s975_s1 + $0x50] sm:$0xff]   ;;  %s953_s8 = scalar_lea.vmem %s977_s3, %s661_s5 }
   0xe   : > { %717 = vmatprep.subr.bf16.mxu0 %v800_v2  ;;  %774 = vmatprep.subr.bf16.mxu1 %v800_v2  ;;  %v805_v7 = vld [vmem:[%s975_s1 + $0x20] sm:$0xff]   ;;  %s901_s9 = scalar_lea.vmem %s974_s0, %s789_s29  ;;  %v807_v9 = vld [vmem:[%s975_s1 + $0x18] sm:$0xff]   ;;  %v809_v13 = vld [vmem:[%s975_s1 + $0x10] sm:$0xff]  }
   0xf   : > { %v816_v11 = vld [vmem:[%s901_s9 + $0x4] ss:$12 sps:$4 sm:$0xff]   ;;  %v819_v12 = vld [vmem:[%s901_s9 + $0x4c] ss:$12 sps:$4 sm:$0xff]   ;;  %v817_v20 = vld [vmem:[%s901_s9 + $0x48] ss:$12 sps:$4 sm:$0xff]  }
  0x10   : > { %v810_v14 = vld [vmem:[%s975_s1 + $0x48] sm:$0xff]   ;;  %450 = vmatprep.mubr.bf16.mxu0 %v816_v11  ;;  %474 = vmatprep.mubr.bf16.mxu1 %v819_v12  ;;  %v812_v16 = vld [vmem:[%s975_s1 + $0x40] sm:$0xff]   ;;  %v830_v28 = vld [vmem:[%s901_s9 + $0x30] ss:$12 sps:$4 sm:$0xff]  }
  0x11   : > { %718 = vmatpush3.bf16.msra.mxu0 %v801_v3  ;;  %782 = vmatpush3.bf16.msra.mxu1 %v801_v3  ;;  %v811_v15 = vld [vmem:[%s975_s1 + $0x8] sm:$0xff]   ;;  %v813_v17 = vld [vmem:[%s975_s1] sm:$0xff]   ;;  %v831_v29 = vld [vmem:[%s901_s9 + $0x50] ss:$12 sps:$4 sm:$0xff]  }
  0x12   : > { %719 = vmatprep.subr.bf16.mxu0 %v802_v4  ;;  %775 = vmatprep.subr.bf16.mxu1 %v802_v4  ;;  %v820_v18 = vld [vmem:[%s975_s1 + $0x88] sm:$0xff]   ;;  %v821_v22 = vld [vmem:[%s975_s1 + $0x80] sm:$0xff]  }
  0x13   : > { %v814_v19 = vld [vmem:[%s901_s9] ss:$12 sps:$4 sm:$0xff]   ;;  %v822_v21 = vld [vmem:[%s901_s9 + $0x1c] ss:$12 sps:$4 sm:$0xff]   ;;  %v825_v24 = vld [vmem:[%s901_s9 + $0x18] ss:$12 sps:$4 sm:$0xff]  }
  0x14   : > { %v824_v23 = vld [vmem:[%s901_s9 + $0x8] ss:$12 sps:$4 sm:$0xff]   ;;  %v826_v25 = vld [vmem:[%s901_s9 + $0x20] ss:$12 sps:$4 sm:$0xff]   ;;  %v829_v27 = vld [vmem:[%s901_s9 + $0x38] ss:$12 sps:$4 sm:$0xff]  }
  0x15   : > { %720 = vmatpush3.bf16.msra.mxu0 %v803_v5  ;;  %783 = vmatpush3.bf16.msra.mxu1 %v803_v5  ;;  %v827_v26 = vld [vmem:[%s901_s9 + $0x34] ss:$12 sps:$4 sm:$0xff]  }
  0x16   : > { %721 = vmatprep.subr.bf16.mxu0 %v804_v6  ;;  %776 = vmatprep.subr.bf16.mxu1 %v804_v6  ;;  %v662_v39 = vld [vmem:[%s976_s2] ss:$0 sm:$0xff] }
  0x19   : > { %722 = vmatpush3.bf16.msra.mxu0 %v805_v7  ;;  %784 = vmatpush3.bf16.msra.mxu1 %v805_v7 }
  0x1a   : > { %723 = vmatprep.subr.bf16.mxu0 %v806_v8  ;;  %777 = vmatprep.subr.bf16.mxu1 %v806_v8 }
  0x1d   : > { %724 = vmatpush3.bf16.msra.mxu0 %v807_v9  ;;  %785 = vmatpush3.bf16.msra.mxu1 %v807_v9 }
  0x1e   : > { %725 = vmatprep.subr.bf16.mxu0 %v808_v10  ;;  %778 = vmatprep.subr.bf16.mxu1 %v808_v10 }
  0x21   : > { %726 = vmatpush3.bf16.msra.mxu0 %v809_v13  ;;  %786 = vmatpush3.bf16.msra.mxu1 %v809_v13 }
  0x22   : > { %727 = vmatprep.subr.bf16.mxu0 %v810_v14  ;;  %779 = vmatprep.subr.bf16.mxu1 %v810_v14 }
  0x25   : > { %728 = vmatpush3.bf16.msra.mxu0 %v811_v15  ;;  %787 = vmatpush3.bf16.msra.mxu1 %v811_v15 }
  0x26   : > { %729 = vmatprep.subr.bf16.mxu0 %v812_v16  ;;  %780 = vmatprep.subr.bf16.mxu1 %v812_v16 }
  0x29   : > { %730 = vmatpush3.bf16.msra.mxu0 %v813_v17  ;;  %788 = vmatpush3.bf16.msra.mxu1 %v813_v17 }
  0x2a   : > { %761 = vmatprep.subr.bf16.mxu1 %v820_v18 }
  0x2c   : > { %451 = vmatmul.mubr.bf16.vlgmr.msra.gmra.mxu0 %v814_v19  ;;  %475 = vmatmul.mubr.bf16.vlgmr.msra.gmra.mxu1 %v817_v20 }
  0x2d   : > { %762 = vmatpush3.bf16.msra.mxu1 %v820_v18  ;;  %458 = vmatprep.mubr.bf16.mxu0 %v822_v21 }
  0x2e   : > { %763 = vmatprep.subr.bf16.mxu1 %v821_v22  ;;  %765 = vmatprep.mubr.msk.bf16.mxu1 %vm405_vm0, %v824_v23 }
  0x31   : > { %764 = vmatpush3.bf16.msra.mxu1 %v821_v22 }
  0x34   : > { %459 = vmatmul.mubr.bf16.gmra.mxu0 %v825_v24  ;;  %766 = vmatmul.mubr.msk.bf16.vlgmr.msra.gmra.mxu1 %vm405_vm0, %v826_v25 }
  0x35   : > { %466 = vmatprep.mubr.bf16.mxu0 %v827_v26  ;;  %769 = vmatprep.mubr.msk.bf16.mxu1 %vm405_vm0, %v829_v27 }
  0x3c   : > { %467 = vmatmul.mubr.bf16.gmra.mxu0 %v830_v28  ;;  %770 = vmatmul.mubr.msk.bf16.gmra.mxu1 %vm405_vm0, %v831_v29 }
  0xec   : > { %v731_v30 = vpop.f32.mrf.mxu0  ;;  %v749_v31 = vpop.f32.mrf.mxu1 }
  0xee   : > { %v732_v32 = vpop.f32.mrf.mxu0  ;;  %v750_v33 = vpop.f32.mrf.mxu1 }
  0xef   : > { %v733_v36 = vadd.f32 %v732_v32, %v731_v30  ;;  %v751_v44 = vadd.f32 %v750_v33, %v749_v31 }
  0xf0   : > { %v734_v34 = vpop.f32.mrf.mxu0  ;;  %v752_v35 = vpop.f32.mrf.mxu1 }
  0xf1   : > { %v453_v43 = vadd.f32 %v733_v36, %v662_v39  ;;  %v477_v57 = vadd.f32 %v751_v44, %v662_v39 }
  0xf2   : > { %v735_v37 = vpop.f32.mrf.mxu0  ;;  %v753_v38 = vpop.f32.mrf.mxu1 }
  0xf3   : > { %v736_v42 = vadd.f32 %v735_v37, %v734_v34  ;;  %v754_v54 = vadd.f32 %v753_v38, %v752_v35 }
  0xf4   : > { %v737_v40 = vpop.f32.mrf.mxu0  ;;  %v767_v41 = vpop.f32.mrf.mxu1 }
  0xf5   : > { %v456_v53 = vadd.f32 %v736_v42, %v662_v39  ;;  %v480_v6 = vadd.f32 %v754_v54, %v662_v39 }
  0xf6   : > { %v738_v45 = vpop.f32.mrf.mxu0  ;;  %v517_v46 = vpop.f32.mrf.mxu1 }
  0xf7   : > { %v739_v47 = vadd.f32 %v738_v45, %v737_v40  ;;  %v518_v48 = vadd.f32 %v517_v46, %v453_v43 }
  0xf8   : > { %v740_v49 = vpop.f32.mrf.mxu0  ;;  %v768_v50 = vpop.f32.mrf.mxu1 }
  0xf9   : > { %v461_v51 = vadd.f32 %v739_v47, %v662_v39  ;;  %v548_v52 = vmax.f32 %v518_v48, 0.0 }
  0xfa   : > { %v741_v55 = vpop.f32.mrf.mxu0  ;;  %v520_v56 = vpop.f32.mrf.mxu1 }
  0xfb   : > { %v526_v58 = vadd.f32 %v767_v41, %v461_v51  ;;  %v707_v59 = vpack.c.bf16 %v548_v52, %v548_v52  ;;  %v742_v60 = vadd.f32 %v741_v55, %v740_v49  ;;  %v521_v61 = vadd.f32 %v520_v56, %v456_v53 }
  0xfc   : > { %v743_v62 = vpop.f32.mrf.mxu0  ;;  %v771_v63 = vpop.f32.mrf.mxu1 }
  0xfd   : > { %v550_v0 = vmax.f32 %v526_v58, 0.0  ;;  %589 = vst.msk [vmem:[%s953_s8] sm:$0xf] %vm588_vm1, %v707_v59  ;;  %v464_v1 = vadd.f32 %v742_v60, %v662_v39  ;;  %v549_v2 = vmax.f32 %v521_v61, 0.0  ;;  %v542_v3 = vadd.f32 %v771_v63, %v477_v57 }
  0xfe   : > { %v744_v4 = vpop.f32.mrf.mxu0  ;;  %v533_v5 = vpop.f32.mrf.mxu1 }
  0xff   : > { %v709_v7 = vpack.c.bf16 %v550_v0, %v550_v0  ;;  %v529_v8 = vadd.f32 %v768_v50, %v464_v1  ;;  %v708_v9 = vpack.c.bf16 %v549_v2, %v549_v2  ;;  %v554_v10 = vmax.f32 %v542_v3, 0.0 }
 0x100   : > { %v745_v11 = vadd.f32 %v744_v4, %v743_v62  ;;  %v746_v12 = vpop.f32.mrf.mxu0  ;;  %v772_v13 = vpop.f32.mrf.mxu1 }
 0x101   : > { %591 = vst.msk [vmem:[%s953_s8 + $0x8] sm:$0xf] %vm588_vm1, %v709_v7  ;;  %v551_v14 = vmax.f32 %v529_v8, 0.0  ;;  %590 = vst.msk [vmem:[%s953_s8 + $0x4] sm:$0xf] %vm588_vm1, %v708_v9  ;;  %v713_v15 = vpack.c.bf16 %v554_v10, %v554_v10  ;;  %v545_v16 = vadd.f32 %v772_v13, %v480_v6 }
 0x102   : > { %v469_v17 = vadd.f32 %v745_v11, %v662_v39  ;;  %v747_v18 = vpop.f32.mrf.mxu0  ;;  %v536_v26 = vpop.f32.mrf.mxu1 }
 0x103   : > { %v710_v19 = vpack.c.bf16 %v551_v14, %v551_v14  ;;  %595 = vst.msk [vmem:[%s953_s8 + $0x18] sm:$0xf] %vm588_vm1, %v713_v15  ;;  %v555_v20 = vmax.f32 %v545_v16, 0.0  ;;  %v748_v21 = vadd.f32 %v747_v18, %v746_v12 }
 0x104   : > { %v534_v22 = vadd.f32 %v533_v5, %v469_v17 }
 0x105   : > { %592 = vst.msk [vmem:[%s953_s8 + $0xc] sm:$0xf] %vm588_vm1, %v710_v19  ;;  %v714_v23 = vpack.c.bf16 %v555_v20, %v555_v20  ;;  %v472_v24 = vadd.f32 %v748_v21, %v662_v39 }
 0x106   : > { %v552_v25 = vmax.f32 %v534_v22, 0.0 }
 0x107   : > { %596 = vst.msk [vmem:[%s953_s8 + $0x1c] sm:$0xf] %vm588_vm1, %v714_v23  ;;  %v537_v27 = vadd.f32 %v536_v26, %v472_v24 }
 0x108   : > { %v711_v28 = vpack.c.bf16 %v552_v25, %v552_v25 }
 0x109   : > { %v553_v29 = vmax.f32 %v537_v27, 0.0 }
 0x10a   : > { %593 = vst.msk [vmem:[%s953_s8 + $0x10] sm:$0xf] %vm588_vm1, %v711_v28 }
 0x10b   : > { %v712_v30 = vpack.c.bf16 %v553_v29, %v553_v29 }
 0x10d   : > { %594 = vst.msk [vmem:[%s953_s8 + $0x14] sm:$0xf] %vm588_vm1, %v712_v30 }
 0x10e PF: > { %s13_s12 = sadd.s32 1, %s838_s12  }
 0x10f   : > { %p10_p4 = scmp.ge.s32.totalorder %s13_s12, 4  }
 0x111   :  { %12 = sbr.rel (!%p10_p4) target bundleno = 1 (0x1), region = 62 }

// kernel: base_net_forward.54
= control target key start
LH: loop header
LB: loop body
LE: loop exit
PB: predicated region body
PF: predicated region fallthrough
CT: control target
= control target key end

     0   :  { %s1322_s15 = smov 0   ;;  %s1525_s0 = inlined_call_operand.vmem [shape: bf16[128,576], index: 0, kind: input, shape index: {}]   ;;  %s1526_s1 = inlined_call_operand.vmem [shape: bf16[576,64], index: 1, kind: input, shape index: {}]   ;;  %s1527_s2 = inlined_call_operand.vmem [shape: f32[1,64], index: 2, kind: input, shape index: {}]   ;;  %s1528_s3 = inlined_call_operand.vmem [shape: bf16[128,64], index: 3, kind: input, shape index: {}]   ;;  %s1529_s4 = inlined_call_operand.vmem [shape: bf16[128,64], index: 4, kind: output, shape index: {}]  }
   0x1 LB: > { %s995_s16 = sadd.s32 4294967295, %s1295_s15   ;;  %p999_p0 = scmp.ge.s32.totalorder %s1295_s15, 1  ;;  %s1295_s15 = sphi %s1322_s15, %s14_s15  }
   0x2   : > { %p175_p1 = scmp.lt.s32.totalorder %s1295_s15, 3 }
   0x4   : > { %p176_p2 = pnand %p999_p0, %p175_p1 }
   0x5   : > { %s1000_s23 = sshll.u32 (!%p176_p2), %s995_s16, 3 }
   0x6   : > { %179 = sbr.rel (%p176_p2) target bundleno = 286 (0x11e), region = 36  ;;  %p208_p3 = scmp.lt.s32.totalorder (!%p176_p2), %s1000_s23, 15 }
   0xb   : > { %v1225_v0 = vld [vmem:[%s1526_s1 + $0x78] sm:$0xff]   ;;  %v1229_v4 = vld [vmem:[%s1526_s1 + $0x70] sm:$0xff]   ;;  %v1233_v8 = vld [vmem:[%s1526_s1 + $0x68] sm:$0xff]   ;;  %s1531_s23 = smov (!%p208_p3, %s1000_s23), 15  ;;  %vm646_vm0 = vcmask 523264   ;;  %vm918_vm1 = vcmask 519168  }
   0xc   : > { %v1226_v1 = vld [vmem:[%s1526_s1 + $0xf8] sm:$0xff]   ;;  %1104 = vmatprep.subr.bf16.mxu0 %v1225_v0  ;;  %v1230_v5 = vld [vmem:[%s1526_s1 + $0xf0] sm:$0xff]   ;;  %v1234_v9 = vld [vmem:[%s1526_s1 + $0xe8] sm:$0xff]   ;;  %s1216_s21 = smul.u32 20, %s1531_s23 }
   0xd   : > { %v1227_v2 = vld [vmem:[%s1526_s1 + $0x38] sm:$0xff]   ;;  %1144 = vmatprep.subr.bf16.mxu1 %v1226_v1  ;;  %v1231_v6 = vld [vmem:[%s1526_s1 + $0x30] sm:$0xff]   ;;  %v1235_v10 = vld [vmem:[%s1526_s1 + $0x28] sm:$0xff]  }
   0xe   : > { %v1228_v3 = vld [vmem:[%s1526_s1 + $0xb8] sm:$0xff]   ;;  %1105 = vmatpush3.bf16.msra.mxu0 %v1227_v2  ;;  %v1232_v7 = vld [vmem:[%s1526_s1 + $0xb0] sm:$0xff]   ;;  %v1236_v11 = vld [vmem:[%s1526_s1 + $0xa8] sm:$0xff]   ;;  %s1428_s6 = scalar_lea.vmem %s1525_s0, %s1216_s21  ;;  %s1003_s21 = sshll.u32 %s1531_s23, 2 }
   0xf   : > { %1145 = vmatpush3.bf16.msra.mxu1 %v1228_v3  ;;  %1106 = vmatprep.subr.bf16.mxu0 %v1229_v4  ;;  %v1237_v12 = vld [vmem:[%s1526_s1 + $0x60] sm:$0xff]   ;;  %v1241_v16 = vld [vmem:[%s1526_s1 + $0x58] sm:$0xff]   ;;  %v1245_v20 = vld [vmem:[%s1526_s1 + $0x50] sm:$0xff]   ;;  %s218_s25 = scalar_lea.vmem %s1528_s3, %s1003_s21  ;;  %s1504_s30 = scalar_lea.vmem %s1529_s4, %s1003_s21 }
  0x10   : > { %1146 = vmatprep.subr.bf16.mxu1 %v1230_v5  ;;  %v1238_v13 = vld [vmem:[%s1526_s1 + $0xe0] sm:$0xff]   ;;  %v1242_v17 = vld [vmem:[%s1526_s1 + $0xd8] sm:$0xff]   ;;  %v1246_v21 = vld [vmem:[%s1526_s1 + $0xd0] sm:$0xff]  }
  0x11   : > { %v1239_v14 = vld [vmem:[%s1526_s1 + $0x20] sm:$0xff]   ;;  %v1243_v18 = vld [vmem:[%s1526_s1 + $0x18] sm:$0xff]   ;;  %v1247_v22 = vld [vmem:[%s1526_s1 + $0x10] sm:$0xff]  }
  0x12   : > { %1107 = vmatpush3.bf16.msra.mxu0 %v1231_v6  ;;  %v1240_v15 = vld [vmem:[%s1526_s1 + $0xa0] sm:$0xff]   ;;  %v1244_v19 = vld [vmem:[%s1526_s1 + $0x98] sm:$0xff]   ;;  %v1248_v23 = vld [vmem:[%s1526_s1 + $0x90] sm:$0xff]  }
  0x13   : > { %1147 = vmatpush3.bf16.msra.mxu1 %v1232_v7  ;;  %1108 = vmatprep.subr.bf16.mxu0 %v1233_v8  ;;  %v1249_v24 = vld [vmem:[%s1526_s1 + $0x48] sm:$0xff]   ;;  %v1253_v28 = vld [vmem:[%s1526_s1 + $0x40] sm:$0xff]   ;;  %v1263_v36 = vld [vmem:[%s1526_s1 + $0x118] sm:$0xff]  }
  0x14   : > { %1148 = vmatprep.subr.bf16.mxu1 %v1234_v9  ;;  %v1250_v25 = vld [vmem:[%s1526_s1 + $0xc8] sm:$0xff]   ;;  %v1254_v29 = vld [vmem:[%s1526_s1 + $0xc0] sm:$0xff]   ;;  %v1270_v39 = vld [vmem:[%s1526_s1 + $0x110] sm:$0xff]  }
  0x15   : > { %v1251_v26 = vld [vmem:[%s1526_s1 + $0x8] sm:$0xff]   ;;  %v1255_v30 = vld [vmem:[%s1526_s1] sm:$0xff]   ;;  %v1273_v43 = vld [vmem:[%s1428_s6 + $0x5c] ss:$20 sps:$4 sm:$0xff]  }
  0x16   : > { %1109 = vmatpush3.bf16.msra.mxu0 %v1235_v10  ;;  %v1252_v27 = vld [vmem:[%s1526_s1 + $0x88] sm:$0xff]   ;;  %v1256_v31 = vld [vmem:[%s1526_s1 + $0x80] sm:$0xff]   ;;  %v1278_v48 = vld [vmem:[%s1428_s6 + $0x7c] ss:$20 sps:$4 sm:$0xff]  }
  0x17   : > { %1149 = vmatpush3.bf16.msra.mxu1 %v1236_v11  ;;  %1110 = vmatprep.subr.bf16.mxu0 %v1237_v12  ;;  %v1257_v32 = vld [vmem:[%s1428_s6] ss:$20 sps:$4 sm:$0xff]   ;;  %v1259_v33 = vld [vmem:[%s1428_s6 + $0x4] ss:$20 sps:$4 sm:$0xff]   ;;  %v1260_v34 = vld [vmem:[%s1428_s6 + $0x8] ss:$20 sps:$4 sm:$0xff]  }
  0x18   : > { %1150 = vmatprep.subr.bf16.mxu1 %v1238_v13  ;;  %v1262_v35 = vld [vmem:[%s1428_s6 + $0xc] ss:$20 sps:$4 sm:$0xff]   ;;  %691 = vmatprep.mubr.bf16.mxu0 %v1259_v33  ;;  %v1266_v38 = vld [vmem:[%s1428_s6 + $0x34] ss:$20 sps:$4 sm:$0xff]   ;;  %v1269_v41 = vld [vmem:[%s1428_s6 + $0x30] ss:$20 sps:$4 sm:$0xff]  }
  0x19   : > { %756 = vmatprep.mubr.bf16.mxu1 %v1262_v35  ;;  %v1264_v37 = vld [vmem:[%s1428_s6 + $0x2c] ss:$20 sps:$4 sm:$0xff]   ;;  %v1268_v40 = vld [vmem:[%s1428_s6 + $0x28] ss:$20 sps:$4 sm:$0xff]   ;;  %v1275_v46 = vld [vmem:[%s1428_s6 + $0x50] ss:$20 sps:$4 sm:$0xff]  }
  0x1a   : > { %1111 = vmatpush3.bf16.msra.mxu0 %v1239_v14  ;;  %v1271_v42 = vld [vmem:[%s1428_s6 + $0x54] ss:$20 sps:$4 sm:$0xff]   ;;  %v1284_v45 = vld [vmem:[%s1526_s1 + $0x100] sm:$0xff]   ;;  %v1276_v47 = vld [vmem:[%s1428_s6 + $0x58] ss:$20 sps:$4 sm:$0xff]  }
  0x1b   : > { %1151 = vmatpush3.bf16.msra.mxu1 %v1240_v15  ;;  %1112 = vmatprep.subr.bf16.mxu0 %v1241_v16  ;;  %v1277_v44 = vld [vmem:[%s1526_s1 + $0x108] sm:$0xff]   ;;  %v1280_v49 = vld [vmem:[%s1428_s6 + $0x84] ss:$20 sps:$4 sm:$0xff]   ;;  %v1283_v51 = vld [vmem:[%s1428_s6 + $0x80] ss:$20 sps:$4 sm:$0xff]  }
  0x1c   : > { %1152 = vmatprep.subr.bf16.mxu1 %v1242_v17  ;;  %v1282_v50 = vld [vmem:[%s1428_s6 + $0x78] ss:$20 sps:$4 sm:$0xff]   ;;  %v1285_v52 = vld [vmem:[%s1428_s6 + $0x10] ss:$20 sps:$4 sm:$0xff]   ;;  %v1286_v53 = vld [vmem:[%s1428_s6 + $0x60] ss:$20 sps:$4 sm:$0xff]  }
  0x1d   : > { %v1287_v54 = vld [vmem:[%s1428_s6 + $0x38] ss:$20 sps:$4 sm:$0xff]   ;;  %v1288_v55 = vld [vmem:[%s1428_s6 + $0x88] ss:$20 sps:$4 sm:$0xff]  }
  0x1e   : > { %1113 = vmatpush3.bf16.msra.mxu0 %v1243_v18  ;;  %v1478_v17 = vld [vmem:[%s218_s25 + $0x8] sm:$0xff]   ;;  %v1480_v18 = vld [vmem:[%s218_s25 + $0x18] sm:$0xff]  }
  0x1f   : > { %1153 = vmatpush3.bf16.msra.mxu1 %v1244_v19  ;;  %1114 = vmatprep.subr.bf16.mxu0 %v1245_v20 }
  0x20   : > { %1154 = vmatprep.subr.bf16.mxu1 %v1246_v21  ;;  %v1482_v21 = vld [vmem:[%s218_s25] sm:$0xff]  }
  0x21   : > { %v1087_v33 = vunpack.c.l.bf16 %v1482_v21 }
  0x22   : > { %1115 = vmatpush3.bf16.msra.mxu0 %v1247_v22  ;;  %v1006_v22 = vld [vmem:[%s1527_s2] ss:$0 sm:$0xff] }
  0x23   : > { %1155 = vmatpush3.bf16.msra.mxu1 %v1248_v23  ;;  %1116 = vmatprep.subr.bf16.mxu0 %v1249_v24  ;;  %v1487_v24 = vld [vmem:[%s218_s25 + $0x10] sm:$0xff]  }
  0x24   : > { %1156 = vmatprep.subr.bf16.mxu1 %v1250_v25 }
  0x26   : > { %1117 = vmatpush3.bf16.msra.mxu0 %v1251_v26 }
  0x27   : > { %1157 = vmatpush3.bf16.msra.mxu1 %v1252_v27  ;;  %1118 = vmatprep.subr.bf16.mxu0 %v1253_v28  ;;  %v1091_v27 = vunpack.c.l.bf16 %v1478_v17  ;;  %v1099_v28 = vunpack.c.l.bf16 %v1480_v18 }
  0x28   : > { %1158 = vmatprep.subr.bf16.mxu1 %v1254_v29 }
  0x2a   : > { %1119 = vmatpush3.bf16.msra.mxu0 %v1255_v30 }
  0x2b   : > { %1159 = vmatpush3.bf16.msra.mxu1 %v1256_v31  ;;  %1192 = vmatprep.subr.bf16.mxu0 %v1263_v36 }
  0x2c   : > { %1208 = vmatprep.subr.bf16.mxu1 %v1263_v36 }
  0x2d   : > { %692 = vmatmul.mubr.bf16.vlgmr.msra.gmra.mxu0 %v1257_v32 }
  0x2e   : > { %757 = vmatmul.mubr.bf16.vlgmr.msra.gmra.mxu1 %v1260_v34  ;;  %1193 = vmatpush3.bf16.msra.mxu0 %v1263_v36 }
  0x2f   : > { %1212 = vmatpush3.bf16.msra.mxu1 %v1263_v36  ;;  %699 = vmatprep.mubr.bf16.mxu0 %v1264_v37  ;;  %v1095_v37 = vunpack.c.l.bf16 %v1487_v24 }
  0x30   : > { %764 = vmatprep.mubr.bf16.mxu1 %v1266_v38  ;;  %1194 = vmatprep.subr.bf16.mxu0 %v1270_v39  ;;  %v1092_v38 = vunpack.c.h.bf16 %v1478_v17  ;;  %v1096_v17 = vunpack.c.h.bf16 %v1487_v24 }
  0x31   : > { %1209 = vmatprep.subr.bf16.mxu1 %v1270_v39 }
  0x32   : > { %1195 = vmatpush3.bf16.msra.mxu0 %v1270_v39 }
  0x33   : > { %1213 = vmatpush3.bf16.msra.mxu1 %v1270_v39  ;;  %1196 = vmatprep.subr.bf16.mxu0 %v1277_v44 }
  0x34   : > { %1210 = vmatprep.subr.bf16.mxu1 %v1277_v44 }
  0x35   : > { %700 = vmatmul.mubr.bf16.gmra.mxu0 %v1268_v40 }
  0x36   : > { %765 = vmatmul.mubr.bf16.gmra.mxu1 %v1269_v41  ;;  %707 = vmatprep.mubr.bf16.mxu0 %v1271_v42 }
  0x37   : > { %772 = vmatprep.mubr.bf16.mxu1 %v1273_v43  ;;  %1197 = vmatpush3.bf16.msra.mxu0 %v1277_v44  ;;  %v1100_v43 = vunpack.c.h.bf16 %v1480_v18 }
  0x38   : > { %1214 = vmatpush3.bf16.msra.mxu1 %v1277_v44  ;;  %1198 = vmatprep.subr.bf16.mxu0 %v1284_v45 }
  0x39   : > { %1211 = vmatprep.subr.bf16.mxu1 %v1284_v45 }
  0x3b   : > { %1199 = vmatpush3.bf16.msra.mxu0 %v1284_v45 }
  0x3c   : > { %1215 = vmatpush3.bf16.msra.mxu1 %v1284_v45 }
  0x3d   : > { %708 = vmatmul.mubr.bf16.gmra.mxu0 %v1275_v46 }
  0x3e   : > { %773 = vmatmul.mubr.bf16.gmra.mxu1 %v1276_v47  ;;  %715 = vmatprep.mubr.bf16.mxu0 %v1278_v48 }
  0x3f   : > { %780 = vmatprep.mubr.bf16.mxu1 %v1280_v49 }
  0x45   : > { %716 = vmatmul.mubr.bf16.gmra.mxu0 %v1282_v50 }
  0x46   : > { %781 = vmatmul.mubr.bf16.gmra.mxu1 %v1283_v51  ;;  %1200 = vmatprep.mubr.msk.bf16.mxu0 %vm646_vm0, %v1285_v52 }
  0x47   : > { %1204 = vmatprep.mubr.msk.bf16.mxu1 %vm646_vm0, %v1286_v53 }
  0x4d   : > { %1201 = vmatmul.mubr.msk.bf16.vlgmr.msra.gmra.mxu0 %vm646_vm0, %v1287_v54 }
  0x4e   : > { %1205 = vmatmul.mubr.msk.bf16.vlgmr.msra.gmra.mxu1 %vm646_vm0, %v1288_v55 }
  0xed   : > { %v1120_v56 = vpop.f32.mrf.mxu0 }
  0xee   : > { %v1160_v57 = vpop.f32.mrf.mxu1 }
  0xef   : > { %v1121_v58 = vpop.f32.mrf.mxu0 }
  0xf0   : > { %v1161_v59 = vpop.f32.mrf.mxu1  ;;  %v1122_v19 = vadd.f32 %v1121_v58, %v1120_v56  ;;  %v1088_v58 = vunpack.c.h.bf16 %v1482_v21 }
  0xf1   : > { %v1123_v60 = vpop.f32.mrf.mxu0  ;;  %v1162_v44 = vadd.f32 %v1161_v59, %v1160_v57 }
  0xf2   : > { %v1468_v61 = vpop.f32.mrf.mxu1  ;;  %v694_v34 = vadd.f32 %v1122_v19, %v1006_v22 }
  0xf3   : > { %v1124_v62 = vpop.f32.mrf.mxu0 }
  0xf4   : > { %v1470_v63 = vpop.f32.mrf.mxu1  ;;  %v1125_v35 = vadd.f32 %v1124_v62, %v1123_v60  ;;  %v759_v56 = vadd.f32 %v1162_v44, %v694_v34 }
  0xf5   : > { %v1126_v0 = vpop.f32.mrf.mxu0  ;;  %v1165_v59 = vadd.f32 %v1470_v63, %v1468_v61 }
  0xf6   : > { %v1166_v1 = vpop.f32.mrf.mxu1  ;;  %v697_v53 = vadd.f32 %v1125_v35, %v1006_v22 }
  0xf7   : > { %v1127_v2 = vpop.f32.mrf.mxu0 }
  0xf8   : > { %v1167_v3 = vpop.f32.mrf.mxu1  ;;  %v1128_v15 = vadd.f32 %v1127_v2, %v1126_v0  ;;  %v762_v63 = vadd.f32 %v1165_v59, %v697_v53 }
  0xf9   : > { %v1129_v4 = vpop.f32.mrf.mxu0  ;;  %v1168_v39 = vadd.f32 %v1167_v3, %v1166_v1 }
  0xfa   : > { %v1169_v5 = vpop.f32.mrf.mxu1  ;;  %v702_v29 = vadd.f32 %v1128_v15, %v1006_v22 }
  0xfb   : > { %v1130_v6 = vpop.f32.mrf.mxu0 }
  0xfc   : > { %v1170_v7 = vpop.f32.mrf.mxu1  ;;  %v1131_v30 = vadd.f32 %v1130_v6, %v1129_v4  ;;  %v767_v51 = vadd.f32 %v1168_v39, %v702_v29 }
  0xfd   : > { %v1132_v8 = vpop.f32.mrf.mxu0  ;;  %v1171_v60 = vadd.f32 %v1170_v7, %v1169_v5 }
  0xfe   : > { %v1172_v9 = vpop.f32.mrf.mxu1  ;;  %v705_v48 = vadd.f32 %v1131_v30, %v1006_v22 }
  0xff   : > { %v1133_v10 = vpop.f32.mrf.mxu0 }
 0x100   : > { %v1173_v11 = vpop.f32.mrf.mxu1  ;;  %v1134_v25 = vadd.f32 %v1133_v10, %v1132_v8 }
 0x101   : > { %v1135_v12 = vpop.f32.mrf.mxu0  ;;  %v1174_v54 = vadd.f32 %v1173_v11, %v1172_v9  ;;  %v770_v11 = vadd.f32 %v1171_v60, %v705_v48 }
 0x102   : > { %v1175_v13 = vpop.f32.mrf.mxu1  ;;  %v710_v45 = vadd.f32 %v1134_v25, %v1006_v22 }
 0x103   : > { %v1136_v14 = vpop.f32.mrf.mxu0 }
 0x104   : > { %v1176_v16 = vpop.f32.mrf.mxu1  ;;  %v1137_v46 = vadd.f32 %v1136_v14, %v1135_v12  ;;  %v775_v6 = vadd.f32 %v1174_v54, %v710_v45 }
 0x105   : > { %v1138_v20 = vpop.f32.mrf.mxu0  ;;  %v1177_v14 = vadd.f32 %v1176_v16, %v1175_v13 }
 0x106   : > { %v1178_v23 = vpop.f32.mrf.mxu1  ;;  %v713_v2 = vadd.f32 %v1137_v46, %v1006_v22 }
 0x107   : > { %v1139_v26 = vpop.f32.mrf.mxu0 }
 0x108   : > { %v1140_v31 = vadd.f32 %v1139_v26, %v1138_v20  ;;  %v1179_v32 = vpop.f32.mrf.mxu1 }
 0x109   : > { %v1141_v36 = vpop.f32.mrf.mxu0  ;;  %v1180_v41 = vadd.f32 %v1179_v32, %v1178_v23  ;;  %v778_v23 = vadd.f32 %v1177_v14, %v713_v2 }
 0x10a   : > { %v718_v40 = vadd.f32 %v1140_v31, %v1006_v22  ;;  %v1181_v42 = vpop.f32.mrf.mxu1 }
 0x10b   : > { %v1142_v47 = vpop.f32.mrf.mxu0 }
 0x10c   : > { %v1143_v49 = vadd.f32 %v1142_v47, %v1141_v36  ;;  %v1182_v50 = vpop.f32.mrf.mxu1  ;;  %v783_v52 = vadd.f32 %v1180_v41, %v718_v40 }
 0x10d   : > { %v1202_v55 = vpop.f32.mrf.mxu0  ;;  %v1183_v0 = vadd.f32 %v1182_v50, %v1181_v42 }
 0x10e   : > { %v721_v62 = vadd.f32 %v1143_v49, %v1006_v22  ;;  %v832_v1 = vadd.f32 %v1202_v55, %v767_v51  ;;  %v1206_v57 = vpop.f32.mrf.mxu1 }
 0x10f   : > { %v848_v3 = vadd.f32 %v1206_v57, %v783_v52  ;;  %v823_v4 = vpop.f32.mrf.mxu0 }
 0x110   : > { %v872_v8 = vadd.f32 %v1091_v27, %v832_v1  ;;  %v824_v10 = vadd.f32 %v823_v4, %v759_v56  ;;  %v839_v9 = vpop.f32.mrf.mxu1  ;;  %v786_v12 = vadd.f32 %v1183_v0, %v721_v62 }
 0x111   : > { %v876_v15 = vadd.f32 %v1099_v28, %v848_v3  ;;  %v840_v5 = vadd.f32 %v839_v9, %v775_v6  ;;  %v1203_v7 = vpop.f32.mrf.mxu0 }
 0x112   : > { %v880_v18 = vmax.f32 %v872_v8, 0.0  ;;  %v870_v19 = vadd.f32 %v1087_v33, %v824_v10  ;;  %v835_v20 = vadd.f32 %v1203_v7, %v770_v11  ;;  %v1207_v61 = vpop.f32.mrf.mxu1 }
 0x113   : > { %v884_v21 = vmax.f32 %v876_v15, 0.0  ;;  %v874_v22 = vadd.f32 %v1095_v37, %v840_v5  ;;  %v851_v13 = vadd.f32 %v1207_v61, %v786_v12  ;;  %v826_v16 = vpop.f32.mrf.mxu0 }
 0x114   : > { %v1079_v25 = vpack.c.bf16 %v880_v18, %v880_v18  ;;  %v878_v24 = vmax.f32 %v870_v19, 0.0  ;;  %v873_v26 = vadd.f32 %v1092_v38, %v835_v20  ;;  %v827_v27 = vadd.f32 %v826_v16, %v762_v63  ;;  %v842_v28 = vpop.f32.mrf.mxu1 }
 0x115   : > { %v1083_v29 = vpack.c.bf16 %v884_v21, %v884_v21  ;;  %v882_v30 = vmax.f32 %v874_v22, 0.0  ;;  %v877_v31 = vadd.f32 %v1100_v43, %v851_v13  ;;  %v843_v32 = vadd.f32 %v842_v28, %v778_v23 }
 0x116   : > { %921 = vst.msk [vmem:[%s1504_s30 + $0x8] sm:$0xf] %vm918_vm1, %v1079_v25  ;;  %v1077_v33 = vpack.c.bf16 %v878_v24, %v878_v24  ;;  %v881_v34 = vmax.f32 %v873_v26, 0.0  ;;  %v871_v35 = vadd.f32 %v1088_v58, %v827_v27 }
 0x117   : > { %925 = vst.msk [vmem:[%s1504_s30 + $0x18] sm:$0xf] %vm918_vm1, %v1083_v29  ;;  %v1081_v36 = vpack.c.bf16 %v882_v30, %v882_v30  ;;  %v885_v37 = vmax.f32 %v877_v31, 0.0  ;;  %v875_v38 = vadd.f32 %v1096_v17, %v843_v32 }
 0x118   : > { %919 = vst.msk [vmem:[%s1504_s30] sm:$0xf] %vm918_vm1, %v1077_v33  ;;  %v1080_v39 = vpack.c.bf16 %v881_v34, %v881_v34  ;;  %v879_v40 = vmax.f32 %v871_v35, 0.0 }
 0x119   : > { %923 = vst.msk [vmem:[%s1504_s30 + $0x10] sm:$0xf] %vm918_vm1, %v1081_v36  ;;  %v1084_v41 = vpack.c.bf16 %v885_v37, %v885_v37  ;;  %v883_v42 = vmax.f32 %v875_v38, 0.0 }
 0x11a   : > { %922 = vst.msk [vmem:[%s1504_s30 + $0xc] sm:$0xf] %vm918_vm1, %v1080_v39  ;;  %v1078_v43 = vpack.c.bf16 %v879_v40, %v879_v40 }
 0x11b   : > { %926 = vst.msk [vmem:[%s1504_s30 + $0x1c] sm:$0xf] %vm918_vm1, %v1084_v41  ;;  %v1082_v44 = vpack.c.bf16 %v883_v42, %v883_v42 }
 0x11c   : > { %920 = vst.msk [vmem:[%s1504_s30 + $0x4] sm:$0xf] %vm918_vm1, %v1078_v43 }
 0x11d   : > { %924 = vst.msk [vmem:[%s1504_s30 + $0x14] sm:$0xf] %vm918_vm1, %v1082_v44 }
 0x11e PF: > { %s14_s15 = sadd.s32 1, %s1295_s15  }
 0x11f   : > { %p11_p4 = scmp.ge.s32.totalorder %s14_s15, 4  }
 0x121   :  { %13 = sbr.rel (!%p11_p4) target bundleno = 1 (0x1), region = 69 }

// kernel: base_net_forward.55
= control target key start
LH: loop header
LB: loop body
LE: loop exit
PB: predicated region body
PF: predicated region fallthrough
CT: control target
= control target key end

     0   :  { %s1211_s12 = smov 0   ;;  %s1385_s0 = inlined_call_operand.vmem [shape: bf16[128,576], index: 0, kind: input, shape index: {}]   ;;  %s1386_s1 = inlined_call_operand.vmem [shape: bf16[576,64], index: 1, kind: input, shape index: {}]   ;;  %s1387_s2 = inlined_call_operand.vmem [shape: f32[1,64], index: 2, kind: input, shape index: {}]   ;;  %s1388_s3 = inlined_call_operand.vmem [shape: bf16[128,64], index: 3, kind: output, shape index: {}]  }
   0x1 LB: > { %s910_s13 = sadd.s32 4294967295, %s1189_s12   ;;  %p914_p0 = scmp.ge.s32.totalorder %s1189_s12, 1  ;;  %s1189_s12 = sphi %s1211_s12, %s13_s12  }
   0x2   : > { %p139_p1 = scmp.lt.s32.totalorder %s1189_s12, 3 }
   0x4   : > { %p140_p2 = pnand %p914_p0, %p139_p1 }
   0x5   : > { %s915_s19 = sshll.u32 (!%p140_p2), %s910_s13, 3 }
   0x6   : > { %143 = sbr.rel (%p140_p2) target bundleno = 284 (0x11c), region = 32  ;;  %p165_p3 = scmp.lt.s32.totalorder (!%p140_p2), %s915_s19, 15 }
   0xb   : > { %v1119_v0 = vld [vmem:[%s1386_s1 + $0x78] sm:$0xff]   ;;  %v1123_v4 = vld [vmem:[%s1386_s1 + $0x70] sm:$0xff]   ;;  %v1127_v8 = vld [vmem:[%s1386_s1 + $0x68] sm:$0xff]   ;;  %s1390_s19 = smov (!%p165_p3, %s915_s19), 15  ;;  %vm597_vm0 = vcmask 523264   ;;  %vm845_vm1 = vcmask 519168  }
   0xc   : > { %v1120_v1 = vld [vmem:[%s1386_s1 + $0xf8] sm:$0xff]   ;;  %998 = vmatprep.subr.bf16.mxu0 %v1119_v0  ;;  %v1124_v5 = vld [vmem:[%s1386_s1 + $0xf0] sm:$0xff]   ;;  %v1128_v9 = vld [vmem:[%s1386_s1 + $0xe8] sm:$0xff]   ;;  %s1110_s16 = smul.u32 20, %s1390_s19  ;;  %s918_s17 = sshll.u32 %s1390_s19, 2 }
   0xd   : > { %v1121_v2 = vld [vmem:[%s1386_s1 + $0x38] sm:$0xff]   ;;  %1038 = vmatprep.subr.bf16.mxu1 %v1120_v1  ;;  %v1125_v6 = vld [vmem:[%s1386_s1 + $0x30] sm:$0xff]   ;;  %v1129_v10 = vld [vmem:[%s1386_s1 + $0x28] sm:$0xff]   ;;  %s1364_s21 = scalar_lea.vmem %s1388_s3, %s918_s17 }
   0xe   : > { %v1122_v3 = vld [vmem:[%s1386_s1 + $0xb8] sm:$0xff]   ;;  %999 = vmatpush3.bf16.msra.mxu0 %v1121_v2  ;;  %v1126_v7 = vld [vmem:[%s1386_s1 + $0xb0] sm:$0xff]   ;;  %v1130_v11 = vld [vmem:[%s1386_s1 + $0xa8] sm:$0xff]   ;;  %s1317_s13 = scalar_lea.vmem %s1385_s0, %s1110_s16 }
   0xf   : > { %1039 = vmatpush3.bf16.msra.mxu1 %v1122_v3  ;;  %1000 = vmatprep.subr.bf16.mxu0 %v1123_v4  ;;  %v1131_v12 = vld [vmem:[%s1386_s1 + $0x60] sm:$0xff]   ;;  %v1135_v16 = vld [vmem:[%s1386_s1 + $0x58] sm:$0xff]   ;;  %v1139_v20 = vld [vmem:[%s1386_s1 + $0x50] sm:$0xff]  }
  0x10   : > { %1040 = vmatprep.subr.bf16.mxu1 %v1124_v5  ;;  %v1132_v13 = vld [vmem:[%s1386_s1 + $0xe0] sm:$0xff]   ;;  %v1136_v17 = vld [vmem:[%s1386_s1 + $0xd8] sm:$0xff]   ;;  %v1140_v21 = vld [vmem:[%s1386_s1 + $0xd0] sm:$0xff]  }
  0x11   : > { %v1133_v14 = vld [vmem:[%s1386_s1 + $0x20] sm:$0xff]   ;;  %v1137_v18 = vld [vmem:[%s1386_s1 + $0x18] sm:$0xff]   ;;  %v1141_v22 = vld [vmem:[%s1386_s1 + $0x10] sm:$0xff]  }
  0x12   : > { %1001 = vmatpush3.bf16.msra.mxu0 %v1125_v6  ;;  %v1134_v15 = vld [vmem:[%s1386_s1 + $0xa0] sm:$0xff]   ;;  %v1138_v19 = vld [vmem:[%s1386_s1 + $0x98] sm:$0xff]   ;;  %v1142_v23 = vld [vmem:[%s1386_s1 + $0x90] sm:$0xff]  }
  0x13   : > { %1041 = vmatpush3.bf16.msra.mxu1 %v1126_v7  ;;  %1002 = vmatprep.subr.bf16.mxu0 %v1127_v8  ;;  %v1143_v24 = vld [vmem:[%s1386_s1 + $0x48] sm:$0xff]   ;;  %v1147_v28 = vld [vmem:[%s1386_s1 + $0x40] sm:$0xff]   ;;  %v1157_v36 = vld [vmem:[%s1386_s1 + $0x118] sm:$0xff]  }
  0x14   : > { %1042 = vmatprep.subr.bf16.mxu1 %v1128_v9  ;;  %v1144_v25 = vld [vmem:[%s1386_s1 + $0xc8] sm:$0xff]   ;;  %v1148_v29 = vld [vmem:[%s1386_s1 + $0xc0] sm:$0xff]   ;;  %v1164_v39 = vld [vmem:[%s1386_s1 + $0x110] sm:$0xff]  }
  0x15   : > { %v1145_v26 = vld [vmem:[%s1386_s1 + $0x8] sm:$0xff]   ;;  %v1149_v30 = vld [vmem:[%s1386_s1] sm:$0xff]   ;;  %v1167_v43 = vld [vmem:[%s1317_s13 + $0x5c] ss:$20 sps:$4 sm:$0xff]  }
  0x16   : > { %1003 = vmatpush3.bf16.msra.mxu0 %v1129_v10  ;;  %v1146_v27 = vld [vmem:[%s1386_s1 + $0x88] sm:$0xff]   ;;  %v1150_v31 = vld [vmem:[%s1386_s1 + $0x80] sm:$0xff]   ;;  %v1172_v48 = vld [vmem:[%s1317_s13 + $0x7c] ss:$20 sps:$4 sm:$0xff]  }
  0x17   : > { %1043 = vmatpush3.bf16.msra.mxu1 %v1130_v11  ;;  %1004 = vmatprep.subr.bf16.mxu0 %v1131_v12  ;;  %v1151_v32 = vld [vmem:[%s1317_s13] ss:$20 sps:$4 sm:$0xff]   ;;  %v1153_v33 = vld [vmem:[%s1317_s13 + $0x4] ss:$20 sps:$4 sm:$0xff]   ;;  %v1154_v34 = vld [vmem:[%s1317_s13 + $0x8] ss:$20 sps:$4 sm:$0xff]  }
  0x18   : > { %1044 = vmatprep.subr.bf16.mxu1 %v1132_v13  ;;  %v1156_v35 = vld [vmem:[%s1317_s13 + $0xc] ss:$20 sps:$4 sm:$0xff]   ;;  %642 = vmatprep.mubr.bf16.mxu0 %v1153_v33  ;;  %v1160_v38 = vld [vmem:[%s1317_s13 + $0x34] ss:$20 sps:$4 sm:$0xff]   ;;  %v1163_v41 = vld [vmem:[%s1317_s13 + $0x30] ss:$20 sps:$4 sm:$0xff]  }
  0x19   : > { %707 = vmatprep.mubr.bf16.mxu1 %v1156_v35  ;;  %v1158_v37 = vld [vmem:[%s1317_s13 + $0x2c] ss:$20 sps:$4 sm:$0xff]   ;;  %v1162_v40 = vld [vmem:[%s1317_s13 + $0x28] ss:$20 sps:$4 sm:$0xff]   ;;  %v1169_v46 = vld [vmem:[%s1317_s13 + $0x50] ss:$20 sps:$4 sm:$0xff]  }
  0x1a   : > { %1005 = vmatpush3.bf16.msra.mxu0 %v1133_v14  ;;  %v1165_v42 = vld [vmem:[%s1317_s13 + $0x54] ss:$20 sps:$4 sm:$0xff]   ;;  %v1178_v45 = vld [vmem:[%s1386_s1 + $0x100] sm:$0xff]   ;;  %v1170_v47 = vld [vmem:[%s1317_s13 + $0x58] ss:$20 sps:$4 sm:$0xff]  }
  0x1b   : > { %1045 = vmatpush3.bf16.msra.mxu1 %v1134_v15  ;;  %1006 = vmatprep.subr.bf16.mxu0 %v1135_v16  ;;  %v1171_v44 = vld [vmem:[%s1386_s1 + $0x108] sm:$0xff]   ;;  %v1174_v49 = vld [vmem:[%s1317_s13 + $0x84] ss:$20 sps:$4 sm:$0xff]   ;;  %v1177_v51 = vld [vmem:[%s1317_s13 + $0x80] ss:$20 sps:$4 sm:$0xff]  }
  0x1c   : > { %1046 = vmatprep.subr.bf16.mxu1 %v1136_v17  ;;  %v1176_v50 = vld [vmem:[%s1317_s13 + $0x78] ss:$20 sps:$4 sm:$0xff]   ;;  %v1179_v52 = vld [vmem:[%s1317_s13 + $0x10] ss:$20 sps:$4 sm:$0xff]   ;;  %v1180_v53 = vld [vmem:[%s1317_s13 + $0x60] ss:$20 sps:$4 sm:$0xff]  }
  0x1d   : > { %v1181_v54 = vld [vmem:[%s1317_s13 + $0x38] ss:$20 sps:$4 sm:$0xff]   ;;  %v1182_v55 = vld [vmem:[%s1317_s13 + $0x88] ss:$20 sps:$4 sm:$0xff]  }
  0x1e   : > { %1007 = vmatpush3.bf16.msra.mxu0 %v1137_v18 }
  0x1f   : > { %1047 = vmatpush3.bf16.msra.mxu1 %v1138_v19  ;;  %1008 = vmatprep.subr.bf16.mxu0 %v1139_v20  ;;  %v919_v19 = vld [vmem:[%s1387_s2] ss:$0 sm:$0xff] }
  0x20   : > { %1048 = vmatprep.subr.bf16.mxu1 %v1140_v21 }
  0x22   : > { %1009 = vmatpush3.bf16.msra.mxu0 %v1141_v22 }
  0x23   : > { %1049 = vmatpush3.bf16.msra.mxu1 %v1142_v23  ;;  %1010 = vmatprep.subr.bf16.mxu0 %v1143_v24 }
  0x24   : > { %1050 = vmatprep.subr.bf16.mxu1 %v1144_v25 }
  0x26   : > { %1011 = vmatpush3.bf16.msra.mxu0 %v1145_v26 }
  0x27   : > { %1051 = vmatpush3.bf16.msra.mxu1 %v1146_v27  ;;  %1012 = vmatprep.subr.bf16.mxu0 %v1147_v28 }
  0x28   : > { %1052 = vmatprep.subr.bf16.mxu1 %v1148_v29 }
  0x2a   : > { %1013 = vmatpush3.bf16.msra.mxu0 %v1149_v30 }
  0x2b   : > { %1053 = vmatpush3.bf16.msra.mxu1 %v1150_v31  ;;  %1086 = vmatprep.subr.bf16.mxu0 %v1157_v36 }
  0x2c   : > { %1102 = vmatprep.subr.bf16.mxu1 %v1157_v36 }
  0x2d   : > { %643 = vmatmul.mubr.bf16.vlgmr.msra.gmra.mxu0 %v1151_v32 }
  0x2e   : > { %708 = vmatmul.mubr.bf16.vlgmr.msra.gmra.mxu1 %v1154_v34  ;;  %1087 = vmatpush3.bf16.msra.mxu0 %v1157_v36 }
  0x2f   : > { %1106 = vmatpush3.bf16.msra.mxu1 %v1157_v36  ;;  %650 = vmatprep.mubr.bf16.mxu0 %v1158_v37 }
  0x30   : > { %715 = vmatprep.mubr.bf16.mxu1 %v1160_v38  ;;  %1088 = vmatprep.subr.bf16.mxu0 %v1164_v39 }
  0x31   : > { %1103 = vmatprep.subr.bf16.mxu1 %v1164_v39 }
  0x32   : > { %1089 = vmatpush3.bf16.msra.mxu0 %v1164_v39 }
  0x33   : > { %1107 = vmatpush3.bf16.msra.mxu1 %v1164_v39  ;;  %1090 = vmatprep.subr.bf16.mxu0 %v1171_v44 }
  0x34   : > { %1104 = vmatprep.subr.bf16.mxu1 %v1171_v44 }
  0x35   : > { %651 = vmatmul.mubr.bf16.gmra.mxu0 %v1162_v40 }
  0x36   : > { %716 = vmatmul.mubr.bf16.gmra.mxu1 %v1163_v41  ;;  %658 = vmatprep.mubr.bf16.mxu0 %v1165_v42 }
  0x37   : > { %723 = vmatprep.mubr.bf16.mxu1 %v1167_v43  ;;  %1091 = vmatpush3.bf16.msra.mxu0 %v1171_v44 }
  0x38   : > { %1108 = vmatpush3.bf16.msra.mxu1 %v1171_v44  ;;  %1092 = vmatprep.subr.bf16.mxu0 %v1178_v45 }
  0x39   : > { %1105 = vmatprep.subr.bf16.mxu1 %v1178_v45 }
  0x3b   : > { %1093 = vmatpush3.bf16.msra.mxu0 %v1178_v45 }
  0x3c   : > { %1109 = vmatpush3.bf16.msra.mxu1 %v1178_v45 }
  0x3d   : > { %659 = vmatmul.mubr.bf16.gmra.mxu0 %v1169_v46 }
  0x3e   : > { %724 = vmatmul.mubr.bf16.gmra.mxu1 %v1170_v47  ;;  %666 = vmatprep.mubr.bf16.mxu0 %v1172_v48 }
  0x3f   : > { %731 = vmatprep.mubr.bf16.mxu1 %v1174_v49 }
  0x45   : > { %667 = vmatmul.mubr.bf16.gmra.mxu0 %v1176_v50 }
  0x46   : > { %732 = vmatmul.mubr.bf16.gmra.mxu1 %v1177_v51  ;;  %1094 = vmatprep.mubr.msk.bf16.mxu0 %vm597_vm0, %v1179_v52 }
  0x47   : > { %1098 = vmatprep.mubr.msk.bf16.mxu1 %vm597_vm0, %v1180_v53 }
  0x4d   : > { %1095 = vmatmul.mubr.msk.bf16.vlgmr.msra.gmra.mxu0 %vm597_vm0, %v1181_v54 }
  0x4e   : > { %1099 = vmatmul.mubr.msk.bf16.vlgmr.msra.gmra.mxu1 %vm597_vm0, %v1182_v55 }
  0xed   : > { %v1014_v56 = vpop.f32.mrf.mxu0 }
  0xee   : > { %v1054_v57 = vpop.f32.mrf.mxu1 }
  0xef   : > { %v1015_v58 = vpop.f32.mrf.mxu0 }
  0xf0   : > { %v1055_v59 = vpop.f32.mrf.mxu1  ;;  %v1016_v17 = vadd.f32 %v1015_v58, %v1014_v56 }
  0xf1   : > { %v1017_v60 = vpop.f32.mrf.mxu0  ;;  %v1056_v34 = vadd.f32 %v1055_v59, %v1054_v57 }
  0xf2   : > { %v1057_v61 = vpop.f32.mrf.mxu1  ;;  %v645_v27 = vadd.f32 %v1016_v17, %v919_v19 }
  0xf3   : > { %v1018_v62 = vpop.f32.mrf.mxu0 }
  0xf4   : > { %v1058_v63 = vpop.f32.mrf.mxu1  ;;  %v1019_v28 = vadd.f32 %v1018_v62, %v1017_v60  ;;  %v710_v46 = vadd.f32 %v1056_v34, %v645_v27 }
  0xf5   : > { %v1020_v0 = vpop.f32.mrf.mxu0  ;;  %v1059_v52 = vadd.f32 %v1058_v63, %v1057_v61 }
  0xf6   : > { %v1060_v1 = vpop.f32.mrf.mxu1  ;;  %v648_v43 = vadd.f32 %v1019_v28, %v919_v19 }
  0xf7   : > { %v1021_v2 = vpop.f32.mrf.mxu0 }
  0xf8   : > { %v1061_v3 = vpop.f32.mrf.mxu1  ;;  %v1022_v15 = vadd.f32 %v1021_v2, %v1020_v0 }
  0xf9   : > { %v1023_v4 = vpop.f32.mrf.mxu0  ;;  %v1062_v30 = vadd.f32 %v1061_v3, %v1060_v1 }
  0xfa   : > { %v1063_v5 = vpop.f32.mrf.mxu1  ;;  %v653_v23 = vadd.f32 %v1022_v15, %v919_v19 }
  0xfb   : > { %v1024_v6 = vpop.f32.mrf.mxu0 }
  0xfc   : > { %v1064_v7 = vpop.f32.mrf.mxu1  ;;  %v1025_v24 = vadd.f32 %v1024_v6, %v1023_v4  ;;  %v718_v41 = vadd.f32 %v1062_v30, %v653_v23  ;;  %v713_v6 = vadd.f32 %v1059_v52, %v648_v43 }
  0xfd   : > { %v1026_v8 = vpop.f32.mrf.mxu0  ;;  %v1065_v47 = vadd.f32 %v1064_v7, %v1063_v5 }
  0xfe   : > { %v1066_v9 = vpop.f32.mrf.mxu1  ;;  %v656_v38 = vadd.f32 %v1025_v24, %v919_v19 }
  0xff   : > { %v1027_v10 = vpop.f32.mrf.mxu0 }
 0x100   : > { %v1067_v11 = vpop.f32.mrf.mxu1  ;;  %v1028_v21 = vadd.f32 %v1027_v10, %v1026_v8  ;;  %v721_v60 = vadd.f32 %v1065_v47, %v656_v38 }
 0x101   : > { %v1029_v12 = vpop.f32.mrf.mxu0  ;;  %v1068_v44 = vadd.f32 %v1067_v11, %v1066_v9 }
 0x102   : > { %v1069_v13 = vpop.f32.mrf.mxu1  ;;  %v661_v35 = vadd.f32 %v1028_v21, %v919_v19 }
 0x103   : > { %v1030_v14 = vpop.f32.mrf.mxu0 }
 0x104   : > { %v1070_v16 = vpop.f32.mrf.mxu1  ;;  %v1031_v36 = vadd.f32 %v1030_v14, %v1029_v12  ;;  %v726_v56 = vadd.f32 %v1068_v44, %v661_v35 }
 0x105   : > { %v1032_v18 = vpop.f32.mrf.mxu0  ;;  %v1071_v0 = vadd.f32 %v1070_v16, %v1069_v13 }
 0x106   : > { %v1072_v20 = vpop.f32.mrf.mxu1  ;;  %v664_v53 = vadd.f32 %v1031_v36, %v919_v19 }
 0x107   : > { %v1033_v22 = vpop.f32.mrf.mxu0 }
 0x108   : > { %v1034_v25 = vadd.f32 %v1033_v22, %v1032_v18  ;;  %v1073_v26 = vpop.f32.mrf.mxu1  ;;  %v729_v11 = vadd.f32 %v1071_v0, %v664_v53 }
 0x109   : > { %v1035_v29 = vpop.f32.mrf.mxu0  ;;  %v1074_v32 = vadd.f32 %v1073_v26, %v1072_v20 }
 0x10a   : > { %v669_v31 = vadd.f32 %v1034_v25, %v919_v19  ;;  %v1075_v33 = vpop.f32.mrf.mxu1 }
 0x10b   : > { %v1036_v37 = vpop.f32.mrf.mxu0 }
 0x10c   : > { %v1037_v39 = vadd.f32 %v1036_v37, %v1035_v29  ;;  %v1076_v40 = vpop.f32.mrf.mxu1  ;;  %v734_v42 = vadd.f32 %v1074_v32, %v669_v31 }
 0x10d   : > { %v1096_v45 = vpop.f32.mrf.mxu0  ;;  %v1077_v49 = vadd.f32 %v1076_v40, %v1075_v33 }
 0x10e   : > { %v672_v48 = vadd.f32 %v1037_v39, %v919_v19  ;;  %v783_v50 = vadd.f32 %v1096_v45, %v718_v41  ;;  %v1100_v51 = vpop.f32.mrf.mxu1 }
 0x10f   : > { %v799_v54 = vadd.f32 %v1100_v51, %v734_v42  ;;  %v774_v55 = vpop.f32.mrf.mxu0 }
 0x110   : > { %v807_v57 = vmax.f32 %v783_v50, 0.0  ;;  %v775_v58 = vadd.f32 %v774_v55, %v710_v46  ;;  %v790_v59 = vpop.f32.mrf.mxu1  ;;  %v737_v62 = vadd.f32 %v1077_v49, %v672_v48 }
 0x111   : > { %v811_v1 = vmax.f32 %v799_v54, 0.0  ;;  %v791_v2 = vadd.f32 %v790_v59, %v726_v56  ;;  %v1097_v61 = vpop.f32.mrf.mxu0 }
 0x112   : > { %v992_v63 = vpack.c.bf16 %v807_v57, %v807_v57  ;;  %v805_v3 = vmax.f32 %v775_v58, 0.0  ;;  %v786_v4 = vadd.f32 %v1097_v61, %v721_v60  ;;  %v1101_v5 = vpop.f32.mrf.mxu1 }
 0x113   : > { %v996_v7 = vpack.c.bf16 %v811_v1, %v811_v1  ;;  %v809_v8 = vmax.f32 %v791_v2, 0.0  ;;  %v802_v9 = vadd.f32 %v1101_v5, %v737_v62  ;;  %v777_v10 = vpop.f32.mrf.mxu0 }
 0x114   : > { %848 = vst.msk [vmem:[%s1364_s21 + $0x8] sm:$0xf] %vm845_vm1, %v992_v63  ;;  %v990_v12 = vpack.c.bf16 %v805_v3, %v805_v3  ;;  %v808_v13 = vmax.f32 %v786_v4, 0.0  ;;  %v778_v14 = vadd.f32 %v777_v10, %v713_v6  ;;  %v793_v15 = vpop.f32.mrf.mxu1 }
 0x115   : > { %852 = vst.msk [vmem:[%s1364_s21 + $0x18] sm:$0xf] %vm845_vm1, %v996_v7  ;;  %v994_v16 = vpack.c.bf16 %v809_v8, %v809_v8  ;;  %v812_v17 = vmax.f32 %v802_v9, 0.0  ;;  %v794_v18 = vadd.f32 %v793_v15, %v729_v11 }
 0x116   : > { %846 = vst.msk [vmem:[%s1364_s21] sm:$0xf] %vm845_vm1, %v990_v12  ;;  %v993_v19 = vpack.c.bf16 %v808_v13, %v808_v13  ;;  %v806_v20 = vmax.f32 %v778_v14, 0.0 }
 0x117   : > { %850 = vst.msk [vmem:[%s1364_s21 + $0x10] sm:$0xf] %vm845_vm1, %v994_v16  ;;  %v997_v21 = vpack.c.bf16 %v812_v17, %v812_v17  ;;  %v810_v22 = vmax.f32 %v794_v18, 0.0 }
 0x118   : > { %849 = vst.msk [vmem:[%s1364_s21 + $0xc] sm:$0xf] %vm845_vm1, %v993_v19  ;;  %v991_v23 = vpack.c.bf16 %v806_v20, %v806_v20 }
 0x119   : > { %853 = vst.msk [vmem:[%s1364_s21 + $0x1c] sm:$0xf] %vm845_vm1, %v997_v21  ;;  %v995_v24 = vpack.c.bf16 %v810_v22, %v810_v22 }
 0x11a   : > { %847 = vst.msk [vmem:[%s1364_s21 + $0x4] sm:$0xf] %vm845_vm1, %v991_v23 }
 0x11b   : > { %851 = vst.msk [vmem:[%s1364_s21 + $0x14] sm:$0xf] %vm845_vm1, %v995_v24 }
 0x11c PF: > { %s13_s12 = sadd.s32 1, %s1189_s12  }
 0x11d   : > { %p10_p4 = scmp.ge.s32.totalorder %s13_s12, 4  }
 0x11f   :  { %12 = sbr.rel (!%p10_p4) target bundleno = 1 (0x1), region = 62 }

// kernel: base_net_forward.63
= control target key start
LH: loop header
LB: loop body
LE: loop exit
PB: predicated region body
PF: predicated region fallthrough
CT: control target
= control target key end

     0   :  { %10 = vsyncpa [#allocation3], 0  ;;  %v336_v1 = vmov 0.0   ;;  %vm337_vm0 = vmmov 0   ;;  %vm50_vm1 = vcmask 523264   ;;  %s448_s0 = inlined_call_operand.vmem [shape: bf16[2,64,64], index: 0, kind: input, shape index: {}]   ;;  %s449_s1 = inlined_call_operand.vmem [shape: f32[64,10], index: 1, kind: input, shape index: {}]   ;;  %s450_s2 = inlined_call_operand.vmem [shape: f32[1,10], index: 2, kind: input, shape index: {}]   ;;  %s451_s3 = inlined_call_operand.hbm [shape: f32[2,64], index: 3, kind: output, shape index: {0}]   ;;  %s452_s4 = inlined_call_operand.hbm [shape: f32[2,10], index: 4, kind: output, shape index: {1}]  }
   0x1   :  { %v109_v0 = vld [vmem:[%s449_s1 + $0x38] sm:$0xff]  ;;  %269 = vmatprep.subr.mxu0 %v336_v1  ;;  %v108_v2 = vld [vmem:[%s449_s1 + $0x30] sm:$0xff]  ;;  %285 = vmatprep.mubr.msk.f32.mxu0 %vm337_vm0, %v336_v1  ;;  %v222_v3 = vld [vmem:[%s448_s0] sm:$0xff]  }
   0x2   :  { %270 = vmatpush3.msra.mxu0 %v109_v0  ;;  %v107_v4 = vld [vmem:[%s449_s1 + $0x28] sm:$0xff]  ;;  %v223_v5 = vunpack.c.l.bf16 %v222_v3  ;;  %v224_v6 = vunpack.c.h.bf16 %v222_v3  ;;  %v254_v9 = vld [vmem:[%s448_s0 + $0x10] sm:$0xff]   ;;  %v256_v10 = vld [vmem:[%s448_s0 + $0x20] sm:$0xff]  }
   0x3   :  { %271 = vmatprep.subr.mxu0 %v336_v1  ;;  %v253_v7 = vld [vmem:[%s448_s0 + $0x8] sm:$0xff]   ;;  %v106_v12 = vld [vmem:[%s449_s1 + $0x20] sm:$0xff]  ;;  %v239_v14 = vunpack.c.l.bf16 %v256_v10 }
   0x4   :  { %272 = vmatpush3.msra.mxu0 %v108_v2  ;;  %v227_v8 = vunpack.c.l.bf16 %v253_v7  ;;  %v257_v11 = vld [vmem:[%s448_s0 + $0x28] sm:$0xff]   ;;  %v228_v13 = vunpack.c.h.bf16 %v253_v7 }
   0x5   :  { %273 = vmatprep.subr.mxu0 %v336_v1 }
   0x6   :  { %11 = vsyncpa [#allocation5], 0  ;;  %274 = vmatpush3.msra.mxu0 %v107_v4  ;;  %v240_v15 = vunpack.c.h.bf16 %v256_v10  ;;  %v243_v16 = vunpack.c.l.bf16 %v257_v11  ;;  %v105_v17 = vld [vmem:[%s449_s1 + $0x18] sm:$0xff]  ;;  %v231_v18 = vunpack.c.l.bf16 %v254_v9  ;;  %v258_v19 = vld [vmem:[%s448_s0 + $0x30] sm:$0xff]   ;;  %v51_v20 = vsel %vm50_vm1, %v223_v5, 0.0 }
   0x7   :  { %275 = vmatprep.subr.mxu0 %v336_v1  ;;  %v52_v21 = vsel %vm50_vm1, %v224_v6, 0.0  ;;  %v255_v22 = vld [vmem:[%s448_s0 + $0x18] sm:$0xff]   ;;  %v244_v23 = vunpack.c.h.bf16 %v257_v11  ;;  %v54_v25 = vsel %vm50_vm1, %v227_v8, 0.0  ;;  %v104_v26 = vld [vmem:[%s449_s1 + $0x10] sm:$0xff]  ;;  %v232_v27 = vunpack.c.h.bf16 %v254_v9  ;;  %v103_v34 = vld [vmem:[%s449_s1 + $0x8] sm:$0xff] }
   0x8   :  { %276 = vmatpush3.msra.mxu0 %v106_v12  ;;  %v53_v24 = vadd.f32 %v52_v21, %v51_v20  ;;  %v56_v28 = vsel %vm50_vm1, %v228_v13, 0.0  ;;  %v72_v29 = vsel %vm50_vm1, %v239_v14, 0.0  ;;  %v247_v30 = vunpack.c.l.bf16 %v258_v19  ;;  %v259_v36 = vld [vmem:[%s448_s0 + $0x38] sm:$0xff]   ;;  %v102_v42 = vld [vmem:[%s449_s1] sm:$0xff]  ;;  %s338_s0 = smov [#allocation2]  }
   0x9   :  { %277 = vmatprep.subr.mxu0 %v336_v1  ;;  %v73_v32 = vsel %vm50_vm1, %v240_v15, 0.0  ;;  %v75_v33 = vsel %vm50_vm1, %v243_v16, 0.0  ;;  %v235_v35 = vunpack.c.l.bf16 %v255_v22  ;;  %v58_v37 = vsel %vm50_vm1, %v231_v18, 0.0  ;;  %s197_s1 = sshll.u32 %s338_s0, 4  ;;  %s198_s1 = int_to_ptr.vmem [resolvable:$true] %s197_s1 }
   0xa   :  { %278 = vmatpush3.msra.mxu0 %v105_v17  ;;  %v55_v31 = vadd.f32 %v54_v25, %v53_v24  ;;  %v74_v38 = vadd.f32 %v73_v32, %v72_v29  ;;  %v248_v39 = vunpack.c.h.bf16 %v258_v19  ;;  %v77_v41 = vsel %vm50_vm1, %v244_v23, 0.0  ;;  %s292_s21 = scalar_lea.vmem %s198_s1, 32  ;;  %p297_p1 = scmp.lt.s32.totalorder %s198_s1, %s198_s1 }
   0xb   :  { %279 = vmatprep.subr.mxu0 %v336_v1  ;;  %v236_v43 = vunpack.c.h.bf16 %v255_v22  ;;  %v60_v44 = vsel %vm50_vm1, %v232_v27, 0.0  ;;  %v251_v46 = vunpack.c.l.bf16 %v259_v36  ;;  %v79_v48 = vsel %vm50_vm1, %v247_v30, 0.0  ;;  %p293_p0 = scmp.ne.s32.totalorder %s198_s1, %s292_s21  ;;  %p298_p2 = scmp.lt.s32.totalorder %s292_s21, %s292_s21 }
   0xc   :  { %280 = vmatpush3.msra.mxu0 %v104_v26  ;;  %v57_v40 = vadd.f32 %v56_v28, %v55_v31  ;;  %v76_v45 = vadd.f32 %v75_v33, %v74_v38  ;;  %v62_v49 = vsel %vm50_vm1, %v235_v35, 0.0  ;;  %v252_v51 = vunpack.c.h.bf16 %v259_v36 }
   0xd   :  { %281 = vmatprep.subr.mxu0 %v336_v1  ;;  %v81_v53 = vsel %vm50_vm1, %v248_v39, 0.0  ;;  %v64_v54 = vsel %vm50_vm1, %v236_v43, 0.0  ;;  %v83_v57 = vsel %vm50_vm1, %v251_v46, 0.0  ;;  %vm97_vm2 = vcmask 1041409   ;;  %p299_p3 = por %p298_p2, %p297_p1 }
   0xe   :  { %282 = vmatpush3.msra.mxu0 %v103_v34  ;;  %v59_v47 = vadd.f32 %v58_v37, %v57_v40  ;;  %v78_v50 = vadd.f32 %v77_v41, %v76_v45  ;;  %v85_v60 = vsel %vm50_vm1, %v252_v51, 0.0  ;;  %vm100_vm3 = vcmask 517120  }
   0xf   :  { %283 = vmatprep.subr.mxu0 %v336_v1  ;;  %p300_p4 = pnand %p299_p3, %p293_p0 }
  0x10   :  { %284 = vmatpush3.msra.mxu0 %v102_v42  ;;  %v61_v52 = vadd.f32 %v60_v44, %v59_v47  ;;  %v80_v55 = vadd.f32 %v79_v48, %v78_v50 }
  0x12   :  { %v63_v56 = vadd.f32 %v62_v49, %v61_v52  ;;  %v82_v58 = vadd.f32 %v81_v53, %v80_v55 }
  0x14   :  { %v65_v59 = vadd.f32 %v64_v54, %v63_v56  ;;  %v84_v61 = vadd.f32 %v83_v57, %v82_v58 }
  0x16   :  { %v66_v62 = vrot.slane %v65_v59, 4  ;;  %v86_v63 = vadd.f32 %v85_v60, %v84_v61 }
  0x18   :  { %v67_v0 = vadd.f32 %v66_v62, %v65_v59  ;;  %v87_v1 = vrot.slane %v86_v63, 4 }
  0x1a   :  { %v68_v2 = vrot.slane %v67_v0, 2  ;;  %v88_v3 = vadd.f32 %v87_v1, %v86_v63 }
  0x1c   :  { %v69_v4 = vadd.f32 %v68_v2, %v67_v0  ;;  %v89_v5 = vrot.slane %v88_v3, 2 }
  0x1e   :  { %v70_v6 = vrot.slane %v69_v4, 1  ;;  %v90_v7 = vadd.f32 %v89_v5, %v88_v3 }
  0x20   :  { %v71_v8 = vadd.f32 %v70_v6, %v69_v4  ;;  %v91_v9 = vrot.slane %v90_v7, 1 }
  0x22   :  { %v92_v10 = vadd.f32 %v91_v9, %v90_v7  ;;  %v93_v11 = vmul.f32 0.015625, %v71_v8 }
  0x24   :  { %v94_v12 = vmul.f32 0.015625, %v92_v10 }
  0x26   :  { %v98_v13 = vsel %vm97_vm2, %v94_v12, %v93_v11 }
  0x27   :  { %286 = vmatmul.mubr.msk.f32.vlgmr.msra.gmra.mxu0 %vm50_vm1, %v98_v13  ;;  %101 = vst.msk [vmem:[#allocation2] sm:$0x3] %vm100_vm3, %v98_v13 }
  0x28   :  { %303 = shalt.err (!%p300_p4)
}
  0x29   :  { %200 = dma.vmem_to_hbm [thread:$0]  %s198_s1, 32, %s451_s3, [#allocation3]   ;;  %v219_v14 = vld [vmem:[%s450_s2] ss:$0 sm:$0xff]  ;;  %vm189_vm4 = vcmask 74752  }
  0x2a   :  { %s339_s26 = smov [#allocation4]  }
  0x2b   :  { %s207_s27 = sshll.u32 %s339_s26, 4  ;;  %s208_s27 = int_to_ptr.vmem [resolvable:$true] %s207_s27 }
  0x2c   :  { %s312_s28 = scalar_lea.vmem %s208_s27, 32  ;;  %p317_p6 = scmp.lt.s32.totalorder %s208_s27, %s208_s27 }
  0x2d   :  { %p313_p5 = scmp.ne.s32.totalorder %s208_s27, %s312_s28  ;;  %p318_p7 = scmp.lt.s32.totalorder %s312_s28, %s312_s28 }
  0x2f   :  { %p319_p8 = por %p318_p7, %p317_p6 }
  0x31   :  { %p320_p9 = pnand %p319_p8, %p313_p5 }
  0xe7   :  { %v185_v15 = vpop.f32.mrf.mxu0 }
  0xe8   :  { %v186_v16 = vadd.f32 %v219_v14, %v185_v15 }
  0xe9   :  { %v287_v17 = vpop.f32.mrf.mxu0 }
  0xea   :  { %190 = vst.msk [vmem:[#allocation4] sm:$0x3] %vm189_vm4, %v186_v16 }
  0xeb   :  { %323 = shalt.err (!%p320_p9)
}
  0xec   :  { %210 = dma.vmem_to_hbm [thread:$0]  %s208_s27, 32, %s452_s4, [#allocation5]  }
  0xed   :  { %332 = dma.done.wait [#allocation3], 32  }
  0xee   :  { %333 = vsyncadd [#allocation3], 4294967264 }
  0xef   :  { %334 = dma.done.wait [#allocation5], 32  }
  0xf0   :  { %335 = vsyncadd [#allocation5], 4294967264 }
  0xf1   :  { %217 = vsyncpa [#allocation3], 1 }
  0xf2   :  { %218 = vsyncpa [#allocation5], 1 }

</bundles_post_ra>
